<compile_context>
chip_gen: v5e
topology: v5e:2x2
jax: 0.10.0
libtpu: 0.0.40
codegen_flags: <defaults>
</compile_context>

<pallas_src>
import functools

import jax
import jax.numpy as jnp
from jax.experimental import pallas as pl
from jax.experimental.pallas import tpu as pltpu

_EPS = 1e-5

_D_IN = 28 * 28          # 784 contraction dim (K)
_K_A = 384               # lane-aligned split of K: 784 = 384 + 400
_K_B = _D_IN - _K_A      # 400
_H1_P = 512              # 500 -> 512
_H2_P = 128              # 80  -> 128
_OUT_P = 128             # 10  -> 128
_OUT_LOGICAL = 10

# Row layout of the packed (8, 512) f32 parameter-vector slab.
_ROW_B1, _ROW_G1, _ROW_BT1, _ROW_L2 = 0, 1, 2, 3


def _medium_model_kernel(
    x_ref,                 # (Bp, 784) f32  VMEM (auto DMA)
    w1a_hbm,               # (384, 512) bf16 HBM (manual DMA)
    w1b_hbm,               # (400, 512) bf16 HBM (manual DMA)
    w2_ref,                # (512, 128) bf16 VMEM
    w3_ref,                # (128, 128) bf16 VMEM
    vec_ref,               # (8, 512)  f32  VMEM  packed b1/g1/bt1/[b2|g2|bt2|b3]
    out_ref,               # (Bp, 128) f32
    w1a_buf, w1b_buf, sem,
    *, batch, padded_batch,
):
    # Kick off both halves of the dominant w1 transfer immediately so the second
    # half's DMA overlaps the first half's matmul.
    cp_a = pltpu.make_async_copy(w1a_hbm, w1a_buf, sem.at[0])
    cp_b = pltpu.make_async_copy(w1b_hbm, w1b_buf, sem.at[1])
    cp_a.start()
    cp_b.start()

    # In-kernel f32 -> bf16 cast of the activations (hidden under the w1 DMA).
    x = x_ref[...].astype(jnp.bfloat16)                      # (Bp, 784)

    # Unpack the coalesced parameter-vector slab (static slices -> no copies).
    vec = vec_ref[...]                                       # (8, 512) f32
    b1 = vec[_ROW_B1:_ROW_B1 + 1, :]                         # (1, 512)
    g1 = vec[_ROW_G1:_ROW_G1 + 1, :]
    bt1 = vec[_ROW_BT1:_ROW_BT1 + 1, :]
    l2 = vec[_ROW_L2:_ROW_L2 + 1, :]                         # (1, 512)
    b2 = l2[:, 0:_H2_P]
    g2 = l2[:, _H2_P:2 * _H2_P]
    bt2 = l2[:, 2 * _H2_P:3 * _H2_P]
    b3 = l2[:, 3 * _H2_P:4 * _H2_P]

    inv_b = jnp.float32(1.0 / batch)
    if padded_batch != batch:
        row_ids = jax.lax.broadcasted_iota(jnp.int32, (padded_batch, 1), 0)
        row_mask = row_ids < batch
    else:
        row_mask = None

    def bn_scale_shift(h, g, bt):
        # Training-mode BN over the *real* batch rows, folded to scale/shift.
        hm = h if row_mask is None else jnp.where(row_mask, h, 0.0)
        m = jnp.sum(hm, axis=0, keepdims=True) * inv_b                 # (1, F)
        ex2 = jnp.sum(hm * hm, axis=0, keepdims=True) * inv_b          # (1, F)
        v = jnp.maximum(ex2 - m * m, 0.0)                              # biased var
        scale = g * jax.lax.rsqrt(v + _EPS)                            # (1, F)
        shift = bt - m * scale                                         # (1, F)
        return h * scale + shift

    # ---- hidden1: Linear(784, 512p) split over K, overlapping w1b's DMA ----
    cp_a.wait()
    h1 = jnp.dot(x[:, :_K_A], w1a_buf[...], preferred_element_type=jnp.float32)
    cp_b.wait()
    h1 = h1 + jnp.dot(x[:, _K_A:], w1b_buf[...], preferred_element_type=jnp.float32)
    h1 = jnp.maximum(h1 + b1, 0.0)
    h1 = bn_scale_shift(h1, g1, bt1)

    # ---- hidden2: Linear(512p, 128p) -> ReLU -> BN ----
    h2 = jnp.dot(h1.astype(jnp.bfloat16), w2_ref[...],
                 preferred_element_type=jnp.float32) + b2
    h2 = jnp.maximum(h2, 0.0)
    h2 = bn_scale_shift(h2, g2, bt2)

    # ---- output_layer: Linear(128p, 128p) ----
    out = jnp.dot(h2.astype(jnp.bfloat16), w3_ref[...],
                  preferred_element_type=jnp.float32) + b3
    out_ref[...] = out.astype(out_ref.dtype)


def _full_spec(shape):
    # Whole-array VMEM block (no grid): block shape equals the array shape.
    return pl.BlockSpec(shape, lambda: (0,) * len(shape))


@jax.jit
def medium_model_forward(x, padded_params):
    """x: (B, 784) float32.  padded_params: output of pad_params(init_params(...)).

    Throughput note: prefer B a multiple of 256 on v6e/v7x (256x256 MXU);
    B=128 already fills v5e's 128x128 MXU.  The kernel is DMA/launch-latency
    bound at these sizes, so this only affects per-sample throughput.
    """
    B = x.shape[0]
    # bf16 LHS packs two rows per sublane -> pad the batch to a multiple of 16.
    Bp = max(16, ((B + 15) // 16) * 16)
    # Grid-less single-block design; for batches in the thousands (esp. v7x with
    # 64 MiB VMEM / 2 TensorCores) switch to a batch-tiled two-phase-BN variant.
    assert Bp <= 2048, "batch too large for the grid-less kernel; tile the batch"

    x = x.astype(jnp.float32)
    if Bp != B:
        x = jnp.pad(x, ((0, Bp - B), (0, 0)))    # f32 pad only; cast is in-kernel

    w1a, w1b, w2, w3, vec = padded_params
    kernel = functools.partial(_medium_model_kernel, batch=B, padded_batch=Bp)

    out = pl.pallas_call(
        kernel,
        out_shape=jax.ShapeDtypeStruct((Bp, _OUT_P), jnp.float32),
        in_specs=[
            _full_spec((Bp, _D_IN)),                 # x (auto VMEM)
            pl.BlockSpec(memory_space=pl.ANY),       # w1 first K-half (manual DMA)
            pl.BlockSpec(memory_space=pl.ANY),       # w1 second K-half (manual DMA)
            _full_spec((_H1_P, _H2_P)),              # w2
            _full_spec((_H2_P, _OUT_P)),             # w3
            _full_spec((8, _H1_P)),                  # packed bias/gamma/beta slab
        ],
        out_specs=_full_spec((Bp, _OUT_P)),
        scratch_shapes=[
            pltpu.VMEM((_K_A, _H1_P), jnp.bfloat16),
            pltpu.VMEM((_K_B, _H1_P), jnp.bfloat16),
            pltpu.SemaphoreType.DMA((2,)),
        ],
        compiler_params=pltpu.CompilerParams(vmem_limit_bytes=16 << 20),
    )(x, w1a, w1b, w2, w3, vec)

    return out[:B, :_OUT_LOGICAL]


def init_params(key):
    """Logical (unpadded) params mimicking PyTorch defaults.
    Linear weights stored transposed as (in_features, out_features);
    biases / gamma / beta kept 2D (1, F).  Ordering:
    w1, b1, g1, bt1, w2, b2, g2, bt2, w3, b3."""
    dims = [(_D_IN, 500), (500, 80), (80, _OUT_LOGICAL)]
    keys = jax.random.split(key, 2 * len(dims))
    params = []
    for idx, (fan_in, fan_out) in enumerate(dims):
        bound = 1.0 / jnp.sqrt(jnp.float32(fan_in))
        w = jax.random.uniform(keys[2 * idx], (fan_in, fan_out), jnp.float32, -bound, bound)
        b = jax.random.uniform(keys[2 * idx + 1], (1, fan_out), jnp.float32, -bound, bound)
        params.append(w)
        params.append(b)
        if idx < 2:  # BN only after hidden1 and hidden2
            params.append(jnp.ones((1, fan_out), jnp.float32))   # gamma
            params.append(jnp.zeros((1, fan_out), jnp.float32))  # beta
    return tuple(params)


def pad_params(params):
    """Zero-pad feature dims to lane-friendly widths, cast weights to bf16,
    split w1 into two lane-aligned K-halves, and coalesce the seven (1,F)
    vectors into one (8, 512) f32 slab."""
    (w1, b1, g1, bt1, w2, b2, g2, bt2, w3, b3) = params

    def pad_w(w, rows, cols):
        wp = jnp.pad(w, ((0, rows - w.shape[0]), (0, cols - w.shape[1])))
        return wp.astype(jnp.bfloat16)

    def pad_v(v, cols):
        return jnp.pad(v, ((0, 0), (0, cols - v.shape[1]))).astype(jnp.float32)

    w1p = pad_w(w1, _D_IN, _H1_P)          # (784, 512) bf16
    w1a = w1p[:_K_A, :]                    # (384, 512)
    w1b = w1p[_K_A:, :]                    # (400, 512)
    w2p = pad_w(w2, _H1_P, _H2_P)          # (512, 128)
    w3p = pad_w(w3, _H2_P, _OUT_P)         # (128, 128)

    row_l2 = jnp.concatenate(
        [pad_v(b2, _H2_P), pad_v(g2, _H2_P), pad_v(bt2, _H2_P), pad_v(b3, _OUT_P)],
        axis=1)                             # (1, 512)
    vec = jnp.concatenate(
        [pad_v(b1, _H1_P), pad_v(g1, _H1_P), pad_v(bt1, _H1_P), row_l2,
         jnp.zeros((4, _H1_P), jnp.float32)],
        axis=0)                             # (8, 512)

    return (w1a, w1b, w2p, w3p, vec)


def reference_forward(x, params, matmul_dtype=jnp.float32):
    """Pure-JAX reference of the same forward pass (training-mode BN).
    With matmul_dtype=bfloat16 it mimics the kernel's MXU input precision."""
    (w1, b1, g1, bt1, w2, b2, g2, bt2, w3, b3) = params

    def dot(a, b):
        return jnp.dot(a.astype(matmul_dtype), b.astype(matmul_dtype),
                       preferred_element_type=jnp.float32)

    def bn_relu_block(h, g, bt):
        h = jnp.maximum(h, 0.0)
        m = jnp.mean(h, axis=0, keepdims=True)
        v = jnp.mean((h - m) ** 2, axis=0, keepdims=True)
        return g * (h - m) / jnp.sqrt(v + _EPS) + bt

    h1 = bn_relu_block(dot(x, w1) + b1, g1, bt1)
    h2 = bn_relu_block(dot(h1, w2) + b2, g2, bt2)
    return dot(h2, w3) + b3


if __name__ == "__main__":
    key = jax.random.PRNGKey(0)
    k_param, k_x = jax.random.split(key)

    # Batch of flattened 28x28 "images": (256, 784) f32.
    # B=256 fills the 256x256 MXU rows on v6e/v7x (128 already fills v5e's MXU).
    B = 256
    x = jax.random.normal(k_x, (B, _D_IN), jnp.float32)

    params = init_params(k_param)
    padded_params = pad_params(params)

    out = medium_model_forward(x, padded_params)
    out = jax.block_until_ready(out)
    assert out.shape == (B, _OUT_LOGICAL), out.shape

    # Tight check against a reference that mimics the kernel's bf16 matmul inputs.
    ref_bf16 = reference_forward(x, params, matmul_dtype=jnp.bfloat16)
    assert jnp.allclose(out, ref_bf16, atol=2e-3, rtol=2e-3), (
        float(jnp.max(jnp.abs(out - ref_bf16)))
    )

    # Loose sanity check against the full-f32 semantics of the PyTorch module.
    ref_f32 = reference_forward(x, params, matmul_dtype=jnp.float32)
    assert float(jnp.max(jnp.abs(out - ref_f32))) < 0.1

    print("KERNEL_OK")
</pallas_src>

<mosaic_0001>
module attributes {stable_mosaic.version = 11 : i64} {
  func.func @_medium_model_kernel(%arg0: memref<256x784xf32, #tpu.memory_space<vmem>>, %arg1: memref<384x512xbf16, #tpu.memory_space<any>>, %arg2: memref<400x512xbf16, #tpu.memory_space<any>>, %arg3: memref<512x128xbf16, #tpu.memory_space<vmem>>, %arg4: memref<128x128xbf16, #tpu.memory_space<vmem>>, %arg5: memref<8x512xf32, #tpu.memory_space<vmem>>, %arg6: memref<256x128xf32, #tpu.memory_space<vmem>>, %arg7: memref<384x512xbf16, #tpu.memory_space<vmem>>, %arg8: memref<400x512xbf16, #tpu.memory_space<vmem>>, %arg9: memref<2x!tpu.dma_semaphore, #tpu.memory_space<semaphore_mem>>) attributes {dimension_semantics = [], scalar_prefetch = 0 : i64, scratch_operands = 3 : i64, tpu.core_type = #tpu.core_type<tc>} {
    %c0_i32 = arith.constant 0 : i32
    %0 = tpu.memref_slice %arg9[%c0_i32] : memref<2x!tpu.dma_semaphore, #tpu.memory_space<semaphore_mem>> -> memref<1x!tpu.dma_semaphore, #tpu.memory_space<semaphore_mem>>
    %1 = tpu.memref_squeeze %0 : memref<1x!tpu.dma_semaphore, #tpu.memory_space<semaphore_mem>> -> memref<!tpu.dma_semaphore, #tpu.memory_space<semaphore_mem>>
    tpu.enqueue_dma source(%arg1 : memref<384x512xbf16, #tpu.memory_space<any>>) target(%arg7 : memref<384x512xbf16, #tpu.memory_space<vmem>>) target_semaphore(%1 : memref<!tpu.dma_semaphore, #tpu.memory_space<semaphore_mem>>)
    %c1_i32 = arith.constant 1 : i32
    %2 = tpu.memref_slice %arg9[%c1_i32] : memref<2x!tpu.dma_semaphore, #tpu.memory_space<semaphore_mem>> -> memref<1x!tpu.dma_semaphore, #tpu.memory_space<semaphore_mem>>
    %3 = tpu.memref_squeeze %2 : memref<1x!tpu.dma_semaphore, #tpu.memory_space<semaphore_mem>> -> memref<!tpu.dma_semaphore, #tpu.memory_space<semaphore_mem>>
    tpu.enqueue_dma source(%arg2 : memref<400x512xbf16, #tpu.memory_space<any>>) target(%arg8 : memref<400x512xbf16, #tpu.memory_space<vmem>>) target_semaphore(%3 : memref<!tpu.dma_semaphore, #tpu.memory_space<semaphore_mem>>)
    %c0 = arith.constant 0 : index
    %c0_0 = arith.constant 0 : index
    %4 = vector.load %arg0[%c0, %c0_0] : memref<256x784xf32, #tpu.memory_space<vmem>>, vector<256x784xf32>
    %5 = arith.truncf %4 : vector<256x784xf32> to vector<256x784xbf16>
    %c0_1 = arith.constant 0 : index
    %c0_2 = arith.constant 0 : index
    %6 = vector.load %arg5[%c0_1, %c0_2] : memref<8x512xf32, #tpu.memory_space<vmem>>, vector<8x512xf32>
    %7 = vector.extract_strided_slice %6 {offsets = [0, 0], sizes = [1, 512], strides = [1, 1]} : vector<8x512xf32> to vector<1x512xf32>
    %8 = vector.extract_strided_slice %6 {offsets = [1, 0], sizes = [1, 512], strides = [1, 1]} : vector<8x512xf32> to vector<1x512xf32>
    %9 = vector.extract_strided_slice %6 {offsets = [2, 0], sizes = [1, 512], strides = [1, 1]} : vector<8x512xf32> to vector<1x512xf32>
    %10 = vector.extract_strided_slice %6 {offsets = [3, 0], sizes = [1, 512], strides = [1, 1]} : vector<8x512xf32> to vector<1x512xf32>
    %11 = vector.extract_strided_slice %10 {offsets = [0, 0], sizes = [1, 128], strides = [1, 1]} : vector<1x512xf32> to vector<1x128xf32>
    %12 = vector.extract_strided_slice %10 {offsets = [0, 128], sizes = [1, 128], strides = [1, 1]} : vector<1x512xf32> to vector<1x128xf32>
    %13 = vector.extract_strided_slice %10 {offsets = [0, 256], sizes = [1, 128], strides = [1, 1]} : vector<1x512xf32> to vector<1x128xf32>
    %14 = vector.extract_strided_slice %10 {offsets = [0, 384], sizes = [1, 128], strides = [1, 1]} : vector<1x512xf32> to vector<1x128xf32>
    %c0_i32_3 = arith.constant 0 : i32
    %15 = tpu.memref_slice %arg9[%c0_i32_3] : memref<2x!tpu.dma_semaphore, #tpu.memory_space<semaphore_mem>> -> memref<1x!tpu.dma_semaphore, #tpu.memory_space<semaphore_mem>>
    %16 = tpu.memref_squeeze %15 : memref<1x!tpu.dma_semaphore, #tpu.memory_space<semaphore_mem>> -> memref<!tpu.dma_semaphore, #tpu.memory_space<semaphore_mem>>
    tpu.wait_dma2 semaphore(%16 : memref<!tpu.dma_semaphore, #tpu.memory_space<semaphore_mem>>) src(%arg1 : memref<384x512xbf16, #tpu.memory_space<any>>) dst(%arg7 : memref<384x512xbf16, #tpu.memory_space<vmem>>)
    %17 = vector.extract_strided_slice %5 {offsets = [0, 0], sizes = [256, 384], strides = [1, 1]} : vector<256x784xbf16> to vector<256x384xbf16>
    %c0_4 = arith.constant 0 : index
    %c0_5 = arith.constant 0 : index
    %18 = vector.load %arg7[%c0_4, %c0_5] : memref<384x512xbf16, #tpu.memory_space<vmem>>, vector<384x512xbf16>
    %cst = arith.constant dense<0.000000e+00> : vector<256x512xf32>
    %19 = tpu.matmul %17, %18, %cst {dimension_numbers = #tpu.dot_dimension_numbers<[1], [0], [0], [1], [0, 0, 1, 1], [], []>} : vector<256x384xbf16>, vector<384x512xbf16>, vector<256x512xf32> -> vector<256x512xf32>
    %c1_i32_6 = arith.constant 1 : i32
    %20 = tpu.memref_slice %arg9[%c1_i32_6] : memref<2x!tpu.dma_semaphore, #tpu.memory_space<semaphore_mem>> -> memref<1x!tpu.dma_semaphore, #tpu.memory_space<semaphore_mem>>
    %21 = tpu.memref_squeeze %20 : memref<1x!tpu.dma_semaphore, #tpu.memory_space<semaphore_mem>> -> memref<!tpu.dma_semaphore, #tpu.memory_space<semaphore_mem>>
    tpu.wait_dma2 semaphore(%21 : memref<!tpu.dma_semaphore, #tpu.memory_space<semaphore_mem>>) src(%arg2 : memref<400x512xbf16, #tpu.memory_space<any>>) dst(%arg8 : memref<400x512xbf16, #tpu.memory_space<vmem>>)
    %22 = vector.extract_strided_slice %5 {offsets = [0, 384], sizes = [256, 400], strides = [1, 1]} : vector<256x784xbf16> to vector<256x400xbf16>
    %c0_7 = arith.constant 0 : index
    %c0_8 = arith.constant 0 : index
    %23 = vector.load %arg8[%c0_7, %c0_8] : memref<400x512xbf16, #tpu.memory_space<vmem>>, vector<400x512xbf16>
    %cst_9 = arith.constant dense<0.000000e+00> : vector<256x512xf32>
    %24 = tpu.matmul %22, %23, %cst_9 {dimension_numbers = #tpu.dot_dimension_numbers<[1], [0], [0], [1], [0, 0, 1, 1], [], []>} : vector<256x400xbf16>, vector<400x512xbf16>, vector<256x512xf32> -> vector<256x512xf32>
    %25 = arith.addf %19, %24 : vector<256x512xf32>
    %26 = vector.broadcast %7 : vector<1x512xf32> to vector<256x512xf32>
    %27 = arith.addf %25, %26 : vector<256x512xf32>
    %cst_10 = arith.constant 0.000000e+00 : f32
    %28 = vector.broadcast %cst_10 : f32 to vector<256x512xf32>
    %29 = arith.maximumf %27, %28 : vector<256x512xf32>
    %cst_11 = arith.constant dense<0.000000e+00> : vector<512xf32>
    %30 = vector.multi_reduction <add>, %29, %cst_11 [0] : vector<256x512xf32> to vector<512xf32>
    %31 = vector.shape_cast %30 : vector<512xf32> to vector<1x512xf32>
    %cst_12 = arith.constant 3.906250e-03 : f32
    %32 = vector.broadcast %cst_12 : f32 to vector<1x512xf32>
    %33 = arith.mulf %31, %32 : vector<1x512xf32>
    %34 = arith.mulf %29, %29 : vector<256x512xf32>
    %cst_13 = arith.constant dense<0.000000e+00> : vector<512xf32>
    %35 = vector.multi_reduction <add>, %34, %cst_13 [0] : vector<256x512xf32> to vector<512xf32>
    %36 = vector.shape_cast %35 : vector<512xf32> to vector<1x512xf32>
    %cst_14 = arith.constant 3.906250e-03 : f32
    %37 = vector.broadcast %cst_14 : f32 to vector<1x512xf32>
    %38 = arith.mulf %36, %37 : vector<1x512xf32>
    %39 = arith.mulf %33, %33 : vector<1x512xf32>
    %40 = arith.subf %38, %39 : vector<1x512xf32>
    %cst_15 = arith.constant 0.000000e+00 : f32
    %41 = vector.broadcast %cst_15 : f32 to vector<1x512xf32>
    %42 = arith.maximumf %40, %41 : vector<1x512xf32>
    %cst_16 = arith.constant 9.99999974E-6 : f32
    %43 = vector.broadcast %cst_16 : f32 to vector<1x512xf32>
    %44 = arith.addf %42, %43 : vector<1x512xf32>
    %45 = math.rsqrt %44 : vector<1x512xf32>
    %46 = arith.mulf %8, %45 : vector<1x512xf32>
    %47 = arith.mulf %33, %46 : vector<1x512xf32>
    %48 = arith.subf %9, %47 : vector<1x512xf32>
    %49 = vector.broadcast %46 : vector<1x512xf32> to vector<256x512xf32>
    %50 = arith.mulf %29, %49 : vector<256x512xf32>
    %51 = vector.broadcast %48 : vector<1x512xf32> to vector<256x512xf32>
    %52 = arith.addf %50, %51 : vector<256x512xf32>
    %53 = arith.truncf %52 : vector<256x512xf32> to vector<256x512xbf16>
    %c0_17 = arith.constant 0 : index
    %c0_18 = arith.constant 0 : index
    %54 = vector.load %arg3[%c0_17, %c0_18] : memref<512x128xbf16, #tpu.memory_space<vmem>>, vector<512x128xbf16>
    %cst_19 = arith.constant dense<0.000000e+00> : vector<256x128xf32>
    %55 = tpu.matmul %53, %54, %cst_19 {dimension_numbers = #tpu.dot_dimension_numbers<[1], [0], [0], [1], [0, 0, 1, 1], [], []>} : vector<256x512xbf16>, vector<512x128xbf16>, vector<256x128xf32> -> vector<256x128xf32>
    %56 = vector.broadcast %11 : vector<1x128xf32> to vector<256x128xf32>
    %57 = arith.addf %55, %56 : vector<256x128xf32>
    %cst_20 = arith.constant 0.000000e+00 : f32
    %58 = vector.broadcast %cst_20 : f32 to vector<256x128xf32>
    %59 = arith.maximumf %57, %58 : vector<256x128xf32>
    %cst_21 = arith.constant dense<0.000000e+00> : vector<128xf32>
    %60 = vector.multi_reduction <add>, %59, %cst_21 [0] : vector<256x128xf32> to vector<128xf32>
    %61 = vector.shape_cast %60 : vector<128xf32> to vector<1x128xf32>
    %cst_22 = arith.constant 3.906250e-03 : f32
    %62 = vector.broadcast %cst_22 : f32 to vector<1x128xf32>
    %63 = arith.mulf %61, %62 : vector<1x128xf32>
    %64 = arith.mulf %59, %59 : vector<256x128xf32>
    %cst_23 = arith.constant dense<0.000000e+00> : vector<128xf32>
    %65 = vector.multi_reduction <add>, %64, %cst_23 [0] : vector<256x128xf32> to vector<128xf32>
    %66 = vector.shape_cast %65 : vector<128xf32> to vector<1x128xf32>
    %cst_24 = arith.constant 3.906250e-03 : f32
    %67 = vector.broadcast %cst_24 : f32 to vector<1x128xf32>
    %68 = arith.mulf %66, %67 : vector<1x128xf32>
    %69 = arith.mulf %63, %63 : vector<1x128xf32>
    %70 = arith.subf %68, %69 : vector<1x128xf32>
    %cst_25 = arith.constant 0.000000e+00 : f32
    %71 = vector.broadcast %cst_25 : f32 to vector<1x128xf32>
    %72 = arith.maximumf %70, %71 : vector<1x128xf32>
    %cst_26 = arith.constant 9.99999974E-6 : f32
    %73 = vector.broadcast %cst_26 : f32 to vector<1x128xf32>
    %74 = arith.addf %72, %73 : vector<1x128xf32>
    %75 = math.rsqrt %74 : vector<1x128xf32>
    %76 = arith.mulf %12, %75 : vector<1x128xf32>
    %77 = arith.mulf %63, %76 : vector<1x128xf32>
    %78 = arith.subf %13, %77 : vector<1x128xf32>
    %79 = vector.broadcast %76 : vector<1x128xf32> to vector<256x128xf32>
    %80 = arith.mulf %59, %79 : vector<256x128xf32>
    %81 = vector.broadcast %78 : vector<1x128xf32> to vector<256x128xf32>
    %82 = arith.addf %80, %81 : vector<256x128xf32>
    %83 = arith.truncf %82 : vector<256x128xf32> to vector<256x128xbf16>
    %c0_27 = arith.constant 0 : index
    %c0_28 = arith.constant 0 : index
    %84 = vector.load %arg4[%c0_27, %c0_28] : memref<128x128xbf16, #tpu.memory_space<vmem>>, vector<128x128xbf16>
    %cst_29 = arith.constant dense<0.000000e+00> : vector<256x128xf32>
    %85 = tpu.matmul %83, %84, %cst_29 {dimension_numbers = #tpu.dot_dimension_numbers<[1], [0], [0], [1], [0, 0, 1, 1], [], []>} : vector<256x128xbf16>, vector<128x128xbf16>, vector<256x128xf32> -> vector<256x128xf32>
    %86 = vector.broadcast %14 : vector<1x128xf32> to vector<256x128xf32>
    %87 = arith.addf %85, %86 : vector<256x128xf32>
    %c0_30 = arith.constant 0 : index
    %c0_31 = arith.constant 0 : index
    %88 = vector.load %arg6[%c0_30, %c0_31] : memref<256x128xf32, #tpu.memory_space<vmem>>, vector<256x128xf32>
    tpu.vector_store %arg6[%c0_30, %c0_31], %87 {strides = array<i32>} : memref<256x128xf32, #tpu.memory_space<vmem>>, vector<256x128xf32>,
    return
  }
}

</mosaic_0001>

<bundles_post_ra>
// kernel: medium_model_forward.1
= control target key start
LH: loop header
LB: loop body
LE: loop exit
PB: predicated region body
PF: predicated region fallthrough
CT: control target
= control target key end

     0   :  { %s16015_s0 = inlined_call_operand.vmem [shape: f32[256,784], index: 0, kind: input, shape index: {}]   ;;  %s16016_s1 = inlined_call_operand.vmem [shape: bf16[384,512], index: 1, kind: input, shape index: {}]   ;;  %s16017_s2 = inlined_call_operand.vmem [shape: bf16[400,512], index: 2, kind: input, shape index: {}]   ;;  %s16018_s3 = inlined_call_operand.vmem [shape: bf16[512,128], index: 3, kind: input, shape index: {}]   ;;  %s16019_s4 = inlined_call_operand.vmem [shape: bf16[128,128], index: 4, kind: input, shape index: {}]   ;;  %s16020_s5 = inlined_call_operand.vmem [shape: f32[8,512], index: 5, kind: input, shape index: {}]   ;;  %s16021_s6 = inlined_call_operand.vmem [shape: f32[256,128], index: 6, kind: output, shape index: {}]  }
   0x1   :  { %v30_v0 = vld [vmem:[%s16016_s1] sm:$0xff]  ;;  %v32_v1 = vld [vmem:[%s16016_s1 + $0x8] sm:$0xff]  ;;  %v34_v2 = vld [vmem:[%s16016_s1 + $0x10] sm:$0xff] }
   0x2   :  { %31 = vst [vmem:[#allocation2] sm:$0xff] %v30_v0  ;;  %v36_v3 = vld [vmem:[%s16016_s1 + $0x18] sm:$0xff]  ;;  %v38_v4 = vld [vmem:[%s16016_s1 + $0x20] sm:$0xff]  ;;  %v40_v5 = vld [vmem:[%s16016_s1 + $0x28] sm:$0xff] }
   0x3   :  { %33 = vst [vmem:[#allocation2 + $0x8] sm:$0xff] %v32_v1  ;;  %v42_v6 = vld [vmem:[%s16016_s1 + $0x30] sm:$0xff]  ;;  %v44_v7 = vld [vmem:[%s16016_s1 + $0x38] sm:$0xff]  ;;  %v46_v8 = vld [vmem:[%s16016_s1 + $0x40] sm:$0xff] }
   0x4   :  { %35 = vst [vmem:[#allocation2 + $0x10] sm:$0xff] %v34_v2  ;;  %v48_v9 = vld [vmem:[%s16016_s1 + $0x48] sm:$0xff]  ;;  %v50_v10 = vld [vmem:[%s16016_s1 + $0x50] sm:$0xff]  ;;  %v52_v11 = vld [vmem:[%s16016_s1 + $0x58] sm:$0xff] }
   0x5   :  { %37 = vst [vmem:[#allocation2 + $0x18] sm:$0xff] %v36_v3  ;;  %v54_v12 = vld [vmem:[%s16016_s1 + $0x60] sm:$0xff]  ;;  %v56_v13 = vld [vmem:[%s16016_s1 + $0x68] sm:$0xff]  ;;  %v58_v14 = vld [vmem:[%s16016_s1 + $0x70] sm:$0xff] }
   0x6   :  { %39 = vst [vmem:[#allocation2 + $0x20] sm:$0xff] %v38_v4  ;;  %v60_v15 = vld [vmem:[%s16016_s1 + $0x78] sm:$0xff]  ;;  %v62_v16 = vld [vmem:[%s16016_s1 + $0x80] sm:$0xff]  ;;  %v64_v17 = vld [vmem:[%s16016_s1 + $0x88] sm:$0xff] }
   0x7   :  { %41 = vst [vmem:[#allocation2 + $0x28] sm:$0xff] %v40_v5  ;;  %v66_v18 = vld [vmem:[%s16016_s1 + $0x90] sm:$0xff]  ;;  %v68_v19 = vld [vmem:[%s16016_s1 + $0x98] sm:$0xff]  ;;  %v70_v20 = vld [vmem:[%s16016_s1 + $0xa0] sm:$0xff] }
   0x8   :  { %43 = vst [vmem:[#allocation2 + $0x30] sm:$0xff] %v42_v6  ;;  %v72_v21 = vld [vmem:[%s16016_s1 + $0xa8] sm:$0xff]  ;;  %v74_v22 = vld [vmem:[%s16016_s1 + $0xb0] sm:$0xff]  ;;  %v76_v23 = vld [vmem:[%s16016_s1 + $0xb8] sm:$0xff] }
   0x9   :  { %45 = vst [vmem:[#allocation2 + $0x38] sm:$0xff] %v44_v7  ;;  %v78_v24 = vld [vmem:[%s16016_s1 + $0xc0] sm:$0xff]  ;;  %v80_v25 = vld [vmem:[%s16016_s1 + $0xc8] sm:$0xff]  ;;  %v82_v26 = vld [vmem:[%s16016_s1 + $0xd0] sm:$0xff] }
   0xa   :  { %47 = vst [vmem:[#allocation2 + $0x40] sm:$0xff] %v46_v8  ;;  %v84_v27 = vld [vmem:[%s16016_s1 + $0xd8] sm:$0xff]  ;;  %v86_v28 = vld [vmem:[%s16016_s1 + $0xe0] sm:$0xff]  ;;  %v88_v29 = vld [vmem:[%s16016_s1 + $0xe8] sm:$0xff] }
   0xb   :  { %49 = vst [vmem:[#allocation2 + $0x48] sm:$0xff] %v48_v9  ;;  %v90_v30 = vld [vmem:[%s16016_s1 + $0xf0] sm:$0xff]  ;;  %v92_v31 = vld [vmem:[%s16016_s1 + $0xf8] sm:$0xff]  ;;  %v94_v32 = vld [vmem:[%s16016_s1 + $0x100] sm:$0xff] }
   0xc   :  { %51 = vst [vmem:[#allocation2 + $0x50] sm:$0xff] %v50_v10  ;;  %v96_v33 = vld [vmem:[%s16016_s1 + $0x108] sm:$0xff]  ;;  %v98_v34 = vld [vmem:[%s16016_s1 + $0x110] sm:$0xff]  ;;  %v100_v35 = vld [vmem:[%s16016_s1 + $0x118] sm:$0xff] }
   0xd   :  { %53 = vst [vmem:[#allocation2 + $0x58] sm:$0xff] %v52_v11  ;;  %v102_v36 = vld [vmem:[%s16016_s1 + $0x120] sm:$0xff]  ;;  %v104_v37 = vld [vmem:[%s16016_s1 + $0x128] sm:$0xff]  ;;  %v106_v38 = vld [vmem:[%s16016_s1 + $0x130] sm:$0xff] }
   0xe   :  { %55 = vst [vmem:[#allocation2 + $0x60] sm:$0xff] %v54_v12  ;;  %v108_v39 = vld [vmem:[%s16016_s1 + $0x138] sm:$0xff]  ;;  %v110_v40 = vld [vmem:[%s16016_s1 + $0x140] sm:$0xff]  ;;  %v112_v41 = vld [vmem:[%s16016_s1 + $0x148] sm:$0xff] }
   0xf   :  { %57 = vst [vmem:[#allocation2 + $0x68] sm:$0xff] %v56_v13  ;;  %v114_v42 = vld [vmem:[%s16016_s1 + $0x150] sm:$0xff]  ;;  %v116_v43 = vld [vmem:[%s16016_s1 + $0x158] sm:$0xff]  ;;  %v118_v44 = vld [vmem:[%s16016_s1 + $0x160] sm:$0xff] }
  0x10   :  { %59 = vst [vmem:[#allocation2 + $0x70] sm:$0xff] %v58_v14  ;;  %v120_v45 = vld [vmem:[%s16016_s1 + $0x168] sm:$0xff]  ;;  %v122_v46 = vld [vmem:[%s16016_s1 + $0x170] sm:$0xff]  ;;  %v124_v47 = vld [vmem:[%s16016_s1 + $0x178] sm:$0xff] }
  0x11   :  { %61 = vst [vmem:[#allocation2 + $0x78] sm:$0xff] %v60_v15  ;;  %v126_v48 = vld [vmem:[%s16016_s1 + $0x180] sm:$0xff]  ;;  %v128_v49 = vld [vmem:[%s16016_s1 + $0x188] sm:$0xff]  ;;  %v130_v50 = vld [vmem:[%s16016_s1 + $0x190] sm:$0xff] }
  0x12   :  { %63 = vst [vmem:[#allocation2 + $0x80] sm:$0xff] %v62_v16  ;;  %v132_v51 = vld [vmem:[%s16016_s1 + $0x198] sm:$0xff]  ;;  %v134_v52 = vld [vmem:[%s16016_s1 + $0x1a0] sm:$0xff]  ;;  %v136_v53 = vld [vmem:[%s16016_s1 + $0x1a8] sm:$0xff] }
  0x13   :  { %65 = vst [vmem:[#allocation2 + $0x88] sm:$0xff] %v64_v17  ;;  %v138_v54 = vld [vmem:[%s16016_s1 + $0x1b0] sm:$0xff]  ;;  %v140_v55 = vld [vmem:[%s16016_s1 + $0x1b8] sm:$0xff]  ;;  %v142_v56 = vld [vmem:[%s16016_s1 + $0x1c0] sm:$0xff] }
  0x14   :  { %67 = vst [vmem:[#allocation2 + $0x90] sm:$0xff] %v66_v18  ;;  %v144_v57 = vld [vmem:[%s16016_s1 + $0x1c8] sm:$0xff]  ;;  %v146_v58 = vld [vmem:[%s16016_s1 + $0x1d0] sm:$0xff]  ;;  %v148_v59 = vld [vmem:[%s16016_s1 + $0x1d8] sm:$0xff] }
  0x15   :  { %69 = vst [vmem:[#allocation2 + $0x98] sm:$0xff] %v68_v19  ;;  %v150_v60 = vld [vmem:[%s16016_s1 + $0x1e0] sm:$0xff]  ;;  %v152_v61 = vld [vmem:[%s16016_s1 + $0x1e8] sm:$0xff]  ;;  %v154_v62 = vld [vmem:[%s16016_s1 + $0x1f0] sm:$0xff] }
  0x16   :  { %71 = vst [vmem:[#allocation2 + $0xa0] sm:$0xff] %v70_v20  ;;  %v156_v63 = vld [vmem:[%s16016_s1 + $0x1f8] sm:$0xff]  ;;  %v158_v0 = vld [vmem:[%s16016_s1 + $0x200] sm:$0xff]  ;;  %v160_v1 = vld [vmem:[%s16016_s1 + $0x208] sm:$0xff] }
  0x17   :  { %73 = vst [vmem:[#allocation2 + $0xa8] sm:$0xff] %v72_v21  ;;  %v162_v2 = vld [vmem:[%s16016_s1 + $0x210] sm:$0xff]  ;;  %v164_v3 = vld [vmem:[%s16016_s1 + $0x218] sm:$0xff]  ;;  %v166_v4 = vld [vmem:[%s16016_s1 + $0x220] sm:$0xff] }
  0x18   :  { %75 = vst [vmem:[#allocation2 + $0xb0] sm:$0xff] %v74_v22  ;;  %v168_v5 = vld [vmem:[%s16016_s1 + $0x228] sm:$0xff]  ;;  %v170_v6 = vld [vmem:[%s16016_s1 + $0x230] sm:$0xff]  ;;  %v172_v7 = vld [vmem:[%s16016_s1 + $0x238] sm:$0xff] }
  0x19   :  { %77 = vst [vmem:[#allocation2 + $0xb8] sm:$0xff] %v76_v23  ;;  %v174_v8 = vld [vmem:[%s16016_s1 + $0x240] sm:$0xff]  ;;  %v176_v9 = vld [vmem:[%s16016_s1 + $0x248] sm:$0xff]  ;;  %v178_v10 = vld [vmem:[%s16016_s1 + $0x250] sm:$0xff] }
  0x1a   :  { %79 = vst [vmem:[#allocation2 + $0xc0] sm:$0xff] %v78_v24  ;;  %v180_v11 = vld [vmem:[%s16016_s1 + $0x258] sm:$0xff]  ;;  %v182_v12 = vld [vmem:[%s16016_s1 + $0x260] sm:$0xff]  ;;  %v184_v13 = vld [vmem:[%s16016_s1 + $0x268] sm:$0xff] }
  0x1b   :  { %81 = vst [vmem:[#allocation2 + $0xc8] sm:$0xff] %v80_v25  ;;  %v186_v14 = vld [vmem:[%s16016_s1 + $0x270] sm:$0xff]  ;;  %v188_v15 = vld [vmem:[%s16016_s1 + $0x278] sm:$0xff]  ;;  %v190_v16 = vld [vmem:[%s16016_s1 + $0x280] sm:$0xff] }
  0x1c   :  { %83 = vst [vmem:[#allocation2 + $0xd0] sm:$0xff] %v82_v26  ;;  %v192_v17 = vld [vmem:[%s16016_s1 + $0x288] sm:$0xff]  ;;  %v194_v18 = vld [vmem:[%s16016_s1 + $0x290] sm:$0xff]  ;;  %v196_v19 = vld [vmem:[%s16016_s1 + $0x298] sm:$0xff] }
  0x1d   :  { %85 = vst [vmem:[#allocation2 + $0xd8] sm:$0xff] %v84_v27  ;;  %v198_v20 = vld [vmem:[%s16016_s1 + $0x2a0] sm:$0xff]  ;;  %v200_v21 = vld [vmem:[%s16016_s1 + $0x2a8] sm:$0xff]  ;;  %v202_v22 = vld [vmem:[%s16016_s1 + $0x2b0] sm:$0xff] }
  0x1e   :  { %87 = vst [vmem:[#allocation2 + $0xe0] sm:$0xff] %v86_v28  ;;  %v204_v23 = vld [vmem:[%s16016_s1 + $0x2b8] sm:$0xff]  ;;  %v206_v24 = vld [vmem:[%s16016_s1 + $0x2c0] sm:$0xff]  ;;  %v208_v25 = vld [vmem:[%s16016_s1 + $0x2c8] sm:$0xff] }
  0x1f   :  { %89 = vst [vmem:[#allocation2 + $0xe8] sm:$0xff] %v88_v29  ;;  %v210_v26 = vld [vmem:[%s16016_s1 + $0x2d0] sm:$0xff]  ;;  %v212_v27 = vld [vmem:[%s16016_s1 + $0x2d8] sm:$0xff]  ;;  %v214_v28 = vld [vmem:[%s16016_s1 + $0x2e0] sm:$0xff] }
  0x20   :  { %91 = vst [vmem:[#allocation2 + $0xf0] sm:$0xff] %v90_v30  ;;  %v216_v29 = vld [vmem:[%s16016_s1 + $0x2e8] sm:$0xff]  ;;  %v218_v30 = vld [vmem:[%s16016_s1 + $0x2f0] sm:$0xff] }
  0x21   :  { %93 = vst [vmem:[#allocation2 + $0xf8] sm:$0xff] %v92_v31  ;;  %v220_v31 = vld [vmem:[%s16016_s1 + $0x2f8] sm:$0xff] }
  0x22   :  { %95 = vst [vmem:[#allocation2 + $0x100] sm:$0xff] %v94_v32 }
  0x23   :  { %97 = vst [vmem:[#allocation2 + $0x108] sm:$0xff] %v96_v33 }
  0x24   :  { %99 = vst [vmem:[#allocation2 + $0x110] sm:$0xff] %v98_v34 }
  0x25   :  { %101 = vst [vmem:[#allocation2 + $0x118] sm:$0xff] %v100_v35 }
  0x26   :  { %103 = vst [vmem:[#allocation2 + $0x120] sm:$0xff] %v102_v36 }
  0x27   :  { %105 = vst [vmem:[#allocation2 + $0x128] sm:$0xff] %v104_v37 }
  0x28   :  { %107 = vst [vmem:[#allocation2 + $0x130] sm:$0xff] %v106_v38 }
  0x29   :  { %109 = vst [vmem:[#allocation2 + $0x138] sm:$0xff] %v108_v39 }
  0x2a   :  { %111 = vst [vmem:[#allocation2 + $0x140] sm:$0xff] %v110_v40 }
  0x2b   :  { %113 = vst [vmem:[#allocation2 + $0x148] sm:$0xff] %v112_v41 }
  0x2c   :  { %115 = vst [vmem:[#allocation2 + $0x150] sm:$0xff] %v114_v42 }
  0x2d   :  { %117 = vst [vmem:[#allocation2 + $0x158] sm:$0xff] %v116_v43 }
  0x2e   :  { %119 = vst [vmem:[#allocation2 + $0x160] sm:$0xff] %v118_v44 }
  0x2f   :  { %121 = vst [vmem:[#allocation2 + $0x168] sm:$0xff] %v120_v45 }
  0x30   :  { %123 = vst [vmem:[#allocation2 + $0x170] sm:$0xff] %v122_v46 }
  0x31   :  { %125 = vst [vmem:[#allocation2 + $0x178] sm:$0xff] %v124_v47 }
  0x32   :  { %127 = vst [vmem:[#allocation2 + $0x180] sm:$0xff] %v126_v48 }
  0x33   :  { %129 = vst [vmem:[#allocation2 + $0x188] sm:$0xff] %v128_v49 }
  0x34   :  { %131 = vst [vmem:[#allocation2 + $0x190] sm:$0xff] %v130_v50 }
  0x35   :  { %133 = vst [vmem:[#allocation2 + $0x198] sm:$0xff] %v132_v51 }
  0x36   :  { %135 = vst [vmem:[#allocation2 + $0x1a0] sm:$0xff] %v134_v52 }
  0x37   :  { %137 = vst [vmem:[#allocation2 + $0x1a8] sm:$0xff] %v136_v53 }
  0x38   :  { %139 = vst [vmem:[#allocation2 + $0x1b0] sm:$0xff] %v138_v54 }
  0x39   :  { %141 = vst [vmem:[#allocation2 + $0x1b8] sm:$0xff] %v140_v55 }
  0x3a   :  { %143 = vst [vmem:[#allocation2 + $0x1c0] sm:$0xff] %v142_v56 }
  0x3b   :  { %145 = vst [vmem:[#allocation2 + $0x1c8] sm:$0xff] %v144_v57 }
  0x3c   :  { %147 = vst [vmem:[#allocation2 + $0x1d0] sm:$0xff] %v146_v58 }
  0x3d   :  { %149 = vst [vmem:[#allocation2 + $0x1d8] sm:$0xff] %v148_v59 }
  0x3e   :  { %151 = vst [vmem:[#allocation2 + $0x1e0] sm:$0xff] %v150_v60 }
  0x3f   :  { %153 = vst [vmem:[#allocation2 + $0x1e8] sm:$0xff] %v152_v61 }
  0x40   :  { %155 = vst [vmem:[#allocation2 + $0x1f0] sm:$0xff] %v154_v62 }
  0x41   :  { %157 = vst [vmem:[#allocation2 + $0x1f8] sm:$0xff] %v156_v63 }
  0x42   :  { %159 = vst [vmem:[#allocation2 + $0x200] sm:$0xff] %v158_v0 }
  0x43   :  { %161 = vst [vmem:[#allocation2 + $0x208] sm:$0xff] %v160_v1 }
  0x44   :  { %163 = vst [vmem:[#allocation2 + $0x210] sm:$0xff] %v162_v2 }
  0x45   :  { %165 = vst [vmem:[#allocation2 + $0x218] sm:$0xff] %v164_v3 }
  0x46   :  { %167 = vst [vmem:[#allocation2 + $0x220] sm:$0xff] %v166_v4 }
  0x47   :  { %169 = vst [vmem:[#allocation2 + $0x228] sm:$0xff] %v168_v5 }
  0x48   :  { %171 = vst [vmem:[#allocation2 + $0x230] sm:$0xff] %v170_v6 }
  0x49   :  { %173 = vst [vmem:[#allocation2 + $0x238] sm:$0xff] %v172_v7 }
  0x4a   :  { %175 = vst [vmem:[#allocation2 + $0x240] sm:$0xff] %v174_v8 }
  0x4b   :  { %177 = vst [vmem:[#allocation2 + $0x248] sm:$0xff] %v176_v9 }
  0x4c   :  { %179 = vst [vmem:[#allocation2 + $0x250] sm:$0xff] %v178_v10 }
  0x4d   :  { %181 = vst [vmem:[#allocation2 + $0x258] sm:$0xff] %v180_v11 }
  0x4e   :  { %183 = vst [vmem:[#allocation2 + $0x260] sm:$0xff] %v182_v12 }
  0x4f   :  { %185 = vst [vmem:[#allocation2 + $0x268] sm:$0xff] %v184_v13 }
  0x50   :  { %187 = vst [vmem:[#allocation2 + $0x270] sm:$0xff] %v186_v14 }
  0x51   :  { %189 = vst [vmem:[#allocation2 + $0x278] sm:$0xff] %v188_v15 }
  0x52   :  { %191 = vst [vmem:[#allocation2 + $0x280] sm:$0xff] %v190_v16 }
  0x53   :  { %193 = vst [vmem:[#allocation2 + $0x288] sm:$0xff] %v192_v17 }
  0x54   :  { %195 = vst [vmem:[#allocation2 + $0x290] sm:$0xff] %v194_v18 }
  0x55   :  { %197 = vst [vmem:[#allocation2 + $0x298] sm:$0xff] %v196_v19 }
  0x56   :  { %199 = vst [vmem:[#allocation2 + $0x2a0] sm:$0xff] %v198_v20 }
  0x57   :  { %201 = vst [vmem:[#allocation2 + $0x2a8] sm:$0xff] %v200_v21 }
  0x58   :  { %203 = vst [vmem:[#allocation2 + $0x2b0] sm:$0xff] %v202_v22 }
  0x59   :  { %205 = vst [vmem:[#allocation2 + $0x2b8] sm:$0xff] %v204_v23 }
  0x5a   :  { %207 = vst [vmem:[#allocation2 + $0x2c0] sm:$0xff] %v206_v24 }
  0x5b   :  { %209 = vst [vmem:[#allocation2 + $0x2c8] sm:$0xff] %v208_v25 }
  0x5c   :  { %211 = vst [vmem:[#allocation2 + $0x2d0] sm:$0xff] %v210_v26 }
  0x5d   :  { %213 = vst [vmem:[#allocation2 + $0x2d8] sm:$0xff] %v212_v27 }
  0x5e   :  { %215 = vst [vmem:[#allocation2 + $0x2e0] sm:$0xff] %v214_v28 }
  0x5f   :  { %217 = vst [vmem:[#allocation2 + $0x2e8] sm:$0xff] %v216_v29 }
  0x60   :  { %219 = vst [vmem:[#allocation2 + $0x2f0] sm:$0xff] %v218_v30 }
  0x61   :  { %221 = vst [vmem:[#allocation2 + $0x2f8] sm:$0xff] %v220_v31 }
  0x62   :  { %227 = vsyncadd [#allocation4], 12288  ;;  %v239_v32 = vld [vmem:[%s16017_s2] sm:$0xff]  ;;  %v241_v33 = vld [vmem:[%s16017_s2 + $0x8] sm:$0xff] }
  0x63   :  { %240 = vst [vmem:[#allocation3] sm:$0xff] %v239_v32  ;;  %v243_v34 = vld [vmem:[%s16017_s2 + $0x10] sm:$0xff]  ;;  %v245_v35 = vld [vmem:[%s16017_s2 + $0x18] sm:$0xff]  ;;  %v247_v36 = vld [vmem:[%s16017_s2 + $0x20] sm:$0xff] }
  0x64   :  { %242 = vst [vmem:[#allocation3 + $0x8] sm:$0xff] %v241_v33  ;;  %v249_v37 = vld [vmem:[%s16017_s2 + $0x28] sm:$0xff]  ;;  %v251_v38 = vld [vmem:[%s16017_s2 + $0x30] sm:$0xff]  ;;  %v253_v39 = vld [vmem:[%s16017_s2 + $0x38] sm:$0xff] }
  0x65   :  { %244 = vst [vmem:[#allocation3 + $0x10] sm:$0xff] %v243_v34  ;;  %v255_v40 = vld [vmem:[%s16017_s2 + $0x40] sm:$0xff]  ;;  %v257_v41 = vld [vmem:[%s16017_s2 + $0x48] sm:$0xff]  ;;  %v259_v42 = vld [vmem:[%s16017_s2 + $0x50] sm:$0xff] }
  0x66   :  { %246 = vst [vmem:[#allocation3 + $0x18] sm:$0xff] %v245_v35  ;;  %v261_v43 = vld [vmem:[%s16017_s2 + $0x58] sm:$0xff]  ;;  %v263_v44 = vld [vmem:[%s16017_s2 + $0x60] sm:$0xff]  ;;  %v265_v45 = vld [vmem:[%s16017_s2 + $0x68] sm:$0xff] }
  0x67   :  { %248 = vst [vmem:[#allocation3 + $0x20] sm:$0xff] %v247_v36  ;;  %v267_v46 = vld [vmem:[%s16017_s2 + $0x70] sm:$0xff]  ;;  %v269_v47 = vld [vmem:[%s16017_s2 + $0x78] sm:$0xff]  ;;  %v271_v48 = vld [vmem:[%s16017_s2 + $0x80] sm:$0xff] }
  0x68   :  { %250 = vst [vmem:[#allocation3 + $0x28] sm:$0xff] %v249_v37  ;;  %v273_v49 = vld [vmem:[%s16017_s2 + $0x88] sm:$0xff]  ;;  %v275_v50 = vld [vmem:[%s16017_s2 + $0x90] sm:$0xff]  ;;  %v277_v51 = vld [vmem:[%s16017_s2 + $0x98] sm:$0xff] }
  0x69   :  { %252 = vst [vmem:[#allocation3 + $0x30] sm:$0xff] %v251_v38  ;;  %v279_v52 = vld [vmem:[%s16017_s2 + $0xa0] sm:$0xff]  ;;  %v281_v53 = vld [vmem:[%s16017_s2 + $0xa8] sm:$0xff]  ;;  %v283_v54 = vld [vmem:[%s16017_s2 + $0xb0] sm:$0xff] }
  0x6a   :  { %254 = vst [vmem:[#allocation3 + $0x38] sm:$0xff] %v253_v39  ;;  %v285_v55 = vld [vmem:[%s16017_s2 + $0xb8] sm:$0xff]  ;;  %v287_v56 = vld [vmem:[%s16017_s2 + $0xc0] sm:$0xff]  ;;  %v289_v57 = vld [vmem:[%s16017_s2 + $0xc8] sm:$0xff] }
  0x6b   :  { %256 = vst [vmem:[#allocation3 + $0x40] sm:$0xff] %v255_v40  ;;  %v291_v58 = vld [vmem:[%s16017_s2 + $0xd0] sm:$0xff]  ;;  %v293_v59 = vld [vmem:[%s16017_s2 + $0xd8] sm:$0xff]  ;;  %v295_v60 = vld [vmem:[%s16017_s2 + $0xe0] sm:$0xff] }
  0x6c   :  { %258 = vst [vmem:[#allocation3 + $0x48] sm:$0xff] %v257_v41  ;;  %v297_v61 = vld [vmem:[%s16017_s2 + $0xe8] sm:$0xff]  ;;  %v299_v62 = vld [vmem:[%s16017_s2 + $0xf0] sm:$0xff]  ;;  %v301_v63 = vld [vmem:[%s16017_s2 + $0xf8] sm:$0xff] }
  0x6d   :  { %260 = vst [vmem:[#allocation3 + $0x50] sm:$0xff] %v259_v42  ;;  %v303_v0 = vld [vmem:[%s16017_s2 + $0x100] sm:$0xff]  ;;  %v305_v1 = vld [vmem:[%s16017_s2 + $0x108] sm:$0xff]  ;;  %v307_v2 = vld [vmem:[%s16017_s2 + $0x110] sm:$0xff] }
  0x6e   :  { %262 = vst [vmem:[#allocation3 + $0x58] sm:$0xff] %v261_v43  ;;  %v309_v3 = vld [vmem:[%s16017_s2 + $0x118] sm:$0xff]  ;;  %v311_v4 = vld [vmem:[%s16017_s2 + $0x120] sm:$0xff]  ;;  %v313_v5 = vld [vmem:[%s16017_s2 + $0x128] sm:$0xff] }
  0x6f   :  { %264 = vst [vmem:[#allocation3 + $0x60] sm:$0xff] %v263_v44  ;;  %v315_v6 = vld [vmem:[%s16017_s2 + $0x130] sm:$0xff]  ;;  %v317_v7 = vld [vmem:[%s16017_s2 + $0x138] sm:$0xff]  ;;  %v319_v8 = vld [vmem:[%s16017_s2 + $0x140] sm:$0xff] }
  0x70   :  { %266 = vst [vmem:[#allocation3 + $0x68] sm:$0xff] %v265_v45  ;;  %v321_v9 = vld [vmem:[%s16017_s2 + $0x148] sm:$0xff]  ;;  %v323_v10 = vld [vmem:[%s16017_s2 + $0x150] sm:$0xff]  ;;  %v325_v11 = vld [vmem:[%s16017_s2 + $0x158] sm:$0xff] }
  0x71   :  { %268 = vst [vmem:[#allocation3 + $0x70] sm:$0xff] %v267_v46  ;;  %v327_v12 = vld [vmem:[%s16017_s2 + $0x160] sm:$0xff]  ;;  %v329_v13 = vld [vmem:[%s16017_s2 + $0x168] sm:$0xff]  ;;  %v331_v14 = vld [vmem:[%s16017_s2 + $0x170] sm:$0xff] }
  0x72   :  { %270 = vst [vmem:[#allocation3 + $0x78] sm:$0xff] %v269_v47  ;;  %v333_v15 = vld [vmem:[%s16017_s2 + $0x178] sm:$0xff]  ;;  %v335_v16 = vld [vmem:[%s16017_s2 + $0x180] sm:$0xff]  ;;  %v337_v17 = vld [vmem:[%s16017_s2 + $0x188] sm:$0xff] }
  0x73   :  { %272 = vst [vmem:[#allocation3 + $0x80] sm:$0xff] %v271_v48  ;;  %v339_v18 = vld [vmem:[%s16017_s2 + $0x190] sm:$0xff]  ;;  %v341_v19 = vld [vmem:[%s16017_s2 + $0x198] sm:$0xff]  ;;  %v343_v20 = vld [vmem:[%s16017_s2 + $0x1a0] sm:$0xff] }
  0x74   :  { %274 = vst [vmem:[#allocation3 + $0x88] sm:$0xff] %v273_v49  ;;  %v345_v21 = vld [vmem:[%s16017_s2 + $0x1a8] sm:$0xff]  ;;  %v347_v22 = vld [vmem:[%s16017_s2 + $0x1b0] sm:$0xff]  ;;  %v349_v23 = vld [vmem:[%s16017_s2 + $0x1b8] sm:$0xff] }
  0x75   :  { %276 = vst [vmem:[#allocation3 + $0x90] sm:$0xff] %v275_v50  ;;  %v351_v24 = vld [vmem:[%s16017_s2 + $0x1c0] sm:$0xff]  ;;  %v353_v25 = vld [vmem:[%s16017_s2 + $0x1c8] sm:$0xff]  ;;  %v355_v26 = vld [vmem:[%s16017_s2 + $0x1d0] sm:$0xff] }
  0x76   :  { %278 = vst [vmem:[#allocation3 + $0x98] sm:$0xff] %v277_v51  ;;  %v357_v27 = vld [vmem:[%s16017_s2 + $0x1d8] sm:$0xff]  ;;  %v359_v28 = vld [vmem:[%s16017_s2 + $0x1e0] sm:$0xff]  ;;  %v361_v29 = vld [vmem:[%s16017_s2 + $0x1e8] sm:$0xff] }
  0x77   :  { %280 = vst [vmem:[#allocation3 + $0xa0] sm:$0xff] %v279_v52  ;;  %v363_v30 = vld [vmem:[%s16017_s2 + $0x1f0] sm:$0xff]  ;;  %v365_v31 = vld [vmem:[%s16017_s2 + $0x1f8] sm:$0xff]  ;;  %v367_v32 = vld [vmem:[%s16017_s2 + $0x200] sm:$0xff] }
  0x78   :  { %282 = vst [vmem:[#allocation3 + $0xa8] sm:$0xff] %v281_v53  ;;  %v369_v33 = vld [vmem:[%s16017_s2 + $0x208] sm:$0xff]  ;;  %v371_v34 = vld [vmem:[%s16017_s2 + $0x210] sm:$0xff]  ;;  %v373_v35 = vld [vmem:[%s16017_s2 + $0x218] sm:$0xff] }
  0x79   :  { %284 = vst [vmem:[#allocation3 + $0xb0] sm:$0xff] %v283_v54  ;;  %v375_v36 = vld [vmem:[%s16017_s2 + $0x220] sm:$0xff]  ;;  %v377_v37 = vld [vmem:[%s16017_s2 + $0x228] sm:$0xff]  ;;  %v379_v38 = vld [vmem:[%s16017_s2 + $0x230] sm:$0xff] }
  0x7a   :  { %286 = vst [vmem:[#allocation3 + $0xb8] sm:$0xff] %v285_v55  ;;  %v381_v39 = vld [vmem:[%s16017_s2 + $0x238] sm:$0xff]  ;;  %v383_v40 = vld [vmem:[%s16017_s2 + $0x240] sm:$0xff]  ;;  %v385_v41 = vld [vmem:[%s16017_s2 + $0x248] sm:$0xff] }
  0x7b   :  { %288 = vst [vmem:[#allocation3 + $0xc0] sm:$0xff] %v287_v56  ;;  %v387_v42 = vld [vmem:[%s16017_s2 + $0x250] sm:$0xff]  ;;  %v389_v43 = vld [vmem:[%s16017_s2 + $0x258] sm:$0xff]  ;;  %v391_v44 = vld [vmem:[%s16017_s2 + $0x260] sm:$0xff] }
  0x7c   :  { %290 = vst [vmem:[#allocation3 + $0xc8] sm:$0xff] %v289_v57  ;;  %v393_v45 = vld [vmem:[%s16017_s2 + $0x268] sm:$0xff]  ;;  %v395_v46 = vld [vmem:[%s16017_s2 + $0x270] sm:$0xff]  ;;  %v397_v47 = vld [vmem:[%s16017_s2 + $0x278] sm:$0xff] }
  0x7d   :  { %292 = vst [vmem:[#allocation3 + $0xd0] sm:$0xff] %v291_v58  ;;  %v399_v48 = vld [vmem:[%s16017_s2 + $0x280] sm:$0xff]  ;;  %v401_v49 = vld [vmem:[%s16017_s2 + $0x288] sm:$0xff]  ;;  %v403_v50 = vld [vmem:[%s16017_s2 + $0x290] sm:$0xff] }
  0x7e   :  { %294 = vst [vmem:[#allocation3 + $0xd8] sm:$0xff] %v293_v59  ;;  %v405_v51 = vld [vmem:[%s16017_s2 + $0x298] sm:$0xff]  ;;  %v407_v52 = vld [vmem:[%s16017_s2 + $0x2a0] sm:$0xff]  ;;  %v409_v53 = vld [vmem:[%s16017_s2 + $0x2a8] sm:$0xff] }
  0x7f   :  { %296 = vst [vmem:[#allocation3 + $0xe0] sm:$0xff] %v295_v60  ;;  %v411_v54 = vld [vmem:[%s16017_s2 + $0x2b0] sm:$0xff]  ;;  %v413_v55 = vld [vmem:[%s16017_s2 + $0x2b8] sm:$0xff]  ;;  %v415_v56 = vld [vmem:[%s16017_s2 + $0x2c0] sm:$0xff] }
  0x80   :  { %298 = vst [vmem:[#allocation3 + $0xe8] sm:$0xff] %v297_v61  ;;  %v417_v57 = vld [vmem:[%s16017_s2 + $0x2c8] sm:$0xff]  ;;  %v419_v58 = vld [vmem:[%s16017_s2 + $0x2d0] sm:$0xff]  ;;  %v421_v59 = vld [vmem:[%s16017_s2 + $0x2d8] sm:$0xff] }
  0x81   :  { %300 = vst [vmem:[#allocation3 + $0xf0] sm:$0xff] %v299_v62  ;;  %v423_v60 = vld [vmem:[%s16017_s2 + $0x2e0] sm:$0xff]  ;;  %v425_v61 = vld [vmem:[%s16017_s2 + $0x2e8] sm:$0xff]  ;;  %v427_v62 = vld [vmem:[%s16017_s2 + $0x2f0] sm:$0xff] }
  0x82   :  { %302 = vst [vmem:[#allocation3 + $0xf8] sm:$0xff] %v301_v63  ;;  %v429_v63 = vld [vmem:[%s16017_s2 + $0x2f8] sm:$0xff] }
  0x83   :  { %304 = vst [vmem:[#allocation3 + $0x100] sm:$0xff] %v303_v0  ;;  %v431_v0 = vld [vmem:[%s16017_s2 + $0x300] sm:$0xff] }
  0x84   :  { %306 = vst [vmem:[#allocation3 + $0x108] sm:$0xff] %v305_v1  ;;  %v433_v1 = vld [vmem:[%s16017_s2 + $0x308] sm:$0xff] }
  0x85   :  { %308 = vst [vmem:[#allocation3 + $0x110] sm:$0xff] %v307_v2  ;;  %v435_v2 = vld [vmem:[%s16017_s2 + $0x310] sm:$0xff] }
  0x86   :  { %310 = vst [vmem:[#allocation3 + $0x118] sm:$0xff] %v309_v3  ;;  %v437_v3 = vld [vmem:[%s16017_s2 + $0x318] sm:$0xff] }
  0x87   :  { %312 = vst [vmem:[#allocation3 + $0x120] sm:$0xff] %v311_v4 }
  0x88   :  { %314 = vst [vmem:[#allocation3 + $0x128] sm:$0xff] %v313_v5 }
  0x89   :  { %316 = vst [vmem:[#allocation3 + $0x130] sm:$0xff] %v315_v6 }
  0x8a   :  { %318 = vst [vmem:[#allocation3 + $0x138] sm:$0xff] %v317_v7 }
  0x8b   :  { %320 = vst [vmem:[#allocation3 + $0x140] sm:$0xff] %v319_v8 }
  0x8c   :  { %322 = vst [vmem:[#allocation3 + $0x148] sm:$0xff] %v321_v9 }
  0x8d   :  { %324 = vst [vmem:[#allocation3 + $0x150] sm:$0xff] %v323_v10 }
  0x8e   :  { %326 = vst [vmem:[#allocation3 + $0x158] sm:$0xff] %v325_v11 }
  0x8f   :  { %328 = vst [vmem:[#allocation3 + $0x160] sm:$0xff] %v327_v12 }
  0x90   :  { %330 = vst [vmem:[#allocation3 + $0x168] sm:$0xff] %v329_v13 }
  0x91   :  { %332 = vst [vmem:[#allocation3 + $0x170] sm:$0xff] %v331_v14 }
  0x92   :  { %334 = vst [vmem:[#allocation3 + $0x178] sm:$0xff] %v333_v15 }
  0x93   :  { %336 = vst [vmem:[#allocation3 + $0x180] sm:$0xff] %v335_v16 }
  0x94   :  { %338 = vst [vmem:[#allocation3 + $0x188] sm:$0xff] %v337_v17 }
  0x95   :  { %340 = vst [vmem:[#allocation3 + $0x190] sm:$0xff] %v339_v18 }
  0x96   :  { %342 = vst [vmem:[#allocation3 + $0x198] sm:$0xff] %v341_v19 }
  0x97   :  { %344 = vst [vmem:[#allocation3 + $0x1a0] sm:$0xff] %v343_v20 }
  0x98   :  { %346 = vst [vmem:[#allocation3 + $0x1a8] sm:$0xff] %v345_v21 }
  0x99   :  { %348 = vst [vmem:[#allocation3 + $0x1b0] sm:$0xff] %v347_v22 }
  0x9a   :  { %350 = vst [vmem:[#allocation3 + $0x1b8] sm:$0xff] %v349_v23 }
  0x9b   :  { %352 = vst [vmem:[#allocation3 + $0x1c0] sm:$0xff] %v351_v24 }
  0x9c   :  { %354 = vst [vmem:[#allocation3 + $0x1c8] sm:$0xff] %v353_v25 }
  0x9d   :  { %356 = vst [vmem:[#allocation3 + $0x1d0] sm:$0xff] %v355_v26 }
  0x9e   :  { %358 = vst [vmem:[#allocation3 + $0x1d8] sm:$0xff] %v357_v27 }
  0x9f   :  { %360 = vst [vmem:[#allocation3 + $0x1e0] sm:$0xff] %v359_v28 }
  0xa0   :  { %362 = vst [vmem:[#allocation3 + $0x1e8] sm:$0xff] %v361_v29 }
  0xa1   :  { %364 = vst [vmem:[#allocation3 + $0x1f0] sm:$0xff] %v363_v30 }
  0xa2   :  { %366 = vst [vmem:[#allocation3 + $0x1f8] sm:$0xff] %v365_v31 }
  0xa3   :  { %368 = vst [vmem:[#allocation3 + $0x200] sm:$0xff] %v367_v32 }
  0xa4   :  { %370 = vst [vmem:[#allocation3 + $0x208] sm:$0xff] %v369_v33 }
  0xa5   :  { %372 = vst [vmem:[#allocation3 + $0x210] sm:$0xff] %v371_v34 }
  0xa6   :  { %374 = vst [vmem:[#allocation3 + $0x218] sm:$0xff] %v373_v35 }
  0xa7   :  { %376 = vst [vmem:[#allocation3 + $0x220] sm:$0xff] %v375_v36 }
  0xa8   :  { %378 = vst [vmem:[#allocation3 + $0x228] sm:$0xff] %v377_v37 }
  0xa9   :  { %380 = vst [vmem:[#allocation3 + $0x230] sm:$0xff] %v379_v38 }
  0xaa   :  { %382 = vst [vmem:[#allocation3 + $0x238] sm:$0xff] %v381_v39 }
  0xab   :  { %384 = vst [vmem:[#allocation3 + $0x240] sm:$0xff] %v383_v40 }
  0xac   :  { %386 = vst [vmem:[#allocation3 + $0x248] sm:$0xff] %v385_v41 }
  0xad   :  { %388 = vst [vmem:[#allocation3 + $0x250] sm:$0xff] %v387_v42 }
  0xae   :  { %390 = vst [vmem:[#allocation3 + $0x258] sm:$0xff] %v389_v43 }
  0xaf   :  { %392 = vst [vmem:[#allocation3 + $0x260] sm:$0xff] %v391_v44 }
  0xb0   :  { %394 = vst [vmem:[#allocation3 + $0x268] sm:$0xff] %v393_v45 }
  0xb1   :  { %396 = vst [vmem:[#allocation3 + $0x270] sm:$0xff] %v395_v46 }
  0xb2   :  { %398 = vst [vmem:[#allocation3 + $0x278] sm:$0xff] %v397_v47 }
  0xb3   :  { %400 = vst [vmem:[#allocation3 + $0x280] sm:$0xff] %v399_v48 }
  0xb4   :  { %402 = vst [vmem:[#allocation3 + $0x288] sm:$0xff] %v401_v49 }
  0xb5   :  { %404 = vst [vmem:[#allocation3 + $0x290] sm:$0xff] %v403_v50 }
  0xb6   :  { %406 = vst [vmem:[#allocation3 + $0x298] sm:$0xff] %v405_v51 }
  0xb7   :  { %408 = vst [vmem:[#allocation3 + $0x2a0] sm:$0xff] %v407_v52 }
  0xb8   :  { %410 = vst [vmem:[#allocation3 + $0x2a8] sm:$0xff] %v409_v53 }
  0xb9   :  { %412 = vst [vmem:[#allocation3 + $0x2b0] sm:$0xff] %v411_v54 }
  0xba   :  { %414 = vst [vmem:[#allocation3 + $0x2b8] sm:$0xff] %v413_v55 }
  0xbb   :  { %416 = vst [vmem:[#allocation3 + $0x2c0] sm:$0xff] %v415_v56 }
  0xbc   :  { %418 = vst [vmem:[#allocation3 + $0x2c8] sm:$0xff] %v417_v57 }
  0xbd   :  { %420 = vst [vmem:[#allocation3 + $0x2d0] sm:$0xff] %v419_v58 }
  0xbe   :  { %422 = vst [vmem:[#allocation3 + $0x2d8] sm:$0xff] %v421_v59 }
  0xbf   :  { %424 = vst [vmem:[#allocation3 + $0x2e0] sm:$0xff] %v423_v60 }
  0xc0   :  { %426 = vst [vmem:[#allocation3 + $0x2e8] sm:$0xff] %v425_v61 }
  0xc1   :  { %428 = vst [vmem:[#allocation3 + $0x2f0] sm:$0xff] %v427_v62 }
  0xc2   :  { %430 = vst [vmem:[#allocation3 + $0x2f8] sm:$0xff] %v429_v63 }
  0xc3   :  { %432 = vst [vmem:[#allocation3 + $0x300] sm:$0xff] %v431_v0 }
  0xc4   :  { %434 = vst [vmem:[#allocation3 + $0x308] sm:$0xff] %v433_v1 }
  0xc5   :  { %436 = vst [vmem:[#allocation3 + $0x310] sm:$0xff] %v435_v2 }
  0xc6   :  { %438 = vst [vmem:[#allocation3 + $0x318] sm:$0xff] %v437_v3 }
  0xc7   :  { %444 = vsyncadd [#allocation4 + $0x1], 12800  ;;  %v445_v4 = vld [vmem:[%s16015_s0] sm:$0xff]  ;;  %v446_v5 = vld [vmem:[%s16015_s0 + $0x8] sm:$0xff] }
  0xc8   :  { %v447_v6 = vld [vmem:[%s16015_s0 + $0x10] sm:$0xff]  ;;  %v448_v7 = vld [vmem:[%s16015_s0 + $0x18] sm:$0xff]  ;;  %v449_v8 = vld [vmem:[%s16015_s0 + $0x20] sm:$0xff]  ;;  %v9287_v46 = vpack.c.bf16 %v446_v5, %v445_v4 }
  0xc9   :  { %v450_v9 = vld [vmem:[%s16015_s0 + $0x28] sm:$0xff]  ;;  %v9170_v10 = vld [vmem:[%s16015_s0 + $0x30] sm:$0xff]  ;;  %v452_v11 = vld [vmem:[%s16015_s0 + $0x38] sm:$0xff]  ;;  %v9289_v47 = vpack.c.bf16 %v448_v7, %v447_v6 }
  0xca   :  { %16448 = vst [vmem:[#allocation9_spill] sm:$0xff] %v9170_v10  ;;  %v453_v12 = vld [vmem:[%s16015_s0 + $0x40] sm:$0xff]  ;;  %v454_v13 = vld [vmem:[%s16015_s0 + $0x48] sm:$0xff]  ;;  %v455_v14 = vld [vmem:[%s16015_s0 + $0x50] sm:$0xff]  ;;  %v9291_v48 = vpack.c.bf16 %v450_v9, %v449_v8 }
  0xcb   :  { %v456_v15 = vld [vmem:[%s16015_s0 + $0x58] sm:$0xff]  ;;  %v457_v16 = vld [vmem:[%s16015_s0 + $0x60] sm:$0xff]  ;;  %v9193_v17 = vld [vmem:[%s16015_s0 + $0x68] sm:$0xff]  ;;  %16454 = vst [vmem:[#allocation15_spill] sm:$0xff] %v9287_v46  ;;  %v9318_v57 = vpack.c.bf16 %v453_v12, %v452_v11  ;;  %v9320_v58 = vpack.c.bf16 %v455_v14, %v454_v13 }
  0xcc   :  { %16449 = vst [vmem:[#allocation10_spill] sm:$0xff] %v9193_v17  ;;  %v459_v18 = vld [vmem:[%s16015_s0 + $0x70] sm:$0xff]  ;;  %v460_v19 = vld [vmem:[%s16015_s0 + $0x78] sm:$0xff]  ;;  %v461_v20 = vld [vmem:[%s16015_s0 + $0x80] sm:$0xff]  ;;  %v9322_v59 = vpack.c.bf16 %v457_v16, %v456_v15 }
  0xcd   :  { %v462_v21 = vld [vmem:[%s16015_s0 + $0x88] sm:$0xff]  ;;  %v463_v22 = vld [vmem:[%s16015_s0 + $0x90] sm:$0xff]  ;;  %v464_v23 = vld [vmem:[%s16015_s0 + $0x98] sm:$0xff]  ;;  %16455 = vst [vmem:[#allocation16_spill] sm:$0xff] %v9289_v47  ;;  %v9349_v4 = vpack.c.bf16 %v460_v19, %v459_v18 }
  0xce   :  { %v9216_v24 = vld [vmem:[%s16015_s0 + $0xa0] sm:$0xff]  ;;  %v466_v25 = vld [vmem:[%s16015_s0 + $0xa8] sm:$0xff]  ;;  %v467_v26 = vld [vmem:[%s16015_s0 + $0xb0] sm:$0xff]  ;;  %16457 = vst [vmem:[#allocation18_spill] sm:$0xff] %v9318_v57  ;;  %v9351_v5 = vpack.c.bf16 %v462_v21, %v461_v20  ;;  %v9353_v6 = vpack.c.bf16 %v464_v23, %v463_v22 }
  0xcf   :  { %16450 = vst [vmem:[#allocation11_spill] sm:$0xff] %v9216_v24  ;;  %v468_v27 = vld [vmem:[%s16015_s0 + $0xb8] sm:$0xff]  ;;  %v469_v28 = vld [vmem:[%s16015_s0 + $0xc0] sm:$0xff]  ;;  %v470_v29 = vld [vmem:[%s16015_s0 + $0xc8] sm:$0xff]  ;;  %v9380_v16 = vpack.c.bf16 %v467_v26, %v466_v25 }
  0xd0   :  { %v471_v30 = vld [vmem:[%s16015_s0 + $0xd0] sm:$0xff]  ;;  %v9239_v31 = vld [vmem:[%s16015_s0 + $0xd8] sm:$0xff]  ;;  %v473_v32 = vld [vmem:[%s16015_s0 + $0xe0] sm:$0xff]  ;;  %16458 = vst [vmem:[#allocation19_spill] sm:$0xff] %v9320_v58  ;;  %v9382_v18 = vpack.c.bf16 %v469_v28, %v468_v27 }
  0xd1   :  { %16451 = vst [vmem:[#allocation12_spill] sm:$0xff] %v9239_v31  ;;  %v474_v33 = vld [vmem:[%s16015_s0 + $0xe8] sm:$0xff]  ;;  %v475_v34 = vld [vmem:[%s16015_s0 + $0xf0] sm:$0xff]  ;;  %v476_v35 = vld [vmem:[%s16015_s0 + $0xf8] sm:$0xff]  ;;  %v9384_v19 = vpack.c.bf16 %v471_v30, %v470_v29 }
  0xd2   :  { %v477_v36 = vld [vmem:[%s16015_s0 + $0x100] sm:$0xff]  ;;  %v478_v37 = vld [vmem:[%s16015_s0 + $0x108] sm:$0xff]  ;;  %v9262_v38 = vld [vmem:[%s16015_s0 + $0x110] sm:$0xff]  ;;  %16460 = vst [vmem:[#allocation21_spill] sm:$0xff] %v9349_v4  ;;  %v9411_v29 = vpack.c.bf16 %v474_v33, %v473_v32  ;;  %v9413_v30 = vpack.c.bf16 %v476_v35, %v475_v34 }
  0xd3   :  { %16452 = vst [vmem:[#allocation13_spill] sm:$0xff] %v9262_v38  ;;  %v480_v39 = vld [vmem:[%s16015_s0 + $0x118] sm:$0xff]  ;;  %v481_v40 = vld [vmem:[%s16015_s0 + $0x120] sm:$0xff]  ;;  %v482_v41 = vld [vmem:[%s16015_s0 + $0x128] sm:$0xff]  ;;  %v9415_v20 = vpack.c.bf16 %v478_v37, %v477_v36 }
  0xd4   :  { %v483_v42 = vld [vmem:[%s16015_s0 + $0x130] sm:$0xff]  ;;  %v484_v43 = vld [vmem:[%s16015_s0 + $0x138] sm:$0xff]  ;;  %v485_v44 = vld [vmem:[%s16015_s0 + $0x140] sm:$0xff]  ;;  %16461 = vst [vmem:[#allocation22_spill] sm:$0xff] %v9351_v5  ;;  %v9442_v37 = vpack.c.bf16 %v481_v40, %v480_v39 }
  0xd5   :  { %v9285_v45 = vld [vmem:[%s16015_s0 + $0x148] sm:$0xff]  ;;  %v487_v50 = vld [vmem:[%s16015_s0 + $0x150] sm:$0xff]  ;;  %v488_v51 = vld [vmem:[%s16015_s0 + $0x158] sm:$0xff]  ;;  %16463 = vst [vmem:[#allocation24_spill] sm:$0xff] %v9380_v16  ;;  %v9444_v7 = vpack.c.bf16 %v483_v42, %v482_v41 }
  0xd6   :  { %16453 = vst [vmem:[#allocation14_spill] sm:$0xff] %v9285_v45  ;;  %v489_v52 = vld [vmem:[%s16015_s0 + $0x160] sm:$0xff]  ;;  %v490_v53 = vld [vmem:[%s16015_s0 + $0x168] sm:$0xff]  ;;  %v491_v54 = vld [vmem:[%s16015_s0 + $0x170] sm:$0xff] }
  0xd7   :  { %v492_v55 = vld [vmem:[%s16015_s0 + $0x178] sm:$0xff]  ;;  %v9316_v56 = vld [vmem:[%s16015_s0 + $0x180] sm:$0xff]  ;;  %v494_v61 = vld [vmem:[%s16015_s0 + $0x188] sm:$0xff]  ;;  %16464 = vst [vmem:[#allocation25_spill] sm:$0xff] %v9382_v18  ;;  %v9475_v16 = vpack.c.bf16 %v490_v53, %v489_v52 }
  0xd8   :  { %16456 = vst [vmem:[#allocation17_spill] sm:$0xff] %v9316_v56  ;;  %v495_v62 = vld [vmem:[%s16015_s0 + $0x190] sm:$0xff]  ;;  %v496_v63 = vld [vmem:[%s16015_s0 + $0x198] sm:$0xff]  ;;  %v497_v0 = vld [vmem:[%s16015_s0 + $0x1a0] sm:$0xff] }
  0xd9   :  { %v498_v1 = vld [vmem:[%s16015_s0 + $0x1a8] sm:$0xff]  ;;  %v499_v2 = vld [vmem:[%s16015_s0 + $0x1b0] sm:$0xff]  ;;  %v9347_v3 = vld [vmem:[%s16015_s0 + $0x1b8] sm:$0xff]  ;;  %16466 = vst [vmem:[#allocation27_spill] sm:$0xff] %v9411_v29  ;;  %v9446_v29 = vpack.c.bf16 %v485_v44, %v484_v43  ;;  %v9473_v44 = vpack.c.bf16 %v488_v51, %v487_v50  ;;  %v9506_v46 = vpack.c.bf16 %v497_v0, %v496_v63 }
  0xda   :  { %16459 = vst [vmem:[#allocation20_spill] sm:$0xff] %v9347_v3  ;;  %v501_v8 = vld [vmem:[%s16015_s0 + $0x1c0] sm:$0xff]  ;;  %v502_v9 = vld [vmem:[%s16015_s0 + $0x1c8] sm:$0xff]  ;;  %v503_v11 = vld [vmem:[%s16015_s0 + $0x1d0] sm:$0xff] }
  0xdb   :  { %v504_v12 = vld [vmem:[%s16015_s0 + $0x1d8] sm:$0xff]  ;;  %v505_v13 = vld [vmem:[%s16015_s0 + $0x1e0] sm:$0xff]  ;;  %v506_v14 = vld [vmem:[%s16015_s0 + $0x1e8] sm:$0xff]  ;;  %16467 = vst [vmem:[#allocation28_spill] sm:$0xff] %v9413_v30 }
  0xdc   :  { %v9378_v15 = vld [vmem:[%s16015_s0 + $0x1f0] sm:$0xff]  ;;  %v508_v21 = vld [vmem:[%s16015_s0 + $0x1f8] sm:$0xff]  ;;  %v509_v22 = vld [vmem:[%s16015_s0 + $0x200] sm:$0xff]  ;;  %16468 = vst [vmem:[#allocation29_spill] sm:$0xff] %v9415_v20  ;;  %v9537_v56 = vpack.c.bf16 %v504_v12, %v503_v11 }
  0xdd   :  { %16462 = vst [vmem:[#allocation23_spill] sm:$0xff] %v9378_v15  ;;  %v510_v23 = vld [vmem:[%s16015_s0 + $0x208] sm:$0xff]  ;;  %v511_v25 = vld [vmem:[%s16015_s0 + $0x210] sm:$0xff]  ;;  %v512_v26 = vld [vmem:[%s16015_s0 + $0x218] sm:$0xff] }
  0xde   :  { %v513_v27 = vld [vmem:[%s16015_s0 + $0x220] sm:$0xff]  ;;  %v9409_v28 = vld [vmem:[%s16015_s0 + $0x228] sm:$0xff]  ;;  %v515_v60 = vld [vmem:[%s16015_s0 + $0x230] sm:$0xff]  ;;  %16470 = vst [vmem:[#allocation31_spill] sm:$0xff] %v9442_v37  ;;  %v9477_v37 = vpack.c.bf16 %v492_v55, %v491_v54  ;;  %v9504_v55 = vpack.c.bf16 %v495_v62, %v494_v61  ;;  %v9568_v3 = vpack.c.bf16 %v511_v25, %v510_v23 }
  0xdf   :  { %16465 = vst [vmem:[#allocation26_spill] sm:$0xff] %v9409_v28  ;;  %v516_v49 = vld [vmem:[%s16015_s0 + $0x238] sm:$0xff]  ;;  %v517_v32 = vld [vmem:[%s16015_s0 + $0x240] sm:$0xff]  ;;  %v518_v33 = vld [vmem:[%s16015_s0 + $0x248] sm:$0xff] }
  0xe0   :  { %v519_v34 = vld [vmem:[%s16015_s0 + $0x250] sm:$0xff]  ;;  %v520_v35 = vld [vmem:[%s16015_s0 + $0x258] sm:$0xff]  ;;  %v9440_v36 = vld [vmem:[%s16015_s0 + $0x260] sm:$0xff]  ;;  %16471 = vst [vmem:[#allocation32_spill] sm:$0xff] %v9444_v7  ;;  %v9599_v15 = vpack.c.bf16 %v518_v33, %v517_v32 }
  0xe1   :  { %16469 = vst [vmem:[#allocation30_spill] sm:$0xff] %v9440_v36  ;;  %v522_v4 = vld [vmem:[%s16015_s0 + $0x268] sm:$0xff]  ;;  %v523_v57 = vld [vmem:[%s16015_s0 + $0x270] sm:$0xff]  ;;  %v524_v39 = vld [vmem:[%s16015_s0 + $0x278] sm:$0xff] }
  0xe2   :  { %16472 = vst [vmem:[#allocation33_spill] sm:$0xff] %v9446_v29  ;;  %v525_v40 = vld [vmem:[%s16015_s0 + $0x280] sm:$0xff]  ;;  %v526_v41 = vld [vmem:[%s16015_s0 + $0x288] sm:$0xff]  ;;  %v527_v42 = vld [vmem:[%s16015_s0 + $0x290] sm:$0xff] }
  0xe3   :  { %v9471_v43 = vld [vmem:[%s16015_s0 + $0x298] sm:$0xff]  ;;  %16474 = vst [vmem:[#allocation35_spill] sm:$0xff] %v9473_v44  ;;  %v529_v45 = vld [vmem:[%s16015_s0 + $0x2a0] sm:$0xff]  ;;  %v530_v38 = vld [vmem:[%s16015_s0 + $0x2a8] sm:$0xff]  ;;  %v9508_v44 = vpack.c.bf16 %v499_v2, %v498_v1  ;;  %v9535_v2 = vpack.c.bf16 %v502_v9, %v501_v8  ;;  %v9630_v28 = vpack.c.bf16 %v525_v40, %v524_v39 }
  0xe4   :  { %16473 = vst [vmem:[#allocation34_spill] sm:$0xff] %v9471_v43  ;;  %v531_v50 = vld [vmem:[%s16015_s0 + $0x2b0] sm:$0xff]  ;;  %v532_v51 = vld [vmem:[%s16015_s0 + $0x2b8] sm:$0xff]  ;;  %v533_v52 = vld [vmem:[%s16015_s0 + $0x2c0] sm:$0xff] }
  0xe5   :  { %16475 = vst [vmem:[#allocation36_spill] sm:$0xff] %v9475_v16  ;;  %v534_v53 = vld [vmem:[%s16015_s0 + $0x2c8] sm:$0xff]  ;;  %v9502_v54 = vld [vmem:[%s16015_s0 + $0x2d0] sm:$0xff]  ;;  %v536_v31 = vld [vmem:[%s16015_s0 + $0x2d8] sm:$0xff]  ;;  %v9661_v36 = vpack.c.bf16 %v532_v51, %v531_v50 }
  0xe6   :  { %16476 = vst [vmem:[#allocation37_spill] sm:$0xff] %v9477_v37  ;;  %v537_v24 = vld [vmem:[%s16015_s0 + $0x2e0] sm:$0xff]  ;;  %v538_v61 = vld [vmem:[%s16015_s0 + $0x2e8] sm:$0xff]  ;;  %v539_v62 = vld [vmem:[%s16015_s0 + $0x2f0] sm:$0xff] }
  0xe7   :  { %16477 = vst [vmem:[#allocation38_spill] sm:$0xff] %v9502_v54  ;;  %v540_v63 = vld [vmem:[%s16015_s0 + $0x2f8] sm:$0xff]  ;;  %v541_v0 = vld [vmem:[%s16015_s0 + $0x300] sm:$0xff]  ;;  %v9533_v1 = vld [vmem:[%s16015_s0 + $0x308] sm:$0xff]  ;;  %v9692_v43 = vpack.c.bf16 %v539_v62, %v538_v61 }
  0xe8   :  { %16478 = vst [vmem:[#allocation39_spill] sm:$0xff] %v9504_v55  ;;  %v9539_v55 = vpack.c.bf16 %v506_v14, %v505_v13  ;;  %v543_v17 = vld [vmem:[%s16015_s0 + $0x310] sm:$0xff]  ;;  %v544_v10 = vld [vmem:[%s16015_s0 + $0x318] sm:$0xff]  ;;  %v545_v8 = vld [vmem:[%s16015_s0 + $0x320] sm:$0xff]  ;;  %v9566_v14 = vpack.c.bf16 %v509_v22, %v508_v21 }
  0xe9   :  { %16479 = vst [vmem:[#allocation40_spill] sm:$0xff] %v9506_v46  ;;  %v546_v9 = vld [vmem:[%s16015_s0 + $0x328] sm:$0xff]  ;;  %v547_v11 = vld [vmem:[%s16015_s0 + $0x330] sm:$0xff]  ;;  %v548_v12 = vld [vmem:[%s16015_s0 + $0x338] sm:$0xff] }
  0xea   :  { %16480 = vst [vmem:[#allocation41_spill] sm:$0xff] %v9508_v44  ;;  %v9564_v13 = vld [vmem:[%s16015_s0 + $0x340] sm:$0xff]  ;;  %v551_v44 = vld [vmem:[%s16015_s0 + $0x350] sm:$0xff]  ;;  %v552_v21 = vld [vmem:[%s16015_s0 + $0x358] sm:$0xff]  ;;  %v9723_v54 = vpack.c.bf16 %v546_v9, %v545_v8 }
  0xeb   :  { %16481 = vst [vmem:[#allocation42_spill] sm:$0xff] %v9533_v1  ;;  %v553_v22 = vld [vmem:[%s16015_s0 + $0x360] sm:$0xff]  ;;  %v554_v23 = vld [vmem:[%s16015_s0 + $0x368] sm:$0xff]  ;;  %v555_v25 = vld [vmem:[%s16015_s0 + $0x370] sm:$0xff] }
  0xec   :  { %16482 = vst [vmem:[#allocation43_spill] sm:$0xff] %v9535_v2  ;;  %v9570_v2 = vpack.c.bf16 %v513_v27, %v512_v26  ;;  %v9595_v26 = vld [vmem:[%s16015_s0 + $0x378] sm:$0xff]  ;;  %v9597_v27 = vpack.c.bf16 %v516_v49, %v515_v60  ;;  %v558_v37 = vld [vmem:[%s16015_s0 + $0x388] sm:$0xff]  ;;  %v559_v49 = vld [vmem:[%s16015_s0 + $0x390] sm:$0xff]  ;;  %v9754_v1 = vpack.c.bf16 %v553_v22, %v552_v21 }
  0xed   :  { %16483 = vst [vmem:[#allocation44_spill] sm:$0xff] %v9537_v56  ;;  %v560_v60 = vld [vmem:[%s16015_s0 + $0x398] sm:$0xff]  ;;  %v561_v32 = vld [vmem:[%s16015_s0 + $0x3a0] sm:$0xff]  ;;  %v562_v33 = vld [vmem:[%s16015_s0 + $0x3a8] sm:$0xff] }
  0xee   :  { %16484 = vst [vmem:[#allocation45_spill] sm:$0xff] %v9539_v55  ;;  %v550_v55 = vld [vmem:[%s16015_s0 + $0x348] sm:$0xff]  ;;  %v568_v39 = vld [vmem:[%s16015_s0 + $0x3d8] sm:$0xff]  ;;  %v569_v40 = vld [vmem:[%s16015_s0 + $0x3e0] sm:$0xff] }
  0xef   :  { %16485 = vst [vmem:[#allocation46_spill] sm:$0xff] %v9564_v13  ;;  %v575_v50 = vld [vmem:[%s16015_s0 + $0x410] sm:$0xff]  ;;  %v576_v51 = vld [vmem:[%s16015_s0 + $0x418] sm:$0xff]  ;;  %v582_v61 = vld [vmem:[%s16015_s0 + $0x448] sm:$0xff]  ;;  %v9785_v13 = vpack.c.bf16 %v560_v60, %v559_v49 }
  0xf0   :  { %16486 = vst [vmem:[#allocation47_spill] sm:$0xff] %v9566_v14  ;;  %v9601_v14 = vpack.c.bf16 %v520_v35, %v519_v34  ;;  %v9626_v34 = vld [vmem:[%s16015_s0 + $0x3b0] sm:$0xff]  ;;  %v9628_v35 = vpack.c.bf16 %v523_v57, %v522_v4  ;;  %v566_v57 = vld [vmem:[%s16015_s0 + $0x3c8] sm:$0xff]  ;;  %v589_v8 = vld [vmem:[%s16015_s0 + $0x480] sm:$0xff] }
  0xf1   :  { %16487 = vst [vmem:[#allocation48_spill] sm:$0xff] %v9568_v3  ;;  %v567_v4 = vld [vmem:[%s16015_s0 + $0x3d0] sm:$0xff]  ;;  %v590_v9 = vld [vmem:[%s16015_s0 + $0x488] sm:$0xff]  ;;  %v596_v21 = vld [vmem:[%s16015_s0 + $0x4b8] sm:$0xff] }
  0xf2   :  { %16488 = vst [vmem:[#allocation49_spill] sm:$0xff] %v9570_v2  ;;  %v557_v2 = vld [vmem:[%s16015_s0 + $0x380] sm:$0xff]  ;;  %v583_v62 = vld [vmem:[%s16015_s0 + $0x450] sm:$0xff]  ;;  %v604_v60 = vld [vmem:[%s16015_s0 + $0x4f8] sm:$0xff] }
  0xf3   :  { %16489 = vst [vmem:[#allocation50_spill] sm:$0xff] %v9595_v26  ;;  %v597_v22 = vld [vmem:[%s16015_s0 + $0x4c0] sm:$0xff]  ;;  %v603_v49 = vld [vmem:[%s16015_s0 + $0x4f0] sm:$0xff]  ;;  %v9816_v26 = vpack.c.bf16 %v567_v4, %v566_v57  ;;  %v610_v57 = vld [vmem:[%s16015_s0 + $0x528] sm:$0xff] }
  0xf4   :  { %16490 = vst [vmem:[#allocation51_spill] sm:$0xff] %v9597_v27  ;;  %v9632_v27 = vpack.c.bf16 %v527_v42, %v526_v41  ;;  %v9657_v41 = vld [vmem:[%s16015_s0 + $0x3e8] sm:$0xff]  ;;  %v9659_v42 = vpack.c.bf16 %v530_v38, %v529_v45  ;;  %v573_v38 = vld [vmem:[%s16015_s0 + $0x400] sm:$0xff]  ;;  %v611_v4 = vld [vmem:[%s16015_s0 + $0x530] sm:$0xff] }
  0xf5   :  { %16491 = vst [vmem:[#allocation52_spill] sm:$0xff] %v9599_v15  ;;  %v565_v15 = vld [vmem:[%s16015_s0 + $0x3c0] sm:$0xff]  ;;  %v574_v45 = vld [vmem:[%s16015_s0 + $0x408] sm:$0xff]  ;;  %v635_v20 = vld [vmem:[%s16015_s0 + $0x5f0] sm:$0xff] }
  0xf6   :  { %16492 = vst [vmem:[#allocation53_spill] sm:$0xff] %v9601_v14  ;;  %v564_v14 = vld [vmem:[%s16015_s0 + $0x3b8] sm:$0xff]  ;;  %v634_v29 = vld [vmem:[%s16015_s0 + $0x5e8] sm:$0xff] }
  0xf7   :  { %16493 = vst [vmem:[#allocation54_spill] sm:$0xff] %v9626_v34  ;;  %v9847_v34 = vpack.c.bf16 %v574_v45, %v573_v38  ;;  %v617_v38 = vld [vmem:[%s16015_s0 + $0x560] sm:$0xff]  ;;  %v618_v45 = vld [vmem:[%s16015_s0 + $0x568] sm:$0xff] }
  0xf8   :  { %16494 = vst [vmem:[#allocation55_spill] sm:$0xff] %v9628_v35  ;;  %v9663_v35 = vpack.c.bf16 %v534_v53, %v533_v52  ;;  %v9688_v52 = vld [vmem:[%s16015_s0 + $0x420] sm:$0xff]  ;;  %v9690_v53 = vpack.c.bf16 %v537_v24, %v536_v31  ;;  %v580_v24 = vld [vmem:[%s16015_s0 + $0x438] sm:$0xff] }
  0xf9   :  { %16495 = vst [vmem:[#allocation56_spill] sm:$0xff] %v9630_v28  ;;  %v572_v28 = vld [vmem:[%s16015_s0 + $0x3f8] sm:$0xff]  ;;  %v581_v31 = vld [vmem:[%s16015_s0 + $0x440] sm:$0xff] }
  0xfa   :  { %16496 = vst [vmem:[#allocation57_spill] sm:$0xff] %v9632_v27  ;;  %v571_v27 = vld [vmem:[%s16015_s0 + $0x3f0] sm:$0xff] }
  0xfb   :  { %16497 = vst [vmem:[#allocation58_spill] sm:$0xff] %v9657_v41  ;;  %v9878_v41 = vpack.c.bf16 %v581_v31, %v580_v24  ;;  %v624_v24 = vld [vmem:[%s16015_s0 + $0x598] sm:$0xff]  ;;  %v625_v31 = vld [vmem:[%s16015_s0 + $0x5a0] sm:$0xff] }
  0xfc   :  { %16498 = vst [vmem:[#allocation59_spill] sm:$0xff] %v9659_v42  ;;  %v9694_v42 = vpack.c.bf16 %v541_v0, %v540_v63  ;;  %v9719_v63 = vld [vmem:[%s16015_s0 + $0x458] sm:$0xff]  ;;  %v9721_v0 = vpack.c.bf16 %v544_v10, %v543_v17  ;;  %v587_v10 = vld [vmem:[%s16015_s0 + $0x470] sm:$0xff] }
  0xfd   :  { %16499 = vst [vmem:[#allocation60_spill] sm:$0xff] %v9661_v36  ;;  %v579_v36 = vld [vmem:[%s16015_s0 + $0x430] sm:$0xff]  ;;  %v588_v17 = vld [vmem:[%s16015_s0 + $0x478] sm:$0xff] }
  0xfe   :  { %16500 = vst [vmem:[#allocation61_spill] sm:$0xff] %v9663_v35  ;;  %v578_v35 = vld [vmem:[%s16015_s0 + $0x428] sm:$0xff] }
  0xff   :  { %16501 = vst [vmem:[#allocation62_spill] sm:$0xff] %v9688_v52  ;;  %v9909_v52 = vpack.c.bf16 %v588_v17, %v587_v10  ;;  %v631_v10 = vld [vmem:[%s16015_s0 + $0x5d0] sm:$0xff]  ;;  %v632_v17 = vld [vmem:[%s16015_s0 + $0x5d8] sm:$0xff] }
 0x100   :  { %16502 = vst [vmem:[#allocation63_spill] sm:$0xff] %v9690_v53  ;;  %v9725_v53 = vpack.c.bf16 %v548_v12, %v547_v11  ;;  %v9750_v11 = vld [vmem:[%s16015_s0 + $0x490] sm:$0xff]  ;;  %v9752_v12 = vpack.c.bf16 %v551_v44, %v550_v55  ;;  %v594_v44 = vld [vmem:[%s16015_s0 + $0x4a8] sm:$0xff] }
 0x101   :  { %16503 = vst [vmem:[#allocation64_spill] sm:$0xff] %v9692_v43  ;;  %v586_v43 = vld [vmem:[%s16015_s0 + $0x468] sm:$0xff]  ;;  %v595_v55 = vld [vmem:[%s16015_s0 + $0x4b0] sm:$0xff] }
 0x102   :  { %16504 = vst [vmem:[#allocation65_spill] sm:$0xff] %v9694_v42  ;;  %v585_v42 = vld [vmem:[%s16015_s0 + $0x460] sm:$0xff] }
 0x103   :  { %16505 = vst [vmem:[#allocation66_spill] sm:$0xff] %v9719_v63  ;;  %v9940_v63 = vpack.c.bf16 %v595_v55, %v594_v44  ;;  %v638_v44 = vld [vmem:[%s16015_s0 + $0x608] sm:$0xff] }
 0x104   :  { %16506 = vst [vmem:[#allocation67_spill] sm:$0xff] %v9721_v0  ;;  %v9756_v0 = vpack.c.bf16 %v555_v25, %v554_v23  ;;  %v9781_v23 = vld [vmem:[%s16015_s0 + $0x4c8] sm:$0xff]  ;;  %v9783_v25 = vpack.c.bf16 %v558_v37, %v557_v2  ;;  %v601_v37 = vld [vmem:[%s16015_s0 + $0x4e0] sm:$0xff] }
 0x105   :  { %16507 = vst [vmem:[#allocation68_spill] sm:$0xff] %v9723_v54  ;;  %v593_v54 = vld [vmem:[%s16015_s0 + $0x4a0] sm:$0xff]  ;;  %v602_v2 = vld [vmem:[%s16015_s0 + $0x4e8] sm:$0xff] }
 0x106   :  { %16508 = vst [vmem:[#allocation69_spill] sm:$0xff] %v9725_v53  ;;  %v592_v53 = vld [vmem:[%s16015_s0 + $0x498] sm:$0xff] }
 0x107   :  { %16509 = vst [vmem:[#allocation70_spill] sm:$0xff] %v9752_v12  ;;  %v9787_v12 = vpack.c.bf16 %v562_v33, %v561_v32  ;;  %v9812_v32 = vld [vmem:[%s16015_s0 + $0x500] sm:$0xff]  ;;  %v9814_v33 = vpack.c.bf16 %v565_v15, %v564_v14  ;;  %v608_v15 = vld [vmem:[%s16015_s0 + $0x518] sm:$0xff] }
 0x108   :  { %16510 = vst [vmem:[#allocation71_spill] sm:$0xff] %v9754_v1  ;;  %v600_v1 = vld [vmem:[%s16015_s0 + $0x4d8] sm:$0xff]  ;;  %v609_v14 = vld [vmem:[%s16015_s0 + $0x520] sm:$0xff] }
 0x109   :  { %16511 = vst [vmem:[#allocation72_spill] sm:$0xff] %v9756_v0  ;;  %v599_v0 = vld [vmem:[%s16015_s0 + $0x4d0] sm:$0xff] }
 0x10a   :  { %16512 = vst [vmem:[#allocation73_spill] sm:$0xff] %v9783_v25  ;;  %v9818_v25 = vpack.c.bf16 %v569_v40, %v568_v39  ;;  %v9843_v39 = vld [vmem:[%s16015_s0 + $0x538] sm:$0xff]  ;;  %v9845_v40 = vpack.c.bf16 %v572_v28, %v571_v27  ;;  %v615_v28 = vld [vmem:[%s16015_s0 + $0x550] sm:$0xff]  ;;  %v9961_v55 = vpack.c.bf16 %v600_v1, %v599_v0  ;;  %v641_v1 = vld [vmem:[%s16015_s0 + $0x620] sm:$0xff] }
 0x10b   :  { %16513 = vst [vmem:[#allocation74_spill] sm:$0xff] %v9785_v13  ;;  %v607_v13 = vld [vmem:[%s16015_s0 + $0x510] sm:$0xff]  ;;  %v616_v27 = vld [vmem:[%s16015_s0 + $0x558] sm:$0xff] }
 0x10c   :  { %16514 = vst [vmem:[#allocation75_spill] sm:$0xff] %v9787_v12  ;;  %v606_v12 = vld [vmem:[%s16015_s0 + $0x508] sm:$0xff] }
 0x10d   :  { %16515 = vst [vmem:[#allocation76_spill] sm:$0xff] %v9814_v33  ;;  %v9849_v33 = vpack.c.bf16 %v576_v51, %v575_v50  ;;  %v9874_v50 = vld [vmem:[%s16015_s0 + $0x570] sm:$0xff]  ;;  %v9876_v51 = vpack.c.bf16 %v579_v36, %v578_v35  ;;  %v622_v36 = vld [vmem:[%s16015_s0 + $0x588] sm:$0xff]  ;;  %v9980_v0 = vpack.c.bf16 %v607_v13, %v606_v12  ;;  %v644_v13 = vld [vmem:[%s16015_s0 + $0x638] sm:$0xff] }
 0x10e   :  { %16516 = vst [vmem:[#allocation77_spill] sm:$0xff] %v9816_v26  ;;  %v614_v26 = vld [vmem:[%s16015_s0 + $0x548] sm:$0xff]  ;;  %v623_v35 = vld [vmem:[%s16015_s0 + $0x590] sm:$0xff] }
 0x10f   :  { %16517 = vst [vmem:[#allocation78_spill] sm:$0xff] %v9818_v25  ;;  %v613_v25 = vld [vmem:[%s16015_s0 + $0x540] sm:$0xff] }
 0x110   :  { %16518 = vst [vmem:[#allocation79_spill] sm:$0xff] %v9845_v40  ;;  %v9880_v40 = vpack.c.bf16 %v583_v62, %v582_v61  ;;  %v9905_v61 = vld [vmem:[%s16015_s0 + $0x5a8] sm:$0xff]  ;;  %v9907_v62 = vpack.c.bf16 %v586_v43, %v585_v42  ;;  %v629_v43 = vld [vmem:[%s16015_s0 + $0x5c0] sm:$0xff]  ;;  %v9997_v12 = vpack.c.bf16 %v614_v26, %v613_v25  ;;  %v10014_v26 = vld [vmem:[%s16015_s0 + $0x650] sm:$0xff] }
 0x111   :  { %16519 = vst [vmem:[#allocation80_spill] sm:$0xff] %v9847_v34  ;;  %v621_v34 = vld [vmem:[%s16015_s0 + $0x580] sm:$0xff]  ;;  %v630_v42 = vld [vmem:[%s16015_s0 + $0x5c8] sm:$0xff] }
 0x112   :  { %16520 = vst [vmem:[#allocation81_spill] sm:$0xff] %v9849_v33  ;;  %v620_v33 = vld [vmem:[%s16015_s0 + $0x578] sm:$0xff] }
 0x113   :  { %16521 = vst [vmem:[#allocation82_spill] sm:$0xff] %v9876_v51  ;;  %v9911_v51 = vpack.c.bf16 %v590_v9, %v589_v8  ;;  %v9936_v8 = vld [vmem:[%s16015_s0 + $0x5e0] sm:$0xff]  ;;  %v9938_v9 = vpack.c.bf16 %v593_v54, %v592_v53  ;;  %v636_v54 = vld [vmem:[%s16015_s0 + $0x5f8] sm:$0xff]  ;;  %v10016_v25 = vpack.c.bf16 %v621_v34, %v620_v33  ;;  %v650_v34 = vld [vmem:[%s16015_s0 + $0x668] sm:$0xff] }
 0x114   :  { %16522 = vst [vmem:[#allocation83_spill] sm:$0xff] %v9878_v41  ;;  %v628_v41 = vld [vmem:[%s16015_s0 + $0x5b8] sm:$0xff]  ;;  %v637_v53 = vld [vmem:[%s16015_s0 + $0x600] sm:$0xff] }
 0x115   :  { %16523 = vst [vmem:[#allocation84_spill] sm:$0xff] %v9880_v40  ;;  %v627_v40 = vld [vmem:[%s16015_s0 + $0x5b0] sm:$0xff] }
 0x116   :  { %16524 = vst [vmem:[#allocation85_spill] sm:$0xff] %v9907_v62  ;;  %v9942_v62 = vpack.c.bf16 %v597_v22, %v596_v21  ;;  %v9963_v21 = vpack.c.bf16 %v602_v2, %v601_v37  ;;  %v9965_v22 = vpack.c.bf16 %v604_v60, %v603_v49  ;;  %v9982_v37 = vpack.c.bf16 %v609_v14, %v608_v15  ;;  %v642_v60 = vld [vmem:[%s16015_s0 + $0x628] sm:$0xff] }
 0x117   :  { %16525 = vst [vmem:[#allocation86_spill] sm:$0xff] %v9909_v52  ;;  %v9984_v2 = vpack.c.bf16 %v611_v4, %v610_v57  ;;  %v9999_v15 = vpack.c.bf16 %v616_v27, %v615_v28  ;;  %v10001_v14 = vpack.c.bf16 %v618_v45, %v617_v38  ;;  %v645_v4 = vld [vmem:[%s16015_s0 + $0x640] sm:$0xff]  ;;  %v646_v49 = vld [vmem:[%s16015_s0 + $0x648] sm:$0xff]  ;;  %v10018_v28 = vpack.c.bf16 %v623_v35, %v622_v36  ;;  %v648_v45 = vld [vmem:[%s16015_s0 + $0x658] sm:$0xff] }
 0x118   :  { %16526 = vst [vmem:[#allocation87_spill] sm:$0xff] %v9911_v51  ;;  %v643_v51 = vld [vmem:[%s16015_s0 + $0x630] sm:$0xff]  ;;  %v10020_v27 = vpack.c.bf16 %v625_v31, %v624_v24  ;;  %v649_v57 = vld [vmem:[%s16015_s0 + $0x660] sm:$0xff]  ;;  %v10033_v33 = vpack.c.bf16 %v628_v41, %v627_v40  ;;  %v10035_v36 = vpack.c.bf16 %v630_v42, %v629_v43  ;;  %v10037_v35 = vpack.c.bf16 %v632_v17, %v631_v10  ;;  %v652_v38 = vld [vmem:[%s16015_s0 + $0x678] sm:$0xff] }
 0x119   :  { %16527 = vst [vmem:[#allocation88_spill] sm:$0xff] %v9938_v9  ;;  %v639_v9 = vld [vmem:[%s16015_s0 + $0x610] sm:$0xff]  ;;  %v653_v41 = vld [vmem:[%s16015_s0 + $0x680] sm:$0xff]  ;;  %v10050_v40 = vpack.c.bf16 %v635_v20, %v634_v29  ;;  %v10052_v43 = vpack.c.bf16 %v637_v53, %v636_v54  ;;  %v10061_v17 = vld [vmem:[%s16015_s0 + $0x688] sm:$0xff]  ;;  %v10069_v29 = vpack.c.bf16 %v642_v60, %v641_v1  ;;  %v10073_v54 = vpack.c.bf16 %v646_v49, %v645_v4 }
 0x11a   :  { %16528 = vst [vmem:[#allocation89_spill] sm:$0xff] %v9940_v63  ;;  %v651_v31 = vld [vmem:[%s16015_s0 + $0x670] sm:$0xff]  ;;  %v10054_v42 = vpack.c.bf16 %v639_v9, %v638_v44  ;;  %v656_v20 = vld [vmem:[%s16015_s0 + $0x698] sm:$0xff]  ;;  %v10071_v9 = vpack.c.bf16 %v644_v13, %v643_v51  ;;  %v657_v44 = vld [vmem:[%s16015_s0 + $0x6a0] sm:$0xff]  ;;  %v10086_v60 = vpack.c.bf16 %v649_v57, %v648_v45  ;;  %v10090_v49 = vpack.c.bf16 %v653_v41, %v652_v38 }
 0x11b   :  { %16529 = vst [vmem:[#allocation90_spill] sm:$0xff] %v9942_v62  ;;  %v9975_v62 = vld [vmem:[%s16015_s0 + $0x618] sm:$0xff]  ;;  %v655_v24 = vld [vmem:[%s16015_s0 + $0x690] sm:$0xff]  ;;  %v658_v10 = vld [vmem:[%s16015_s0 + $0x6a8] sm:$0xff]  ;;  %v10088_v51 = vpack.c.bf16 %v651_v31, %v650_v34 }
 0x11c   :  { %16530 = vst [vmem:[#allocation91_spill] sm:$0xff] %v9961_v55  ;;  %v659_v1 = vld [vmem:[%s16015_s0 + $0x6b0] sm:$0xff]  ;;  %v660_v4 = vld [vmem:[%s16015_s0 + $0x6b8] sm:$0xff]  ;;  %v10100_v53 = vld [vmem:[%s16015_s0 + $0x6c0] sm:$0xff]  ;;  %v10105_v45 = vpack.c.bf16 %v656_v20, %v655_v24  ;;  %v10107_v38 = vpack.c.bf16 %v658_v10, %v657_v44 }
 0x11d   :  { %16531 = vst [vmem:[#allocation92_spill] sm:$0xff] %v9963_v21  ;;  %v662_v57 = vld [vmem:[%s16015_s0 + $0x6c8] sm:$0xff]  ;;  %v663_v34 = vld [vmem:[%s16015_s0 + $0x6d0] sm:$0xff]  ;;  %v664_v31 = vld [vmem:[%s16015_s0 + $0x6d8] sm:$0xff]  ;;  %v10118_v13 = vpack.c.bf16 %v660_v4, %v659_v1 }
 0x11e   :  { %16532 = vst [vmem:[#allocation93_spill] sm:$0xff] %v9980_v0  ;;  %v665_v41 = vld [vmem:[%s16015_s0 + $0x6e0] sm:$0xff]  ;;  %v666_v10 = vld [vmem:[%s16015_s0 + $0x6e8] sm:$0xff]  ;;  %v667_v20 = vld [vmem:[%s16015_s0 + $0x6f0] sm:$0xff] }
 0x11f   :  { %16533 = vst [vmem:[#allocation94_spill] sm:$0xff] %v9982_v37  ;;  %v10131_v44 = vld [vmem:[%s16015_s0 + $0x6f8] sm:$0xff]  ;;  %v10135_v1 = vpack.c.bf16 %v665_v41, %v664_v31  ;;  %v10137_v4 = vpack.c.bf16 %v667_v20, %v666_v10 }
 0x120   :  { %16534 = vst [vmem:[#allocation95_spill] sm:$0xff] %v9997_v12 }
 0x121   :  { %16535 = vst [vmem:[#allocation96_spill] sm:$0xff] %v9999_v15 }
 0x122   :  { %16536 = vst [vmem:[#allocation97_spill] sm:$0xff] %v10016_v25 }
 0x123   :  { %16537 = vst [vmem:[#allocation98_spill] sm:$0xff] %v10018_v28 }
 0x124   :  { %16538 = vst [vmem:[#allocation99_spill] sm:$0xff] %v10033_v33 }
 0x125   :  { %16539 = vst [vmem:[#allocation100_spill] sm:$0xff] %v10035_v36 }
 0x126   :  { %16540 = vst [vmem:[#allocation101_spill] sm:$0xff] %v10050_v40 }
 0x127   :  { %16541 = vst [vmem:[#allocation102_spill] sm:$0xff] %v10052_v43 }
 0x128   :  { %16542 = vst [vmem:[#allocation103_spill] sm:$0xff] %v10069_v29  ;;  %v10149_v29 = vld [vmem:[%s16020_s5 + $0x8] sm:$0xff] }
 0x129   :  { %16543 = vst [vmem:[#allocation104_spill] sm:$0xff] %v10071_v9 }
 0x12a   :  { %16544 = vst [vmem:[#allocation105_spill] sm:$0xff] %v10086_v60  ;;  %v10144_v60 = vld [vmem:[%s16020_s5] sm:$0xff] }
 0x12b   :  { %16545 = vst [vmem:[#allocation106_spill] sm:$0xff] %v10088_v51 }
 0x12c   :  { %16546 = vst [vmem:[#allocation107_spill] sm:$0xff] %v10105_v45  ;;  %v10133_v45 = vpack.c.bf16 %v663_v34, %v662_v57  ;;  %v10154_v57 = vld [vmem:[%s16020_s5 + $0x10] sm:$0xff]  ;;  %v10159_v34 = vld [vmem:[%s16020_s5 + $0x18] sm:$0xff] }
 0x12d   :  { %16547 = vst [vmem:[#allocation108_spill] sm:$0xff] %v10107_v38 }
 0x12e   :  { %16548 = vst [vmem:[#allocation109_spill] sm:$0xff] %v10133_v45 }
 0x12f   :  { %16549 = vst [vmem:[#allocation110_spill] sm:$0xff] %v10135_v1 }
 0x130   :  { %16550 = vst [vmem:[#allocation111_spill] sm:$0xff] %v10144_v60 }
 0x131   :  { %16551 = vst [vmem:[#allocation112_spill] sm:$0xff] %v10149_v29 }
 0x132   :  { %16552 = vst [vmem:[#allocation113_spill] sm:$0xff] %v10154_v57 }
 0x133   :  { %16553 = vst [vmem:[#allocation114_spill] sm:$0xff] %v10159_v34 }
 0x134   :  { %8522 = dma.done.wait [#allocation4], 12288 }
 0x135   :  { %8523 = vsyncadd [#allocation4], 4294955008  ;;  %v10161_v31 = vld [vmem:[#allocation2 + $0x4] sm:$0xf]  ;;  %v10163_v41 = vld [vmem:[#allocation2] sm:$0xf] }
 0x136   :  { %16554 = vst [vmem:[#allocation115_spill] sm:$0xff] %v10161_v31  ;;  %v10165_v10 = vld [vmem:[#allocation2 + $0xc] sm:$0xf]  ;;  %v10167_v20 = vld [vmem:[#allocation2 + $0x8] sm:$0xf] }
 0x137   :  { %16555 = vst [vmem:[#allocation116_spill] sm:$0xff] %v10163_v41  ;;  %v10169_v24 = vld [vmem:[#allocation2 + $0x10] sm:$0xf0]  ;;  %v10171_v29 = vld [vmem:[#allocation2 + $0xc] sm:$0xf0] }
 0x138   :  { %16556 = vst [vmem:[#allocation117_spill] sm:$0xff] %v10165_v10  ;;  %v10173_v57 = vld [vmem:[#allocation2 + $0x18] sm:$0xf0]  ;;  %v10175_v60 = vld [vmem:[#allocation2 + $0x14] sm:$0xf0] }
 0x139   :  { %16557 = vst [vmem:[#allocation118_spill] sm:$0xff] %v10167_v20  ;;  %v10177_v45 = vld [vmem:[#allocation2 + $0x24] sm:$0xf]  ;;  %v10179_v34 = vld [vmem:[#allocation2 + $0x20] sm:$0xf] }
 0x13a   :  { %16558 = vst [vmem:[#allocation119_spill] sm:$0xff] %v10169_v24  ;;  %v10181_v40 = vld [vmem:[#allocation2 + $0x2c] sm:$0xf]  ;;  %v10183_v33 = vld [vmem:[#allocation2 + $0x28] sm:$0xf] }
 0x13b   :  { %16559 = vst [vmem:[#allocation120_spill] sm:$0xff] %v10171_v29  ;;  %v10185_v31 = vld [vmem:[#allocation2 + $0x30] sm:$0xf0]  ;;  %v10187_v10 = vld [vmem:[#allocation2 + $0x2c] sm:$0xf0] }
 0x13c   :  { %16560 = vst [vmem:[#allocation121_spill] sm:$0xff] %v10173_v57  ;;  %v10189_v20 = vld [vmem:[#allocation2 + $0x38] sm:$0xf0]  ;;  %v10191_v24 = vld [vmem:[#allocation2 + $0x34] sm:$0xf0] }
 0x13d   :  { %16561 = vst [vmem:[#allocation122_spill] sm:$0xff] %v10175_v60  ;;  %v10193_v25 = vld [vmem:[#allocation2 + $0x44] sm:$0xf]  ;;  %v10195_v57 = vld [vmem:[#allocation2 + $0x40] sm:$0xf] }
 0x13e   :  { %16562 = vst [vmem:[#allocation123_spill] sm:$0xff] %v10177_v45  ;;  %v10197_v60 = vld [vmem:[#allocation2 + $0x4c] sm:$0xf]  ;;  %v10199_v12 = vld [vmem:[#allocation2 + $0x48] sm:$0xf] }
 0x13f   :  { %16563 = vst [vmem:[#allocation124_spill] sm:$0xff] %v10179_v34  ;;  %v10201_v0 = vld [vmem:[#allocation2 + $0x50] sm:$0xf0]  ;;  %v10207_v55 = vld [vmem:[#allocation2 + $0x54] sm:$0xf0] }
 0x140   :  { %16564 = vst [vmem:[#allocation125_spill] sm:$0xff] %v10181_v40  ;;  %v10203_v40 = vld [vmem:[#allocation2 + $0x4c] sm:$0xf0]  ;;  %v10209_v45 = vld [vmem:[#allocation2 + $0x64] sm:$0xf] }
 0x141   :  { %16565 = vst [vmem:[#allocation126_spill] sm:$0xff] %v10183_v33  ;;  %v10205_v33 = vld [vmem:[#allocation2 + $0x58] sm:$0xf0]  ;;  %v10225_v29 = vld [vmem:[#allocation2 + $0x84] sm:$0xf] }
 0x142   :  { %16566 = vst [vmem:[#allocation127_spill] sm:$0xff] %v10185_v31  ;;  %v10215_v31 = vld [vmem:[#allocation2 + $0x68] sm:$0xf]  ;;  %v10233_v41 = vld [vmem:[#allocation2 + $0x90] sm:$0xf0] }
 0x143   :  { %16567 = vst [vmem:[#allocation128_spill] sm:$0xff] %v10187_v10  ;;  %v10241_v10 = vld [vmem:[#allocation2 + $0xa4] sm:$0xf]  ;;  %v10249_v34 = vld [vmem:[#allocation2 + $0xb0] sm:$0xf0] }
 0x144   :  { %16568 = vst [vmem:[#allocation129_spill] sm:$0xff] %v10189_v20  ;;  %v10211_v20 = vld [vmem:[#allocation2 + $0x60] sm:$0xf] }
 0x145   :  { %16569 = vst [vmem:[#allocation130_spill] sm:$0xff] %v10191_v24  ;;  %v10213_v24 = vld [vmem:[#allocation2 + $0x6c] sm:$0xf] }
 0x146   :  { %16570 = vst [vmem:[#allocation131_spill] sm:$0xff] %v10193_v25  ;;  %v10217_v25 = vld [vmem:[#allocation2 + $0x70] sm:$0xf0] }
 0x147   :  { %16571 = vst [vmem:[#allocation132_spill] sm:$0xff] %v10195_v57  ;;  %v10265_v57 = vld [vmem:[#allocation2 + $0xd0] sm:$0xf0] }
 0x148   :  { %16572 = vst [vmem:[#allocation133_spill] sm:$0xff] %v10197_v60  ;;  %v10219_v60 = vld [vmem:[#allocation2 + $0x6c] sm:$0xf0] }
 0x149   :  { %16573 = vst [vmem:[#allocation134_spill] sm:$0xff] %v10199_v12  ;;  %v10221_v12 = vld [vmem:[#allocation2 + $0x78] sm:$0xf0] }
 0x14a   :  { %16574 = vst [vmem:[#allocation135_spill] sm:$0xff] %v10201_v0  ;;  %v10223_v0 = vld [vmem:[#allocation2 + $0x74] sm:$0xf0] }
 0x14b   :  { %16575 = vst [vmem:[#allocation136_spill] sm:$0xff] %v10203_v40  ;;  %v10257_v40 = vld [vmem:[#allocation2 + $0xc4] sm:$0xf] }
 0x14c   :  { %16576 = vst [vmem:[#allocation137_spill] sm:$0xff] %v10205_v33  ;;  %v10227_v33 = vld [vmem:[#allocation2 + $0x80] sm:$0xf] }
 0x14d   :  { %16577 = vst [vmem:[#allocation138_spill] sm:$0xff] %v10207_v55  ;;  %v10229_v55 = vld [vmem:[#allocation2 + $0x8c] sm:$0xf] }
 0x14e   :  { %16578 = vst [vmem:[#allocation139_spill] sm:$0xff] %v10209_v45  ;;  %v10231_v45 = vld [vmem:[#allocation2 + $0x88] sm:$0xf] }
 0x14f   :  { %16579 = vst [vmem:[#allocation140_spill] sm:$0xff] %v10211_v20  ;;  %v10281_v20 = vld [vmem:[#allocation2 + $0xf0] sm:$0xf0] }
 0x150   :  { %16580 = vst [vmem:[#allocation141_spill] sm:$0xff] %v10213_v24  ;;  %v10235_v24 = vld [vmem:[#allocation2 + $0x8c] sm:$0xf0] }
 0x151   :  { %16581 = vst [vmem:[#allocation142_spill] sm:$0xff] %v10215_v31  ;;  %v10237_v31 = vld [vmem:[#allocation2 + $0x98] sm:$0xf0] }
 0x152   :  { %16582 = vst [vmem:[#allocation143_spill] sm:$0xff] %v10217_v25  ;;  %v10239_v25 = vld [vmem:[#allocation2 + $0x94] sm:$0xf0] }
 0x153   :  { %16583 = vst [vmem:[#allocation144_spill] sm:$0xff] %v10219_v60  ;;  %v10273_v60 = vld [vmem:[#allocation2 + $0xe4] sm:$0xf] }
 0x154   :  { %16584 = vst [vmem:[#allocation145_spill] sm:$0xff] %v10221_v12  ;;  %v10243_v12 = vld [vmem:[#allocation2 + $0xa0] sm:$0xf] }
 0x155   :  { %16585 = vst [vmem:[#allocation146_spill] sm:$0xff] %v10223_v0  ;;  %v10245_v0 = vld [vmem:[#allocation2 + $0xac] sm:$0xf] }
 0x156   :  { %16586 = vst [vmem:[#allocation147_spill] sm:$0xff] %v10225_v29  ;;  %v10247_v29 = vld [vmem:[#allocation2 + $0xa8] sm:$0xf] }
 0x157   :  { %16587 = vst [vmem:[#allocation148_spill] sm:$0xff] %v10227_v33  ;;  %v10297_v33 = vld [vmem:[#allocation2 + $0x110] sm:$0xf0] }
 0x158   :  { %16588 = vst [vmem:[#allocation149_spill] sm:$0xff] %v10229_v55  ;;  %v10251_v55 = vld [vmem:[#allocation2 + $0xac] sm:$0xf0] }
 0x159   :  { %16589 = vst [vmem:[#allocation150_spill] sm:$0xff] %v10231_v45  ;;  %v10253_v45 = vld [vmem:[#allocation2 + $0xb8] sm:$0xf0] }
 0x15a   :  { %16590 = vst [vmem:[#allocation151_spill] sm:$0xff] %v10233_v41  ;;  %v10255_v41 = vld [vmem:[#allocation2 + $0xb4] sm:$0xf0] }
 0x15b   :  { %16591 = vst [vmem:[#allocation152_spill] sm:$0xff] %v10235_v24  ;;  %v10289_v24 = vld [vmem:[#allocation2 + $0x104] sm:$0xf] }
 0x15c   :  { %16592 = vst [vmem:[#allocation153_spill] sm:$0xff] %v10237_v31  ;;  %v10259_v31 = vld [vmem:[#allocation2 + $0xc0] sm:$0xf] }
 0x15d   :  { %16593 = vst [vmem:[#allocation154_spill] sm:$0xff] %v10239_v25  ;;  %v10261_v25 = vld [vmem:[#allocation2 + $0xcc] sm:$0xf] }
 0x15e   :  { %16594 = vst [vmem:[#allocation155_spill] sm:$0xff] %v10241_v10  ;;  %v10263_v10 = vld [vmem:[#allocation2 + $0xc8] sm:$0xf] }
 0x15f   :  { %16595 = vst [vmem:[#allocation156_spill] sm:$0xff] %v10243_v12 }
 0x160   :  { %16596 = vst [vmem:[#allocation157_spill] sm:$0xff] %v10245_v0  ;;  %v10267_v0 = vld [vmem:[#allocation2 + $0xcc] sm:$0xf0] }
 0x161   :  { %16597 = vst [vmem:[#allocation158_spill] sm:$0xff] %v10247_v29  ;;  %v10269_v29 = vld [vmem:[#allocation2 + $0xd8] sm:$0xf0] }
 0x162   :  { %16598 = vst [vmem:[#allocation159_spill] sm:$0xff] %v10249_v34  ;;  %v10271_v34 = vld [vmem:[#allocation2 + $0xd4] sm:$0xf0] }
 0x163   :  { %16599 = vst [vmem:[#allocation160_spill] sm:$0xff] %v10251_v55  ;;  %v10305_v55 = vld [vmem:[#allocation2 + $0x124] sm:$0xf] }
 0x164   :  { %16600 = vst [vmem:[#allocation161_spill] sm:$0xff] %v10253_v45  ;;  %v10275_v45 = vld [vmem:[#allocation2 + $0xe0] sm:$0xf] }
 0x165   :  { %16601 = vst [vmem:[#allocation162_spill] sm:$0xff] %v10255_v41  ;;  %v10277_v41 = vld [vmem:[#allocation2 + $0xec] sm:$0xf] }
 0x166   :  { %16602 = vst [vmem:[#allocation163_spill] sm:$0xff] %v10257_v40  ;;  %v10279_v40 = vld [vmem:[#allocation2 + $0xe8] sm:$0xf] }
 0x167   :  { %16603 = vst [vmem:[#allocation164_spill] sm:$0xff] %v10259_v31 }
 0x168   :  { %16604 = vst [vmem:[#allocation165_spill] sm:$0xff] %v10261_v25  ;;  %v10283_v25 = vld [vmem:[#allocation2 + $0xec] sm:$0xf0] }
 0x169   :  { %16605 = vst [vmem:[#allocation166_spill] sm:$0xff] %v10263_v10  ;;  %v10285_v10 = vld [vmem:[#allocation2 + $0xf8] sm:$0xf0] }
 0x16a   :  { %16606 = vst [vmem:[#allocation167_spill] sm:$0xff] %v10265_v57  ;;  %v10287_v57 = vld [vmem:[#allocation2 + $0xf4] sm:$0xf0] }
 0x16b   :  { %16607 = vst [vmem:[#allocation168_spill] sm:$0xff] %v10267_v0 }
 0x16c   :  { %16608 = vst [vmem:[#allocation169_spill] sm:$0xff] %v10269_v29  ;;  %v10291_v29 = vld [vmem:[#allocation2 + $0x100] sm:$0xf] }
 0x16d   :  { %16609 = vst [vmem:[#allocation170_spill] sm:$0xff] %v10271_v34  ;;  %v10293_v34 = vld [vmem:[#allocation2 + $0x10c] sm:$0xf] }
 0x16e   :  { %16610 = vst [vmem:[#allocation171_spill] sm:$0xff] %v10273_v60  ;;  %v10295_v60 = vld [vmem:[#allocation2 + $0x108] sm:$0xf] }
 0x16f   :  { %16611 = vst [vmem:[#allocation172_spill] sm:$0xff] %v10275_v45 }
 0x170   :  { %16612 = vst [vmem:[#allocation173_spill] sm:$0xff] %v10277_v41  ;;  %v10299_v41 = vld [vmem:[#allocation2 + $0x10c] sm:$0xf0] }
 0x171   :  { %16613 = vst [vmem:[#allocation174_spill] sm:$0xff] %v10279_v40  ;;  %v10301_v40 = vld [vmem:[#allocation2 + $0x118] sm:$0xf0] }
 0x172   :  { %16614 = vst [vmem:[#allocation175_spill] sm:$0xff] %v10281_v20  ;;  %v10303_v20 = vld [vmem:[#allocation2 + $0x114] sm:$0xf0] }
 0x173   :  { %16615 = vst [vmem:[#allocation176_spill] sm:$0xff] %v10283_v25 }
 0x174   :  { %16616 = vst [vmem:[#allocation177_spill] sm:$0xff] %v10285_v10  ;;  %v10307_v10 = vld [vmem:[#allocation2 + $0x120] sm:$0xf] }
 0x175   :  { %16617 = vst [vmem:[#allocation178_spill] sm:$0xff] %v10287_v57  ;;  %v10309_v57 = vld [vmem:[#allocation2 + $0x12c] sm:$0xf] }
 0x176   :  { %16618 = vst [vmem:[#allocation179_spill] sm:$0xff] %v10289_v24  ;;  %v10311_v24 = vld [vmem:[#allocation2 + $0x128] sm:$0xf] }
 0x177   :  { %16619 = vst [vmem:[#allocation180_spill] sm:$0xff] %v10291_v29  ;;  %v10313_v29 = vld [vmem:[#allocation2 + $0x130] sm:$0xf0] }
 0x178   :  { %16620 = vst [vmem:[#allocation181_spill] sm:$0xff] %v10293_v34  ;;  %v10315_v34 = vld [vmem:[#allocation2 + $0x12c] sm:$0xf0] }
 0x179   :  { %16621 = vst [vmem:[#allocation182_spill] sm:$0xff] %v10295_v60  ;;  %v10317_v60 = vld [vmem:[#allocation2 + $0x138] sm:$0xf0] }
 0x17a   :  { %16622 = vst [vmem:[#allocation183_spill] sm:$0xff] %v10297_v33  ;;  %v10319_v33 = vld [vmem:[#allocation2 + $0x134] sm:$0xf0] }
 0x17b   :  { %16623 = vst [vmem:[#allocation184_spill] sm:$0xff] %v10299_v41  ;;  %v10321_v41 = vld [vmem:[#allocation2 + $0x144] sm:$0xf] }
 0x17c   :  { %16624 = vst [vmem:[#allocation185_spill] sm:$0xff] %v10301_v40  ;;  %v10323_v40 = vld [vmem:[#allocation2 + $0x140] sm:$0xf] }
 0x17d   :  { %16625 = vst [vmem:[#allocation186_spill] sm:$0xff] %v10303_v20  ;;  %v10325_v20 = vld [vmem:[#allocation2 + $0x14c] sm:$0xf] }
 0x17e   :  { %16626 = vst [vmem:[#allocation187_spill] sm:$0xff] %v10305_v55  ;;  %v10327_v55 = vld [vmem:[#allocation2 + $0x148] sm:$0xf] }
 0x17f   :  { %16627 = vst [vmem:[#allocation188_spill] sm:$0xff] %v10307_v10  ;;  %v10329_v10 = vld [vmem:[#allocation2 + $0x150] sm:$0xf0] }
 0x180   :  { %16628 = vst [vmem:[#allocation189_spill] sm:$0xff] %v10309_v57  ;;  %v10331_v57 = vld [vmem:[#allocation2 + $0x14c] sm:$0xf0] }
 0x181   :  { %16629 = vst [vmem:[#allocation190_spill] sm:$0xff] %v10311_v24  ;;  %v10333_v24 = vld [vmem:[#allocation2 + $0x158] sm:$0xf0] }
 0x182   :  { %16630 = vst [vmem:[#allocation191_spill] sm:$0xff] %v10313_v29  ;;  %v10335_v29 = vld [vmem:[#allocation2 + $0x154] sm:$0xf0] }
 0x183   :  { %16631 = vst [vmem:[#allocation192_spill] sm:$0xff] %v10315_v34  ;;  %v10337_v34 = vld [vmem:[#allocation2 + $0x164] sm:$0xf] }
 0x184   :  { %16632 = vst [vmem:[#allocation193_spill] sm:$0xff] %v10317_v60  ;;  %v10339_v60 = vld [vmem:[#allocation2 + $0x160] sm:$0xf] }
 0x185   :  { %16633 = vst [vmem:[#allocation194_spill] sm:$0xff] %v10319_v33  ;;  %v10341_v33 = vld [vmem:[#allocation2 + $0x16c] sm:$0xf] }
 0x186   :  { %16634 = vst [vmem:[#allocation195_spill] sm:$0xff] %v10321_v41  ;;  %v10343_v41 = vld [vmem:[#allocation2 + $0x168] sm:$0xf] }
 0x187   :  { %16635 = vst [vmem:[#allocation196_spill] sm:$0xff] %v10323_v40  ;;  %v10345_v40 = vld [vmem:[#allocation2 + $0x170] sm:$0xf0] }
 0x188   :  { %16636 = vst [vmem:[#allocation197_spill] sm:$0xff] %v10325_v20  ;;  %v10347_v20 = vld [vmem:[#allocation2 + $0x16c] sm:$0xf0] }
 0x189   :  { %16637 = vst [vmem:[#allocation198_spill] sm:$0xff] %v10327_v55  ;;  %v10349_v55 = vld [vmem:[#allocation2 + $0x178] sm:$0xf0] }
 0x18a   :  { %16638 = vst [vmem:[#allocation199_spill] sm:$0xff] %v10329_v10  ;;  %v10351_v10 = vld [vmem:[#allocation2 + $0x174] sm:$0xf0] }
 0x18b   :  { %16639 = vst [vmem:[#allocation200_spill] sm:$0xff] %v10331_v57  ;;  %v10353_v57 = vld [vmem:[#allocation2 + $0x184] sm:$0xf] }
 0x18c   :  { %16640 = vst [vmem:[#allocation201_spill] sm:$0xff] %v10333_v24  ;;  %v10355_v24 = vld [vmem:[#allocation2 + $0x180] sm:$0xf] }
 0x18d   :  { %16641 = vst [vmem:[#allocation202_spill] sm:$0xff] %v10335_v29  ;;  %v10357_v29 = vld [vmem:[#allocation2 + $0x18c] sm:$0xf] }
 0x18e   :  { %16642 = vst [vmem:[#allocation203_spill] sm:$0xff] %v10337_v34  ;;  %v10359_v34 = vld [vmem:[#allocation2 + $0x188] sm:$0xf] }
 0x18f   :  { %16643 = vst [vmem:[#allocation204_spill] sm:$0xff] %v10339_v60  ;;  %v10361_v60 = vld [vmem:[#allocation2 + $0x190] sm:$0xf0] }
 0x190   :  { %16644 = vst [vmem:[#allocation205_spill] sm:$0xff] %v10341_v33  ;;  %v10363_v33 = vld [vmem:[#allocation2 + $0x18c] sm:$0xf0] }
 0x191   :  { %16645 = vst [vmem:[#allocation206_spill] sm:$0xff] %v10343_v41  ;;  %v10365_v41 = vld [vmem:[#allocation2 + $0x198] sm:$0xf0] }
 0x192   :  { %16646 = vst [vmem:[#allocation207_spill] sm:$0xff] %v10345_v40  ;;  %v10367_v40 = vld [vmem:[#allocation2 + $0x194] sm:$0xf0] }
 0x193   :  { %16647 = vst [vmem:[#allocation208_spill] sm:$0xff] %v10347_v20  ;;  %v10369_v20 = vld [vmem:[#allocation2 + $0x1a4] sm:$0xf] }
 0x194   :  { %16648 = vst [vmem:[#allocation209_spill] sm:$0xff] %v10349_v55  ;;  %v10371_v55 = vld [vmem:[#allocation2 + $0x1a0] sm:$0xf] }
 0x195   :  { %16649 = vst [vmem:[#allocation210_spill] sm:$0xff] %v10351_v10  ;;  %v10373_v10 = vld [vmem:[#allocation2 + $0x1ac] sm:$0xf] }
 0x196   :  { %16650 = vst [vmem:[#allocation211_spill] sm:$0xff] %v10353_v57  ;;  %v10375_v57 = vld [vmem:[#allocation2 + $0x1a8] sm:$0xf] }
 0x197   :  { %16651 = vst [vmem:[#allocation212_spill] sm:$0xff] %v10355_v24  ;;  %v10377_v24 = vld [vmem:[#allocation2 + $0x1b0] sm:$0xf0] }
 0x198   :  { %16652 = vst [vmem:[#allocation213_spill] sm:$0xff] %v10357_v29  ;;  %v10379_v29 = vld [vmem:[#allocation2 + $0x1ac] sm:$0xf0] }
 0x199   :  { %16653 = vst [vmem:[#allocation214_spill] sm:$0xff] %v10359_v34  ;;  %v10381_v34 = vld [vmem:[#allocation2 + $0x1b8] sm:$0xf0] }
 0x19a   :  { %16654 = vst [vmem:[#allocation215_spill] sm:$0xff] %v10361_v60  ;;  %v10383_v60 = vld [vmem:[#allocation2 + $0x1b4] sm:$0xf0] }
 0x19b   :  { %16655 = vst [vmem:[#allocation216_spill] sm:$0xff] %v10363_v33  ;;  %v10385_v33 = vld [vmem:[#allocation2 + $0x1c4] sm:$0xf] }
 0x19c   :  { %16656 = vst [vmem:[#allocation217_spill] sm:$0xff] %v10365_v41  ;;  %v10387_v41 = vld [vmem:[#allocation2 + $0x1c0] sm:$0xf] }
 0x19d   :  { %16657 = vst [vmem:[#allocation218_spill] sm:$0xff] %v10367_v40  ;;  %v10389_v40 = vld [vmem:[#allocation2 + $0x1cc] sm:$0xf] }
 0x19e   :  { %16658 = vst [vmem:[#allocation219_spill] sm:$0xff] %v10369_v20  ;;  %v10391_v20 = vld [vmem:[#allocation2 + $0x1c8] sm:$0xf] }
 0x19f   :  { %16659 = vst [vmem:[#allocation220_spill] sm:$0xff] %v10371_v55  ;;  %v10393_v55 = vld [vmem:[#allocation2 + $0x1d0] sm:$0xf0] }
 0x1a0   :  { %16660 = vst [vmem:[#allocation221_spill] sm:$0xff] %v10373_v10  ;;  %v10395_v10 = vld [vmem:[#allocation2 + $0x1cc] sm:$0xf0] }
 0x1a1   :  { %16661 = vst [vmem:[#allocation222_spill] sm:$0xff] %v10375_v57  ;;  %v10397_v57 = vld [vmem:[#allocation2 + $0x1d8] sm:$0xf0] }
 0x1a2   :  { %16662 = vst [vmem:[#allocation223_spill] sm:$0xff] %v10377_v24  ;;  %v10399_v24 = vld [vmem:[#allocation2 + $0x1d4] sm:$0xf0] }
 0x1a3   :  { %16663 = vst [vmem:[#allocation224_spill] sm:$0xff] %v10379_v29  ;;  %v10401_v29 = vld [vmem:[#allocation2 + $0x1e4] sm:$0xf] }
 0x1a4   :  { %16664 = vst [vmem:[#allocation225_spill] sm:$0xff] %v10381_v34  ;;  %v10403_v34 = vld [vmem:[#allocation2 + $0x1e0] sm:$0xf] }
 0x1a5   :  { %16665 = vst [vmem:[#allocation226_spill] sm:$0xff] %v10383_v60  ;;  %v10405_v60 = vld [vmem:[#allocation2 + $0x1ec] sm:$0xf] }
 0x1a6   :  { %16666 = vst [vmem:[#allocation227_spill] sm:$0xff] %v10385_v33  ;;  %v10407_v33 = vld [vmem:[#allocation2 + $0x1e8] sm:$0xf] }
 0x1a7   :  { %16667 = vst [vmem:[#allocation228_spill] sm:$0xff] %v10387_v41  ;;  %v10409_v41 = vld [vmem:[#allocation2 + $0x1f0] sm:$0xf0] }
 0x1a8   :  { %16668 = vst [vmem:[#allocation229_spill] sm:$0xff] %v10389_v40  ;;  %v10411_v40 = vld [vmem:[#allocation2 + $0x1ec] sm:$0xf0] }
 0x1a9   :  { %16669 = vst [vmem:[#allocation230_spill] sm:$0xff] %v10391_v20  ;;  %v10413_v20 = vld [vmem:[#allocation2 + $0x1f8] sm:$0xf0] }
 0x1aa   :  { %16670 = vst [vmem:[#allocation231_spill] sm:$0xff] %v10393_v55  ;;  %v10415_v55 = vld [vmem:[#allocation2 + $0x1f4] sm:$0xf0] }
 0x1ab   :  { %16671 = vst [vmem:[#allocation232_spill] sm:$0xff] %v10395_v10  ;;  %v10417_v10 = vld [vmem:[#allocation2 + $0x204] sm:$0xf] }
 0x1ac   :  { %16672 = vst [vmem:[#allocation233_spill] sm:$0xff] %v10397_v57  ;;  %v10419_v57 = vld [vmem:[#allocation2 + $0x200] sm:$0xf] }
 0x1ad   :  { %16673 = vst [vmem:[#allocation234_spill] sm:$0xff] %v10399_v24  ;;  %v10421_v24 = vld [vmem:[#allocation2 + $0x20c] sm:$0xf] }
 0x1ae   :  { %16674 = vst [vmem:[#allocation235_spill] sm:$0xff] %v10401_v29  ;;  %v10423_v29 = vld [vmem:[#allocation2 + $0x208] sm:$0xf] }
 0x1af   :  { %16675 = vst [vmem:[#allocation236_spill] sm:$0xff] %v10403_v34  ;;  %v10425_v34 = vld [vmem:[#allocation2 + $0x210] sm:$0xf0] }
 0x1b0   :  { %16676 = vst [vmem:[#allocation237_spill] sm:$0xff] %v10405_v60  ;;  %v10427_v60 = vld [vmem:[#allocation2 + $0x20c] sm:$0xf0] }
 0x1b1   :  { %16677 = vst [vmem:[#allocation238_spill] sm:$0xff] %v10407_v33  ;;  %v10429_v33 = vld [vmem:[#allocation2 + $0x218] sm:$0xf0] }
 0x1b2   :  { %16678 = vst [vmem:[#allocation239_spill] sm:$0xff] %v10409_v41  ;;  %v10431_v41 = vld [vmem:[#allocation2 + $0x214] sm:$0xf0] }
 0x1b3   :  { %16679 = vst [vmem:[#allocation240_spill] sm:$0xff] %v10411_v40  ;;  %v10433_v40 = vld [vmem:[#allocation2 + $0x224] sm:$0xf] }
 0x1b4   :  { %16680 = vst [vmem:[#allocation241_spill] sm:$0xff] %v10413_v20  ;;  %v10435_v20 = vld [vmem:[#allocation2 + $0x220] sm:$0xf] }
 0x1b5   :  { %16681 = vst [vmem:[#allocation242_spill] sm:$0xff] %v10415_v55  ;;  %v10437_v55 = vld [vmem:[#allocation2 + $0x22c] sm:$0xf] }
 0x1b6   :  { %16682 = vst [vmem:[#allocation243_spill] sm:$0xff] %v10417_v10  ;;  %v10439_v10 = vld [vmem:[#allocation2 + $0x228] sm:$0xf] }
 0x1b7   :  { %16683 = vst [vmem:[#allocation244_spill] sm:$0xff] %v10419_v57  ;;  %v10441_v57 = vld [vmem:[#allocation2 + $0x230] sm:$0xf0] }
 0x1b8   :  { %16684 = vst [vmem:[#allocation245_spill] sm:$0xff] %v10421_v24  ;;  %v10443_v24 = vld [vmem:[#allocation2 + $0x22c] sm:$0xf0] }
 0x1b9   :  { %16685 = vst [vmem:[#allocation246_spill] sm:$0xff] %v10423_v29  ;;  %v10445_v29 = vld [vmem:[#allocation2 + $0x238] sm:$0xf0] }
 0x1ba   :  { %16686 = vst [vmem:[#allocation247_spill] sm:$0xff] %v10425_v34  ;;  %v10447_v34 = vld [vmem:[#allocation2 + $0x234] sm:$0xf0] }
 0x1bb   :  { %16687 = vst [vmem:[#allocation248_spill] sm:$0xff] %v10427_v60  ;;  %v10449_v60 = vld [vmem:[#allocation2 + $0x244] sm:$0xf] }
 0x1bc   :  { %16688 = vst [vmem:[#allocation249_spill] sm:$0xff] %v10429_v33  ;;  %v10451_v33 = vld [vmem:[#allocation2 + $0x240] sm:$0xf] }
 0x1bd   :  { %16689 = vst [vmem:[#allocation250_spill] sm:$0xff] %v10431_v41  ;;  %v10453_v41 = vld [vmem:[#allocation2 + $0x24c] sm:$0xf] }
 0x1be   :  { %16690 = vst [vmem:[#allocation251_spill] sm:$0xff] %v10433_v40  ;;  %v10455_v40 = vld [vmem:[#allocation2 + $0x248] sm:$0xf] }
 0x1bf   :  { %16691 = vst [vmem:[#allocation252_spill] sm:$0xff] %v10435_v20  ;;  %v10457_v20 = vld [vmem:[#allocation2 + $0x250] sm:$0xf0] }
 0x1c0   :  { %16692 = vst [vmem:[#allocation253_spill] sm:$0xff] %v10437_v55  ;;  %v10459_v55 = vld [vmem:[#allocation2 + $0x24c] sm:$0xf0] }
 0x1c1   :  { %16693 = vst [vmem:[#allocation254_spill] sm:$0xff] %v10439_v10  ;;  %v10461_v10 = vld [vmem:[#allocation2 + $0x258] sm:$0xf0] }
 0x1c2   :  { %16694 = vst [vmem:[#allocation255_spill] sm:$0xff] %v10441_v57  ;;  %v10463_v57 = vld [vmem:[#allocation2 + $0x254] sm:$0xf0] }
 0x1c3   :  { %16695 = vst [vmem:[#allocation256_spill] sm:$0xff] %v10443_v24  ;;  %v10465_v24 = vld [vmem:[#allocation2 + $0x264] sm:$0xf] }
 0x1c4   :  { %16696 = vst [vmem:[#allocation257_spill] sm:$0xff] %v10445_v29  ;;  %v10467_v29 = vld [vmem:[#allocation2 + $0x260] sm:$0xf] }
 0x1c5   :  { %16697 = vst [vmem:[#allocation258_spill] sm:$0xff] %v10447_v34  ;;  %v10469_v34 = vld [vmem:[#allocation2 + $0x26c] sm:$0xf] }
 0x1c6   :  { %16698 = vst [vmem:[#allocation259_spill] sm:$0xff] %v10449_v60  ;;  %v10471_v60 = vld [vmem:[#allocation2 + $0x268] sm:$0xf] }
 0x1c7   :  { %16699 = vst [vmem:[#allocation260_spill] sm:$0xff] %v10451_v33  ;;  %v10473_v33 = vld [vmem:[#allocation2 + $0x270] sm:$0xf0] }
 0x1c8   :  { %16700 = vst [vmem:[#allocation261_spill] sm:$0xff] %v10453_v41  ;;  %v10475_v41 = vld [vmem:[#allocation2 + $0x26c] sm:$0xf0] }
 0x1c9   :  { %16701 = vst [vmem:[#allocation262_spill] sm:$0xff] %v10455_v40  ;;  %v10477_v40 = vld [vmem:[#allocation2 + $0x278] sm:$0xf0] }
 0x1ca   :  { %16702 = vst [vmem:[#allocation263_spill] sm:$0xff] %v10457_v20  ;;  %v10479_v20 = vld [vmem:[#allocation2 + $0x274] sm:$0xf0] }
 0x1cb   :  { %16703 = vst [vmem:[#allocation264_spill] sm:$0xff] %v10459_v55  ;;  %v10481_v55 = vld [vmem:[#allocation2 + $0x284] sm:$0xf] }
 0x1cc   :  { %16704 = vst [vmem:[#allocation265_spill] sm:$0xff] %v10461_v10  ;;  %v10483_v10 = vld [vmem:[#allocation2 + $0x280] sm:$0xf] }
 0x1cd   :  { %16705 = vst [vmem:[#allocation266_spill] sm:$0xff] %v10463_v57  ;;  %v10485_v57 = vld [vmem:[#allocation2 + $0x28c] sm:$0xf] }
 0x1ce   :  { %16706 = vst [vmem:[#allocation267_spill] sm:$0xff] %v10465_v24  ;;  %v10487_v24 = vld [vmem:[#allocation2 + $0x288] sm:$0xf] }
 0x1cf   :  { %16707 = vst [vmem:[#allocation268_spill] sm:$0xff] %v10467_v29  ;;  %v10489_v29 = vld [vmem:[#allocation2 + $0x290] sm:$0xf0] }
 0x1d0   :  { %16708 = vst [vmem:[#allocation269_spill] sm:$0xff] %v10469_v34  ;;  %v10491_v34 = vld [vmem:[#allocation2 + $0x28c] sm:$0xf0] }
 0x1d1   :  { %16709 = vst [vmem:[#allocation270_spill] sm:$0xff] %v10471_v60  ;;  %v10493_v60 = vld [vmem:[#allocation2 + $0x298] sm:$0xf0] }
 0x1d2   :  { %16710 = vst [vmem:[#allocation271_spill] sm:$0xff] %v10473_v33  ;;  %v10495_v33 = vld [vmem:[#allocation2 + $0x294] sm:$0xf0] }
 0x1d3   :  { %16711 = vst [vmem:[#allocation272_spill] sm:$0xff] %v10475_v41  ;;  %v10497_v41 = vld [vmem:[#allocation2 + $0x2a4] sm:$0xf] }
 0x1d4   :  { %16712 = vst [vmem:[#allocation273_spill] sm:$0xff] %v10477_v40  ;;  %v10499_v40 = vld [vmem:[#allocation2 + $0x2a0] sm:$0xf] }
 0x1d5   :  { %16713 = vst [vmem:[#allocation274_spill] sm:$0xff] %v10479_v20  ;;  %v10501_v20 = vld [vmem:[#allocation2 + $0x2ac] sm:$0xf] }
 0x1d6   :  { %16714 = vst [vmem:[#allocation275_spill] sm:$0xff] %v10481_v55  ;;  %v10503_v55 = vld [vmem:[#allocation2 + $0x2a8] sm:$0xf] }
 0x1d7   :  { %16715 = vst [vmem:[#allocation276_spill] sm:$0xff] %v10483_v10  ;;  %v10505_v10 = vld [vmem:[#allocation2 + $0x2b0] sm:$0xf0] }
 0x1d8   :  { %16716 = vst [vmem:[#allocation277_spill] sm:$0xff] %v10485_v57  ;;  %v10507_v57 = vld [vmem:[#allocation2 + $0x2ac] sm:$0xf0] }
 0x1d9   :  { %16717 = vst [vmem:[#allocation278_spill] sm:$0xff] %v10487_v24  ;;  %v10509_v24 = vld [vmem:[#allocation2 + $0x2b8] sm:$0xf0] }
 0x1da   :  { %16718 = vst [vmem:[#allocation279_spill] sm:$0xff] %v10489_v29  ;;  %v10511_v29 = vld [vmem:[#allocation2 + $0x2b4] sm:$0xf0] }
 0x1db   :  { %16719 = vst [vmem:[#allocation280_spill] sm:$0xff] %v10491_v34  ;;  %v10513_v34 = vld [vmem:[#allocation2 + $0x2c4] sm:$0xf] }
 0x1dc   :  { %16720 = vst [vmem:[#allocation281_spill] sm:$0xff] %v10493_v60  ;;  %v10515_v60 = vld [vmem:[#allocation2 + $0x2c0] sm:$0xf] }
 0x1dd   :  { %16721 = vst [vmem:[#allocation282_spill] sm:$0xff] %v10495_v33  ;;  %v10517_v33 = vld [vmem:[#allocation2 + $0x2cc] sm:$0xf] }
 0x1de   :  { %16722 = vst [vmem:[#allocation283_spill] sm:$0xff] %v10497_v41  ;;  %v10519_v41 = vld [vmem:[#allocation2 + $0x2c8] sm:$0xf] }
 0x1df   :  { %16723 = vst [vmem:[#allocation284_spill] sm:$0xff] %v10499_v40  ;;  %v10521_v40 = vld [vmem:[#allocation2 + $0x2d0] sm:$0xf0] }
 0x1e0   :  { %16724 = vst [vmem:[#allocation285_spill] sm:$0xff] %v10501_v20  ;;  %v10523_v20 = vld [vmem:[#allocation2 + $0x2cc] sm:$0xf0] }
 0x1e1   :  { %16725 = vst [vmem:[#allocation286_spill] sm:$0xff] %v10503_v55  ;;  %v10525_v55 = vld [vmem:[#allocation2 + $0x2d8] sm:$0xf0] }
 0x1e2   :  { %16726 = vst [vmem:[#allocation287_spill] sm:$0xff] %v10505_v10  ;;  %v10527_v10 = vld [vmem:[#allocation2 + $0x2d4] sm:$0xf0] }
 0x1e3   :  { %16727 = vst [vmem:[#allocation288_spill] sm:$0xff] %v10507_v57  ;;  %v10529_v57 = vld [vmem:[#allocation2 + $0x2e4] sm:$0xf] }
 0x1e4   :  { %16728 = vst [vmem:[#allocation289_spill] sm:$0xff] %v10509_v24  ;;  %v10531_v24 = vld [vmem:[#allocation2 + $0x2e0] sm:$0xf] }
 0x1e5   :  { %16729 = vst [vmem:[#allocation290_spill] sm:$0xff] %v10511_v29  ;;  %v10533_v29 = vld [vmem:[#allocation2 + $0x2ec] sm:$0xf] }
 0x1e6   :  { %16730 = vst [vmem:[#allocation291_spill] sm:$0xff] %v10513_v34  ;;  %v10535_v34 = vld [vmem:[#allocation2 + $0x2e8] sm:$0xf] }
 0x1e7   :  { %16731 = vst [vmem:[#allocation292_spill] sm:$0xff] %v10515_v60  ;;  %v10537_v60 = vld [vmem:[#allocation2 + $0x2f0] sm:$0xf0] }
 0x1e8   :  { %16732 = vst [vmem:[#allocation293_spill] sm:$0xff] %v10517_v33  ;;  %v10539_v33 = vld [vmem:[#allocation2 + $0x2ec] sm:$0xf0] }
 0x1e9   :  { %16733 = vst [vmem:[#allocation294_spill] sm:$0xff] %v10519_v41  ;;  %v10541_v41 = vld [vmem:[#allocation2 + $0x2f8] sm:$0xf0] }
 0x1ea   :  { %16734 = vst [vmem:[#allocation295_spill] sm:$0xff] %v10521_v40  ;;  %v10543_v40 = vld [vmem:[#allocation2 + $0x2f4] sm:$0xf0] }
 0x1eb   :  { %16735 = vst [vmem:[#allocation296_spill] sm:$0xff] %v10523_v20 }
 0x1ec   :  { %16736 = vst [vmem:[#allocation297_spill] sm:$0xff] %v10525_v55 }
 0x1ed   :  { %16737 = vst [vmem:[#allocation298_spill] sm:$0xff] %v10527_v10 }
 0x1ee   :  { %16738 = vst [vmem:[#allocation299_spill] sm:$0xff] %v10529_v57 }
 0x1ef   :  { %16739 = vst [vmem:[#allocation300_spill] sm:$0xff] %v10531_v24 }
 0x1f0   :  { %16740 = vst [vmem:[#allocation301_spill] sm:$0xff] %v10533_v29 }
 0x1f1   :  { %16741 = vst [vmem:[#allocation302_spill] sm:$0xff] %v10535_v34 }
 0x1f2   :  { %16742 = vst [vmem:[#allocation303_spill] sm:$0xff] %v10537_v60 }
 0x1f3   :  { %16743 = vst [vmem:[#allocation304_spill] sm:$0xff] %v10539_v33 }
 0x1f4   :  { %16744 = vst [vmem:[#allocation305_spill] sm:$0xff] %v10541_v41 }
 0x1f5   :  { %16745 = vst [vmem:[#allocation306_spill] sm:$0xff] %v10543_v40 }
 0x1f6   :  { %8524 = dma.done.wait [#allocation4 + $0x1], 12800 }
 0x1f7   :  { %8525 = vsyncadd [#allocation4 + $0x1], 4294954496  ;;  %v16746_v55 = vpack.c.bf16 %v9750_v11, %v9750_v11  ;;  %v16747_v57 = vpack.c.bf16 %v9781_v23, %v9781_v23  ;;  %v7363_v20 = vld [vmem:[#allocation3 + $0xe0] sm:$0xf]  ;;  %v8385_v34 = vld [vmem:[#allocation3 + $0xec] sm:$0xf0] }
 0x1f8   :  { %v7635_v24 = vld [vmem:[#allocation3 + $0x300] sm:$0xf]  ;;  %v7364_v60 = vor.u32 %v8385_v34, %v7363_v20  ;;  %v8453_v12 = vld [vmem:[#allocation3 + $0x30c] sm:$0xf0]  ;;  %vm1841_vm0 = vcmask 130048  }
 0x1f9   :  { %v1184_v10 = vunpack.c.l.b16 %v16746_v55  ;;  %v1188_v29 = vunpack.c.l.b16 %v16747_v57  ;;  %v7347_v33 = vld [vmem:[#allocation3 + $0xc0] sm:$0xf]  ;;  %v8381_v0 = vld [vmem:[#allocation3 + $0xcc] sm:$0xf0]  ;;  %v10551_v41 = vor.u32 %v8453_v12, %v7635_v24 }
 0x1fa   :  { %1890 = vmatpush.bf16.msra.mxu0 %v7364_v60  ;;  %8495 = vmatpush.bf16.msra.mxu1 %v7364_v60  ;;  %v7348_v31 = vor.u32 %v8381_v0, %v7347_v33  ;;  %v7331_v11 = vld [vmem:[#allocation3 + $0xa0] sm:$0xf]  ;;  %v8377_v23 = vld [vmem:[#allocation3 + $0xac] sm:$0xf0] }
 0x1fb   :  { %v10553_v40 = vpack.c.b16 %v1188_v29, %v1184_v10  ;;  %8496 = vmatpush.bf16.msra.mxu2 %v7364_v60  ;;  %8511 = vmatpush.bf16.msra.mxu3 %v10551_v41  ;;  %v7332_v55 = vor.u32 %v8377_v23, %v7331_v11  ;;  %v7315_v12 = vld [vmem:[#allocation3 + $0x80] sm:$0xf]  ;;  %v8373_v24 = vld [vmem:[#allocation3 + $0x8c] sm:$0xf0]  ;;  %v16749_v60 = vpack.c.bf16 %v9812_v32, %v9812_v32 }
 0x1fc   :  { %v7316_v57 = vor.u32 %v8373_v24, %v7315_v12  ;;  %v7299_v0 = vld [vmem:[#allocation3 + $0x60] sm:$0xf]  ;;  %v8369_v33 = vld [vmem:[#allocation3 + $0x6c] sm:$0xf0]  ;;  %v16750_v10 = vpack.c.bf16 %v9843_v39, %v9843_v39 }
 0x1fd   :  { %16748 = vst [vmem:[#allocation307_spill] sm:$0xff] %v10553_v40  ;;  %v7300_v29 = vor.u32 %v8369_v33, %v7299_v0  ;;  %v1192_v34 = vunpack.c.l.b16 %v16749_v60  ;;  %v8365_v11 = vld [vmem:[#allocation3 + $0x4c] sm:$0xf0]  ;;  %v7267_v12 = vld [vmem:[#allocation3 + $0x20] sm:$0xf]  ;;  %v1101_v33 = vunpack.c.h.b16 %v9289_v47  ;;  %v1105_v60 = vunpack.c.h.b16 %v9320_v58 }
 0x1fe   :  { %7659 = vmatmul.msk.bf16.vlgmr.msra.gmra.mxu3 %vm1841_vm0, %v10553_v40  ;;  %1891 = vmatpush.bf16.msra.mxu0 %v7348_v31  ;;  %v1196_v20 = vunpack.c.l.b16 %v16750_v10  ;;  %v8361_v24 = vld [vmem:[#allocation3 + $0x2c] sm:$0xf0]  ;;  %v7251_v39 = vld [vmem:[#allocation3] sm:$0xf] }
 0x1ff   :  { %8497 = vmatpush.bf16.msra.mxu1 %v7348_v31  ;;  %8498 = vmatpush.bf16.msra.mxu2 %v7348_v31  ;;  %v7283_v31 = vld [vmem:[#allocation3 + $0x40] sm:$0xf]  ;;  %v7268_v32 = vor.u32 %v8361_v24, %v7267_v12  ;;  %v8357_v0 = vld [vmem:[#allocation3 + $0xc] sm:$0xf0]  ;;  %v1197_v12 = vunpack.c.h.b16 %v9999_v15  ;;  %v10574_v45 = vpack.c.b16 %v1105_v60, %v1101_v33 }
 0x200   :  { %v10564_v23 = vpack.c.b16 %v1196_v20, %v1192_v34  ;;  %v1181_v34 = vunpack.c.h.b16 %v9909_v52  ;;  %v8449_v10 = vld [vmem:[#allocation3 + $0x2ec] sm:$0xf0]  ;;  %v7475_v47 = vld [vmem:[#allocation3 + $0x1c0] sm:$0xf] }
 0x201   :  { %v8417_v20 = vld [vmem:[#allocation3 + $0x1ec] sm:$0xf0]  ;;  %v7603_v52 = vld [vmem:[#allocation3 + $0x2c0] sm:$0xf] }
 0x202   :  { %1892 = vmatpush.bf16.msra.mxu0 %v7332_v55  ;;  %16751 = vst [vmem:[#allocation308_spill] sm:$0xff] %v10564_v23  ;;  %v8413_v58 = vld [vmem:[#allocation3 + $0x1cc] sm:$0xf0] }
 0x203   :  { %8499 = vmatpush.bf16.msra.mxu1 %v7332_v55  ;;  %8500 = vmatpush.bf16.msra.mxu2 %v7332_v55  ;;  %v7284_v55 = vor.u32 %v8365_v11, %v7283_v31  ;;  %v7252_v31 = vor.u32 %v8357_v0, %v7251_v39  ;;  %v1185_v11 = vunpack.c.h.b16 %v9940_v63  ;;  %v16754_v0 = vpack.c.bf16 %v9874_v50, %v9874_v50 }
 0x204   :  { %v7476_v33 = vor.u32 %v8413_v58, %v7475_v47  ;;  %v8383_v58 = vld [vmem:[#allocation3 + $0xe4] sm:$0xf] }
 0x205   :  { %v10576_v40 = vpack.c.b16 %v1185_v11, %v1181_v34  ;;  %v1200_v15 = vunpack.c.l.b16 %v16754_v0  ;;  %v8409_v34 = vld [vmem:[#allocation3 + $0x1ac] sm:$0xf0] }
 0x206   :  { %1893 = vmatpush.bf16.msra.mxu0 %v7316_v57  ;;  %v8437_v11 = vld [vmem:[#allocation3 + $0x28c] sm:$0xf0] }
 0x207   :  { %8501 = vmatpush.bf16.msra.mxu1 %v7316_v57  ;;  %8502 = vmatpush.bf16.msra.mxu2 %v7316_v57  ;;  %v7619_v57 = vld [vmem:[#allocation3 + $0x2e0] sm:$0xf]  ;;  %16752 = vst [vmem:[#allocation309_spill] sm:$0xff] %v10576_v40 }
 0x208   :  { %v7620_v24 = vor.u32 %v8449_v10, %v7619_v57  ;;  %v7459_v10 = vld [vmem:[#allocation3 + $0x1a0] sm:$0xf] }
 0x20a   :  { %1894 = vmatpush.bf16.msra.mxu0 %v7300_v29 }
 0x20b   :  { %8503 = vmatpush.bf16.msra.mxu1 %v7300_v29  ;;  %8504 = vmatpush.bf16.msra.mxu2 %v7300_v29  ;;  %v7491_v29 = vld [vmem:[#allocation3 + $0x1e0] sm:$0xf] }
 0x20c   :  { %v7492_v25 = vor.u32 %v8417_v20, %v7491_v29  ;;  %v7587_v29 = vld [vmem:[#allocation3 + $0x2a0] sm:$0xf]  ;;  %v8441_v20 = vld [vmem:[#allocation3 + $0x2ac] sm:$0xf0] }
 0x20d   :  { %v7588_v47 = vor.u32 %v8441_v20, %v7587_v29  ;;  %v7555_v29 = vld [vmem:[#allocation3 + $0x260] sm:$0xf]  ;;  %v8433_v20 = vld [vmem:[#allocation3 + $0x26c] sm:$0xf0] }
 0x20e   :  { %7660 = vmatmul.msk.bf16.gmra.mxu3 %vm1841_vm0, %v10564_v23  ;;  %1895 = vmatpush.bf16.msra.mxu0 %v7284_v55  ;;  %v8445_v23 = vld [vmem:[#allocation3 + $0x2cc] sm:$0xf0] }
 0x20f   :  { %8505 = vmatpush.bf16.msra.mxu1 %v7284_v55  ;;  %8506 = vmatpush.bf16.msra.mxu2 %v7284_v55  ;;  %v1201_v55 = vunpack.c.h.b16 %v10018_v28  ;;  %v7604_v60 = vor.u32 %v8445_v23, %v7603_v52  ;;  %v7365_v52 = vld [vmem:[#allocation3 + $0xf0] sm:$0xf0]  ;;  %v8405_v23 = vld [vmem:[#allocation3 + $0x18c] sm:$0xf0] }
 0x210   :  { %v8429_v28 = vld [vmem:[#allocation3 + $0x24c] sm:$0xf0] }
 0x211   :  { %v10578_v39 = vpack.c.b16 %v1201_v55, %v1197_v12  ;;  %v7368_v12 = vor.u32 %v8383_v58, %v7365_v52  ;;  %v8379_v55 = vld [vmem:[#allocation3 + $0xc4] sm:$0xf]  ;;  %v1189_v58 = vunpack.c.h.b16 %v9963_v21  ;;  %v1193_v52 = vunpack.c.h.b16 %v9982_v37 }
 0x212   :  { %1896 = vmatpush.bf16.msra.mxu0 %v7268_v32 }
 0x213   :  { %8507 = vmatpush.bf16.msra.mxu1 %v7268_v32  ;;  %8508 = vmatpush.bf16.msra.mxu2 %v7268_v32  ;;  %16753 = vst [vmem:[#allocation310_spill] sm:$0xff] %v10578_v39  ;;  %v16755_v32 = vpack.c.bf16 %v9905_v61, %v9905_v61  ;;  %v7460_v61 = vor.u32 %v8409_v34, %v7459_v10  ;;  %v1113_v10 = vunpack.c.h.b16 %v9382_v18  ;;  %v8401_v34 = vld [vmem:[#allocation3 + $0x16c] sm:$0xf0] }
 0x214   :  { %2246 = vmatpush.bf16.msrb.mxu3 %v7368_v12  ;;  %v10602_v63 = vpack.c.b16 %v1193_v52, %v1189_v58  ;;  %v7301_v58 = vld [vmem:[#allocation3 + $0x70] sm:$0xf0]  ;;  %v7379_v52 = vld [vmem:[#allocation3 + $0x100] sm:$0xf] }
 0x215   :  { %v1204_v57 = vunpack.c.l.b16 %v16755_v32 }
 0x216   :  { %1897 = vmatpush.bf16.msra.mxu0 %v7252_v31  ;;  %16757 = vst [vmem:[#allocation312_spill] sm:$0xff] %v10602_v63 }
 0x217   :  { %8509 = vmatpush.bf16.msra.mxu1 %v7252_v31  ;;  %8510 = vmatpush.bf16.msra.mxu2 %v7252_v31  ;;  %v10589_v50 = vpack.c.b16 %v1204_v57, %v1200_v15  ;;  %v7571_v31 = vld [vmem:[#allocation3 + $0x280] sm:$0xf]  ;;  %v7349_v15 = vld [vmem:[#allocation3 + $0xd0] sm:$0xf0]  ;;  %v8375_v57 = vld [vmem:[#allocation3 + $0xa4] sm:$0xf] }
 0x218   :  { %v7572_v0 = vor.u32 %v8437_v11, %v7571_v31  ;;  %v7352_v32 = vor.u32 %v8379_v55, %v7349_v15  ;;  %v7411_v31 = vld [vmem:[#allocation3 + $0x140] sm:$0xf]  ;;  %v7556_v11 = vor.u32 %v8433_v20, %v7555_v29  ;;  %v8397_v55 = vld [vmem:[#allocation3 + $0x14c] sm:$0xf0]  ;;  %v8367_v20 = vld [vmem:[#allocation3 + $0x64] sm:$0xf] }
 0x219   :  { %1898 = vmatmul.bf16.vlgmr.msra.gmra.mxu0 %v10574_v45  ;;  %16756 = vst [vmem:[#allocation311_spill] sm:$0xff] %v10589_v50  ;;  %v7539_v15 = vld [vmem:[#allocation3 + $0x240] sm:$0xf] }
 0x21a   :  { %1948 = vmatmul.bf16.vlgmr.msra.gmra.mxu1 %v10576_v40  ;;  %1958 = vmatmul.bf16.vlgmr.msra.gmra.mxu2 %v10578_v39 }
 0x21b   :  { %2068 = vmatpush.bf16.msrb.mxu2 %v7620_v24  ;;  %1979 = vmatpush.bf16.msrb.mxu1 %v7492_v25  ;;  %v7443_v25 = vld [vmem:[#allocation3 + $0x180] sm:$0xf] }
 0x21c   :  { %2164 = vmatpush.bf16.msrb.mxu0 %v10551_v41  ;;  %v7444_v24 = vor.u32 %v8405_v23, %v7443_v25  ;;  %v7427_v41 = vld [vmem:[#allocation3 + $0x160] sm:$0xf]  ;;  %v1209_v25 = vunpack.c.h.b16 %v10052_v43  ;;  %2247 = vmatpush.bf16.msrb.mxu3 %v7352_v32  ;;  %v7540_v32 = vor.u32 %v8429_v28, %v7539_v15 }
 0x21d   :  { %v7428_v23 = vor.u32 %v8401_v34, %v7427_v41 }
 0x21e   :  { %7661 = vmatmul.msk.bf16.gmra.mxu3 %vm1841_vm0, %v10589_v50 }
 0x21f   :  { %1980 = vmatpush.bf16.msrb.mxu1 %v7476_v33  ;;  %2069 = vmatpush.bf16.msrb.mxu2 %v7604_v60  ;;  %v7333_v33 = vld [vmem:[#allocation3 + $0xb0] sm:$0xf0]  ;;  %v1109_v60 = vunpack.c.h.b16 %v9351_v5 }
 0x221   :  { %v10600_v12 = vpack.c.b16 %v1113_v10, %v1109_v60  ;;  %v7395_v60 = vld [vmem:[#allocation3 + $0x120] sm:$0xf]  ;;  %v8393_v10 = vld [vmem:[#allocation3 + $0x12c] sm:$0xf0] }
 0x222   :  { %v7396_v29 = vor.u32 %v8393_v10, %v7395_v60  ;;  %v1102_v60 = vunpack.c.l.b16 %v9291_v48  ;;  %v1106_v10 = vunpack.c.l.b16 %v9322_v59 }
 0x223   :  { %1981 = vmatpush.bf16.msrb.mxu1 %v7460_v61  ;;  %2070 = vmatpush.bf16.msrb.mxu2 %v7588_v47  ;;  %v1205_v61 = vunpack.c.h.b16 %v10035_v36  ;;  %v7336_v47 = vor.u32 %v8375_v57, %v7333_v33  ;;  %v16759_v36 = vpack.c.bf16 %v9936_v8, %v9936_v8  ;;  %v8371_v57 = vld [vmem:[#allocation3 + $0x84] sm:$0xf]  ;;  %v7317_v33 = vld [vmem:[#allocation3 + $0x90] sm:$0xf0] }
 0x224   :  { %v7320_v34 = vor.u32 %v8371_v57, %v7317_v33  ;;  %v1213_v57 = vunpack.c.h.b16 %v10071_v9  ;;  %v1217_v33 = vunpack.c.h.b16 %v10088_v51 }
 0x225   :  { %v10604_v21 = vpack.c.b16 %v1209_v25, %v1205_v61  ;;  %v1208_v43 = vunpack.c.l.b16 %v16759_v36  ;;  %2248 = vmatpush.bf16.msrb.mxu3 %v7336_v47  ;;  %v8425_v36 = vld [vmem:[#allocation3 + $0x22c] sm:$0xf0]  ;;  %v7304_v25 = vor.u32 %v8367_v20, %v7301_v58  ;;  %v7507_v47 = vld [vmem:[#allocation3 + $0x200] sm:$0xf]  ;;  %v16763_v58 = vpack.c.bf16 %v10061_v17, %v10061_v17  ;;  %v8447_v17 = vld [vmem:[#allocation3 + $0x2e4] sm:$0xf] }
 0x226   :  { %v8389_v61 = vld [vmem:[#allocation3 + $0x10c] sm:$0xf0] }
 0x227   :  { %1982 = vmatpush.bf16.msrb.mxu1 %v7444_v24  ;;  %2071 = vmatpush.bf16.msrb.mxu2 %v7572_v0  ;;  %16758 = vst [vmem:[#allocation313_spill] sm:$0xff] %v10604_v21  ;;  %v16760_v24 = vpack.c.bf16 %v9975_v62, %v9975_v62  ;;  %v7412_v0 = vor.u32 %v8397_v55, %v7411_v31  ;;  %v7523_v62 = vld [vmem:[#allocation3 + $0x220] sm:$0xf]  ;;  %v8363_v31 = vld [vmem:[#allocation3 + $0x44] sm:$0xf] }
 0x228   :  { %v7524_v28 = vor.u32 %v8425_v36, %v7523_v62  ;;  %v10627_v36 = vpack.c.b16 %v1217_v33, %v1213_v57  ;;  %v1114_v57 = vunpack.c.l.b16 %v9384_v19 }
 0x229   :  { %v1212_v41 = vunpack.c.l.b16 %v16760_v24  ;;  %1903 = vmatmul.bf16.gmra.mxu0 %v10600_v12  ;;  %2249 = vmatpush.bf16.msrb.mxu3 %v7320_v34  ;;  %v8359_v24 = vld [vmem:[#allocation3 + $0x24] sm:$0xf] }
 0x22a   :  { %1953 = vmatmul.bf16.gmra.mxu1 %v10602_v63  ;;  %1963 = vmatmul.bf16.gmra.mxu2 %v10604_v21 }
 0x22b   :  { %1983 = vmatpush.bf16.msrb.mxu1 %v7428_v23  ;;  %2072 = vmatpush.bf16.msrb.mxu2 %v7556_v11  ;;  %v10615_v8 = vpack.c.b16 %v1212_v41, %v1208_v43  ;;  %v8421_v23 = vld [vmem:[#allocation3 + $0x20c] sm:$0xf0]  ;;  %v7285_v43 = vld [vmem:[#allocation3 + $0x50] sm:$0xf0]  ;;  %v7380_v11 = vor.u32 %v8389_v61, %v7379_v52  ;;  %v1220_v52 = vunpack.c.l.b16 %v16763_v58  ;;  %v8355_v61 = vld [vmem:[#allocation3 + $0x4] sm:$0xf] }
 0x22c   :  { %v7508_v55 = vor.u32 %v8421_v23, %v7507_v47  ;;  %v7288_v15 = vor.u32 %v8363_v31, %v7285_v43  ;;  %v7269_v41 = vld [vmem:[#allocation3 + $0x30] sm:$0xf0]  ;;  %v8451_v31 = vld [vmem:[#allocation3 + $0x304] sm:$0xf] }
 0x22d   :  { %16761 = vst [vmem:[#allocation314_spill] sm:$0xff] %v10615_v8  ;;  %2250 = vmatpush.bf16.msrb.mxu3 %v7304_v25  ;;  %v7272_v34 = vor.u32 %v8359_v24, %v7269_v41  ;;  %v7253_v25 = vld [vmem:[#allocation3 + $0x10] sm:$0xf0]  ;;  %v1129_v24 = vunpack.c.h.b16 %v9506_v46  ;;  %v1221_v41 = vunpack.c.h.b16 %v10107_v38 }
 0x22e   :  { %7662 = vmatmul.msk.bf16.gmra.mxu3 %vm1841_vm0, %v10615_v8  ;;  %v7256_v47 = vor.u32 %v8355_v61, %v7253_v25  ;;  %v7637_v43 = vld [vmem:[#allocation3 + $0x310] sm:$0xf0]  ;;  %v1133_v61 = vunpack.c.h.b16 %v9537_v56  ;;  %v16769_v25 = vld [vmem:[#allocation29_spill] sm:$0xff]  ;;  %v16802_v56 = vld [vmem:[#allocation80_spill] sm:$0xff] }
 0x22f   :  { %1984 = vmatpush.bf16.msrb.mxu1 %v7412_v0  ;;  %2073 = vmatpush.bf16.msrb.mxu2 %v7540_v32  ;;  %v1117_v0 = vunpack.c.h.b16 %v9413_v30  ;;  %v1121_v32 = vunpack.c.h.b16 %v9444_v7  ;;  %v7589_v38 = vld [vmem:[#allocation3 + $0x2b0] sm:$0xf0]  ;;  %v1173_v46 = vunpack.c.h.b16 %v16802_v56  ;;  %v16804_v30 = vld [vmem:[#allocation69_spill] sm:$0xff] }
 0x231   :  { %2251 = vmatpush.bf16.msrb.mxu3 %v7288_v15  ;;  %v10625_v62 = vpack.c.b16 %v1121_v32, %v1117_v0  ;;  %v1125_v15 = vunpack.c.h.b16 %v9475_v16  ;;  %v1225_v0 = vunpack.c.h.b16 %v10135_v1  ;;  %v1110_v32 = vunpack.c.l.b16 %v9353_v6  ;;  %v8439_v1 = vld [vmem:[#allocation3 + $0x2a4] sm:$0xf]  ;;  %v16803_v16 = vld [vmem:[#allocation83_spill] sm:$0xff] }
 0x232   :  { %v7592_v51 = vor.u32 %v8439_v1, %v7589_v38  ;;  %v1177_v7 = vunpack.c.h.b16 %v16803_v16 }
 0x233   :  { %1985 = vmatpush.bf16.msrb.mxu1 %v7396_v29  ;;  %2074 = vmatpush.bf16.msrb.mxu2 %v7524_v28  ;;  %v10629_v29 = vpack.c.b16 %v1106_v10, %v1102_v60  ;;  %v16762_v28 = vpack.c.bf16 %v10014_v26, %v10014_v26  ;;  %v7640_v26 = vor.u32 %v8451_v31, %v7637_v43  ;;  %v16770_v31 = vld [vmem:[#allocation33_spill] sm:$0xff]  ;;  %v1103_v43 = vunpack.c.h.b16 %v9291_v48  ;;  %v16773_v48 = vld [vmem:[#allocation52_spill] sm:$0xff] }
 0x234   :  { %v10650_v33 = vpack.c.b16 %v1129_v24, %v1125_v15  ;;  %v10652_v60 = vpack.c.b16 %v1225_v0, %v1221_v41  ;;  %v10654_v10 = vpack.c.b16 %v1114_v57, %v1110_v32  ;;  %v8443_v15 = vld [vmem:[#allocation3 + $0x2c4] sm:$0xf]  ;;  %v7605_v24 = vld [vmem:[#allocation3 + $0x2d0] sm:$0xf0]  ;;  %v1141_v0 = vunpack.c.h.b16 %v16773_v48 }
 0x235   :  { %v1216_v20 = vunpack.c.l.b16 %v16762_v28  ;;  %2252 = vmatpush.bf16.msrb.mxu3 %v7272_v34  ;;  %v16766_v34 = vpack.c.bf16 %v10100_v53, %v10100_v53  ;;  %v1137_v53 = vunpack.c.h.b16 %v9568_v3  ;;  %v7608_v41 = vor.u32 %v8443_v15, %v7605_v24  ;;  %v16775_v57 = vld [vmem:[#allocation37_spill] sm:$0xff]  ;;  %v16779_v15 = vld [vmem:[#allocation64_spill] sm:$0xff] }
 0x236   :  { %16765 = vst [vmem:[#allocation316_spill] sm:$0xff] %v10650_v33  ;;  %v16780_v24 = vld [vmem:[#allocation45_spill] sm:$0xff]  ;;  %v1127_v37 = vunpack.c.h.b16 %v16775_v57 }
 0x237   :  { %1986 = vmatpush.bf16.msrb.mxu1 %v7380_v11  ;;  %2075 = vmatpush.bf16.msrb.mxu2 %v7508_v55  ;;  %v10640_v23 = vpack.c.b16 %v1220_v52, %v1216_v20  ;;  %v7621_v11 = vld [vmem:[#allocation3 + $0x2f0] sm:$0xf0]  ;;  %v1224_v28 = vunpack.c.l.b16 %v16766_v34  ;;  %v16767_v20 = vpack.c.bf16 %v10131_v44, %v10131_v44  ;;  %v1122_v44 = vunpack.c.l.b16 %v16770_v31 }
 0x238   :  { %v7624_v55 = vor.u32 %v8447_v17, %v7621_v11  ;;  %v10675_v17 = vpack.c.b16 %v1137_v53, %v1133_v61  ;;  %v1126_v34 = vunpack.c.l.b16 %v16775_v57  ;;  %v1115_v61 = vunpack.c.h.b16 %v9384_v19  ;;  %v16793_v57 = vld [vmem:[#allocation74_spill] sm:$0xff] }
 0x239   :  { %1908 = vmatmul.bf16.gmra.mxu0 %v10625_v62  ;;  %16764 = vst [vmem:[#allocation315_spill] sm:$0xff] %v10640_v23  ;;  %2253 = vmatpush.bf16.msrb.mxu3 %v7256_v47  ;;  %v1228_v58 = vunpack.c.l.b16 %v16767_v20  ;;  %v1118_v47 = vunpack.c.l.b16 %v16769_v25  ;;  %v1134_v19 = vunpack.c.l.b16 %v16780_v24 }
 0x23a   :  { %1968 = vmatmul.bf16.gmra.mxu2 %v10627_v36  ;;  %1987 = vmatmul.bf16.vlgmr.msrb.gmra.mxu1 %v10629_v29  ;;  %16771 = vst [vmem:[#allocation29_spill] sm:$0xff] %v10675_v17 }
 0x23b   :  { %2520 = vmatpush.bf16.msra.mxu2 %v7640_v26  ;;  %2424 = vmatpush.bf16.msra.mxu1 %v7624_v55  ;;  %v10665_v52 = vpack.c.b16 %v1228_v58, %v1224_v28  ;;  %v1107_v26 = vunpack.c.h.b16 %v9322_v59  ;;  %v10677_v11 = vpack.c.b16 %v1122_v44, %v1118_v47  ;;  %v16774_v59 = vld [vmem:[#allocation56_spill] sm:$0xff]  ;;  %v16776_v28 = vld [vmem:[#allocation41_spill] sm:$0xff]  ;;  %v1111_v58 = vunpack.c.h.b16 %v9353_v6 }
 0x23c   :  { %v1145_v32 = vunpack.c.h.b16 %v16774_v59  ;;  %v1130_v20 = vunpack.c.l.b16 %v16776_v28  ;;  %v1153_v6 = vunpack.c.h.b16 %v16779_v15  ;;  %v1131_v15 = vunpack.c.h.b16 %v16776_v28 }
 0x23d   :  { %16768 = vst [vmem:[#allocation317_spill] sm:$0xff] %v10665_v52  ;;  %v10679_v55 = vpack.c.b16 %v1107_v26, %v1103_v43  ;;  %v10695_v44 = vpack.c.b16 %v1115_v61, %v1111_v58  ;;  %v16778_v43 = vld [vmem:[#allocation60_spill] sm:$0xff]  ;;  %v1165_v28 = vunpack.c.h.b16 %v16793_v57 }
 0x23e   :  { %7663 = vmatmul.msk.bf16.gmra.mxu3 %vm1841_vm0, %v10640_v23  ;;  %v10691_v53 = vpack.c.b16 %v1145_v32, %v1141_v0  ;;  %v10693_v47 = vpack.c.b16 %v1130_v20, %v1126_v34  ;;  %v1149_v26 = vunpack.c.h.b16 %v16778_v43  ;;  %v1119_v32 = vunpack.c.h.b16 %v16769_v25 }
 0x23f   :  { %16772 = vst [vmem:[#allocation33_spill] sm:$0xff] %v10679_v55  ;;  %2425 = vmatpush.bf16.msra.mxu1 %v7608_v41  ;;  %v16781_v41 = vld [vmem:[#allocation49_spill] sm:$0xff]  ;;  %v1123_v34 = vunpack.c.h.b16 %v16770_v31  ;;  %v16785_v31 = vld [vmem:[#allocation68_spill] sm:$0xff]  ;;  %v10729_v38 = vpack.c.b16 %v1131_v15, %v1127_v37  ;;  %v10773_v23 = vpack.c.b16 %v1177_v7, %v1173_v46 }
 0x240   :  { %16777 = vst [vmem:[#allocation37_spill] sm:$0xff] %v10691_v53  ;;  %v1138_v0 = vunpack.c.l.b16 %v16781_v41  ;;  %v10707_v20 = vpack.c.b16 %v1153_v6, %v1149_v26  ;;  %v1157_v26 = vunpack.c.h.b16 %v16785_v31  ;;  %v16786_v6 = vld [vmem:[#allocation71_spill] sm:$0xff]  ;;  %v16796_v37 = vld [vmem:[#allocation65_spill] sm:$0xff]  ;;  %v1139_v31 = vunpack.c.h.b16 %v16781_v41 }
 0x241   :  { %v10711_v61 = vpack.c.b16 %v1123_v34, %v1119_v32  ;;  %v16788_v34 = vld [vmem:[#allocation57_spill] sm:$0xff]  ;;  %v1154_v15 = vunpack.c.l.b16 %v16796_v37 }
 0x242   :  { %16782 = vst [vmem:[#allocation41_spill] sm:$0xff] %v10707_v20  ;;  %v10709_v58 = vpack.c.b16 %v1138_v0, %v1134_v19  ;;  %v1161_v19 = vunpack.c.h.b16 %v16786_v6  ;;  %v16787_v0 = vld [vmem:[#allocation53_spill] sm:$0xff]  ;;  %v1146_v9 = vunpack.c.l.b16 %v16788_v34  ;;  %v1135_v6 = vunpack.c.h.b16 %v16780_v24 }
 0x243   :  { %2426 = vmatpush.bf16.msra.mxu1 %v7592_v51  ;;  %v1142_v32 = vunpack.c.l.b16 %v16787_v0  ;;  %v8415_v24 = vld [vmem:[#allocation3 + $0x1e4] sm:$0xf]  ;;  %v1147_v5 = vunpack.c.h.b16 %v16788_v34 }
 0x244   :  { %16783 = vst [vmem:[#allocation45_spill] sm:$0xff] %v10709_v58  ;;  %v10725_v43 = vpack.c.b16 %v1161_v19, %v1157_v26  ;;  %v16794_v26 = vld [vmem:[#allocation77_spill] sm:$0xff]  ;;  %v10749_v3 = vpack.c.b16 %v1139_v31, %v1135_v6 }
 0x245   :  { %v10727_v59 = vpack.c.b16 %v1146_v9, %v1142_v32  ;;  %v1169_v19 = vunpack.c.h.b16 %v16794_v26  ;;  %v16795_v9 = vld [vmem:[#allocation61_spill] sm:$0xff]  ;;  %v7493_v26 = vld [vmem:[#allocation3 + $0x1f0] sm:$0xf0] }
 0x246   :  { %16789 = vst [vmem:[#allocation53_spill] sm:$0xff] %v10725_v43  ;;  %v1150_v32 = vunpack.c.l.b16 %v16795_v9  ;;  %v7496_v41 = vor.u32 %v8415_v24, %v7493_v26  ;;  %v8435_v6 = vld [vmem:[#allocation3 + $0x284] sm:$0xf]  ;;  %v1158_v26 = vunpack.c.l.b16 %v16804_v30  ;;  %v16805_v24 = vld [vmem:[#allocation72_spill] sm:$0xff] }
 0x247   :  { %16790 = vst [vmem:[#allocation57_spill] sm:$0xff] %v10727_v59  ;;  %v1162_v18 = vunpack.c.l.b16 %v16805_v24 }
 0x248   :  { %2335 = vmatpush.bf16.msra.mxu0 %v7496_v41  ;;  %v1143_v41 = vunpack.c.h.b16 %v16787_v0  ;;  %16807 = vst [vmem:[#allocation72_spill] sm:$0xff] %v10773_v23 }
 0x249   :  { %1913 = vmatmul.bf16.gmra.mxu0 %v10650_v33 }
 0x24a   :  { %1973 = vmatmul.bf16.gmra.mxu2 %v10652_v60  ;;  %1992 = vmatmul.bf16.gmra.mxu1 %v10654_v10 }
 0x24e   :  { %7664 = vmatmul.msk.bf16.gmra.mxu3 %vm1841_vm0, %v10665_v52 }
 0x259   :  { %1918 = vmatmul.bf16.gmra.mxu0 %v10675_v17 }
 0x25a   :  { %1997 = vmatmul.bf16.gmra.mxu1 %v10677_v11  ;;  %2076 = vmatmul.bf16.vlgmr.msrb.gmra.mxu2 %v10679_v55 }
 0x25e   :  { %2254 = vmatmul.bf16.vlgmr.msrb.gmra.mxu3 %v10574_v45 }
 0x269   :  { %1923 = vmatmul.bf16.gmra.mxu0 %v10691_v53 }
 0x26a   :  { %2002 = vmatmul.bf16.gmra.mxu1 %v10693_v47  ;;  %2081 = vmatmul.bf16.gmra.mxu2 %v10695_v44 }
 0x26e   :  { %2259 = vmatmul.bf16.gmra.mxu3 %v10600_v12 }
 0x279   :  { %1928 = vmatmul.bf16.gmra.mxu0 %v10707_v20 }
 0x27a   :  { %2007 = vmatmul.bf16.gmra.mxu1 %v10709_v58  ;;  %2086 = vmatmul.bf16.gmra.mxu2 %v10711_v61 }
 0x27e   :  { %2264 = vmatmul.bf16.gmra.mxu3 %v10625_v62 }
 0x281   :  { %v10717_v25 = vpop.f32.mrf.mxu3 }
 0x282   :  { %16784 = vst [vmem:[#allocation49_spill] sm:$0xff] %v10717_v25  ;;  %v10747_v25 = vpack.c.b16 %v1154_v15, %v1150_v32 }
 0x284   :  { %16798 = vst [vmem:[#allocation65_spill] sm:$0xff] %v10747_v25 }
 0x289   :  { %v10731_v1 = vpop.f32.mrf.mxu3  ;;  %1933 = vmatmul.bf16.gmra.mxu0 %v10725_v43 }
 0x28a   :  { %16791 = vst [vmem:[#allocation318_spill] sm:$0xff] %v10731_v1  ;;  %2012 = vmatmul.bf16.gmra.mxu1 %v10727_v59  ;;  %2091 = vmatmul.bf16.gmra.mxu2 %v10729_v38  ;;  %v10745_v1 = vpack.c.b16 %v1169_v19, %v1165_v28  ;;  %v7573_v19 = vld [vmem:[#allocation3 + $0x290] sm:$0xf0]  ;;  %v16820_v59 = vld [vmem:[#allocation78_spill] sm:$0xff] }
 0x28b   :  { %v7576_v15 = vor.u32 %v8435_v6, %v7573_v19  ;;  %v10775_v19 = vpack.c.b16 %v1162_v18, %v1158_v26  ;;  %v8411_v18 = vld [vmem:[#allocation3 + $0x1c4] sm:$0xf] }
 0x28c   :  { %16797 = vst [vmem:[#allocation61_spill] sm:$0xff] %v10745_v1  ;;  %v16815_v26 = vld [vmem:[#allocation9_spill] sm:$0xff] }
 0x28d   :  { %2427 = vmatpush.bf16.msra.mxu1 %v7576_v15  ;;  %16808 = vst [vmem:[#allocation323_spill] sm:$0xff] %v10775_v19 }
 0x28e   :  { %2269 = vmatmul.bf16.gmra.mxu3 %v10650_v33 }
 0x291   :  { %v10737_v51 = vpop.f32.mrf.mxu3 }
 0x292   :  { %16792 = vst [vmem:[#allocation319_spill] sm:$0xff] %v10737_v51 }
 0x296   :  { %v1899_v48 = vpop.f32.mrf.mxu0 }
 0x297   :  { %v10751_v51 = vpop.f32.mrf.mxu1 }
 0x299   :  { %v10753_v57 = vpop.f32.mrf.mxu3  ;;  %1938 = vmatmul.bf16.gmra.mxu0 %v10745_v1 }
 0x29a   :  { %16799 = vst [vmem:[#allocation320_spill] sm:$0xff] %v10753_v57  ;;  %2017 = vmatmul.bf16.gmra.mxu1 %v10747_v25  ;;  %2096 = vmatmul.bf16.gmra.mxu2 %v10749_v3  ;;  %v16819_v25 = vld [vmem:[#allocation75_spill] sm:$0xff] }
 0x29d   :  { %v10758_v28 = vpop.f32.mrf.mxu2 }
 0x29e   :  { %16800 = vst [vmem:[#allocation321_spill] sm:$0xff] %v10758_v28  ;;  %2274 = vmatmul.bf16.gmra.mxu3 %v10675_v17  ;;  %v1901_v31 = vpop.f32.mrf.mxu0  ;;  %v1155_v17 = vunpack.c.h.b16 %v16796_v37 }
 0x29f   :  { %v10761_v32 = vpop.f32.mrf.mxu1 }
 0x2a1   :  { %v10763_v57 = vpop.f32.mrf.mxu3 }
 0x2a2   :  { %16801 = vst [vmem:[#allocation322_spill] sm:$0xff] %v10763_v57  ;;  %v10777_v57 = vpack.c.b16 %v1147_v5, %v1143_v41  ;;  %v7477_v5 = vld [vmem:[#allocation3 + $0x1d0] sm:$0xf0]  ;;  %v16816_v41 = vpack.c.bf16 %v16815_v26, %v16815_v26 }
 0x2a4   :  { %16809 = vst [vmem:[#allocation324_spill] sm:$0xff] %v10777_v57  ;;  %v1104_v16 = vunpack.c.l.b16 %v16816_v41 }
 0x2a5   :  { %v10771_v52 = vpop.f32.mrf.mxu2 }
 0x2a6   :  { %16806 = vst [vmem:[#allocation69_spill] sm:$0xff] %v10771_v52  ;;  %v1904_v6 = vpop.f32.mrf.mxu0  ;;  %v1151_v52 = vunpack.c.h.b16 %v16795_v9 }
 0x2a7   :  { %v10779_v56 = vpop.f32.mrf.mxu1 }
 0x2a8   :  { %16810 = vst [vmem:[#allocation325_spill] sm:$0xff] %v10779_v56  ;;  %v10809_v58 = vpack.c.b16 %v1155_v17, %v1151_v52  ;;  %v7557_v52 = vld [vmem:[#allocation3 + $0x270] sm:$0xf0] }
 0x2a9   :  { %v10781_v15 = vpop.f32.mrf.mxu3  ;;  %1943 = vmatmul.bf16.gmra.mxu0 %v10773_v23 }
 0x2aa   :  { %16811 = vst [vmem:[#allocation326_spill] sm:$0xff] %v10781_v15  ;;  %2022 = vmatmul.bf16.gmra.mxu1 %v10775_v19  ;;  %2101 = vmatmul.bf16.gmra.mxu2 %v10777_v57  ;;  %v16817_v15 = vld [vmem:[#allocation10_spill] sm:$0xff]  ;;  %v7480_v19 = vor.u32 %v8411_v18, %v7477_v5  ;;  %v16829_v5 = vld [vmem:[#allocation11_spill] sm:$0xff] }
 0x2ab   :  { %v16818_v8 = vpack.c.bf16 %v16817_v15, %v16817_v15  ;;  %16824 = vst [vmem:[#allocation78_spill] sm:$0xff] %v10809_v58 }
 0x2ac   :  { %2336 = vmatpush.bf16.msra.mxu0 %v7480_v19  ;;  %v16828_v19 = vld [vmem:[#allocation81_spill] sm:$0xff] }
 0x2ad   :  { %v10786_v0 = vpop.f32.mrf.mxu2  ;;  %v1108_v50 = vunpack.c.l.b16 %v16818_v8 }
 0x2ae   :  { %16812 = vst [vmem:[#allocation327_spill] sm:$0xff] %v10786_v0  ;;  %2279 = vmatmul.bf16.gmra.mxu3 %v10691_v53  ;;  %v1906_v46 = vpop.f32.mrf.mxu0  ;;  %v1166_v0 = vunpack.c.l.b16 %v16819_v25  ;;  %v1170_v53 = vunpack.c.l.b16 %v16820_v59 }
 0x2af   :  { %v10789_v7 = vpop.f32.mrf.mxu1 }
 0x2b0   :  { %16813 = vst [vmem:[#allocation328_spill] sm:$0xff] %v10789_v7  ;;  %v10807_v41 = vpack.c.b16 %v1170_v53, %v1166_v0  ;;  %v1174_v0 = vunpack.c.l.b16 %v16828_v19  ;;  %v16833_v7 = vld [vmem:[#allocation84_spill] sm:$0xff] }
 0x2b1   :  { %v10791_v34 = vpop.f32.mrf.mxu3  ;;  %v1178_v33 = vunpack.c.l.b16 %v16833_v7 }
 0x2b2   :  { %16814 = vst [vmem:[#allocation329_spill] sm:$0xff] %v10791_v34  ;;  %v10805_v34 = vpack.c.b16 %v1108_v50, %v1104_v16  ;;  %v8431_v50 = vld [vmem:[#allocation3 + $0x264] sm:$0xf] }
 0x2b3   :  { %16823 = vst [vmem:[#allocation75_spill] sm:$0xff] %v10807_v41 }
 0x2b4   :  { %16822 = vst [vmem:[#allocation10_spill] sm:$0xff] %v10805_v34 }
 0x2b5   :  { %v10803_v28 = vpop.f32.mrf.mxu2 }
 0x2b6   :  { %16821 = vst [vmem:[#allocation9_spill] sm:$0xff] %v10803_v28  ;;  %v1909_v26 = vpop.f32.mrf.mxu0  ;;  %v8407_v28 = vld [vmem:[#allocation3 + $0x1a4] sm:$0xf] }
 0x2b7   :  { %v1988_v8 = vpop.f32.mrf.mxu1 }
 0x2b8   :  { %v10811_v15 = vadd.f32 %v1988_v8, %v1899_v48  ;;  %v7560_v48 = vor.u32 %v8431_v50, %v7557_v52  ;;  %v16830_v8 = vpack.c.bf16 %v16829_v5, %v16829_v5  ;;  %v1163_v50 = vunpack.c.h.b16 %v16805_v24  ;;  %v16840_v24 = vld [vmem:[#allocation13_spill] sm:$0xff] }
 0x2b9   :  { %v10813_v18 = vpop.f32.mrf.mxu3  ;;  %7649 = vmatmul.msk.bf16.vlgmr.msrb.gmra.mxu0 %vm1841_vm0, %v10805_v34 }
 0x2ba   :  { %16825 = vst [vmem:[#allocation330_spill] sm:$0xff] %v10813_v18  ;;  %2027 = vmatmul.bf16.gmra.mxu1 %v10807_v41  ;;  %2106 = vmatmul.bf16.gmra.mxu2 %v10809_v58  ;;  %v1112_v18 = vunpack.c.l.b16 %v16830_v8  ;;  %v16831_v41 = vld [vmem:[#allocation12_spill] sm:$0xff]  ;;  %v7461_v58 = vld [vmem:[#allocation3 + $0x1b0] sm:$0xf0]  ;;  %v10842_v8 = vpack.c.b16 %v1178_v33, %v1174_v0  ;;  %v16842_v0 = vld [vmem:[#allocation14_spill] sm:$0xff] }
 0x2bb   :  { %2428 = vmatpush.bf16.msra.mxu1 %v7560_v48  ;;  %v7464_v52 = vor.u32 %v8407_v28, %v7461_v58 }
 0x2bc   :  { %16835 = vst [vmem:[#allocation11_spill] sm:$0xff] %v10842_v8 }
 0x2bd   :  { %v10819_v9 = vpop.f32.mrf.mxu2  ;;  %2337 = vmatpush.bf16.msra.mxu0 %v7464_v52  ;;  %v16844_v52 = vld [vmem:[#allocation87_spill] sm:$0xff] }
 0x2be   :  { %16826 = vst [vmem:[#allocation331_spill] sm:$0xff] %v10819_v9  ;;  %2284 = vmatmul.bf16.gmra.mxu3 %v10707_v20  ;;  %v10822_v16 = vpop.f32.mrf.mxu0  ;;  %v16832_v9 = vpack.c.bf16 %v16831_v41, %v16831_v41 }
 0x2bf   :  { %v1990_v17 = vpop.f32.mrf.mxu1 }
 0x2c0   :  { %v10824_v53 = vadd.f32 %v1990_v17, %v1901_v31  ;;  %v1116_v20 = vunpack.c.l.b16 %v16832_v9  ;;  %v1159_v31 = vunpack.c.h.b16 %v16804_v30 }
 0x2c1   :  { %v10826_v37 = vpop.f32.mrf.mxu3 }
 0x2c2   :  { %16827 = vst [vmem:[#allocation332_spill] sm:$0xff] %v10826_v37  ;;  %v10840_v37 = vpack.c.b16 %v1116_v20, %v1112_v18  ;;  %v10844_v41 = vpack.c.b16 %v1163_v50, %v1159_v31  ;;  %v16843_v31 = vpack.c.bf16 %v16842_v0, %v16842_v0 }
 0x2c4   :  { %16836 = vst [vmem:[#allocation12_spill] sm:$0xff] %v10844_v41  ;;  %v1124_v50 = vunpack.c.l.b16 %v16843_v31 }
 0x2c5   :  { %v10838_v17 = vpop.f32.mrf.mxu2 }
 0x2c6   :  { %16834 = vst [vmem:[#allocation81_spill] sm:$0xff] %v10838_v17  ;;  %v1914_v5 = vpop.f32.mrf.mxu0  ;;  %v8403_v17 = vld [vmem:[#allocation3 + $0x184] sm:$0xf] }
 0x2c7   :  { %v1993_v9 = vpop.f32.mrf.mxu1 }
 0x2c8   :  { %v10846_v48 = vadd.f32 %v1993_v9, %v1904_v6  ;;  %v16841_v6 = vpack.c.bf16 %v16840_v24, %v16840_v24  ;;  %v1182_v9 = vunpack.c.l.b16 %v16844_v52 }
 0x2c9   :  { %v10848_v56 = vpop.f32.mrf.mxu3  ;;  %7650 = vmatmul.msk.bf16.gmra.mxu0 %vm1841_vm0, %v10840_v37 }
 0x2ca   :  { %16837 = vst [vmem:[#allocation84_spill] sm:$0xff] %v10848_v56  ;;  %2032 = vmatmul.bf16.gmra.mxu1 %v10842_v8  ;;  %2111 = vmatmul.bf16.gmra.mxu2 %v10844_v41  ;;  %v1120_v18 = vunpack.c.l.b16 %v16841_v6  ;;  %v16845_v56 = vld [vmem:[#allocation90_spill] sm:$0xff]  ;;  %v7445_v41 = vld [vmem:[#allocation3 + $0x190] sm:$0xf0] }
 0x2cb   :  { %v1186_v8 = vunpack.c.l.b16 %v16845_v56 }
 0x2cd   :  { %v10854_v30 = vpop.f32.mrf.mxu2  ;;  %v10879_v24 = vpack.c.b16 %v1186_v8, %v1182_v9  ;;  %v8427_v8 = vld [vmem:[#allocation3 + $0x244] sm:$0xf] }
 0x2ce   :  { %16838 = vst [vmem:[#allocation333_spill] sm:$0xff] %v10854_v30  ;;  %2289 = vmatmul.bf16.gmra.mxu3 %v10725_v43  ;;  %v10857_v33 = vpop.f32.mrf.mxu0  ;;  %v1167_v43 = vunpack.c.h.b16 %v16819_v25  ;;  %v1171_v30 = vunpack.c.h.b16 %v16820_v59  ;;  %v7448_v59 = vor.u32 %v8403_v17, %v7445_v41  ;;  %v16852_v41 = vld [vmem:[#allocation17_spill] sm:$0xff] }
 0x2cf   :  { %v1995_v20 = vpop.f32.mrf.mxu1  ;;  %16848 = vst [vmem:[#allocation87_spill] sm:$0xff] %v10879_v24 }
 0x2d0   :  { %v10859_v58 = vadd.f32 %v1995_v20, %v1906_v46  ;;  %v10875_v20 = vpack.c.b16 %v1124_v50, %v1120_v18  ;;  %v10881_v6 = vpack.c.b16 %v1171_v30, %v1167_v43  ;;  %2338 = vmatpush.bf16.msra.mxu0 %v7448_v59  ;;  %v7541_v30 = vld [vmem:[#allocation3 + $0x250] sm:$0xf0] }
 0x2d1   :  { %v10861_v28 = vpop.f32.mrf.mxu3  ;;  %v7544_v50 = vor.u32 %v8427_v8, %v7541_v30  ;;  %v1175_v8 = vunpack.c.h.b16 %v16828_v19 }
 0x2d2   :  { %16839 = vst [vmem:[#allocation334_spill] sm:$0xff] %v10861_v28 }
 0x2d3   :  { %16847 = vst [vmem:[#allocation14_spill] sm:$0xff] %v10875_v20  ;;  %2429 = vmatpush.bf16.msra.mxu1 %v7544_v50 }
 0x2d4   :  { %16849 = vst [vmem:[#allocation90_spill] sm:$0xff] %v10881_v6 }
 0x2d5   :  { %v10873_v46 = vpop.f32.mrf.mxu2 }
 0x2d6   :  { %16846 = vst [vmem:[#allocation13_spill] sm:$0xff] %v10873_v46  ;;  %v10877_v28 = vpop.f32.mrf.mxu0 }
 0x2d7   :  { %v1998_v0 = vpop.f32.mrf.mxu1 }
 0x2d8   :  { %v10883_v31 = vadd.f32 %v1998_v0, %v1909_v26  ;;  %v16853_v0 = vpack.c.bf16 %v16852_v41, %v16852_v41 }
 0x2d9   :  { %v10885_v57 = vpop.f32.mrf.mxu3  ;;  %7651 = vmatmul.msk.bf16.gmra.mxu0 %vm1841_vm0, %v10875_v20 }
 0x2da   :  { %16850 = vst [vmem:[#allocation335_spill] sm:$0xff] %v10885_v57  ;;  %2037 = vmatmul.bf16.gmra.mxu1 %v10879_v24  ;;  %2116 = vmatmul.bf16.gmra.mxu2 %v10881_v6  ;;  %v1128_v59 = vunpack.c.l.b16 %v16853_v0  ;;  %v16854_v57 = vld [vmem:[#allocation20_spill] sm:$0xff]  ;;  %v1190_v24 = vunpack.c.l.b16 %v9965_v22  ;;  %v1206_v6 = vunpack.c.l.b16 %v10037_v35 }
 0x2dd   :  { %v2077_v25 = vpop.f32.mrf.mxu2 }
 0x2de   :  { %v10892_v43 = vadd.f32 %v2077_v25, %v10811_v15  ;;  %2294 = vmatmul.bf16.gmra.mxu3 %v10745_v1  ;;  %v10895_v26 = vpop.f32.mrf.mxu0  ;;  %v16855_v15 = vpack.c.bf16 %v16854_v57, %v16854_v57  ;;  %v1194_v1 = vunpack.c.l.b16 %v9984_v2 }
 0x2df   :  { %v2000_v18 = vpop.f32.mrf.mxu1 }
 0x2e0   :  { %v10898_v9 = vadd.f32 %v2000_v18, %v10822_v16  ;;  %v1132_v25 = vunpack.c.l.b16 %v16855_v15  ;;  %v1179_v16 = vunpack.c.h.b16 %v16833_v7  ;;  %v10919_v0 = vpack.c.b16 %v1194_v1, %v1190_v24  ;;  %v8399_v7 = vld [vmem:[#allocation3 + $0x164] sm:$0xf] }
 0x2e1   :  { %v10900_v17 = vpop.f32.mrf.mxu3 }
 0x2e2   :  { %16851 = vst [vmem:[#allocation336_spill] sm:$0xff] %v10900_v17  ;;  %v10912_v18 = vpack.c.b16 %v1132_v25, %v1128_v59  ;;  %v10921_v57 = vpack.c.b16 %v1179_v16, %v1175_v8  ;;  %v16861_v16 = vld [vmem:[#allocation23_spill] sm:$0xff] }
 0x2e3   :  { %16857 = vst [vmem:[#allocation20_spill] sm:$0xff] %v10919_v0 }
 0x2e4   :  { %16856 = vst [vmem:[#allocation17_spill] sm:$0xff] %v10912_v18 }
 0x2e5   :  { %v2079_v30 = vpop.f32.mrf.mxu2  ;;  %16858 = vst [vmem:[#allocation337_spill] sm:$0xff] %v10921_v57 }
 0x2e6   :  { %v10915_v17 = vadd.f32 %v2079_v30, %v10824_v53  ;;  %v10917_v41 = vpop.f32.mrf.mxu0  ;;  %v7429_v53 = vld [vmem:[#allocation3 + $0x170] sm:$0xf0]  ;;  %v16862_v30 = vpack.c.bf16 %v16861_v16, %v16861_v16 }
 0x2e7   :  { %v2003_v50 = vpop.f32.mrf.mxu1  ;;  %v7432_v19 = vor.u32 %v8399_v7, %v7429_v53 }
 0x2e8   :  { %v10923_v15 = vadd.f32 %v2003_v50, %v1914_v5  ;;  %v1136_v50 = vunpack.c.l.b16 %v16862_v30 }
 0x2e9   :  { %v10925_v46 = vpop.f32.mrf.mxu3  ;;  %7652 = vmatmul.msk.bf16.gmra.mxu0 %vm1841_vm0, %v10912_v18 }
 0x2ea   :  { %16859 = vst [vmem:[#allocation338_spill] sm:$0xff] %v10925_v46  ;;  %2042 = vmatmul.bf16.gmra.mxu1 %v10919_v0  ;;  %2121 = vmatmul.bf16.gmra.mxu2 %v10921_v57  ;;  %v16863_v0 = vld [vmem:[#allocation26_spill] sm:$0xff] }
 0x2eb   :  { %2339 = vmatpush.bf16.msra.mxu0 %v7432_v19  ;;  %v16864_v7 = vpack.c.bf16 %v16863_v0, %v16863_v0  ;;  %v1202_v19 = vunpack.c.l.b16 %v10020_v27 }
 0x2ed   :  { %v2082_v59 = vpop.f32.mrf.mxu2  ;;  %v1140_v53 = vunpack.c.l.b16 %v16864_v7 }
 0x2ee   :  { %v10932_v1 = vadd.f32 %v2082_v59, %v10846_v48  ;;  %2299 = vmatmul.bf16.gmra.mxu3 %v10773_v23  ;;  %v1926_v5 = vpop.f32.mrf.mxu0  ;;  %v1198_v48 = vunpack.c.l.b16 %v10001_v14  ;;  %v1183_v59 = vunpack.c.h.b16 %v16844_v52  ;;  %v1187_v23 = vunpack.c.h.b16 %v16845_v56  ;;  %v8423_v52 = vld [vmem:[#allocation3 + $0x224] sm:$0xf] }
 0x2ef   :  { %v2005_v24 = vpop.f32.mrf.mxu1 }
 0x2f0   :  { %v10936_v25 = vadd.f32 %v2005_v24, %v10857_v33  ;;  %v10950_v24 = vpack.c.b16 %v1140_v53, %v1136_v50  ;;  %v10957_v30 = vpack.c.b16 %v1202_v19, %v1198_v48  ;;  %v10959_v0 = vpack.c.b16 %v1187_v23, %v1183_v59  ;;  %v8395_v19 = vld [vmem:[#allocation3 + $0x144] sm:$0xf]  ;;  %v7413_v59 = vld [vmem:[#allocation3 + $0x150] sm:$0xf0] }
 0x2f1   :  { %v10938_v8 = vpop.f32.mrf.mxu3 }
 0x2f2   :  { %16860 = vst [vmem:[#allocation339_spill] sm:$0xff] %v10938_v8 }
 0x2f3   :  { %16865 = vst [vmem:[#allocation23_spill] sm:$0xff] %v10950_v24 }
 0x2f4   :  { %16866 = vst [vmem:[#allocation26_spill] sm:$0xff] %v10957_v30 }
 0x2f5   :  { %v2084_v33 = vpop.f32.mrf.mxu2  ;;  %16867 = vst [vmem:[#allocation340_spill] sm:$0xff] %v10959_v0 }
 0x2f6   :  { %v10953_v8 = vadd.f32 %v2084_v33, %v10859_v58  ;;  %v10955_v16 = vpop.f32.mrf.mxu0 }
 0x2f7   :  { %v2008_v7 = vpop.f32.mrf.mxu1 }
 0x2f8   :  { %v10962_v46 = vadd.f32 %v2008_v7, %v10877_v28  ;;  %v7525_v28 = vld [vmem:[#allocation3 + $0x230] sm:$0xf0]  ;;  %v16870_v7 = vld [vmem:[#allocation30_spill] sm:$0xff] }
 0x2f9   :  { %v10964_v57 = vpop.f32.mrf.mxu3  ;;  %7653 = vmatmul.msk.bf16.gmra.mxu0 %vm1841_vm0, %v10950_v24  ;;  %v7528_v53 = vor.u32 %v8423_v52, %v7525_v28  ;;  %v1210_v52 = vunpack.c.l.b16 %v10054_v42  ;;  %v1195_v28 = vunpack.c.h.b16 %v9984_v2 }
 0x2fa   :  { %16868 = vst [vmem:[#allocation341_spill] sm:$0xff] %v10964_v57  ;;  %2047 = vmatmul.bf16.gmra.mxu1 %v10957_v30  ;;  %2126 = vmatmul.bf16.gmra.mxu2 %v10959_v0  ;;  %v16871_v30 = vpack.c.bf16 %v16870_v7, %v16870_v7  ;;  %v7416_v0 = vor.u32 %v8395_v19, %v7413_v59 }
 0x2fb   :  { %2430 = vmatpush.bf16.msra.mxu1 %v7528_v53 }
 0x2fc   :  { %2340 = vmatpush.bf16.msra.mxu0 %v7416_v0 }
 0x2fd   :  { %v2087_v56 = vpop.f32.mrf.mxu2 }
 0x2fe   :  { %v10971_v58 = vadd.f32 %v2087_v56, %v10883_v31  ;;  %2304 = vmatmul.bf16.gmra.mxu3 %v10576_v40  ;;  %v10974_v23 = vpop.f32.mrf.mxu0  ;;  %v1144_v31 = vunpack.c.l.b16 %v16871_v30  ;;  %v16872_v56 = vld [vmem:[#allocation34_spill] sm:$0xff] }
 0x2ff   :  { %v2010_v50 = vpop.f32.mrf.mxu1  ;;  %v16873_v40 = vpack.c.bf16 %v16872_v56, %v16872_v56  ;;  %v16879_v56 = vld [vmem:[#allocation38_spill] sm:$0xff] }
 0x300   :  { %v10977_v48 = vadd.f32 %v2010_v50, %v10895_v26  ;;  %v1191_v26 = vunpack.c.h.b16 %v9965_v22 }
 0x301   :  { %v10979_v33 = vpop.f32.mrf.mxu3  ;;  %v1148_v57 = vunpack.c.l.b16 %v16873_v40  ;;  %v10998_v40 = vpack.c.b16 %v1210_v52, %v1206_v6  ;;  %v16880_v52 = vpack.c.bf16 %v16879_v56, %v16879_v56 }
 0x302   :  { %16869 = vst [vmem:[#allocation342_spill] sm:$0xff] %v10979_v33  ;;  %v11000_v53 = vpack.c.b16 %v1195_v28, %v1191_v26  ;;  %v16881_v28 = vld [vmem:[#allocation42_spill] sm:$0xff] }
 0x303   :  { %v10991_v33 = vpack.c.b16 %v1148_v57, %v1144_v31  ;;  %16875 = vst [vmem:[#allocation34_spill] sm:$0xff] %v10998_v40  ;;  %v1214_v31 = vunpack.c.l.b16 %v10073_v54  ;;  %v1152_v26 = vunpack.c.l.b16 %v16880_v52 }
 0x304   :  { %16876 = vst [vmem:[#allocation343_spill] sm:$0xff] %v11000_v53 }
 0x305   :  { %v2089_v50 = vpop.f32.mrf.mxu2  ;;  %16874 = vst [vmem:[#allocation30_spill] sm:$0xff] %v10991_v33 }
 0x306   :  { %v10994_v30 = vadd.f32 %v2089_v50, %v10898_v9  ;;  %v10996_v7 = vpop.f32.mrf.mxu0  ;;  %v16882_v50 = vpack.c.bf16 %v16881_v28, %v16881_v28 }
 0x307   :  { %v2013_v19 = vpop.f32.mrf.mxu1 }
 0x308   :  { %v11003_v59 = vadd.f32 %v2013_v19, %v10917_v41  ;;  %v8391_v19 = vld [vmem:[#allocation3 + $0x124] sm:$0xf] }
 0x309   :  { %v11005_v22 = vpop.f32.mrf.mxu3  ;;  %7654 = vmatmul.msk.bf16.gmra.mxu0 %vm1841_vm0, %v10991_v33 }
 0x30a   :  { %16877 = vst [vmem:[#allocation344_spill] sm:$0xff] %v11005_v22  ;;  %2052 = vmatmul.bf16.gmra.mxu1 %v10998_v40  ;;  %2131 = vmatmul.bf16.gmra.mxu2 %v11000_v53  ;;  %v1218_v40 = vunpack.c.l.b16 %v10090_v49  ;;  %v7509_v22 = vld [vmem:[#allocation3 + $0x210] sm:$0xf0] }
 0x30d   :  { %v2092_v2 = vpop.f32.mrf.mxu2 }
 0x30e   :  { %v11012_v9 = vadd.f32 %v2092_v2, %v10923_v15  ;;  %2309 = vmatmul.bf16.gmra.mxu3 %v10602_v63  ;;  %v11015_v6 = vpop.f32.mrf.mxu0  ;;  %v1156_v15 = vunpack.c.l.b16 %v16882_v50  ;;  %v7397_v2 = vld [vmem:[#allocation3 + $0x130] sm:$0xf0]  ;;  %v1199_v63 = vunpack.c.h.b16 %v10001_v14  ;;  %v11038_v50 = vpack.c.b16 %v1218_v40, %v1214_v31 }
 0x30f   :  { %v2015_v57 = vpop.f32.mrf.mxu1 }
 0x310   :  { %v11017_v41 = vadd.f32 %v2015_v57, %v1926_v5  ;;  %v1203_v5 = vunpack.c.h.b16 %v10020_v27  ;;  %v7400_v57 = vor.u32 %v8391_v19, %v7397_v2  ;;  %v11031_v33 = vpack.c.b16 %v1156_v15, %v1152_v26  ;;  %16884 = vst [vmem:[#allocation42_spill] sm:$0xff] %v11038_v50  ;;  %v7355_v26 = vld [vmem:[#allocation3 + $0xc8] sm:$0xf]  ;;  %v8382_v15 = vld [vmem:[#allocation3 + $0xd4] sm:$0xf0] }
 0x311   :  { %v11019_v0 = vpop.f32.mrf.mxu3 }
 0x312   :  { %16878 = vst [vmem:[#allocation345_spill] sm:$0xff] %v11019_v0  ;;  %2341 = vmatpush.bf16.msra.mxu0 %v7400_v57  ;;  %v8419_v0 = vld [vmem:[#allocation3 + $0x204] sm:$0xf]  ;;  %v11040_v24 = vpack.c.b16 %v1203_v5, %v1199_v63  ;;  %v16888_v5 = vld [vmem:[#allocation46_spill] sm:$0xff] }
 0x313   :  { %16883 = vst [vmem:[#allocation38_spill] sm:$0xff] %v11031_v33  ;;  %v7512_v56 = vor.u32 %v8419_v0, %v7509_v22  ;;  %v16889_v57 = vpack.c.bf16 %v16888_v5, %v16888_v5 }
 0x314   :  { %16885 = vst [vmem:[#allocation346_spill] sm:$0xff] %v11040_v24 }
 0x315   :  { %v2094_v53 = vpop.f32.mrf.mxu2  ;;  %2431 = vmatpush.bf16.msra.mxu1 %v7512_v56  ;;  %v1160_v56 = vunpack.c.l.b16 %v16889_v57 }
 0x316   :  { %v11034_v52 = vadd.f32 %v2094_v53, %v10936_v25  ;;  %v11036_v28 = vpop.f32.mrf.mxu0  ;;  %v7371_v25 = vld [vmem:[#allocation3 + $0xe8] sm:$0xf]  ;;  %v8386_v53 = vld [vmem:[#allocation3 + $0xf4] sm:$0xf0] }
 0x317   :  { %v2018_v14 = vpop.f32.mrf.mxu1  ;;  %v7372_v22 = vor.u32 %v8386_v53, %v7371_v25  ;;  %v7356_v53 = vor.u32 %v8382_v15, %v7355_v26 }
 0x318   :  { %v11043_v27 = vadd.f32 %v2018_v14, %v10955_v16  ;;  %v16890_v14 = vld [vmem:[#allocation50_spill] sm:$0xff] }
 0x319   :  { %v11045_v19 = vpop.f32.mrf.mxu3  ;;  %7655 = vmatmul.msk.bf16.gmra.mxu0 %vm1841_vm0, %v11031_v33  ;;  %2602 = vmatpush.bf16.msra.mxu3 %v7372_v22  ;;  %v1226_v22 = vunpack.c.l.b16 %v10137_v4 }
 0x31a   :  { %16886 = vst [vmem:[#allocation347_spill] sm:$0xff] %v11045_v19  ;;  %2057 = vmatmul.bf16.gmra.mxu1 %v11038_v50  ;;  %2136 = vmatmul.bf16.gmra.mxu2 %v11040_v24  ;;  %v7339_v50 = vld [vmem:[#allocation3 + $0xa8] sm:$0xf] }
 0x31b   :  { %v7323_v24 = vld [vmem:[#allocation3 + $0x88] sm:$0xf] }
 0x31d   :  { %v2097_v40 = vpop.f32.mrf.mxu2  ;;  %2603 = vmatpush.bf16.msra.mxu3 %v7356_v53  ;;  %v7381_v53 = vld [vmem:[#allocation3 + $0x110] sm:$0xf0] }
 0x31e   :  { %v11052_v63 = vadd.f32 %v2097_v40, %v10962_v46  ;;  %2314 = vmatmul.bf16.gmra.mxu3 %v10578_v39  ;;  %v11055_v16 = vpop.f32.mrf.mxu0  ;;  %v16891_v46 = vpack.c.bf16 %v16890_v14, %v16890_v14  ;;  %v1222_v40 = vunpack.c.l.b16 %v10118_v13  ;;  %v8378_v39 = vld [vmem:[#allocation3 + $0xb4] sm:$0xf0] }
 0x31f   :  { %v2020_v0 = vpop.f32.mrf.mxu1  ;;  %v7340_v5 = vor.u32 %v8378_v39, %v7339_v50 }
 0x320   :  { %v11058_v31 = vadd.f32 %v2020_v0, %v10974_v23  ;;  %v1164_v25 = vunpack.c.l.b16 %v16891_v46  ;;  %v1207_v23 = vunpack.c.h.b16 %v10037_v35  ;;  %v1211_v0 = vunpack.c.h.b16 %v10054_v42  ;;  %v8387_v42 = vld [vmem:[#allocation3 + $0x104] sm:$0xf] }
 0x321   :  { %v11060_v2 = vpop.f32.mrf.mxu3  ;;  %v11079_v26 = vpack.c.b16 %v1226_v22, %v1222_v40  ;;  %2604 = vmatpush.bf16.msra.mxu3 %v7340_v5  ;;  %v7384_v39 = vor.u32 %v8387_v42, %v7381_v53  ;;  %v16897_v53 = vld [vmem:[#allocation54_spill] sm:$0xff] }
 0x322   :  { %16887 = vst [vmem:[#allocation348_spill] sm:$0xff] %v11060_v2  ;;  %v11072_v19 = vpack.c.b16 %v1164_v25, %v1160_v56  ;;  %v11081_v15 = vpack.c.b16 %v1211_v0, %v1207_v23 }
 0x323   :  { %16893 = vst [vmem:[#allocation50_spill] sm:$0xff] %v11079_v26  ;;  %2342 = vmatpush.bf16.msra.mxu0 %v7384_v39  ;;  %v16898_v39 = vpack.c.bf16 %v16897_v53, %v16897_v53 }
 0x324   :  { %16892 = vst [vmem:[#allocation46_spill] sm:$0xff] %v11072_v19 }
 0x325   :  { %v2099_v2 = vpop.f32.mrf.mxu2  ;;  %16894 = vst [vmem:[#allocation349_spill] sm:$0xff] %v11081_v15 }
 0x326   :  { %v11075_v57 = vadd.f32 %v2099_v2, %v10977_v48  ;;  %v11077_v14 = vpop.f32.mrf.mxu0  ;;  %v8374_v48 = vld [vmem:[#allocation3 + $0x94] sm:$0xf0]  ;;  %v7307_v2 = vld [vmem:[#allocation3 + $0x68] sm:$0xf] }
 0x327   :  { %v2023_v46 = vpop.f32.mrf.mxu1  ;;  %v7324_v50 = vor.u32 %v8374_v48, %v7323_v24  ;;  %v8366_v24 = vld [vmem:[#allocation3 + $0x54] sm:$0xf0]  ;;  %v1168_v48 = vunpack.c.l.b16 %v16898_v39 }
 0x328   :  { %v11084_v35 = vadd.f32 %v2023_v46, %v10996_v7  ;;  %v8370_v7 = vld [vmem:[#allocation3 + $0x74] sm:$0xf0]  ;;  %v7291_v46 = vld [vmem:[#allocation3 + $0x48] sm:$0xf] }
 0x329   :  { %v11086_v56 = vpop.f32.mrf.mxu3  ;;  %7656 = vmatmul.msk.bf16.gmra.mxu0 %vm1841_vm0, %v11072_v19  ;;  %2605 = vmatpush.bf16.msra.mxu3 %v7324_v50  ;;  %v7308_v40 = vor.u32 %v8370_v7, %v7307_v2  ;;  %v16899_v50 = vld [vmem:[#allocation58_spill] sm:$0xff]  ;;  %v7292_v7 = vor.u32 %v8366_v24, %v7291_v46  ;;  %v8358_v24 = vld [vmem:[#allocation3 + $0x14] sm:$0xf0] }
 0x32a   :  { %16895 = vst [vmem:[#allocation350_spill] sm:$0xff] %v11086_v56  ;;  %2062 = vmatmul.bf16.gmra.mxu1 %v11079_v26  ;;  %2141 = vmatmul.bf16.gmra.mxu2 %v11081_v15  ;;  %v1219_v26 = vunpack.c.h.b16 %v10090_v49  ;;  %v7259_v49 = vld [vmem:[#allocation3 + $0x8] sm:$0xf] }
 0x32d   :  { %v2102_v25 = vpop.f32.mrf.mxu2  ;;  %2606 = vmatpush.bf16.msra.mxu3 %v7308_v40  ;;  %v8362_v40 = vld [vmem:[#allocation3 + $0x34] sm:$0xf0] }
 0x32e   :  { %v11093_v22 = vadd.f32 %v2102_v25, %v11003_v59  ;;  %2319 = vmatmul.bf16.gmra.mxu3 %v10604_v21  ;;  %v11096_v23 = vpop.f32.mrf.mxu0  ;;  %v16900_v59 = vpack.c.bf16 %v16899_v50, %v16899_v50  ;;  %v1215_v25 = vunpack.c.h.b16 %v10073_v54 }
 0x32f   :  { %v2025_v0 = vpop.f32.mrf.mxu1 }
 0x330   :  { %v11099_v5 = vadd.f32 %v2025_v0, %v11015_v6  ;;  %v1172_v2 = vunpack.c.l.b16 %v16900_v59  ;;  %v7275_v6 = vld [vmem:[#allocation3 + $0x28] sm:$0xf]  ;;  %v11116_v39 = vpack.c.b16 %v1219_v26, %v1215_v25 }
 0x331   :  { %v11101_v42 = vpop.f32.mrf.mxu3  ;;  %2607 = vmatpush.bf16.msra.mxu3 %v7292_v7  ;;  %v7643_v26 = vld [vmem:[#allocation3 + $0x308] sm:$0xf]  ;;  %v8418_v7 = vld [vmem:[#allocation3 + $0x1f4] sm:$0xf0] }
 0x332   :  { %16896 = vst [vmem:[#allocation351_spill] sm:$0xff] %v11101_v42  ;;  %v11111_v21 = vpack.c.b16 %v1172_v2, %v1168_v48  ;;  %v7276_v42 = vor.u32 %v8362_v40, %v7275_v6  ;;  %v8454_v48 = vld [vmem:[#allocation3 + $0x314] sm:$0xf0]  ;;  %v7627_v40 = vld [vmem:[#allocation3 + $0x2e8] sm:$0xf] }
 0x333   :  { %16902 = vst [vmem:[#allocation58_spill] sm:$0xff] %v11116_v39  ;;  %v7644_v2 = vor.u32 %v8454_v48, %v7643_v26  ;;  %v16905_v26 = vld [vmem:[#allocation62_spill] sm:$0xff] }
 0x334   :  { %16901 = vst [vmem:[#allocation54_spill] sm:$0xff] %v11111_v21  ;;  %v16906_v48 = vpack.c.bf16 %v16905_v26, %v16905_v26 }
 0x335   :  { %v2104_v0 = vpop.f32.mrf.mxu2  ;;  %2608 = vmatpush.bf16.msra.mxu3 %v7276_v42  ;;  %2876 = vmatpush.bf16.msrb.mxu2 %v7644_v2 }
 0x336   :  { %v11114_v56 = vadd.f32 %v2104_v0, %v11017_v41  ;;  %v2166_v53 = vpop.f32.mrf.mxu0  ;;  %v7260_v41 = vor.u32 %v8358_v24, %v7259_v49  ;;  %v8450_v0 = vld [vmem:[#allocation3 + $0x2f4] sm:$0xf0] }
 0x337   :  { %v2028_v50 = vpop.f32.mrf.mxu1  ;;  %v11119_v46 = vadd.f32 %v2166_v53, %v10892_v43  ;;  %v7499_v43 = vld [vmem:[#allocation3 + $0x1e8] sm:$0xf]  ;;  %v7628_v49 = vor.u32 %v8450_v0, %v7627_v40 }
 0x338   :  { %v11122_v54 = vadd.f32 %v2028_v50, %v11036_v28  ;;  %v7500_v28 = vor.u32 %v8418_v7, %v7499_v43  ;;  %v16907_v43 = vld [vmem:[#allocation66_spill] sm:$0xff] }
 0x339   :  { %16903 = vst [vmem:[#allocation352_spill] sm:$0xff] %v11119_v46  ;;  %v11124_v59 = vpop.f32.mrf.mxu3  ;;  %7657 = vmatmul.msk.bf16.gmra.mxu0 %vm1841_vm0, %v11111_v21  ;;  %2609 = vmatpush.bf16.msra.mxu3 %v7260_v41  ;;  %v16908_v2 = vpack.c.bf16 %v16907_v43, %v16907_v43 }
 0x33a   :  { %2146 = vmatmul.bf16.gmra.mxu2 %v11116_v39  ;;  %2432 = vmatmul.bf16.vlgmr.msra.gmra.mxu1 %v10679_v55 }
 0x33b   :  { %2691 = vmatpush.bf16.msrb.mxu0 %v7500_v28  ;;  %v1180_v7 = vunpack.c.l.b16 %v16908_v2  ;;  %2780 = vmatpush.bf16.msrb.mxu1 %v7628_v49  ;;  %v1223_v28 = vunpack.c.h.b16 %v10118_v13 }
 0x33d   :  { %v2107_v42 = vpop.f32.mrf.mxu2 }
 0x33e   :  { %v11131_v25 = vadd.f32 %v2107_v42, %v11043_v27  ;;  %2324 = vmatmul.bf16.gmra.mxu3 %v10627_v36  ;;  %v2168_v6 = vpop.f32.mrf.mxu0  ;;  %v1176_v27 = vunpack.c.l.b16 %v16906_v48  ;;  %v1227_v42 = vunpack.c.h.b16 %v10137_v4 }
 0x33f   :  { %v2030_v53 = vpop.f32.mrf.mxu1  ;;  %v11135_v50 = vadd.f32 %v2168_v6, %v10915_v17 }
 0x340   :  { %v2031_v24 = vadd.f32 %v2030_v53, %v11055_v16  ;;  %v11148_v6 = vpack.c.b16 %v1180_v7, %v1176_v27  ;;  %v11153_v0 = vpack.c.b16 %v1227_v42, %v1223_v28 }
 0x341   :  { %16904 = vst [vmem:[#allocation353_spill] sm:$0xff] %v11135_v50  ;;  %v11138_v41 = vpop.f32.mrf.mxu3 }
 0x342   :  { %16909 = vst [vmem:[#allocation62_spill] sm:$0xff] %v11148_v6 }
 0x343   :  { %16910 = vst [vmem:[#allocation66_spill] sm:$0xff] %v11153_v0 }
 0x345   :  { %v2109_v17 = vpop.f32.mrf.mxu2 }
 0x346   :  { %v11151_v16 = vadd.f32 %v2109_v17, %v11058_v31  ;;  %v2171_v40 = vpop.f32.mrf.mxu0 }
 0x347   :  { %v2033_v53 = vpop.f32.mrf.mxu1  ;;  %v11156_v26 = vadd.f32 %v2171_v40, %v10932_v1 }
 0x348   :  { %v2034_v48 = vadd.f32 %v2033_v53, %v11077_v14 }
 0x349   :  { %16911 = vst [vmem:[#allocation354_spill] sm:$0xff] %v11156_v26  ;;  %v11159_v49 = vpop.f32.mrf.mxu3  ;;  %7658 = vmatmul.msk.bf16.gmra.mxu0 %vm1841_vm0, %v11148_v6 }
 0x34a   :  { %2151 = vmatmul.bf16.gmra.mxu2 %v11153_v0  ;;  %2437 = vmatmul.bf16.gmra.mxu1 %v10695_v44 }
 0x34d   :  { %v2112_v13 = vpop.f32.mrf.mxu2 }
 0x34e   :  { %v11166_v4 = vadd.f32 %v2112_v13, %v11084_v35  ;;  %2329 = vmatmul.bf16.gmra.mxu3 %v10652_v60  ;;  %v2173_v31 = vpop.f32.mrf.mxu0  ;;  %v7611_v13 = vld [vmem:[#allocation3 + $0x2c8] sm:$0xf] }
 0x34f   :  { %v2035_v1 = vpop.f32.mrf.mxu1  ;;  %v11170_v27 = vadd.f32 %v2173_v31, %v10953_v8  ;;  %v7483_v8 = vld [vmem:[#allocation3 + $0x1c8] sm:$0xf]  ;;  %v8446_v31 = vld [vmem:[#allocation3 + $0x2d4] sm:$0xf0] }
 0x350   :  { %v2036_v14 = vadd.f32 %v2035_v1, %v11096_v23  ;;  %v8414_v23 = vld [vmem:[#allocation3 + $0x1d4] sm:$0xf0] }
 0x351   :  { %16912 = vst [vmem:[#allocation355_spill] sm:$0xff] %v11170_v27  ;;  %v11173_v43 = vpop.f32.mrf.mxu3  ;;  %v7484_v40 = vor.u32 %v8414_v23, %v7483_v8 }
 0x353   :  { %2692 = vmatpush.bf16.msrb.mxu0 %v7484_v40 }
 0x355   :  { %v2114_v2 = vpop.f32.mrf.mxu2 }
 0x356   :  { %v11176_v7 = vadd.f32 %v2114_v2, %v11099_v5  ;;  %v2176_v28 = vpop.f32.mrf.mxu0 }
 0x357   :  { %v2038_v42 = vpop.f32.mrf.mxu1  ;;  %v11179_v35 = vadd.f32 %v2176_v28, %v10971_v58  ;;  %v7612_v28 = vor.u32 %v8446_v31, %v7611_v13 }
 0x359   :  { %16913 = vst [vmem:[#allocation356_spill] sm:$0xff] %v11179_v35  ;;  %v11181_v17 = vpop.f32.mrf.mxu3  ;;  %2343 = vmatmul.bf16.vlgmr.msra.gmra.mxu0 %v10629_v29  ;;  %2781 = vmatpush.bf16.msrb.mxu1 %v7612_v28 }
 0x35a   :  { %2442 = vmatmul.bf16.gmra.mxu1 %v10711_v61  ;;  %7665 = vmatmul.msk.bf16.vlgmr.msra.gmra.mxu2 %vm1841_vm0, %v10805_v34 }
 0x35d   :  { %v2117_v53 = vpop.f32.mrf.mxu2 }
 0x35e   :  { %v11188_v5 = vadd.f32 %v2117_v53, %v11122_v54  ;;  %2610 = vmatmul.bf16.vlgmr.msra.gmra.mxu3 %v10574_v45  ;;  %v2178_v58 = vpop.f32.mrf.mxu0 }
 0x35f   :  { %v2040_v1 = vpop.f32.mrf.mxu1  ;;  %v11192_v2 = vadd.f32 %v2178_v58, %v10994_v30 }
 0x361   :  { %16914 = vst [vmem:[#allocation357_spill] sm:$0xff] %v11192_v2  ;;  %v11194_v35 = vpop.f32.mrf.mxu3 }
 0x365   :  { %v2119_v27 = vpop.f32.mrf.mxu2 }
 0x366   :  { %v11196_v8 = vadd.f32 %v2119_v27, %v2031_v24  ;;  %v2181_v23 = vpop.f32.mrf.mxu0 }
 0x367   :  { %v2043_v40 = vpop.f32.mrf.mxu1  ;;  %v11199_v54 = vadd.f32 %v2181_v23, %v11012_v9 }
 0x369   :  { %16915 = vst [vmem:[#allocation358_spill] sm:$0xff] %v11199_v54  ;;  %v11201_v53 = vpop.f32.mrf.mxu3  ;;  %2348 = vmatmul.bf16.gmra.mxu0 %v10654_v10 }
 0x36a   :  { %2447 = vmatmul.bf16.gmra.mxu1 %v10729_v38  ;;  %7666 = vmatmul.msk.bf16.gmra.mxu2 %vm1841_vm0, %v10840_v37 }
 0x36d   :  { %v2122_v30 = vpop.f32.mrf.mxu2 }
 0x36e   :  { %v11207_v58 = vadd.f32 %v2122_v30, %v2034_v48  ;;  %2615 = vmatmul.bf16.gmra.mxu3 %v10600_v12  ;;  %v2183_v24 = vpop.f32.mrf.mxu0  ;;  %v8410_v48 = vld [vmem:[#allocation3 + $0x1b4] sm:$0xf0] }
 0x36f   :  { %v2045_v27 = vpop.f32.mrf.mxu1  ;;  %v11211_v13 = vadd.f32 %v2183_v24, %v11034_v52  ;;  %v7467_v52 = vld [vmem:[#allocation3 + $0x1a8] sm:$0xf] }
 0x370   :  { %v7468_v30 = vor.u32 %v8410_v48, %v7467_v52  ;;  %v2041_v52 = vadd.f32 %v2040_v1, %v10761_v32 }
 0x371   :  { %16916 = vst [vmem:[#allocation359_spill] sm:$0xff] %v11211_v13  ;;  %v11213_v9 = vpop.f32.mrf.mxu3 }
 0x372   :  { %2693 = vmatpush.bf16.msrb.mxu0 %v7468_v30 }
 0x375   :  { %v2124_v31 = vpop.f32.mrf.mxu2 }
 0x376   :  { %v11215_v28 = vadd.f32 %v2124_v31, %v2036_v14  ;;  %v2186_v23 = vpop.f32.mrf.mxu0  ;;  %v2039_v14 = vadd.f32 %v2038_v42, %v10751_v51 }
 0x377   :  { %v2048_v54 = vpop.f32.mrf.mxu1  ;;  %v11218_v2 = vadd.f32 %v2186_v23, %v11052_v63  ;;  %v7595_v23 = vld [vmem:[#allocation3 + $0x2a8] sm:$0xf] }
 0x379   :  { %16917 = vst [vmem:[#allocation360_spill] sm:$0xff] %v11218_v2  ;;  %v11220_v26 = vpop.f32.mrf.mxu3  ;;  %2353 = vmatmul.bf16.gmra.mxu0 %v10677_v11  ;;  %v8442_v2 = vld [vmem:[#allocation3 + $0x2b4] sm:$0xf0] }
 0x37a   :  { %2452 = vmatmul.bf16.gmra.mxu1 %v10749_v3  ;;  %7667 = vmatmul.msk.bf16.gmra.mxu2 %vm1841_vm0, %v10875_v20  ;;  %v7596_v46 = vor.u32 %v8442_v2, %v7595_v23 }
 0x37c   :  { %2782 = vmatpush.bf16.msrb.mxu1 %v7596_v46  ;;  %v16923_v46 = vld [vmem:[#allocation325_spill] sm:$0xff] }
 0x37d   :  { %v2127_v24 = vpop.f32.mrf.mxu2  ;;  %v2044_v2 = vadd.f32 %v2043_v40, %v16923_v46 }
 0x37e   :  { %v11227_v31 = vadd.f32 %v2127_v24, %v2039_v14  ;;  %2620 = vmatmul.bf16.gmra.mxu3 %v10625_v62  ;;  %v2188_v63 = vpop.f32.mrf.mxu0 }
 0x37f   :  { %v2050_v13 = vpop.f32.mrf.mxu1  ;;  %v11231_v50 = vadd.f32 %v2188_v63, %v11075_v57  ;;  %v16922_v57 = vld [vmem:[#allocation324_spill] sm:$0xff] }
 0x380   :  { %16918 = vst [vmem:[#allocation361_spill] sm:$0xff] %v11227_v31  ;;  %v16925_v63 = vld [vmem:[#allocation316_spill] sm:$0xff] }
 0x381   :  { %16919 = vst [vmem:[#allocation362_spill] sm:$0xff] %v11231_v50  ;;  %v11233_v20 = vpop.f32.mrf.mxu3 }
 0x385   :  { %v2129_v51 = vpop.f32.mrf.mxu2 }
 0x386   :  { %v11236_v42 = vadd.f32 %v2129_v51, %v2041_v52  ;;  %v2191_v48 = vpop.f32.mrf.mxu0 }
 0x387   :  { %v2053_v30 = vpop.f32.mrf.mxu1  ;;  %v11239_v14 = vadd.f32 %v2191_v48, %v11093_v22  ;;  %v16927_v48 = vld [vmem:[#allocation328_spill] sm:$0xff] }
 0x388   :  { %16920 = vst [vmem:[#allocation363_spill] sm:$0xff] %v11236_v42  ;;  %v2046_v42 = vadd.f32 %v2045_v27, %v16927_v48  ;;  %v16934_v48 = vld [vmem:[#allocation321_spill] sm:$0xff] }
 0x389   :  { %16921 = vst [vmem:[#allocation364_spill] sm:$0xff] %v11239_v14  ;;  %v11241_v24 = vpop.f32.mrf.mxu3  ;;  %2358 = vmatmul.bf16.gmra.mxu0 %v10693_v47 }
 0x38a   :  { %2457 = vmatmul.bf16.gmra.mxu1 %v16922_v57  ;;  %7668 = vmatmul.msk.bf16.gmra.mxu2 %vm1841_vm0, %v10912_v18 }
 0x38d   :  { %v2132_v32 = vpop.f32.mrf.mxu2 }
 0x38e   :  { %v11248_v1 = vadd.f32 %v2132_v32, %v2044_v2  ;;  %2625 = vmatmul.bf16.gmra.mxu3 %v16925_v63  ;;  %v2193_v23 = vpop.f32.mrf.mxu0  ;;  %v16931_v2 = vld [vmem:[#allocation45_spill] sm:$0xff]  ;;  %v16932_v32 = vld [vmem:[#allocation78_spill] sm:$0xff] }
 0x38f   :  { %v2055_v52 = vpop.f32.mrf.mxu1  ;;  %v11252_v22 = vadd.f32 %v2193_v23, %v11114_v56  ;;  %v16933_v56 = vld [vmem:[#allocation23_spill] sm:$0xff]  ;;  %v7451_v23 = vld [vmem:[#allocation3 + $0x188] sm:$0xf] }
 0x390   :  { %16924 = vst [vmem:[#allocation324_spill] sm:$0xff] %v11248_v1  ;;  %v8406_v1 = vld [vmem:[#allocation3 + $0x194] sm:$0xf0] }
 0x391   :  { %16926 = vst [vmem:[#allocation325_spill] sm:$0xff] %v11252_v22  ;;  %v11254_v51 = vpop.f32.mrf.mxu3  ;;  %v7452_v27 = vor.u32 %v8406_v1, %v7451_v23  ;;  %v8438_v22 = vld [vmem:[#allocation3 + $0x294] sm:$0xf0]  ;;  %v16938_v1 = vld [vmem:[#allocation69_spill] sm:$0xff] }
 0x392   :  { %v2051_v23 = vadd.f32 %v2050_v13, %v16938_v1  ;;  %v16946_v1 = vld [vmem:[#allocation37_spill] sm:$0xff] }
 0x393   :  { %2694 = vmatpush.bf16.msrb.mxu0 %v7452_v27 }
 0x395   :  { %v2134_v31 = vpop.f32.mrf.mxu2 }
 0x396   :  { %v11257_v14 = vadd.f32 %v2134_v31, %v2046_v42  ;;  %v2196_v50 = vpop.f32.mrf.mxu0  ;;  %v2049_v31 = vadd.f32 %v2048_v54, %v16934_v48 }
 0x397   :  { %v2058_v18 = vpop.f32.mrf.mxu1  ;;  %v11260_v40 = vadd.f32 %v2196_v50, %v11131_v25  ;;  %v16936_v25 = vld [vmem:[#allocation29_spill] sm:$0xff] }
 0x398   :  { %16928 = vst [vmem:[#allocation316_spill] sm:$0xff] %v11257_v14 }
 0x399   :  { %16929 = vst [vmem:[#allocation328_spill] sm:$0xff] %v11260_v40  ;;  %v11262_v46 = vpop.f32.mrf.mxu3  ;;  %2363 = vmatmul.bf16.gmra.mxu0 %v16931_v2  ;;  %v7579_v40 = vld [vmem:[#allocation3 + $0x288] sm:$0xf] }
 0x39a   :  { %16930 = vst [vmem:[#allocation365_spill] sm:$0xff] %v11262_v46  ;;  %2462 = vmatmul.bf16.gmra.mxu1 %v16932_v32  ;;  %7669 = vmatmul.msk.bf16.gmra.mxu2 %vm1841_vm0, %v16933_v56  ;;  %v7580_v46 = vor.u32 %v8438_v22, %v7579_v40  ;;  %v16943_v22 = vld [vmem:[#allocation30_spill] sm:$0xff]  ;;  %v16944_v40 = vld [vmem:[#allocation327_spill] sm:$0xff] }
 0x39c   :  { %2783 = vmatpush.bf16.msrb.mxu1 %v7580_v46  ;;  %v2054_v46 = vadd.f32 %v2053_v30, %v16944_v40 }
 0x39d   :  { %v2137_v42 = vpop.f32.mrf.mxu2 }
 0x39e   :  { %v11269_v14 = vadd.f32 %v2137_v42, %v2049_v31  ;;  %2630 = vmatmul.bf16.gmra.mxu3 %v16936_v25  ;;  %v2198_v50 = vpop.f32.mrf.mxu0  ;;  %v16941_v25 = vld [vmem:[#allocation57_spill] sm:$0xff] }
 0x39f   :  { %v2060_v2 = vpop.f32.mrf.mxu1  ;;  %v11273_v32 = vadd.f32 %v2198_v50, %v11151_v16  ;;  %v16942_v16 = vld [vmem:[#allocation12_spill] sm:$0xff] }
 0x3a0   :  { %16935 = vst [vmem:[#allocation321_spill] sm:$0xff] %v11269_v14 }
 0x3a1   :  { %16937 = vst [vmem:[#allocation366_spill] sm:$0xff] %v11273_v32  ;;  %v11275_v56 = vpop.f32.mrf.mxu3 }
 0x3a5   :  { %v2139_v54 = vpop.f32.mrf.mxu2 }
 0x3a6   :  { %v11278_v48 = vadd.f32 %v2139_v54, %v2051_v23  ;;  %v2201_v27 = vpop.f32.mrf.mxu0 }
 0x3a7   :  { %v2063_v31 = vpop.f32.mrf.mxu1  ;;  %v11281_v42 = vadd.f32 %v2201_v27, %v11166_v4 }
 0x3a8   :  { %16939 = vst [vmem:[#allocation69_spill] sm:$0xff] %v11278_v48  ;;  %v16948_v48 = vld [vmem:[#allocation9_spill] sm:$0xff] }
 0x3a9   :  { %16940 = vst [vmem:[#allocation367_spill] sm:$0xff] %v11281_v42  ;;  %v11283_v14 = vpop.f32.mrf.mxu3  ;;  %2368 = vmatmul.bf16.gmra.mxu0 %v16941_v25  ;;  %v2056_v42 = vadd.f32 %v2055_v52, %v16948_v48  ;;  %v16954_v48 = vld [vmem:[#allocation331_spill] sm:$0xff] }
 0x3aa   :  { %2467 = vmatmul.bf16.gmra.mxu1 %v16942_v16  ;;  %7670 = vmatmul.msk.bf16.gmra.mxu2 %vm1841_vm0, %v16943_v22 }
 0x3ad   :  { %v2142_v13 = vpop.f32.mrf.mxu2 }
 0x3ae   :  { %v11290_v50 = vadd.f32 %v2142_v13, %v2054_v46  ;;  %2635 = vmatmul.bf16.gmra.mxu3 %v16946_v1  ;;  %v2203_v23 = vpop.f32.mrf.mxu0  ;;  %v16952_v13 = vld [vmem:[#allocation65_spill] sm:$0xff] }
 0x3af   :  { %v2065_v54 = vpop.f32.mrf.mxu1  ;;  %v11294_v4 = vadd.f32 %v2203_v23, %v11176_v7  ;;  %v7435_v7 = vld [vmem:[#allocation3 + $0x168] sm:$0xf]  ;;  %v8402_v23 = vld [vmem:[#allocation3 + $0x174] sm:$0xf0] }
 0x3b0   :  { %16945 = vst [vmem:[#allocation57_spill] sm:$0xff] %v11290_v50  ;;  %v16953_v50 = vld [vmem:[#allocation90_spill] sm:$0xff]  ;;  %v7436_v52 = vor.u32 %v8402_v23, %v7435_v7  ;;  %v16958_v7 = vld [vmem:[#allocation81_spill] sm:$0xff] }
 0x3b1   :  { %16947 = vst [vmem:[#allocation327_spill] sm:$0xff] %v11294_v4  ;;  %v11296_v27 = vpop.f32.mrf.mxu3  ;;  %v8434_v4 = vld [vmem:[#allocation3 + $0x274] sm:$0xf0]  ;;  %v2061_v23 = vadd.f32 %v2060_v2, %v16958_v7 }
 0x3b2   :  { %2695 = vmatpush.bf16.msrb.mxu0 %v7436_v52 }
 0x3b5   :  { %v2144_v32 = vpop.f32.mrf.mxu2 }
 0x3b6   :  { %v11299_v16 = vadd.f32 %v2144_v32, %v2056_v42  ;;  %v2206_v22 = vpop.f32.mrf.mxu0  ;;  %v2059_v32 = vadd.f32 %v2058_v18, %v16954_v48 }
 0x3b7   :  { %v11302_v30 = vadd.f32 %v2206_v22, %v11188_v5  ;;  %v2433_v40 = vpop.f32.mrf.mxu1  ;;  %v16956_v5 = vld [vmem:[#allocation41_spill] sm:$0xff] }
 0x3b8   :  { %16949 = vst [vmem:[#allocation37_spill] sm:$0xff] %v11299_v16 }
 0x3b9   :  { %16950 = vst [vmem:[#allocation9_spill] sm:$0xff] %v11302_v30  ;;  %v11304_v46 = vpop.f32.mrf.mxu3  ;;  %2373 = vmatmul.bf16.gmra.mxu0 %v16952_v13  ;;  %v7563_v30 = vld [vmem:[#allocation3 + $0x268] sm:$0xf] }
 0x3ba   :  { %16951 = vst [vmem:[#allocation368_spill] sm:$0xff] %v11304_v46  ;;  %2472 = vmatmul.bf16.gmra.mxu1 %v16953_v50  ;;  %7671 = vmatmul.msk.bf16.gmra.mxu2 %vm1841_vm0, %v11031_v33  ;;  %v7564_v46 = vor.u32 %v8434_v4, %v7563_v30  ;;  %v16963_v4 = vld [vmem:[#allocation333_spill] sm:$0xff] }
 0x3bb   :  { %v2064_v30 = vadd.f32 %v2063_v31, %v16963_v4 }
 0x3bc   :  { %2784 = vmatpush.bf16.msrb.mxu1 %v7564_v46 }
 0x3bd   :  { %v2147_v42 = vpop.f32.mrf.mxu2 }
 0x3be   :  { %v11311_v16 = vadd.f32 %v2147_v42, %v2059_v32  ;;  %2640 = vmatmul.bf16.gmra.mxu3 %v16956_v5  ;;  %v2208_v22 = vpop.f32.mrf.mxu0  ;;  %v16961_v5 = vld [vmem:[#allocation323_spill] sm:$0xff] }
 0x3bf   :  { %v11315_v13 = vadd.f32 %v2208_v22, %v11196_v8  ;;  %v2435_v50 = vpop.f32.mrf.mxu1  ;;  %v16962_v8 = vld [vmem:[#allocation337_spill] sm:$0xff] }
 0x3c0   :  { %16955 = vst [vmem:[#allocation331_spill] sm:$0xff] %v11311_v16  ;;  %v16965_v22 = vld [vmem:[#allocation53_spill] sm:$0xff] }
 0x3c1   :  { %16957 = vst [vmem:[#allocation369_spill] sm:$0xff] %v11315_v13  ;;  %v11317_v33 = vpop.f32.mrf.mxu3 }
 0x3c5   :  { %v2149_v18 = vpop.f32.mrf.mxu2 }
 0x3c6   :  { %v11320_v48 = vadd.f32 %v2149_v18, %v2061_v23  ;;  %v2211_v52 = vpop.f32.mrf.mxu0 }
 0x3c7   :  { %v11323_v32 = vadd.f32 %v2211_v52, %v11207_v58  ;;  %v2438_v42 = vpop.f32.mrf.mxu1  ;;  %v16968_v52 = vld [vmem:[#allocation13_spill] sm:$0xff] }
 0x3c8   :  { %16959 = vst [vmem:[#allocation81_spill] sm:$0xff] %v11320_v48  ;;  %v2066_v48 = vadd.f32 %v2065_v54, %v16968_v52 }
 0x3c9   :  { %16960 = vst [vmem:[#allocation370_spill] sm:$0xff] %v11323_v32  ;;  %v11325_v16 = vpop.f32.mrf.mxu3  ;;  %2378 = vmatmul.bf16.gmra.mxu0 %v16961_v5 }
 0x3ca   :  { %2477 = vmatmul.bf16.gmra.mxu1 %v16962_v8  ;;  %7672 = vmatmul.msk.bf16.gmra.mxu2 %vm1841_vm0, %v11072_v19  ;;  %v16970_v8 = vld [vmem:[#allocation336_spill] sm:$0xff] }
 0x3cd   :  { %v2152_v2 = vpop.f32.mrf.mxu2 }
 0x3ce   :  { %v11332_v46 = vadd.f32 %v2152_v2, %v2064_v30  ;;  %2645 = vmatmul.bf16.gmra.mxu3 %v16965_v22  ;;  %v2213_v7 = vpop.f32.mrf.mxu0  ;;  %v16972_v2 = vld [vmem:[#allocation75_spill] sm:$0xff]  ;;  %v16973_v22 = vld [vmem:[#allocation340_spill] sm:$0xff] }
 0x3cf   :  { %v11336_v58 = vadd.f32 %v2213_v7, %v11215_v28  ;;  %v2440_v23 = vpop.f32.mrf.mxu1  ;;  %v7419_v28 = vld [vmem:[#allocation3 + $0x148] sm:$0xf]  ;;  %v8398_v7 = vld [vmem:[#allocation3 + $0x154] sm:$0xf0] }
 0x3d0   :  { %16964 = vst [vmem:[#allocation333_spill] sm:$0xff] %v11332_v46  ;;  %v7420_v54 = vor.u32 %v8398_v7, %v7419_v28  ;;  %v16978_v7 = vld [vmem:[#allocation339_spill] sm:$0xff] }
 0x3d1   :  { %16966 = vst [vmem:[#allocation371_spill] sm:$0xff] %v11336_v58  ;;  %v11338_v18 = vpop.f32.mrf.mxu3  ;;  %v16976_v58 = vld [vmem:[#allocation338_spill] sm:$0xff] }
 0x3d2   :  { %16967 = vst [vmem:[#allocation372_spill] sm:$0xff] %v11338_v18  ;;  %2696 = vmatpush.bf16.msrb.mxu0 %v7420_v54  ;;  %v16980_v18 = vld [vmem:[#allocation343_spill] sm:$0xff] }
 0x3d5   :  { %v2154_v32 = vpop.f32.mrf.mxu2 }
 0x3d6   :  { %v11341_v13 = vadd.f32 %v2154_v32, %v2066_v48  ;;  %v2344_v19 = vpop.f32.mrf.mxu0  ;;  %v16975_v32 = vld [vmem:[#allocation61_spill] sm:$0xff] }
 0x3d7   :  { %v2345_v31 = vadd.f32 %v2344_v19, %v16970_v8  ;;  %v2443_v4 = vpop.f32.mrf.mxu1  ;;  %v7547_v8 = vld [vmem:[#allocation3 + $0x248] sm:$0xf] }
 0x3d8   :  { %16969 = vst [vmem:[#allocation13_spill] sm:$0xff] %v11341_v13  ;;  %v8430_v13 = vld [vmem:[#allocation3 + $0x254] sm:$0xf0] }
 0x3d9   :  { %v11344_v30 = vpop.f32.mrf.mxu3  ;;  %2383 = vmatmul.bf16.gmra.mxu0 %v16972_v2  ;;  %v2434_v46 = vadd.f32 %v2433_v40, %v2345_v31  ;;  %v7548_v31 = vor.u32 %v8430_v13, %v7547_v8 }
 0x3da   :  { %16971 = vst [vmem:[#allocation336_spill] sm:$0xff] %v11344_v30  ;;  %2482 = vmatmul.bf16.gmra.mxu1 %v16973_v22  ;;  %7673 = vmatmul.msk.bf16.gmra.mxu2 %vm1841_vm0, %v11111_v21 }
 0x3db   :  { %2785 = vmatpush.bf16.msrb.mxu1 %v7548_v31 }
 0x3dd   :  { %v2522_v52 = vpop.f32.mrf.mxu2 }
 0x3de   :  { %v11350_v48 = vadd.f32 %v2522_v52, %v2434_v46  ;;  %2650 = vmatmul.bf16.gmra.mxu3 %v16975_v32  ;;  %v2346_v19 = vpop.f32.mrf.mxu0 }
 0x3df   :  { %v2347_v2 = vadd.f32 %v2346_v19, %v16976_v58  ;;  %v2445_v40 = vpop.f32.mrf.mxu1  ;;  %v16982_v58 = vld [vmem:[#allocation72_spill] sm:$0xff] }
 0x3e0   :  { %16974 = vst [vmem:[#allocation373_spill] sm:$0xff] %v11350_v48  ;;  %v16979_v48 = vld [vmem:[#allocation11_spill] sm:$0xff] }
 0x3e1   :  { %v11354_v22 = vpop.f32.mrf.mxu3  ;;  %v2436_v30 = vadd.f32 %v2435_v50, %v2347_v2 }
 0x3e5   :  { %v2524_v21 = vpop.f32.mrf.mxu2 }
 0x3e6   :  { %v11356_v5 = vadd.f32 %v2524_v21, %v2436_v30  ;;  %v2349_v28 = vpop.f32.mrf.mxu0  ;;  %v16983_v30 = vld [vmem:[#allocation341_spill] sm:$0xff] }
 0x3e7   :  { %v2350_v46 = vadd.f32 %v2349_v28, %v16978_v7  ;;  %v2448_v54 = vpop.f32.mrf.mxu1 }
 0x3e8   :  { %16977 = vst [vmem:[#allocation338_spill] sm:$0xff] %v11356_v5 }
 0x3e9   :  { %v11359_v52 = vpop.f32.mrf.mxu3  ;;  %2388 = vmatmul.bf16.gmra.mxu0 %v16979_v48  ;;  %v2439_v32 = vadd.f32 %v2438_v42, %v2350_v46  ;;  %v16986_v46 = vld [vmem:[#allocation342_spill] sm:$0xff] }
 0x3ea   :  { %2487 = vmatmul.bf16.gmra.mxu1 %v16980_v18  ;;  %7674 = vmatmul.msk.bf16.gmra.mxu2 %vm1841_vm0, %v11148_v6 }
 0x3ed   :  { %v2527_v13 = vpop.f32.mrf.mxu2 }
 0x3ee   :  { %v11365_v50 = vadd.f32 %v2527_v13, %v2439_v32  ;;  %2655 = vmatmul.bf16.gmra.mxu3 %v16982_v58  ;;  %v2351_v21 = vpop.f32.mrf.mxu0  ;;  %v16988_v32 = vld [vmem:[#allocation87_spill] sm:$0xff] }
 0x3ef   :  { %v2352_v2 = vadd.f32 %v2351_v21, %v16983_v30  ;;  %v2450_v19 = vpop.f32.mrf.mxu1  ;;  %v16990_v58 = vld [vmem:[#allocation307_spill] sm:$0xff]  ;;  %v7403_v21 = vld [vmem:[#allocation3 + $0x128] sm:$0xf]  ;;  %v8394_v30 = vld [vmem:[#allocation3 + $0x134] sm:$0xf0] }
 0x3f0   :  { %16981 = vst [vmem:[#allocation339_spill] sm:$0xff] %v11365_v50  ;;  %v16989_v50 = vld [vmem:[#allocation346_spill] sm:$0xff] }
 0x3f1   :  { %v11369_v8 = vpop.f32.mrf.mxu3  ;;  %v2441_v31 = vadd.f32 %v2440_v23, %v2352_v2  ;;  %v7404_v23 = vor.u32 %v8394_v30, %v7403_v21  ;;  %v16995_v30 = vld [vmem:[#allocation345_spill] sm:$0xff] }
 0x3f2   :  { %16984 = vst [vmem:[#allocation341_spill] sm:$0xff] %v11369_v8 }
 0x3f3   :  { %2697 = vmatpush.bf16.msrb.mxu0 %v7404_v23 }
 0x3f5   :  { %v2529_v28 = vpop.f32.mrf.mxu2 }
 0x3f6   :  { %v11371_v7 = vadd.f32 %v2529_v28, %v2441_v31  ;;  %v2354_v42 = vpop.f32.mrf.mxu0  ;;  %v16992_v28 = vld [vmem:[#allocation309_spill] sm:$0xff] }
 0x3f7   :  { %v2355_v5 = vadd.f32 %v2354_v42, %v16986_v46  ;;  %v2453_v18 = vpop.f32.mrf.mxu1  ;;  %v7531_v46 = vld [vmem:[#allocation3 + $0x228] sm:$0xf] }
 0x3f8   :  { %16985 = vst [vmem:[#allocation374_spill] sm:$0xff] %v11371_v7  ;;  %v8426_v7 = vld [vmem:[#allocation3 + $0x234] sm:$0xf0] }
 0x3f9   :  { %v11374_v6 = vpop.f32.mrf.mxu3  ;;  %2393 = vmatmul.bf16.gmra.mxu0 %v16988_v32  ;;  %v2444_v13 = vadd.f32 %v2443_v4, %v2355_v5  ;;  %v7532_v4 = vor.u32 %v8426_v7, %v7531_v46 }
 0x3fa   :  { %16987 = vst [vmem:[#allocation342_spill] sm:$0xff] %v11374_v6  ;;  %2492 = vmatmul.bf16.gmra.mxu1 %v16989_v50  ;;  %7675 = vmatmul.msk.bf16.gmra.mxu2 %vm1841_vm0, %v16990_v58  ;;  %v16993_v6 = vld [vmem:[#allocation344_spill] sm:$0xff] }
 0x3fb   :  { %2786 = vmatpush.bf16.msrb.mxu1 %v7532_v4 }
 0x3fd   :  { %v2532_v2 = vpop.f32.mrf.mxu2 }
 0x3fe   :  { %v11380_v31 = vadd.f32 %v2532_v2, %v2444_v13  ;;  %2660 = vmatmul.bf16.gmra.mxu3 %v16992_v28  ;;  %v2356_v42 = vpop.f32.mrf.mxu0 }
 0x3ff   :  { %v2357_v32 = vadd.f32 %v2356_v42, %v16993_v6  ;;  %v2455_v5 = vpop.f32.mrf.mxu1  ;;  %v16998_v6 = vld [vmem:[#allocation308_spill] sm:$0xff] }
 0x400   :  { %16991 = vst [vmem:[#allocation375_spill] sm:$0xff] %v11380_v31  ;;  %v16997_v31 = vld [vmem:[#allocation20_spill] sm:$0xff] }
 0x401   :  { %v11384_v50 = vpop.f32.mrf.mxu3  ;;  %v2446_v48 = vadd.f32 %v2445_v40, %v2357_v32  ;;  %v17000_v32 = vld [vmem:[#allocation312_spill] sm:$0xff] }
 0x405   :  { %v2534_v58 = vpop.f32.mrf.mxu2 }
 0x406   :  { %v11386_v8 = vadd.f32 %v2534_v58, %v2446_v48  ;;  %v2359_v21 = vpop.f32.mrf.mxu0  ;;  %v17001_v58 = vld [vmem:[#allocation347_spill] sm:$0xff] }
 0x407   :  { %v2360_v13 = vadd.f32 %v2359_v21, %v16995_v30  ;;  %v2458_v23 = vpop.f32.mrf.mxu1  ;;  %v7515_v30 = vld [vmem:[#allocation3 + $0x208] sm:$0xf] }
 0x408   :  { %16994 = vst [vmem:[#allocation344_spill] sm:$0xff] %v11386_v8 }
 0x409   :  { %v11389_v2 = vpop.f32.mrf.mxu3  ;;  %2398 = vmatmul.bf16.gmra.mxu0 %v16997_v31  ;;  %v2449_v28 = vadd.f32 %v2448_v54, %v2360_v13  ;;  %v8422_v54 = vld [vmem:[#allocation3 + $0x214] sm:$0xf0] }
 0x40a   :  { %16996 = vst [vmem:[#allocation345_spill] sm:$0xff] %v11389_v2  ;;  %2497 = vmatmul.bf16.gmra.mxu1 %v11081_v15  ;;  %7676 = vmatmul.msk.bf16.gmra.mxu2 %vm1841_vm0, %v16998_v6  ;;  %v7516_v8 = vor.u32 %v8422_v54, %v7515_v30  ;;  %v17004_v31 = vld [vmem:[#allocation348_spill] sm:$0xff]  ;;  %v8384_v54 = vld [vmem:[#allocation3 + $0xec] sm:$0xf] }
 0x40b   :  { %v8390_v30 = vld [vmem:[#allocation3 + $0x114] sm:$0xf0] }
 0x40c   :  { %2787 = vmatpush.bf16.msrb.mxu1 %v7516_v8  ;;  %v17009_v8 = vld [vmem:[#allocation310_spill] sm:$0xff] }
 0x40d   :  { %v2537_v7 = vpop.f32.mrf.mxu2 }
 0x40e   :  { %v11395_v40 = vadd.f32 %v2537_v7, %v2449_v28  ;;  %2665 = vmatmul.bf16.gmra.mxu3 %v17000_v32  ;;  %v2361_v48 = vpop.f32.mrf.mxu0 }
 0x40f   :  { %v2362_v42 = vadd.f32 %v2361_v48, %v17001_v58  ;;  %v11399_v46 = vpop.f32.mrf.mxu1  ;;  %v17006_v48 = vld [vmem:[#allocation26_spill] sm:$0xff] }
 0x410   :  { %16999 = vst [vmem:[#allocation376_spill] sm:$0xff] %v11395_v40 }
 0x411   :  { %v11401_v4 = vpop.f32.mrf.mxu3  ;;  %v2451_v21 = vadd.f32 %v2450_v19, %v2362_v42  ;;  %v17007_v19 = vld [vmem:[#allocation311_spill] sm:$0xff]  ;;  %v7387_v42 = vld [vmem:[#allocation3 + $0x108] sm:$0xf] }
 0x412   :  { %17002 = vst [vmem:[#allocation347_spill] sm:$0xff] %v11401_v4  ;;  %v8376_v4 = vld [vmem:[#allocation3 + $0xac] sm:$0xf] }
 0x415   :  { %v2539_v13 = vpop.f32.mrf.mxu2 }
 0x416   :  { %v11403_v15 = vadd.f32 %v2539_v13, %v2451_v21  ;;  %v2364_v6 = vpop.f32.mrf.mxu0  ;;  %v7388_v21 = vor.u32 %v8390_v30, %v7387_v42  ;;  %v7373_v13 = vld [vmem:[#allocation3 + $0xf8] sm:$0xf0] }
 0x417   :  { %v2365_v28 = vadd.f32 %v2364_v6, %v17004_v31  ;;  %v11406_v7 = vpop.f32.mrf.mxu1  ;;  %v7376_v31 = vor.u32 %v8384_v54, %v7373_v13 }
 0x418   :  { %17003 = vst [vmem:[#allocation377_spill] sm:$0xff] %v11403_v15  ;;  %2698 = vmatpush.bf16.msrb.mxu0 %v7388_v21  ;;  %v7341_v21 = vld [vmem:[#allocation3 + $0xb8] sm:$0xf0] }
 0x419   :  { %v11408_v40 = vpop.f32.mrf.mxu3  ;;  %2403 = vmatmul.bf16.gmra.mxu0 %v17006_v48  ;;  %v2454_v58 = vadd.f32 %v2453_v18, %v2365_v28  ;;  %v17010_v48 = vld [vmem:[#allocation350_spill] sm:$0xff]  ;;  %2958 = vmatpush.bf16.msrb.mxu3 %v7376_v31  ;;  %v7325_v31 = vld [vmem:[#allocation3 + $0x98] sm:$0xf0] }
 0x41a   :  { %17005 = vst [vmem:[#allocation348_spill] sm:$0xff] %v11408_v40  ;;  %2502 = vmatmul.bf16.gmra.mxu1 %v11116_v39  ;;  %7677 = vmatmul.msk.bf16.gmra.mxu2 %vm1841_vm0, %v17007_v19  ;;  %v8380_v39 = vld [vmem:[#allocation3 + $0xcc] sm:$0xf]  ;;  %v7357_v19 = vld [vmem:[#allocation3 + $0xd8] sm:$0xf0] }
 0x41b   :  { %v7360_v30 = vor.u32 %v8380_v39, %v7357_v19  ;;  %v17015_v19 = vld [vmem:[#allocation314_spill] sm:$0xff] }
 0x41d   :  { %v2542_v15 = vpop.f32.mrf.mxu2  ;;  %2959 = vmatpush.bf16.msrb.mxu3 %v7360_v30 }
 0x41e   :  { %v11414_v6 = vadd.f32 %v2542_v15, %v2454_v58  ;;  %2670 = vmatmul.bf16.gmra.mxu3 %v17009_v8  ;;  %v2366_v40 = vpop.f32.mrf.mxu0  ;;  %v7344_v15 = vor.u32 %v8376_v4, %v7341_v21  ;;  %v8368_v4 = vld [vmem:[#allocation3 + $0x6c] sm:$0xf]  ;;  %v17017_v21 = vld [vmem:[#allocation313_spill] sm:$0xff] }
 0x41f   :  { %v2367_v18 = vadd.f32 %v2366_v40, %v17010_v48  ;;  %v11418_v28 = vpop.f32.mrf.mxu1  ;;  %v8372_v48 = vld [vmem:[#allocation3 + $0x8c] sm:$0xf] }
 0x420   :  { %17008 = vst [vmem:[#allocation378_spill] sm:$0xff] %v11414_v6  ;;  %v17013_v6 = vld [vmem:[#allocation351_spill] sm:$0xff] }
 0x421   :  { %v11420_v32 = vpop.f32.mrf.mxu3  ;;  %v2456_v42 = vadd.f32 %v2455_v5, %v2367_v18  ;;  %2960 = vmatpush.bf16.msrb.mxu3 %v7344_v15  ;;  %v7328_v5 = vor.u32 %v8372_v48, %v7325_v31  ;;  %v7309_v18 = vld [vmem:[#allocation3 + $0x78] sm:$0xf0] }
 0x422   :  { %17011 = vst [vmem:[#allocation350_spill] sm:$0xff] %v11420_v32  ;;  %v17014_v32 = vld [vmem:[#allocation34_spill] sm:$0xff] }
 0x425   :  { %v2544_v54 = vpop.f32.mrf.mxu2  ;;  %2961 = vmatpush.bf16.msrb.mxu3 %v7328_v5 }
 0x426   :  { %v11422_v58 = vadd.f32 %v2544_v54, %v2456_v42  ;;  %v2369_v13 = vpop.f32.mrf.mxu0  ;;  %v7312_v42 = vor.u32 %v8368_v4, %v7309_v18  ;;  %v7277_v4 = vld [vmem:[#allocation3 + $0x38] sm:$0xf0] }
 0x427   :  { %v2370_v8 = vadd.f32 %v2369_v13, %v17013_v6  ;;  %v11425_v40 = vpop.f32.mrf.mxu1 }
 0x428   :  { %17012 = vst [vmem:[#allocation379_spill] sm:$0xff] %v11422_v58  ;;  %v8360_v58 = vld [vmem:[#allocation3 + $0x2c] sm:$0xf] }
 0x429   :  { %v11427_v2 = vpop.f32.mrf.mxu3  ;;  %2408 = vmatmul.bf16.gmra.mxu0 %v17014_v32  ;;  %v2459_v39 = vadd.f32 %v2458_v23, %v2370_v8  ;;  %2962 = vmatpush.bf16.msrb.mxu3 %v7312_v42  ;;  %v8364_v23 = vld [vmem:[#allocation3 + $0x4c] sm:$0xf]  ;;  %v7293_v8 = vld [vmem:[#allocation3 + $0x58] sm:$0xf0]  ;;  %v7280_v18 = vor.u32 %v8360_v58, %v7277_v4 }
 0x42a   :  { %2507 = vmatmul.bf16.gmra.mxu1 %v11153_v0  ;;  %7678 = vmatmul.msk.bf16.gmra.mxu2 %vm1841_vm0, %v17015_v19  ;;  %v7296_v5 = vor.u32 %v8364_v23, %v7293_v8  ;;  %v8356_v42 = vld [vmem:[#allocation3 + $0xc] sm:$0xf]  ;;  %v17020_v23 = vld [vmem:[#allocation315_spill] sm:$0xff]  ;;  %v7645_v8 = vld [vmem:[#allocation3 + $0x318] sm:$0xf0] }
 0x42b   :  { %v17019_v0 = vld [vmem:[#allocation42_spill] sm:$0xff] }
 0x42c   :  { %v8452_v58 = vld [vmem:[#allocation3 + $0x30c] sm:$0xf] }
 0x42d   :  { %v2547_v6 = vpop.f32.mrf.mxu2  ;;  %2963 = vmatpush.bf16.msrb.mxu3 %v7296_v5 }
 0x42e   :  { %v11433_v30 = vadd.f32 %v2547_v6, %v2459_v39  ;;  %2675 = vmatmul.bf16.gmra.mxu3 %v17017_v21  ;;  %v2371_v54 = vpop.f32.mrf.mxu0  ;;  %v7261_v21 = vld [vmem:[#allocation3 + $0x18] sm:$0xf0] }
 0x42f   :  { %v2372_v15 = vadd.f32 %v2371_v54, %v11124_v59  ;;  %v11437_v13 = vpop.f32.mrf.mxu1 }
 0x430   :  { %17016 = vst [vmem:[#allocation351_spill] sm:$0xff] %v11433_v30 }
 0x431   :  { %v11439_v48 = vpop.f32.mrf.mxu3  ;;  %v2461_v31 = vadd.f32 %v11399_v46, %v2372_v15  ;;  %2964 = vmatpush.bf16.msrb.mxu3 %v7280_v18  ;;  %v7264_v15 = vor.u32 %v8356_v42, %v7261_v21  ;;  %v8448_v21 = vld [vmem:[#allocation3 + $0x2ec] sm:$0xf]  ;;  %v7629_v18 = vld [vmem:[#allocation3 + $0x2f8] sm:$0xf0] }
 0x435   :  { %v2549_v39 = vpop.f32.mrf.mxu2  ;;  %2965 = vmatpush.bf16.msrb.mxu3 %v7264_v15 }
 0x436   :  { %v11442_v6 = vadd.f32 %v2549_v39, %v2461_v31  ;;  %v2374_v30 = vpop.f32.mrf.mxu0  ;;  %v8416_v31 = vld [vmem:[#allocation3 + $0x1ec] sm:$0xf] }
 0x437   :  { %v2375_v59 = vadd.f32 %v2374_v30, %v11138_v41  ;;  %v2473_v54 = vpop.f32.mrf.mxu1  ;;  %v7648_v41 = vor.u32 %v8452_v58, %v7645_v8  ;;  %v7501_v30 = vld [vmem:[#allocation3 + $0x1f8] sm:$0xf0] }
 0x438   :  { %17018 = vst [vmem:[#allocation34_spill] sm:$0xff] %v11442_v6  ;;  %v7504_v5 = vor.u32 %v8416_v31, %v7501_v30  ;;  %v7632_v6 = vor.u32 %v8448_v21, %v7629_v18 }
 0x439   :  { %v11445_v19 = vpop.f32.mrf.mxu3  ;;  %2413 = vmatmul.bf16.gmra.mxu0 %v17019_v0  ;;  %v2464_v46 = vadd.f32 %v11406_v7, %v2375_v59  ;;  %3232 = vmatpush.bf16.msra.mxu2 %v7648_v41 }
 0x43a   :  { %7679 = vmatmul.msk.bf16.gmra.mxu2 %vm1841_vm0, %v17020_v23  ;;  %2788 = vmatmul.bf16.vlgmr.msrb.gmra.mxu1 %v10679_v55 }
 0x43b   :  { %3047 = vmatpush.bf16.msra.mxu0 %v7504_v5  ;;  %3136 = vmatpush.bf16.msra.mxu1 %v7632_v6  ;;  %v17023_v5 = vld [vmem:[#allocation50_spill] sm:$0xff] }
 0x43d   :  { %v2552_v4 = vpop.f32.mrf.mxu2 }
 0x43e   :  { %v11452_v39 = vadd.f32 %v2552_v4, %v2464_v46  ;;  %2680 = vmatmul.bf16.gmra.mxu3 %v10627_v36  ;;  %v2376_v7 = vpop.f32.mrf.mxu0  ;;  %v17024_v4 = vld [vmem:[#allocation317_spill] sm:$0xff] }
 0x43f   :  { %v2377_v59 = vadd.f32 %v2376_v7, %v11159_v49  ;;  %v2475_v42 = vpop.f32.mrf.mxu1 }
 0x440   :  { %17021 = vst [vmem:[#allocation42_spill] sm:$0xff] %v11452_v39 }
 0x441   :  { %v11456_v55 = vpop.f32.mrf.mxu3  ;;  %v2466_v15 = vadd.f32 %v11418_v28, %v2377_v59 }
 0x445   :  { %v2554_v58 = vpop.f32.mrf.mxu2 }
 0x446   :  { %v11459_v8 = vadd.f32 %v2554_v58, %v2466_v15  ;;  %v2379_v46 = vpop.f32.mrf.mxu0 }
 0x447   :  { %v2380_v31 = vadd.f32 %v2379_v46, %v11173_v43  ;;  %v2478_v41 = vpop.f32.mrf.mxu1 }
 0x448   :  { %17022 = vst [vmem:[#allocation315_spill] sm:$0xff] %v11459_v8 }
 0x449   :  { %v11462_v30 = vpop.f32.mrf.mxu3  ;;  %2418 = vmatmul.bf16.gmra.mxu0 %v17023_v5  ;;  %v2469_v49 = vadd.f32 %v11425_v40, %v2380_v31 }
 0x44a   :  { %7680 = vmatmul.msk.bf16.gmra.mxu2 %vm1841_vm0, %v17024_v4  ;;  %2793 = vmatmul.bf16.gmra.mxu1 %v10695_v44 }
 0x44d   :  { %v2557_v28 = vpop.f32.mrf.mxu2 }
 0x44e   :  { %v11469_v6 = vadd.f32 %v2557_v28, %v2469_v49  ;;  %2685 = vmatmul.bf16.gmra.mxu3 %v10652_v60  ;;  %v2381_v7 = vpop.f32.mrf.mxu0  ;;  %v7485_v28 = vld [vmem:[#allocation3 + $0x1d8] sm:$0xf0] }
 0x44f   :  { %v2382_v43 = vadd.f32 %v2381_v7, %v11181_v17  ;;  %v2480_v21 = vpop.f32.mrf.mxu1  ;;  %v8412_v17 = vld [vmem:[#allocation3 + $0x1cc] sm:$0xf] }
 0x450   :  { %17025 = vst [vmem:[#allocation50_spill] sm:$0xff] %v11469_v6 }
 0x451   :  { %v11473_v18 = vpop.f32.mrf.mxu3  ;;  %v2471_v59 = vadd.f32 %v11437_v13, %v2382_v43  ;;  %v7488_v13 = vor.u32 %v8412_v17, %v7485_v28 }
 0x453   :  { %3048 = vmatpush.bf16.msra.mxu0 %v7488_v13 }
 0x455   :  { %v2559_v15 = vpop.f32.mrf.mxu2 }
 0x456   :  { %v11476_v40 = vadd.f32 %v2559_v15, %v2471_v59  ;;  %v2384_v58 = vpop.f32.mrf.mxu0  ;;  %v8444_v59 = vld [vmem:[#allocation3 + $0x2cc] sm:$0xf]  ;;  %v7613_v15 = vld [vmem:[#allocation3 + $0x2d8] sm:$0xf0] }
 0x457   :  { %v2385_v46 = vadd.f32 %v2384_v58, %v11194_v35  ;;  %v2483_v31 = vpop.f32.mrf.mxu1 }
 0x458   :  { %17026 = vst [vmem:[#allocation317_spill] sm:$0xff] %v11476_v40 }
 0x459   :  { %v11479_v8 = vpop.f32.mrf.mxu3  ;;  %2699 = vmatmul.bf16.vlgmr.msrb.gmra.mxu0 %v10629_v29  ;;  %v2474_v49 = vadd.f32 %v2473_v54, %v2385_v46  ;;  %v7616_v46 = vor.u32 %v8444_v59, %v7613_v15 }
 0x45a   :  { %2798 = vmatmul.bf16.gmra.mxu1 %v10711_v61  ;;  %7681 = vmatmul.msk.bf16.vlgmr.msrb.gmra.mxu2 %vm1841_vm0, %v10805_v34 }
 0x45b   :  { %3137 = vmatpush.bf16.msra.mxu1 %v7616_v46 }
 0x45d   :  { %v2562_v7 = vpop.f32.mrf.mxu2 }
 0x45e   :  { %v11485_v43 = vadd.f32 %v2562_v7, %v2474_v49  ;;  %2966 = vmatmul.bf16.vlgmr.msrb.gmra.mxu3 %v10574_v45  ;;  %v2386_v35 = vpop.f32.mrf.mxu0 }
 0x45f   :  { %v2387_v58 = vadd.f32 %v2386_v35, %v11201_v53  ;;  %v2485_v54 = vpop.f32.mrf.mxu1 }
 0x460   :  { %17027 = vst [vmem:[#allocation380_spill] sm:$0xff] %v11485_v43 }
 0x461   :  { %v11489_v40 = vpop.f32.mrf.mxu3  ;;  %v2476_v6 = vadd.f32 %v2475_v42, %v2387_v58 }
 0x465   :  { %v2564_v39 = vpop.f32.mrf.mxu2 }
 0x466   :  { %v11491_v34 = vadd.f32 %v2564_v39, %v2476_v6  ;;  %v2389_v17 = vpop.f32.mrf.mxu0 }
 0x467   :  { %v2390_v49 = vadd.f32 %v2389_v17, %v11213_v9  ;;  %v2488_v28 = vpop.f32.mrf.mxu1 }
 0x468   :  { %17028 = vst [vmem:[#allocation381_spill] sm:$0xff] %v11491_v34 }
 0x469   :  { %v11494_v13 = vpop.f32.mrf.mxu3  ;;  %2704 = vmatmul.bf16.gmra.mxu0 %v10654_v10  ;;  %v2479_v45 = vadd.f32 %v2478_v41, %v2390_v49 }
 0x46a   :  { %2803 = vmatmul.bf16.gmra.mxu1 %v10729_v38  ;;  %7682 = vmatmul.msk.bf16.gmra.mxu2 %vm1841_vm0, %v10840_v37 }
 0x46d   :  { %v2567_v53 = vpop.f32.mrf.mxu2 }
 0x46e   :  { %v11500_v42 = vadd.f32 %v2567_v53, %v2479_v45  ;;  %2971 = vmatmul.bf16.gmra.mxu3 %v10600_v12  ;;  %v2391_v39 = vpop.f32.mrf.mxu0  ;;  %v17031_v12 = vld [vmem:[#allocation14_spill] sm:$0xff]  ;;  %v7469_v45 = vld [vmem:[#allocation3 + $0x1b8] sm:$0xf0] }
 0x46f   :  { %v2392_v6 = vadd.f32 %v2391_v39, %v11220_v26  ;;  %v2490_v9 = vpop.f32.mrf.mxu1  ;;  %v8408_v26 = vld [vmem:[#allocation3 + $0x1ac] sm:$0xf] }
 0x470   :  { %17029 = vst [vmem:[#allocation382_spill] sm:$0xff] %v11500_v42 }
 0x471   :  { %v11504_v7 = vpop.f32.mrf.mxu3  ;;  %v2481_v35 = vadd.f32 %v2480_v21, %v2392_v6  ;;  %v7472_v21 = vor.u32 %v8408_v26, %v7469_v45  ;;  %v8440_v6 = vld [vmem:[#allocation3 + $0x2ac] sm:$0xf] }
 0x473   :  { %3049 = vmatpush.bf16.msra.mxu0 %v7472_v21 }
 0x475   :  { %v2569_v59 = vpop.f32.mrf.mxu2 }
 0x476   :  { %v11506_v15 = vadd.f32 %v2569_v59, %v2481_v35  ;;  %v2394_v41 = vpop.f32.mrf.mxu0  ;;  %v7597_v35 = vld [vmem:[#allocation3 + $0x2b8] sm:$0xf0] }
 0x477   :  { %v2395_v58 = vadd.f32 %v2394_v41, %v11233_v20  ;;  %v2493_v46 = vpop.f32.mrf.mxu1  ;;  %v7600_v41 = vor.u32 %v8440_v6, %v7597_v35 }
 0x478   :  { %17030 = vst [vmem:[#allocation383_spill] sm:$0xff] %v11506_v15 }
 0x479   :  { %v11509_v17 = vpop.f32.mrf.mxu3  ;;  %2709 = vmatmul.bf16.gmra.mxu0 %v10677_v11  ;;  %v2484_v49 = vadd.f32 %v2483_v31, %v2395_v58  ;;  %3138 = vmatpush.bf16.msra.mxu1 %v7600_v41 }
 0x47a   :  { %2808 = vmatmul.bf16.gmra.mxu1 %v10749_v3  ;;  %7683 = vmatmul.msk.bf16.gmra.mxu2 %vm1841_vm0, %v17031_v12 }
 0x47d   :  { %v2572_v53 = vpop.f32.mrf.mxu2 }
 0x47e   :  { %v11515_v39 = vadd.f32 %v2572_v53, %v2484_v49  ;;  %2976 = vmatmul.bf16.gmra.mxu3 %v10625_v62  ;;  %v2396_v20 = vpop.f32.mrf.mxu0 }
 0x47f   :  { %v2397_v59 = vadd.f32 %v2396_v20, %v11241_v24  ;;  %v2495_v31 = vpop.f32.mrf.mxu1  ;;  %v17034_v24 = vld [vmem:[#allocation17_spill] sm:$0xff] }
 0x480   :  { %17032 = vst [vmem:[#allocation14_spill] sm:$0xff] %v11515_v39 }
 0x481   :  { %v11519_v58 = vpop.f32.mrf.mxu3  ;;  %v2486_v15 = vadd.f32 %v2485_v54, %v2397_v59 }
 0x485   :  { %v2574_v42 = vpop.f32.mrf.mxu2 }
 0x486   :  { %v11521_v34 = vadd.f32 %v2574_v42, %v2486_v15  ;;  %v2399_v26 = vpop.f32.mrf.mxu0  ;;  %v17036_v15 = vld [vmem:[#allocation365_spill] sm:$0xff] }
 0x487   :  { %v2400_v49 = vadd.f32 %v2399_v26, %v11254_v51  ;;  %v2498_v45 = vpop.f32.mrf.mxu1 }
 0x488   :  { %17033 = vst [vmem:[#allocation384_spill] sm:$0xff] %v11521_v34 }
 0x489   :  { %v11524_v21 = vpop.f32.mrf.mxu3  ;;  %2714 = vmatmul.bf16.gmra.mxu0 %v10693_v47  ;;  %v2489_v62 = vadd.f32 %v2488_v28, %v2400_v49 }
 0x48a   :  { %2813 = vmatmul.bf16.gmra.mxu1 %v16922_v57  ;;  %7684 = vmatmul.msk.bf16.gmra.mxu2 %vm1841_vm0, %v17034_v24 }
 0x48d   :  { %v2577_v53 = vpop.f32.mrf.mxu2 }
 0x48e   :  { %v11530_v54 = vadd.f32 %v2577_v53, %v2489_v62  ;;  %2981 = vmatmul.bf16.gmra.mxu3 %v16925_v63  ;;  %v2401_v42 = vpop.f32.mrf.mxu0  ;;  %v17038_v62 = vld [vmem:[#allocation45_spill] sm:$0xff]  ;;  %v17039_v63 = vld [vmem:[#allocation78_spill] sm:$0xff] }
 0x48f   :  { %v2402_v20 = vadd.f32 %v2401_v42, %v17036_v15  ;;  %v2500_v51 = vpop.f32.mrf.mxu1  ;;  %v8404_v42 = vld [vmem:[#allocation3 + $0x18c] sm:$0xf]  ;;  %v7453_v15 = vld [vmem:[#allocation3 + $0x198] sm:$0xf0] }
 0x490   :  { %17035 = vst [vmem:[#allocation17_spill] sm:$0xff] %v11530_v54  ;;  %v17040_v54 = vld [vmem:[#allocation23_spill] sm:$0xff] }
 0x491   :  { %v11534_v6 = vpop.f32.mrf.mxu3  ;;  %v2491_v35 = vadd.f32 %v2490_v9, %v2402_v20  ;;  %v7456_v9 = vor.u32 %v8404_v42, %v7453_v15 }
 0x493   :  { %3050 = vmatpush.bf16.msra.mxu0 %v7456_v9 }
 0x495   :  { %v2579_v59 = vpop.f32.mrf.mxu2 }
 0x496   :  { %v11536_v41 = vadd.f32 %v2579_v59, %v2491_v35  ;;  %v2404_v28 = vpop.f32.mrf.mxu0  ;;  %v17042_v59 = vld [vmem:[#allocation29_spill] sm:$0xff] }
 0x497   :  { %v2405_v26 = vadd.f32 %v2404_v28, %v11275_v56  ;;  %v2503_v49 = vpop.f32.mrf.mxu1  ;;  %v8436_v28 = vld [vmem:[#allocation3 + $0x28c] sm:$0xf] }
 0x498   :  { %17037 = vst [vmem:[#allocation365_spill] sm:$0xff] %v11536_v41  ;;  %v7581_v41 = vld [vmem:[#allocation3 + $0x298] sm:$0xf0] }
 0x499   :  { %v11539_v34 = vpop.f32.mrf.mxu3  ;;  %2719 = vmatmul.bf16.gmra.mxu0 %v17038_v62  ;;  %v2494_v53 = vadd.f32 %v2493_v46, %v2405_v26  ;;  %v7584_v26 = vor.u32 %v8436_v28, %v7581_v41 }
 0x49a   :  { %2818 = vmatmul.bf16.gmra.mxu1 %v17039_v63  ;;  %7685 = vmatmul.msk.bf16.gmra.mxu2 %vm1841_vm0, %v17040_v54 }
 0x49b   :  { %3139 = vmatpush.bf16.msra.mxu1 %v7584_v26 }
 0x49d   :  { %v2582_v20 = vpop.f32.mrf.mxu2 }
 0x49e   :  { %v11545_v35 = vadd.f32 %v2582_v20, %v2494_v53  ;;  %2986 = vmatmul.bf16.gmra.mxu3 %v17042_v59  ;;  %v2406_v56 = vpop.f32.mrf.mxu0  ;;  %v17044_v59 = vld [vmem:[#allocation12_spill] sm:$0xff] }
 0x49f   :  { %v2407_v39 = vadd.f32 %v2406_v56, %v11283_v14  ;;  %v2505_v46 = vpop.f32.mrf.mxu1  ;;  %v17045_v14 = vld [vmem:[#allocation30_spill] sm:$0xff] }
 0x4a0   :  { %17041 = vst [vmem:[#allocation385_spill] sm:$0xff] %v11545_v35 }
 0x4a1   :  { %v11549_v43 = vpop.f32.mrf.mxu3  ;;  %v2496_v63 = vadd.f32 %v2495_v31, %v2407_v39 }
 0x4a5   :  { %v2584_v54 = vpop.f32.mrf.mxu2 }
 0x4a6   :  { %v11551_v62 = vadd.f32 %v2584_v54, %v2496_v63  ;;  %v2409_v42 = vpop.f32.mrf.mxu0  ;;  %v17047_v54 = vld [vmem:[#allocation368_spill] sm:$0xff] }
 0x4a7   :  { %v2410_v53 = vadd.f32 %v2409_v42, %v11296_v27  ;;  %v2508_v15 = vpop.f32.mrf.mxu1 }
 0x4a8   :  { %17043 = vst [vmem:[#allocation29_spill] sm:$0xff] %v11551_v62 }
 0x4a9   :  { %v11554_v9 = vpop.f32.mrf.mxu3  ;;  %2724 = vmatmul.bf16.gmra.mxu0 %v16941_v25  ;;  %v2499_v20 = vadd.f32 %v2498_v45, %v2410_v53 }
 0x4aa   :  { %2823 = vmatmul.bf16.gmra.mxu1 %v17044_v59  ;;  %7686 = vmatmul.msk.bf16.gmra.mxu2 %vm1841_vm0, %v17045_v14  ;;  %v17058_v59 = vld [vmem:[#allocation337_spill] sm:$0xff] }
 0x4ad   :  { %v2587_v41 = vpop.f32.mrf.mxu2 }
 0x4ae   :  { %v11560_v39 = vadd.f32 %v2587_v41, %v2499_v20  ;;  %2991 = vmatmul.bf16.gmra.mxu3 %v16946_v1  ;;  %v2411_v31 = vpop.f32.mrf.mxu0  ;;  %v17050_v20 = vld [vmem:[#allocation65_spill] sm:$0xff]  ;;  %v17051_v1 = vld [vmem:[#allocation90_spill] sm:$0xff] }
 0x4af   :  { %v2412_v63 = vadd.f32 %v2411_v31, %v17047_v54  ;;  %v2510_v27 = vpop.f32.mrf.mxu1  ;;  %v8400_v31 = vld [vmem:[#allocation3 + $0x16c] sm:$0xf]  ;;  %v7437_v54 = vld [vmem:[#allocation3 + $0x178] sm:$0xf0] }
 0x4b0   :  { %17046 = vst [vmem:[#allocation386_spill] sm:$0xff] %v11560_v39  ;;  %v17052_v39 = vld [vmem:[#allocation38_spill] sm:$0xff] }
 0x4b1   :  { %v11564_v56 = vpop.f32.mrf.mxu3  ;;  %v2501_v28 = vadd.f32 %v2500_v51, %v2412_v63  ;;  %v7440_v51 = vor.u32 %v8400_v31, %v7437_v54  ;;  %v17056_v54 = vld [vmem:[#allocation372_spill] sm:$0xff] }
 0x4b3   :  { %3051 = vmatpush.bf16.msra.mxu0 %v7440_v51 }
 0x4b5   :  { %v2589_v26 = vpop.f32.mrf.mxu2 }
 0x4b6   :  { %v11566_v42 = vadd.f32 %v2589_v26, %v2501_v28  ;;  %v2414_v45 = vpop.f32.mrf.mxu0  ;;  %v17054_v26 = vld [vmem:[#allocation41_spill] sm:$0xff] }
 0x4b7   :  { %v2415_v53 = vadd.f32 %v2414_v45, %v11317_v33  ;;  %v2789_v62 = vpop.f32.mrf.mxu1  ;;  %v8432_v45 = vld [vmem:[#allocation3 + $0x26c] sm:$0xf] }
 0x4b8   :  { %17048 = vst [vmem:[#allocation368_spill] sm:$0xff] %v11566_v42  ;;  %v7565_v42 = vld [vmem:[#allocation3 + $0x278] sm:$0xf0] }
 0x4b9   :  { %v11569_v35 = vpop.f32.mrf.mxu3  ;;  %2729 = vmatmul.bf16.gmra.mxu0 %v17050_v20  ;;  %v2504_v41 = vadd.f32 %v2503_v49, %v2415_v53  ;;  %v7568_v53 = vor.u32 %v8432_v45, %v7565_v42 }
 0x4ba   :  { %17049 = vst [vmem:[#allocation387_spill] sm:$0xff] %v11569_v35  ;;  %2828 = vmatmul.bf16.gmra.mxu1 %v17051_v1  ;;  %7687 = vmatmul.msk.bf16.gmra.mxu2 %vm1841_vm0, %v17052_v39 }
 0x4bb   :  { %3140 = vmatpush.bf16.msra.mxu1 %v7568_v53 }
 0x4bd   :  { %v2592_v63 = vpop.f32.mrf.mxu2 }
 0x4be   :  { %v11575_v28 = vadd.f32 %v2592_v63, %v2504_v41  ;;  %2996 = vmatmul.bf16.gmra.mxu3 %v17054_v26  ;;  %v2416_v33 = vpop.f32.mrf.mxu0  ;;  %v17057_v26 = vld [vmem:[#allocation323_spill] sm:$0xff] }
 0x4bf   :  { %v2417_v20 = vadd.f32 %v2416_v33, %v11325_v16  ;;  %v2791_v49 = vpop.f32.mrf.mxu1  ;;  %v17059_v16 = vld [vmem:[#allocation46_spill] sm:$0xff] }
 0x4c0   :  { %17053 = vst [vmem:[#allocation388_spill] sm:$0xff] %v11575_v28 }
 0x4c1   :  { %v11579_v1 = vpop.f32.mrf.mxu3  ;;  %v2506_v35 = vadd.f32 %v2505_v46, %v2417_v20  ;;  %v17061_v20 = vld [vmem:[#allocation53_spill] sm:$0xff] }
 0x4c5   :  { %v2594_v39 = vpop.f32.mrf.mxu2 }
 0x4c6   :  { %v11581_v14 = vadd.f32 %v2594_v39, %v2506_v35  ;;  %v2419_v31 = vpop.f32.mrf.mxu0  ;;  %v17062_v39 = vld [vmem:[#allocation336_spill] sm:$0xff] }
 0x4c7   :  { %v2420_v41 = vadd.f32 %v2419_v31, %v17056_v54  ;;  %v2794_v51 = vpop.f32.mrf.mxu1 }
 0x4c8   :  { %17055 = vst [vmem:[#allocation41_spill] sm:$0xff] %v11581_v14 }
 0x4c9   :  { %v11584_v63 = vpop.f32.mrf.mxu3  ;;  %2734 = vmatmul.bf16.gmra.mxu0 %v17057_v26  ;;  %v2509_v28 = vadd.f32 %v2508_v15, %v2420_v41 }
 0x4ca   :  { %2833 = vmatmul.bf16.gmra.mxu1 %v17058_v59  ;;  %7688 = vmatmul.msk.bf16.gmra.mxu2 %vm1841_vm0, %v17059_v16 }
 0x4cd   :  { %v2597_v42 = vpop.f32.mrf.mxu2 }
 0x4ce   :  { %v11590_v46 = vadd.f32 %v2597_v42, %v2509_v28  ;;  %3001 = vmatmul.bf16.gmra.mxu3 %v17061_v20  ;;  %v2421_v35 = vpop.f32.mrf.mxu0  ;;  %v17066_v28 = vld [vmem:[#allocation75_spill] sm:$0xff]  ;;  %v17067_v20 = vld [vmem:[#allocation340_spill] sm:$0xff] }
 0x4cf   :  { %v2422_v33 = vadd.f32 %v2421_v35, %v17062_v39  ;;  %v2796_v45 = vpop.f32.mrf.mxu1  ;;  %v8396_v35 = vld [vmem:[#allocation3 + $0x14c] sm:$0xf]  ;;  %v7421_v39 = vld [vmem:[#allocation3 + $0x158] sm:$0xf0] }
 0x4d0   :  { %17060 = vst [vmem:[#allocation372_spill] sm:$0xff] %v11590_v46  ;;  %v17068_v46 = vld [vmem:[#allocation54_spill] sm:$0xff] }
 0x4d1   :  { %v11594_v53 = vpop.f32.mrf.mxu3  ;;  %v2511_v31 = vadd.f32 %v2510_v27, %v2422_v33  ;;  %v7424_v27 = vor.u32 %v8396_v35, %v7421_v39  ;;  %v17072_v39 = vld [vmem:[#allocation341_spill] sm:$0xff] }
 0x4d2   :  { %17063 = vst [vmem:[#allocation53_spill] sm:$0xff] %v11594_v53  ;;  %v17075_v53 = vld [vmem:[#allocation343_spill] sm:$0xff] }
 0x4d3   :  { %3052 = vmatpush.bf16.msra.mxu0 %v7424_v27 }
 0x4d5   :  { %v2599_v54 = vpop.f32.mrf.mxu2 }
 0x4d6   :  { %v11596_v14 = vadd.f32 %v2599_v54, %v2511_v31  ;;  %v2700_v15 = vpop.f32.mrf.mxu0  ;;  %v17070_v54 = vld [vmem:[#allocation61_spill] sm:$0xff] }
 0x4d7   :  { %v2701_v41 = vadd.f32 %v2700_v15, %v11354_v22  ;;  %v2799_v59 = vpop.f32.mrf.mxu1  ;;  %v8428_v15 = vld [vmem:[#allocation3 + $0x24c] sm:$0xf] }
 0x4d8   :  { %17064 = vst [vmem:[#allocation336_spill] sm:$0xff] %v11596_v14  ;;  %v7549_v14 = vld [vmem:[#allocation3 + $0x258] sm:$0xf0] }
 0x4d9   :  { %v11599_v16 = vpop.f32.mrf.mxu3  ;;  %2739 = vmatmul.bf16.gmra.mxu0 %v17066_v28  ;;  %v2790_v42 = vadd.f32 %v2789_v62, %v2701_v41  ;;  %v7552_v41 = vor.u32 %v8428_v15, %v7549_v14 }
 0x4da   :  { %17065 = vst [vmem:[#allocation389_spill] sm:$0xff] %v11599_v16  ;;  %2838 = vmatmul.bf16.gmra.mxu1 %v17067_v20  ;;  %7689 = vmatmul.msk.bf16.gmra.mxu2 %vm1841_vm0, %v17068_v46 }
 0x4db   :  { %3141 = vmatpush.bf16.msra.mxu1 %v7552_v41 }
 0x4dd   :  { %v2878_v33 = vpop.f32.mrf.mxu2 }
 0x4de   :  { %v11605_v31 = vadd.f32 %v2878_v33, %v2790_v42  ;;  %3006 = vmatmul.bf16.gmra.mxu3 %v17070_v54  ;;  %v2702_v22 = vpop.f32.mrf.mxu0  ;;  %v17074_v54 = vld [vmem:[#allocation11_spill] sm:$0xff] }
 0x4df   :  { %v2703_v28 = vadd.f32 %v2702_v22, %v11359_v52  ;;  %v2801_v62 = vpop.f32.mrf.mxu1  ;;  %v17076_v52 = vld [vmem:[#allocation62_spill] sm:$0xff] }
 0x4e0   :  { %17069 = vst [vmem:[#allocation390_spill] sm:$0xff] %v11605_v31 }
 0x4e1   :  { %v11609_v20 = vpop.f32.mrf.mxu3  ;;  %v2792_v16 = vadd.f32 %v2791_v49, %v2703_v28  ;;  %v17078_v28 = vld [vmem:[#allocation72_spill] sm:$0xff] }
 0x4e5   :  { %v2880_v46 = vpop.f32.mrf.mxu2 }
 0x4e6   :  { %v11611_v26 = vadd.f32 %v2880_v46, %v2792_v16  ;;  %v2705_v35 = vpop.f32.mrf.mxu0  ;;  %v17079_v46 = vld [vmem:[#allocation342_spill] sm:$0xff] }
 0x4e7   :  { %v2706_v42 = vadd.f32 %v2705_v35, %v17072_v39  ;;  %v2804_v27 = vpop.f32.mrf.mxu1 }
 0x4e8   :  { %17071 = vst [vmem:[#allocation61_spill] sm:$0xff] %v11611_v26 }
 0x4e9   :  { %v11614_v33 = vpop.f32.mrf.mxu3  ;;  %2744 = vmatmul.bf16.gmra.mxu0 %v17074_v54  ;;  %v2795_v31 = vadd.f32 %v2794_v51, %v2706_v42 }
 0x4ea   :  { %17073 = vst [vmem:[#allocation341_spill] sm:$0xff] %v11614_v33  ;;  %2843 = vmatmul.bf16.gmra.mxu1 %v17075_v53  ;;  %7690 = vmatmul.msk.bf16.gmra.mxu2 %vm1841_vm0, %v17076_v52  ;;  %v17093_v33 = vld [vmem:[#allocation349_spill] sm:$0xff] }
 0x4ed   :  { %v2883_v14 = vpop.f32.mrf.mxu2 }
 0x4ee   :  { %v11620_v49 = vadd.f32 %v2883_v14, %v2795_v31  ;;  %3011 = vmatmul.bf16.gmra.mxu3 %v17078_v28  ;;  %v2707_v16 = vpop.f32.mrf.mxu0  ;;  %v17083_v31 = vld [vmem:[#allocation87_spill] sm:$0xff]  ;;  %v17084_v28 = vld [vmem:[#allocation346_spill] sm:$0xff] }
 0x4ef   :  { %v2708_v22 = vadd.f32 %v2707_v16, %v17079_v46  ;;  %v2806_v15 = vpop.f32.mrf.mxu1  ;;  %v8392_v16 = vld [vmem:[#allocation3 + $0x12c] sm:$0xf]  ;;  %v7405_v46 = vld [vmem:[#allocation3 + $0x138] sm:$0xf0] }
 0x4f0   :  { %17077 = vst [vmem:[#allocation391_spill] sm:$0xff] %v11620_v49  ;;  %v17085_v49 = vld [vmem:[#allocation307_spill] sm:$0xff] }
 0x4f1   :  { %v11624_v41 = vpop.f32.mrf.mxu3  ;;  %v2797_v35 = vadd.f32 %v2796_v45, %v2708_v22  ;;  %v7408_v45 = vor.u32 %v8392_v16, %v7405_v46  ;;  %v17090_v46 = vld [vmem:[#allocation347_spill] sm:$0xff] }
 0x4f2   :  { %17080 = vst [vmem:[#allocation72_spill] sm:$0xff] %v11624_v41 }
 0x4f3   :  { %3053 = vmatpush.bf16.msra.mxu0 %v7408_v45 }
 0x4f5   :  { %v2885_v39 = vpop.f32.mrf.mxu2 }
 0x4f6   :  { %v11626_v26 = vadd.f32 %v2885_v39, %v2797_v35  ;;  %v2710_v51 = vpop.f32.mrf.mxu0  ;;  %v17087_v39 = vld [vmem:[#allocation309_spill] sm:$0xff] }
 0x4f7   :  { %v2711_v42 = vadd.f32 %v2710_v51, %v11384_v50  ;;  %v2809_v53 = vpop.f32.mrf.mxu1  ;;  %v8424_v51 = vld [vmem:[#allocation3 + $0x22c] sm:$0xf] }
 0x4f8   :  { %17081 = vst [vmem:[#allocation342_spill] sm:$0xff] %v11626_v26  ;;  %v7533_v26 = vld [vmem:[#allocation3 + $0x238] sm:$0xf0] }
 0x4f9   :  { %v11629_v52 = vpop.f32.mrf.mxu3  ;;  %2749 = vmatmul.bf16.gmra.mxu0 %v17083_v31  ;;  %v2800_v14 = vadd.f32 %v2799_v59, %v2711_v42  ;;  %v7536_v42 = vor.u32 %v8424_v51, %v7533_v26 }
 0x4fa   :  { %17082 = vst [vmem:[#allocation392_spill] sm:$0xff] %v11629_v52  ;;  %2848 = vmatmul.bf16.gmra.mxu1 %v17084_v28  ;;  %7691 = vmatmul.msk.bf16.gmra.mxu2 %vm1841_vm0, %v17085_v49  ;;  %v17088_v52 = vld [vmem:[#allocation345_spill] sm:$0xff] }
 0x4fb   :  { %3142 = vmatpush.bf16.msra.mxu1 %v7536_v42 }
 0x4fd   :  { %v2888_v22 = vpop.f32.mrf.mxu2 }
 0x4fe   :  { %v11635_v35 = vadd.f32 %v2888_v22, %v2800_v14  ;;  %3016 = vmatmul.bf16.gmra.mxu3 %v17087_v39  ;;  %v2712_v50 = vpop.f32.mrf.mxu0  ;;  %v17092_v39 = vld [vmem:[#allocation20_spill] sm:$0xff] }
 0x4ff   :  { %v2713_v31 = vadd.f32 %v2712_v50, %v17088_v52  ;;  %v2811_v59 = vpop.f32.mrf.mxu1  ;;  %v17094_v52 = vld [vmem:[#allocation308_spill] sm:$0xff] }
 0x500   :  { %17086 = vst [vmem:[#allocation393_spill] sm:$0xff] %v11635_v35 }
 0x501   :  { %v11639_v28 = vpop.f32.mrf.mxu3  ;;  %v2802_v54 = vadd.f32 %v2801_v62, %v2713_v31  ;;  %v17096_v31 = vld [vmem:[#allocation312_spill] sm:$0xff] }
 0x505   :  { %v2890_v49 = vpop.f32.mrf.mxu2 }
 0x506   :  { %v11641_v41 = vadd.f32 %v2890_v49, %v2802_v54  ;;  %v2715_v16 = vpop.f32.mrf.mxu0  ;;  %v17097_v49 = vld [vmem:[#allocation348_spill] sm:$0xff] }
 0x507   :  { %v2716_v14 = vadd.f32 %v2715_v16, %v17090_v46  ;;  %v2814_v45 = vpop.f32.mrf.mxu1  ;;  %v8420_v46 = vld [vmem:[#allocation3 + $0x20c] sm:$0xf] }
 0x508   :  { %17089 = vst [vmem:[#allocation309_spill] sm:$0xff] %v11641_v41  ;;  %v7517_v41 = vld [vmem:[#allocation3 + $0x218] sm:$0xf0] }
 0x509   :  { %v11644_v22 = vpop.f32.mrf.mxu3  ;;  %2754 = vmatmul.bf16.gmra.mxu0 %v17092_v39  ;;  %v2805_v35 = vadd.f32 %v2804_v27, %v2716_v14  ;;  %v7520_v14 = vor.u32 %v8420_v46, %v7517_v41  ;;  %v17105_v46 = vld [vmem:[#allocation172_spill] sm:$0xff] }
 0x50a   :  { %17091 = vst [vmem:[#allocation345_spill] sm:$0xff] %v11644_v22  ;;  %2853 = vmatmul.bf16.gmra.mxu1 %v17093_v33  ;;  %7692 = vmatmul.msk.bf16.gmra.mxu2 %vm1841_vm0, %v17094_v52  ;;  %v17100_v52 = vld [vmem:[#allocation350_spill] sm:$0xff] }
 0x50b   :  { %3143 = vmatpush.bf16.msra.mxu1 %v7520_v14  ;;  %v17108_v14 = vld [vmem:[#allocation310_spill] sm:$0xff] }
 0x50d   :  { %v2893_v26 = vpop.f32.mrf.mxu2 }
 0x50e   :  { %v11650_v62 = vadd.f32 %v2893_v26, %v2805_v35  ;;  %3021 = vmatmul.bf16.gmra.mxu3 %v17096_v31  ;;  %v2717_v54 = vpop.f32.mrf.mxu0  ;;  %v17102_v31 = vld [vmem:[#allocation26_spill] sm:$0xff] }
 0x50f   :  { %v2718_v50 = vadd.f32 %v2717_v54, %v17097_v49  ;;  %v2816_v51 = vpop.f32.mrf.mxu1  ;;  %v17103_v49 = vld [vmem:[#allocation58_spill] sm:$0xff] }
 0x510   :  { %17095 = vst [vmem:[#allocation347_spill] sm:$0xff] %v11650_v62  ;;  %v17104_v62 = vld [vmem:[#allocation311_spill] sm:$0xff] }
 0x511   :  { %v11654_v42 = vpop.f32.mrf.mxu3  ;;  %v2807_v16 = vadd.f32 %v2806_v15, %v2718_v50  ;;  %v8388_v15 = vld [vmem:[#allocation3 + $0x10c] sm:$0xf]  ;;  %v7389_v50 = vld [vmem:[#allocation3 + $0x118] sm:$0xf0] }
 0x512   :  { %17098 = vst [vmem:[#allocation312_spill] sm:$0xff] %v11654_v42  ;;  %v7392_v41 = vor.u32 %v8388_v15, %v7389_v50  ;;  %v17112_v42 = vld [vmem:[#allocation160_spill] sm:$0xff] }
 0x514   :  { %3054 = vmatpush.bf16.msra.mxu0 %v7392_v41  ;;  %v17111_v41 = vld [vmem:[#allocation156_spill] sm:$0xff] }
 0x515   :  { %v2895_v27 = vpop.f32.mrf.mxu2 }
 0x516   :  { %v11656_v33 = vadd.f32 %v2895_v27, %v2807_v16  ;;  %v2720_v39 = vpop.f32.mrf.mxu0  ;;  %v17106_v27 = vld [vmem:[#allocation176_spill] sm:$0xff] }
 0x517   :  { %v2721_v22 = vadd.f32 %v2720_v39, %v17100_v52  ;;  %v2819_v35 = vpop.f32.mrf.mxu1  ;;  %v7828_v39 = vor.u32 %v17106_v27, %v17105_v46  ;;  %v7796_v46 = vor.u32 %v17112_v42, %v17111_v41  ;;  %v17118_v42 = vld [vmem:[#allocation140_spill] sm:$0xff]  ;;  %v17121_v41 = vld [vmem:[#allocation313_spill] sm:$0xff] }
 0x518   :  { %17099 = vst [vmem:[#allocation348_spill] sm:$0xff] %v11656_v33 }
 0x519   :  { %v11659_v26 = vpop.f32.mrf.mxu3  ;;  %2759 = vmatmul.bf16.gmra.mxu0 %v17102_v31  ;;  %v2810_v54 = vadd.f32 %v2809_v53, %v2721_v22  ;;  %4018 = vmatpush.bf16.msra.mxu3 %v7828_v39  ;;  %v17109_v31 = vld [vmem:[#allocation164_spill] sm:$0xff] }
 0x51a   :  { %17101 = vst [vmem:[#allocation350_spill] sm:$0xff] %v11659_v26  ;;  %2858 = vmatmul.bf16.gmra.mxu1 %v17103_v49  ;;  %7693 = vmatmul.msk.bf16.gmra.mxu2 %vm1841_vm0, %v17104_v62  ;;  %v17110_v26 = vld [vmem:[#allocation168_spill] sm:$0xff] }
 0x51b   :  { %v7812_v15 = vor.u32 %v17110_v26, %v17109_v31  ;;  %v17115_v39 = vld [vmem:[#allocation152_spill] sm:$0xff]  ;;  %v17116_v31 = vld [vmem:[#allocation66_spill] sm:$0xff] }
 0x51d   :  { %v2898_v16 = vpop.f32.mrf.mxu2  ;;  %4019 = vmatpush.bf16.msra.mxu3 %v7812_v15  ;;  %v17119_v15 = vld [vmem:[#allocation144_spill] sm:$0xff] }
 0x51e   :  { %v11667_v52 = vadd.f32 %v2898_v16, %v2810_v54  ;;  %3026 = vmatmul.bf16.gmra.mxu3 %v17108_v14  ;;  %v2722_v33 = vpop.f32.mrf.mxu0 }
 0x51f   :  { %v2723_v53 = vadd.f32 %v2722_v33, %v11427_v2  ;;  %v2821_v22 = vpop.f32.mrf.mxu1 }
 0x520   :  { %17107 = vst [vmem:[#allocation172_spill] sm:$0xff] %v11667_v52 }
 0x521   :  { %v11671_v49 = vpop.f32.mrf.mxu3  ;;  %v2812_v62 = vadd.f32 %v2811_v59, %v2723_v53  ;;  %4020 = vmatpush.bf16.msra.mxu3 %v7796_v46  ;;  %v17114_v59 = vld [vmem:[#allocation148_spill] sm:$0xff]  ;;  %v17117_v53 = vld [vmem:[#allocation314_spill] sm:$0xff] }
 0x522   :  { %v7780_v26 = vor.u32 %v17115_v39, %v17114_v59  ;;  %v17122_v39 = vld [vmem:[#allocation132_spill] sm:$0xff] }
 0x525   :  { %v2900_v50 = vpop.f32.mrf.mxu2  ;;  %4021 = vmatpush.bf16.msra.mxu3 %v7780_v26 }
 0x526   :  { %v11677_v54 = vadd.f32 %v2900_v50, %v2812_v62  ;;  %v2725_v16 = vpop.f32.mrf.mxu0 }
 0x527   :  { %v2726_v27 = vadd.f32 %v2725_v16, %v11439_v48  ;;  %v2824_v14 = vpop.f32.mrf.mxu1  ;;  %v7764_v48 = vor.u32 %v17119_v15, %v17118_v42 }
 0x528   :  { %17113 = vst [vmem:[#allocation176_spill] sm:$0xff] %v11677_v54  ;;  %v17123_v54 = vld [vmem:[#allocation136_spill] sm:$0xff] }
 0x529   :  { %v11680_v2 = vpop.f32.mrf.mxu3  ;;  %2764 = vmatmul.bf16.gmra.mxu0 %v17014_v32  ;;  %v2815_v33 = vadd.f32 %v2814_v45, %v2726_v27  ;;  %4022 = vmatpush.bf16.msra.mxu3 %v7764_v48  ;;  %v7748_v52 = vor.u32 %v17123_v54, %v17122_v39  ;;  %v17127_v48 = vld [vmem:[#allocation116_spill] sm:$0xff] }
 0x52a   :  { %2863 = vmatmul.bf16.gmra.mxu1 %v17116_v31  ;;  %7694 = vmatmul.msk.bf16.gmra.mxu2 %vm1841_vm0, %v17117_v53  ;;  %v17124_v53 = vld [vmem:[#allocation124_spill] sm:$0xff] }
 0x52b   :  { %v17125_v31 = vld [vmem:[#allocation128_spill] sm:$0xff] }
 0x52c   :  { %v7732_v42 = vor.u32 %v17125_v31, %v17124_v53  ;;  %v17130_v31 = vld [vmem:[#allocation175_spill] sm:$0xff] }
 0x52d   :  { %v2903_v62 = vpop.f32.mrf.mxu2  ;;  %4023 = vmatpush.bf16.msra.mxu3 %v7748_v52  ;;  %v17129_v52 = vld [vmem:[#allocation33_spill] sm:$0xff]  ;;  %v17131_v53 = vld [vmem:[#allocation171_spill] sm:$0xff] }
 0x52e   :  { %v11690_v50 = vadd.f32 %v2903_v62, %v2815_v33  ;;  %3031 = vmatmul.bf16.gmra.mxu3 %v17121_v41  ;;  %v2727_v46 = vpop.f32.mrf.mxu0 }
 0x52f   :  { %v2728_v45 = vadd.f32 %v2727_v46, %v11445_v19  ;;  %v2826_v16 = vpop.f32.mrf.mxu1  ;;  %v17128_v46 = vld [vmem:[#allocation120_spill] sm:$0xff] }
 0x530   :  { %17120 = vst [vmem:[#allocation310_spill] sm:$0xff] %v11690_v50  ;;  %v7716_v54 = vor.u32 %v17128_v46, %v17127_v48 }
 0x531   :  { %v11694_v27 = vpop.f32.mrf.mxu3  ;;  %v2817_v59 = vadd.f32 %v2816_v51, %v2728_v45  ;;  %4024 = vmatpush.bf16.msra.mxu3 %v7732_v42  ;;  %v7832_v45 = vor.u32 %v17131_v53, %v17130_v31 }
 0x533   :  { %4285 = vmatpush.bf16.msrb.mxu2 %v7832_v45 }
 0x535   :  { %v2905_v26 = vpop.f32.mrf.mxu2  ;;  %4025 = vmatpush.bf16.msra.mxu3 %v7716_v54 }
 0x536   :  { %v11700_v33 = vadd.f32 %v2905_v26, %v2817_v59  ;;  %v2730_v62 = vpop.f32.mrf.mxu0  ;;  %v17132_v59 = vld [vmem:[#allocation236_spill] sm:$0xff] }
 0x537   :  { %v2731_v15 = vadd.f32 %v2730_v62, %v11456_v55  ;;  %v2829_v41 = vpop.f32.mrf.mxu1  ;;  %v17133_v55 = vld [vmem:[#allocation240_spill] sm:$0xff] }
 0x538   :  { %17126 = vst [vmem:[#allocation164_spill] sm:$0xff] %v11700_v33  ;;  %v7956_v39 = vor.u32 %v17133_v55, %v17132_v59  ;;  %v17135_v62 = vld [vmem:[#allocation300_spill] sm:$0xff] }
 0x539   :  { %v11703_v19 = vpop.f32.mrf.mxu3  ;;  %2769 = vmatmul.bf16.gmra.mxu0 %v17019_v0  ;;  %v2820_v51 = vadd.f32 %v2819_v35, %v2731_v15  ;;  %v17136_v15 = vld [vmem:[#allocation304_spill] sm:$0xff] }
 0x53a   :  { %7695 = vmatmul.msk.bf16.gmra.mxu2 %vm1841_vm0, %v17020_v23  ;;  %3144 = vmatmul.bf16.vlgmr.msra.gmra.mxu1 %v17129_v52  ;;  %v8084_v48 = vor.u32 %v17136_v15, %v17135_v62 }
 0x53b   :  { %4107 = vmatpush.bf16.msrb.mxu0 %v7956_v39 }
 0x53c   :  { %4196 = vmatpush.bf16.msrb.mxu1 %v8084_v48 }
 0x53d   :  { %v2908_v26 = vpop.f32.mrf.mxu2 }
 0x53e   :  { %v11715_v42 = vadd.f32 %v2908_v26, %v2820_v51  ;;  %3036 = vmatmul.bf16.gmra.mxu3 %v10627_v36  ;;  %v2732_v35 = vpop.f32.mrf.mxu0 }
 0x53f   :  { %v2733_v46 = vadd.f32 %v2732_v35, %v11462_v30  ;;  %v2831_v52 = vpop.f32.mrf.mxu1 }
 0x540   :  { %17134 = vst [vmem:[#allocation168_spill] sm:$0xff] %v11715_v42 }
 0x541   :  { %v11721_v31 = vpop.f32.mrf.mxu3  ;;  %v2822_v53 = vadd.f32 %v2821_v22, %v2733_v46 }
 0x545   :  { %v2910_v59 = vpop.f32.mrf.mxu2 }
 0x546   :  { %v11723_v54 = vadd.f32 %v2910_v59, %v2822_v53  ;;  %v2735_v45 = vpop.f32.mrf.mxu0  ;;  %v17140_v53 = vld [vmem:[#allocation15_spill] sm:$0xff] }
 0x547   :  { %v2736_v51 = vadd.f32 %v2735_v45, %v11473_v18  ;;  %v2834_v55 = vpop.f32.mrf.mxu1  ;;  %v3346_v59 = vunpack.c.l.b16 %v17140_v53  ;;  %v17141_v45 = vld [vmem:[#allocation18_spill] sm:$0xff] }
 0x548   :  { %17137 = vst [vmem:[#allocation156_spill] sm:$0xff] %v11723_v54 }
 0x549   :  { %v11726_v39 = vpop.f32.mrf.mxu3  ;;  %2774 = vmatmul.bf16.gmra.mxu0 %v17023_v5  ;;  %v2825_v36 = vadd.f32 %v2824_v14, %v2736_v51 }
 0x54a   :  { %7696 = vmatmul.msk.bf16.gmra.mxu2 %vm1841_vm0, %v17024_v4  ;;  %3149 = vmatmul.bf16.gmra.mxu1 %v10695_v44  ;;  %v3349_v44 = vunpack.c.l.b16 %v17141_v45 }
 0x54d   :  { %v2913_v30 = vpop.f32.mrf.mxu2 }
 0x54e   :  { %v11732_v26 = vadd.f32 %v2913_v30, %v2825_v36  ;;  %3041 = vmatmul.bf16.gmra.mxu3 %v10652_v60  ;;  %v2737_v22 = vpop.f32.mrf.mxu0 }
 0x54f   :  { %v2738_v35 = vadd.f32 %v2737_v22, %v11479_v8  ;;  %v2836_v18 = vpop.f32.mrf.mxu1  ;;  %v17142_v8 = vld [vmem:[#allocation10_spill] sm:$0xff]  ;;  %v17144_v22 = vld [vmem:[#allocation167_spill] sm:$0xff] }
 0x550   :  { %17138 = vst [vmem:[#allocation160_spill] sm:$0xff] %v11732_v26 }
 0x551   :  { %v11736_v62 = vpop.f32.mrf.mxu3  ;;  %v2827_v15 = vadd.f32 %v2826_v16, %v2738_v35  ;;  %v11749_v16 = vpack.c.b16 %v3349_v44, %v3346_v59  ;;  %v17145_v35 = vld [vmem:[#allocation163_spill] sm:$0xff] }
 0x553   :  { %17143 = vst [vmem:[#allocation152_spill] sm:$0xff] %v11749_v16 }
 0x555   :  { %v2915_v48 = vpop.f32.mrf.mxu2 }
 0x556   :  { %v11738_v46 = vadd.f32 %v2915_v48, %v2827_v15  ;;  %v2740_v14 = vpop.f32.mrf.mxu0  ;;  %v7816_v15 = vor.u32 %v17145_v35, %v17144_v22  ;;  %v17146_v48 = vld [vmem:[#allocation228_spill] sm:$0xff] }
 0x557   :  { %v2741_v51 = vadd.f32 %v2740_v14, %v11489_v40  ;;  %v2839_v36 = vpop.f32.mrf.mxu1 }
 0x558   :  { %17139 = vst [vmem:[#allocation148_spill] sm:$0xff] %v11738_v46  ;;  %v17147_v46 = vld [vmem:[#allocation232_spill] sm:$0xff]  ;;  %4286 = vmatpush.bf16.msrb.mxu2 %v7816_v15  ;;  %v17152_v15 = vld [vmem:[#allocation21_spill] sm:$0xff] }
 0x559   :  { %v11743_v30 = vpop.f32.mrf.mxu3  ;;  %3055 = vmatmul.bf16.vlgmr.msra.gmra.mxu0 %v10629_v29  ;;  %v2830_v60 = vadd.f32 %v2829_v41, %v2741_v51  ;;  %v7940_v26 = vor.u32 %v17147_v46, %v17146_v48  ;;  %v17150_v41 = vld [vmem:[#allocation296_spill] sm:$0xff] }
 0x55a   :  { %3154 = vmatmul.bf16.gmra.mxu1 %v10711_v61  ;;  %7697 = vmatmul.msk.bf16.vlgmr.msra.gmra.mxu2 %vm1841_vm0, %v17142_v8  ;;  %v17149_v61 = vld [vmem:[#allocation292_spill] sm:$0xff] }
 0x55b   :  { %4108 = vmatpush.bf16.msrb.mxu0 %v7940_v26  ;;  %v8068_v51 = vor.u32 %v17150_v41, %v17149_v61  ;;  %v17153_v48 = vld [vmem:[#allocation24_spill] sm:$0xff] }
 0x55d   :  { %v2918_v40 = vpop.f32.mrf.mxu2  ;;  %4197 = vmatpush.bf16.msrb.mxu1 %v8068_v51 }
 0x55e   :  { %v11755_v14 = vadd.f32 %v2918_v40, %v2830_v60  ;;  %4026 = vmatmul.bf16.vlgmr.msra.gmra.mxu3 %v11749_v16  ;;  %v2742_v29 = vpop.f32.mrf.mxu0  ;;  %v3352_v60 = vunpack.c.l.b16 %v17152_v15  ;;  %v3355_v40 = vunpack.c.l.b16 %v17153_v48 }
 0x55f   :  { %v2743_v59 = vadd.f32 %v2742_v29, %v11494_v13  ;;  %v2841_v44 = vpop.f32.mrf.mxu1 }
 0x560   :  { %17148 = vst [vmem:[#allocation140_spill] sm:$0xff] %v11755_v14 }
 0x561   :  { %v11761_v8 = vpop.f32.mrf.mxu3  ;;  %v2832_v22 = vadd.f32 %v2831_v52, %v2743_v59  ;;  %v11774_v52 = vpack.c.b16 %v3355_v40, %v3352_v60 }
 0x563   :  { %17154 = vst [vmem:[#allocation313_spill] sm:$0xff] %v11774_v52 }
 0x565   :  { %v2920_v35 = vpop.f32.mrf.mxu2 }
 0x566   :  { %v11763_v46 = vadd.f32 %v2920_v35, %v2832_v22  ;;  %v2745_v26 = vpop.f32.mrf.mxu0  ;;  %v17157_v22 = vld [vmem:[#allocation27_spill] sm:$0xff] }
 0x567   :  { %v2746_v14 = vadd.f32 %v2745_v26, %v11504_v7  ;;  %v2844_v54 = vpop.f32.mrf.mxu1  ;;  %v17158_v35 = vld [vmem:[#allocation31_spill] sm:$0xff] }
 0x568   :  { %17151 = vst [vmem:[#allocation144_spill] sm:$0xff] %v11763_v46  ;;  %v3361_v26 = vunpack.c.l.b16 %v17158_v35 }
 0x569   :  { %v11768_v42 = vpop.f32.mrf.mxu3  ;;  %3060 = vmatmul.bf16.gmra.mxu0 %v10654_v10  ;;  %v2835_v13 = vadd.f32 %v2834_v55, %v2746_v14 }
 0x56a   :  { %3159 = vmatmul.bf16.gmra.mxu1 %v10729_v38  ;;  %7698 = vmatmul.msk.bf16.gmra.mxu2 %vm1841_vm0, %v10840_v37  ;;  %v3358_v37 = vunpack.c.l.b16 %v17157_v22 }
 0x56d   :  { %v2923_v29 = vpop.f32.mrf.mxu2 }
 0x56e   :  { %v11776_v61 = vadd.f32 %v2923_v29, %v2835_v13  ;;  %4031 = vmatmul.bf16.gmra.mxu3 %v11774_v52  ;;  %v2747_v41 = vpop.f32.mrf.mxu0  ;;  %v17160_v29 = vld [vmem:[#allocation159_spill] sm:$0xff] }
 0x56f   :  { %v2748_v7 = vadd.f32 %v2747_v41, %v11509_v17  ;;  %v2846_v51 = vpop.f32.mrf.mxu1  ;;  %v17161_v41 = vld [vmem:[#allocation155_spill] sm:$0xff] }
 0x570   :  { %17155 = vst [vmem:[#allocation132_spill] sm:$0xff] %v11776_v61 }
 0x571   :  { %v11780_v59 = vpop.f32.mrf.mxu3  ;;  %v2837_v10 = vadd.f32 %v2836_v18, %v2748_v7  ;;  %v11793_v18 = vpack.c.b16 %v3361_v26, %v3358_v37  ;;  %v7800_v7 = vor.u32 %v17161_v41, %v17160_v29 }
 0x573   :  { %17159 = vst [vmem:[#allocation124_spill] sm:$0xff] %v11793_v18  ;;  %4287 = vmatpush.bf16.msrb.mxu2 %v7800_v7  ;;  %v17168_v7 = vld [vmem:[#allocation35_spill] sm:$0xff] }
 0x575   :  { %v2925_v55 = vpop.f32.mrf.mxu2 }
 0x576   :  { %v11782_v14 = vadd.f32 %v2925_v55, %v2837_v10  ;;  %v2750_v38 = vpop.f32.mrf.mxu0  ;;  %v17162_v10 = vld [vmem:[#allocation220_spill] sm:$0xff] }
 0x577   :  { %v2751_v60 = vadd.f32 %v2750_v38, %v11519_v58  ;;  %v2849_v40 = vpop.f32.mrf.mxu1  ;;  %v17163_v55 = vld [vmem:[#allocation224_spill] sm:$0xff] }
 0x578   :  { %17156 = vst [vmem:[#allocation136_spill] sm:$0xff] %v11782_v14  ;;  %v7924_v14 = vor.u32 %v17163_v55, %v17162_v10  ;;  %v17169_v55 = vld [vmem:[#allocation39_spill] sm:$0xff] }
 0x579   :  { %v11787_v13 = vpop.f32.mrf.mxu3  ;;  %3065 = vmatmul.bf16.gmra.mxu0 %v10677_v11  ;;  %v2840_v17 = vadd.f32 %v2839_v36, %v2751_v60  ;;  %v17166_v36 = vld [vmem:[#allocation288_spill] sm:$0xff] }
 0x57a   :  { %3164 = vmatmul.bf16.gmra.mxu1 %v10749_v3  ;;  %7699 = vmatmul.msk.bf16.gmra.mxu2 %vm1841_vm0, %v17031_v12  ;;  %v17165_v3 = vld [vmem:[#allocation284_spill] sm:$0xff] }
 0x57b   :  { %4109 = vmatpush.bf16.msrb.mxu0 %v7924_v14  ;;  %v8052_v60 = vor.u32 %v17166_v36, %v17165_v3 }
 0x57d   :  { %v2928_v58 = vpop.f32.mrf.mxu2  ;;  %4198 = vmatpush.bf16.msrb.mxu1 %v8052_v60 }
 0x57e   :  { %v11799_v38 = vadd.f32 %v2928_v58, %v2840_v17  ;;  %4036 = vmatmul.bf16.gmra.mxu3 %v11793_v18  ;;  %v2752_v11 = vpop.f32.mrf.mxu0  ;;  %v3364_v17 = vunpack.c.l.b16 %v17168_v7  ;;  %v3367_v58 = vunpack.c.l.b16 %v17169_v55 }
 0x57f   :  { %v2753_v12 = vadd.f32 %v2752_v11, %v11524_v21  ;;  %v2851_v37 = vpop.f32.mrf.mxu1 }
 0x580   :  { %17164 = vst [vmem:[#allocation128_spill] sm:$0xff] %v11799_v38 }
 0x581   :  { %v11805_v26 = vpop.f32.mrf.mxu3  ;;  %v2842_v29 = vadd.f32 %v2841_v44, %v2753_v12  ;;  %v11818_v44 = vpack.c.b16 %v3367_v58, %v3364_v17 }
 0x583   :  { %17170 = vst [vmem:[#allocation120_spill] sm:$0xff] %v11818_v44 }
 0x585   :  { %v2930_v41 = vpop.f32.mrf.mxu2 }
 0x586   :  { %v11807_v10 = vadd.f32 %v2930_v41, %v2842_v29  ;;  %v2755_v14 = vpop.f32.mrf.mxu0  ;;  %v17173_v29 = vld [vmem:[#allocation43_spill] sm:$0xff] }
 0x587   :  { %v2756_v38 = vadd.f32 %v2755_v14, %v11534_v6  ;;  %v2854_v61 = vpop.f32.mrf.mxu1  ;;  %v17174_v41 = vld [vmem:[#allocation47_spill] sm:$0xff] }
 0x588   :  { %17167 = vst [vmem:[#allocation116_spill] sm:$0xff] %v11807_v10  ;;  %v3373_v14 = vunpack.c.l.b16 %v17174_v41  ;;  %v17182_v10 = vld [vmem:[#allocation216_spill] sm:$0xff] }
 0x589   :  { %v11812_v46 = vpop.f32.mrf.mxu3  ;;  %3070 = vmatmul.bf16.gmra.mxu0 %v10693_v47  ;;  %v2845_v21 = vadd.f32 %v2844_v54, %v2756_v38 }
 0x58a   :  { %3169 = vmatmul.bf16.gmra.mxu1 %v16922_v57  ;;  %7700 = vmatmul.msk.bf16.gmra.mxu2 %vm1841_vm0, %v17034_v24  ;;  %v3370_v24 = vunpack.c.l.b16 %v17173_v29 }
 0x58d   :  { %v2933_v11 = vpop.f32.mrf.mxu2 }
 0x58e   :  { %v11820_v3 = vadd.f32 %v2933_v11, %v2845_v21  ;;  %4041 = vmatmul.bf16.gmra.mxu3 %v11818_v44  ;;  %v2757_v36 = vpop.f32.mrf.mxu0  ;;  %v17175_v11 = vld [vmem:[#allocation45_spill] sm:$0xff] }
 0x58f   :  { %v2758_v6 = vadd.f32 %v2757_v36, %v11539_v34  ;;  %v2856_v60 = vpop.f32.mrf.mxu1  ;;  %v17176_v36 = vld [vmem:[#allocation78_spill] sm:$0xff] }
 0x590   :  { %17171 = vst [vmem:[#allocation33_spill] sm:$0xff] %v11820_v3  ;;  %v17177_v3 = vld [vmem:[#allocation23_spill] sm:$0xff] }
 0x591   :  { %v11824_v12 = vpop.f32.mrf.mxu3  ;;  %v2847_v47 = vadd.f32 %v2846_v51, %v2758_v6  ;;  %v11837_v51 = vpack.c.b16 %v3373_v14, %v3370_v24  ;;  %v17179_v6 = vld [vmem:[#allocation151_spill] sm:$0xff] }
 0x593   :  { %17178 = vst [vmem:[#allocation171_spill] sm:$0xff] %v11837_v51 }
 0x595   :  { %v2935_v54 = vpop.f32.mrf.mxu2 }
 0x596   :  { %v11826_v38 = vadd.f32 %v2935_v54, %v2847_v47  ;;  %v2760_v57 = vpop.f32.mrf.mxu0  ;;  %v17180_v47 = vld [vmem:[#allocation147_spill] sm:$0xff] }
 0x597   :  { %v2761_v17 = vadd.f32 %v2760_v57, %v11549_v43  ;;  %v2859_v58 = vpop.f32.mrf.mxu1  ;;  %v7784_v54 = vor.u32 %v17180_v47, %v17179_v6 }
 0x598   :  { %17172 = vst [vmem:[#allocation175_spill] sm:$0xff] %v11826_v38  ;;  %v17181_v38 = vld [vmem:[#allocation212_spill] sm:$0xff] }
 0x599   :  { %v11831_v21 = vpop.f32.mrf.mxu3  ;;  %3075 = vmatmul.bf16.gmra.mxu0 %v17175_v11  ;;  %v2850_v34 = vadd.f32 %v2849_v40, %v2761_v17  ;;  %v7908_v33 = vor.u32 %v17182_v10, %v17181_v38  ;;  %4288 = vmatpush.bf16.msrb.mxu2 %v7784_v54  ;;  %v17184_v17 = vld [vmem:[#allocation276_spill] sm:$0xff]  ;;  %v17187_v38 = vld [vmem:[#allocation51_spill] sm:$0xff] }
 0x59a   :  { %3174 = vmatmul.bf16.gmra.mxu1 %v17176_v36  ;;  %7701 = vmatmul.msk.bf16.gmra.mxu2 %vm1841_vm0, %v17177_v3  ;;  %v17185_v11 = vld [vmem:[#allocation280_spill] sm:$0xff]  ;;  %v17188_v54 = vld [vmem:[#allocation55_spill] sm:$0xff] }
 0x59b   :  { %4110 = vmatpush.bf16.msrb.mxu0 %v7908_v33  ;;  %v8036_v36 = vor.u32 %v17185_v11, %v17184_v17  ;;  %v17190_v17 = vld [vmem:[#allocation30_spill] sm:$0xff] }
 0x59d   :  { %v2938_v43 = vpop.f32.mrf.mxu2  ;;  %4199 = vmatpush.bf16.msrb.mxu1 %v8036_v36 }
 0x59e   :  { %v11843_v57 = vadd.f32 %v2938_v43, %v2850_v34  ;;  %4046 = vmatmul.bf16.gmra.mxu3 %v11837_v51  ;;  %v2762_v40 = vpop.f32.mrf.mxu0  ;;  %v3376_v34 = vunpack.c.l.b16 %v17187_v38  ;;  %v3379_v43 = vunpack.c.l.b16 %v17188_v54 }
 0x59f   :  { %v2763_v3 = vadd.f32 %v2762_v40, %v11554_v9  ;;  %v2861_v24 = vpop.f32.mrf.mxu1  ;;  %v17189_v40 = vld [vmem:[#allocation12_spill] sm:$0xff] }
 0x5a0   :  { %17183 = vst [vmem:[#allocation236_spill] sm:$0xff] %v11843_v57 }
 0x5a1   :  { %v11849_v14 = vpop.f32.mrf.mxu3  ;;  %v2852_v6 = vadd.f32 %v2851_v37, %v2763_v3  ;;  %v11862_v37 = vpack.c.b16 %v3379_v43, %v3376_v34  ;;  %v17197_v34 = vld [vmem:[#allocation63_spill] sm:$0xff] }
 0x5a2   :  { %v3385_v43 = vunpack.c.l.b16 %v17197_v34  ;;  %v17206_v34 = vld [vmem:[#allocation208_spill] sm:$0xff] }
 0x5a3   :  { %17191 = vst [vmem:[#allocation300_spill] sm:$0xff] %v11862_v37 }
 0x5a5   :  { %v2940_v47 = vpop.f32.mrf.mxu2 }
 0x5a6   :  { %v11851_v10 = vadd.f32 %v2940_v47, %v2852_v6  ;;  %v2765_v33 = vpop.f32.mrf.mxu0 }
 0x5a7   :  { %v2766_v57 = vadd.f32 %v2765_v33, %v11564_v56  ;;  %v2864_v50 = vpop.f32.mrf.mxu1  ;;  %v17193_v56 = vld [vmem:[#allocation387_spill] sm:$0xff] }
 0x5a8   :  { %17186 = vst [vmem:[#allocation240_spill] sm:$0xff] %v11851_v10  ;;  %v17196_v10 = vld [vmem:[#allocation59_spill] sm:$0xff] }
 0x5a9   :  { %v11856_v51 = vpop.f32.mrf.mxu3  ;;  %3080 = vmatmul.bf16.gmra.mxu0 %v16941_v25  ;;  %v2855_v9 = vadd.f32 %v2854_v61, %v2766_v57 }
 0x5aa   :  { %3179 = vmatmul.bf16.gmra.mxu1 %v17189_v40  ;;  %7702 = vmatmul.msk.bf16.gmra.mxu2 %vm1841_vm0, %v17190_v17  ;;  %v3382_v17 = vunpack.c.l.b16 %v17196_v10 }
 0x5ad   :  { %v2943_v11 = vpop.f32.mrf.mxu2 }
 0x5ae   :  { %v11864_v36 = vadd.f32 %v2943_v11, %v2855_v9  ;;  %4051 = vmatmul.bf16.gmra.mxu3 %v11862_v37  ;;  %v2767_v3 = vpop.f32.mrf.mxu0  ;;  %v17199_v37 = vld [vmem:[#allocation65_spill] sm:$0xff] }
 0x5af   :  { %v2768_v6 = vadd.f32 %v2767_v3, %v17193_v56  ;;  %v2866_v47 = vpop.f32.mrf.mxu1  ;;  %v17200_v56 = vld [vmem:[#allocation90_spill] sm:$0xff] }
 0x5b0   :  { %17192 = vst [vmem:[#allocation304_spill] sm:$0xff] %v11864_v36 }
 0x5b1   :  { %v11868_v33 = vpop.f32.mrf.mxu3  ;;  %v2857_v25 = vadd.f32 %v2856_v60, %v2768_v6  ;;  %v11881_v60 = vpack.c.b16 %v3385_v43, %v3382_v17  ;;  %v17203_v6 = vld [vmem:[#allocation143_spill] sm:$0xff] }
 0x5b2   :  { %17194 = vst [vmem:[#allocation15_spill] sm:$0xff] %v11868_v33  ;;  %v17201_v33 = vld [vmem:[#allocation38_spill] sm:$0xff] }
 0x5b3   :  { %17202 = vst [vmem:[#allocation167_spill] sm:$0xff] %v11881_v60 }
 0x5b5   :  { %v2945_v61 = vpop.f32.mrf.mxu2 }
 0x5b6   :  { %v11870_v57 = vadd.f32 %v2945_v61, %v2857_v25  ;;  %v2770_v40 = vpop.f32.mrf.mxu0  ;;  %v17204_v25 = vld [vmem:[#allocation139_spill] sm:$0xff] }
 0x5b7   :  { %v2771_v9 = vadd.f32 %v2770_v40, %v11579_v1  ;;  %v3145_v11 = vpop.f32.mrf.mxu1  ;;  %v7768_v61 = vor.u32 %v17204_v25, %v17203_v6 }
 0x5b8   :  { %17195 = vst [vmem:[#allocation18_spill] sm:$0xff] %v11870_v57  ;;  %v17205_v57 = vld [vmem:[#allocation204_spill] sm:$0xff] }
 0x5b9   :  { %v11875_v36 = vpop.f32.mrf.mxu3  ;;  %3085 = vmatmul.bf16.gmra.mxu0 %v17199_v37  ;;  %v2860_v3 = vadd.f32 %v2859_v58, %v2771_v9  ;;  %v7892_v10 = vor.u32 %v17206_v34, %v17205_v57  ;;  %4289 = vmatpush.bf16.msrb.mxu2 %v7768_v61  ;;  %v17208_v37 = vld [vmem:[#allocation268_spill] sm:$0xff]  ;;  %v17211_v34 = vld [vmem:[#allocation67_spill] sm:$0xff]  ;;  %v17212_v61 = vld [vmem:[#allocation70_spill] sm:$0xff] }
 0x5ba   :  { %17198 = vst [vmem:[#allocation10_spill] sm:$0xff] %v11875_v36  ;;  %3184 = vmatmul.bf16.gmra.mxu1 %v17200_v56  ;;  %7703 = vmatmul.msk.bf16.gmra.mxu2 %vm1841_vm0, %v17201_v33  ;;  %v17209_v9 = vld [vmem:[#allocation272_spill] sm:$0xff] }
 0x5bb   :  { %4111 = vmatpush.bf16.msrb.mxu0 %v7892_v10  ;;  %v8020_v56 = vor.u32 %v17209_v9, %v17208_v37  ;;  %v17215_v37 = vld [vmem:[#allocation323_spill] sm:$0xff]  ;;  %v17217_v9 = vld [vmem:[#allocation46_spill] sm:$0xff] }
 0x5bd   :  { %v2948_v1 = vpop.f32.mrf.mxu2  ;;  %4200 = vmatpush.bf16.msrb.mxu1 %v8020_v56 }
 0x5be   :  { %v11887_v40 = vadd.f32 %v2948_v1, %v2860_v3  ;;  %4056 = vmatmul.bf16.gmra.mxu3 %v11881_v60  ;;  %v2772_v58 = vpop.f32.mrf.mxu0  ;;  %v3388_v3 = vunpack.c.l.b16 %v17211_v34  ;;  %v3391_v1 = vunpack.c.l.b16 %v17212_v61  ;;  %v17223_v61 = vld [vmem:[#allocation73_spill] sm:$0xff] }
 0x5bf   :  { %v2773_v33 = vadd.f32 %v2772_v58, %v11584_v63  ;;  %v3147_v17 = vpop.f32.mrf.mxu1  ;;  %v17216_v58 = vld [vmem:[#allocation337_spill] sm:$0xff] }
 0x5c0   :  { %17207 = vst [vmem:[#allocation163_spill] sm:$0xff] %v11887_v40  ;;  %v17213_v40 = vld [vmem:[#allocation53_spill] sm:$0xff] }
 0x5c1   :  { %v11893_v43 = vpop.f32.mrf.mxu3  ;;  %v2862_v6 = vadd.f32 %v2861_v24, %v2773_v33  ;;  %v11906_v24 = vpack.c.b16 %v3391_v1, %v3388_v3  ;;  %v17224_v3 = vld [vmem:[#allocation76_spill] sm:$0xff] }
 0x5c2   :  { %v3397_v1 = vunpack.c.l.b16 %v17224_v3  ;;  %v17233_v3 = vld [vmem:[#allocation200_spill] sm:$0xff] }
 0x5c3   :  { %17218 = vst [vmem:[#allocation292_spill] sm:$0xff] %v11906_v24 }
 0x5c5   :  { %v2950_v25 = vpop.f32.mrf.mxu2 }
 0x5c6   :  { %v11895_v57 = vadd.f32 %v2950_v25, %v2862_v6  ;;  %v2775_v10 = vpop.f32.mrf.mxu0 }
 0x5c7   :  { %v2776_v60 = vadd.f32 %v2775_v10, %v17213_v40  ;;  %v3150_v36 = vpop.f32.mrf.mxu1  ;;  %v17220_v40 = vld [vmem:[#allocation389_spill] sm:$0xff] }
 0x5c8   :  { %17210 = vst [vmem:[#allocation228_spill] sm:$0xff] %v11895_v57 }
 0x5c9   :  { %v11900_v54 = vpop.f32.mrf.mxu3  ;;  %3090 = vmatmul.bf16.gmra.mxu0 %v17215_v37  ;;  %v2865_v63 = vadd.f32 %v2864_v50, %v2776_v60 }
 0x5ca   :  { %17214 = vst [vmem:[#allocation232_spill] sm:$0xff] %v11900_v54  ;;  %3189 = vmatmul.bf16.gmra.mxu1 %v17216_v58  ;;  %7704 = vmatmul.msk.bf16.gmra.mxu2 %vm1841_vm0, %v17217_v9  ;;  %v3394_v9 = vunpack.c.l.b16 %v17223_v61 }
 0x5cd   :  { %v2953_v56 = vpop.f32.mrf.mxu2 }
 0x5ce   :  { %v11908_v33 = vadd.f32 %v2953_v56, %v2865_v63  ;;  %4061 = vmatmul.bf16.gmra.mxu3 %v11906_v24  ;;  %v2777_v6 = vpop.f32.mrf.mxu0  ;;  %v17226_v24 = vld [vmem:[#allocation75_spill] sm:$0xff] }
 0x5cf   :  { %v2778_v25 = vadd.f32 %v2777_v6, %v17220_v40  ;;  %v3152_v10 = vpop.f32.mrf.mxu1  ;;  %v17227_v40 = vld [vmem:[#allocation340_spill] sm:$0xff] }
 0x5d0   :  { %17219 = vst [vmem:[#allocation296_spill] sm:$0xff] %v11908_v33 }
 0x5d1   :  { %v11912_v57 = vpop.f32.mrf.mxu3  ;;  %v2867_v37 = vadd.f32 %v2866_v47, %v2778_v25  ;;  %v11925_v47 = vpack.c.b16 %v3397_v1, %v3394_v9  ;;  %v17230_v25 = vld [vmem:[#allocation135_spill] sm:$0xff] }
 0x5d2   :  { %17221 = vst [vmem:[#allocation21_spill] sm:$0xff] %v11912_v57  ;;  %v17228_v57 = vld [vmem:[#allocation54_spill] sm:$0xff] }
 0x5d3   :  { %17229 = vst [vmem:[#allocation31_spill] sm:$0xff] %v11925_v47 }
 0x5d5   :  { %v2955_v50 = vpop.f32.mrf.mxu2 }
 0x5d6   :  { %v11914_v60 = vadd.f32 %v2955_v50, %v2867_v37  ;;  %v3056_v58 = vpop.f32.mrf.mxu0  ;;  %v17231_v37 = vld [vmem:[#allocation131_spill] sm:$0xff] }
 0x5d7   :  { %v3057_v63 = vadd.f32 %v3056_v58, %v11609_v20  ;;  %v3155_v56 = vpop.f32.mrf.mxu1  ;;  %v7752_v50 = vor.u32 %v17231_v37, %v17230_v25  ;;  %v17238_v37 = vld [vmem:[#allocation352_spill] sm:$0xff] }
 0x5d8   :  { %17222 = vst [vmem:[#allocation24_spill] sm:$0xff] %v11914_v60  ;;  %v17232_v60 = vld [vmem:[#allocation196_spill] sm:$0xff] }
 0x5d9   :  { %v11919_v33 = vpop.f32.mrf.mxu3  ;;  %3095 = vmatmul.bf16.gmra.mxu0 %v17226_v24  ;;  %v3146_v6 = vadd.f32 %v3145_v11, %v3057_v63  ;;  %v7876_v61 = vor.u32 %v17233_v3, %v17232_v60  ;;  %4290 = vmatpush.bf16.msrb.mxu2 %v7752_v50  ;;  %v17235_v24 = vld [vmem:[#allocation260_spill] sm:$0xff] }
 0x5da   :  { %17225 = vst [vmem:[#allocation27_spill] sm:$0xff] %v11919_v33  ;;  %3194 = vmatmul.bf16.gmra.mxu1 %v17227_v40  ;;  %7705 = vmatmul.msk.bf16.gmra.mxu2 %vm1841_vm0, %v17228_v57  ;;  %v17236_v63 = vld [vmem:[#allocation264_spill] sm:$0xff]  ;;  %v17237_v57 = vld [vmem:[#allocation341_spill] sm:$0xff] }
 0x5db   :  { %4112 = vmatpush.bf16.msrb.mxu0 %v7876_v61  ;;  %v8004_v40 = vor.u32 %v17236_v63, %v17235_v24 }
 0x5dd   :  { %v3234_v20 = vpop.f32.mrf.mxu2  ;;  %4201 = vmatpush.bf16.msrb.mxu1 %v8004_v40 }
 0x5de   :  { %v11931_v58 = vadd.f32 %v3234_v20, %v3146_v6  ;;  %4066 = vmatmul.bf16.gmra.mxu3 %v11925_v47  ;;  %v3058_v11 = vpop.f32.mrf.mxu0  ;;  %v17240_v6 = vld [vmem:[#allocation79_spill] sm:$0xff]  ;;  %v17241_v20 = vld [vmem:[#allocation82_spill] sm:$0xff]  ;;  %v17242_v47 = vld [vmem:[#allocation72_spill] sm:$0xff] }
 0x5df   :  { %v3059_v9 = vadd.f32 %v3058_v11, %v17237_v57  ;;  %v3157_v1 = vpop.f32.mrf.mxu1  ;;  %v3400_v50 = vunpack.c.l.b16 %v17240_v6  ;;  %v17243_v11 = vld [vmem:[#allocation11_spill] sm:$0xff]  ;;  %v17244_v57 = vld [vmem:[#allocation353_spill] sm:$0xff] }
 0x5e0   :  { %17234 = vst [vmem:[#allocation159_spill] sm:$0xff] %v11931_v58  ;;  %v3403_v58 = vunpack.c.l.b16 %v17241_v20  ;;  %v17253_v20 = vld [vmem:[#allocation85_spill] sm:$0xff] }
 0x5e1   :  { %v4027_v33 = vpop.f32.mrf.mxu3  ;;  %v3148_v25 = vadd.f32 %v3147_v17, %v3059_v9  ;;  %v17247_v9 = vld [vmem:[#allocation62_spill] sm:$0xff]  ;;  %v3406_v6 = vunpack.c.l.b16 %v17253_v20 }
 0x5e2   :  { %v11938_v34 = vadd.f32 %v4027_v33, %v17238_v37  ;;  %v17246_v33 = vld [vmem:[#allocation343_spill] sm:$0xff] }
 0x5e5   :  { %v3236_v60 = vpop.f32.mrf.mxu2 }
 0x5e6   :  { %v11940_v61 = vadd.f32 %v3236_v60, %v3148_v25  ;;  %v3061_v3 = vpop.f32.mrf.mxu0  ;;  %v11952_v25 = vpack.c.b16 %v3403_v58, %v3400_v50 }
 0x5e7   :  { %v3062_v54 = vadd.f32 %v3061_v3, %v17242_v47  ;;  %v3160_v24 = vpop.f32.mrf.mxu1  ;;  %v17250_v3 = vld [vmem:[#allocation392_spill] sm:$0xff] }
 0x5e8   :  { %17239 = vst [vmem:[#allocation155_spill] sm:$0xff] %v11940_v61 }
 0x5e9   :  { %v4029_v63 = vpop.f32.mrf.mxu3  ;;  %3100 = vmatmul.bf16.gmra.mxu0 %v17243_v11  ;;  %v3151_v40 = vadd.f32 %v3150_v36, %v3062_v54  ;;  %17248 = vst [vmem:[#allocation224_spill] sm:$0xff] %v11952_v25 }
 0x5ea   :  { %v11947_v17 = vadd.f32 %v4029_v63, %v17244_v57  ;;  %3199 = vmatmul.bf16.gmra.mxu1 %v17246_v33  ;;  %7706 = vmatmul.msk.bf16.gmra.mxu2 %vm1841_vm0, %v17247_v9  ;;  %v17251_v63 = vld [vmem:[#allocation354_spill] sm:$0xff]  ;;  %v17254_v9 = vld [vmem:[#allocation88_spill] sm:$0xff] }
 0x5eb   :  { %v3409_v58 = vunpack.c.l.b16 %v17254_v9  ;;  %v17264_v9 = vld [vmem:[#allocation188_spill] sm:$0xff] }
 0x5ec   :  { %17245 = vst [vmem:[#allocation220_spill] sm:$0xff] %v11947_v17  ;;  %v17256_v17 = vld [vmem:[#allocation87_spill] sm:$0xff] }
 0x5ed   :  { %v3239_v37 = vpop.f32.mrf.mxu2 }
 0x5ee   :  { %v11954_v60 = vadd.f32 %v3239_v37, %v3151_v40  ;;  %4071 = vmatmul.bf16.gmra.mxu3 %v11952_v25  ;;  %v3063_v47 = vpop.f32.mrf.mxu0 }
 0x5ef   :  { %v3064_v61 = vadd.f32 %v3063_v47, %v17250_v3  ;;  %v3162_v11 = vpop.f32.mrf.mxu1  ;;  %v11967_v3 = vpack.c.b16 %v3409_v58, %v3406_v6  ;;  %v17268_v58 = vld [vmem:[#allocation256_spill] sm:$0xff] }
 0x5f0   :  { %17249 = vst [vmem:[#allocation284_spill] sm:$0xff] %v11954_v60 }
 0x5f1   :  { %v4032_v54 = vpop.f32.mrf.mxu3  ;;  %v3153_v36 = vadd.f32 %v3152_v10, %v3064_v61  ;;  %17257 = vst [vmem:[#allocation39_spill] sm:$0xff] %v11967_v3  ;;  %v17258_v10 = vld [vmem:[#allocation355_spill] sm:$0xff] }
 0x5f2   :  { %v11959_v57 = vadd.f32 %v4032_v54, %v17251_v63  ;;  %v17260_v54 = vld [vmem:[#allocation346_spill] sm:$0xff]  ;;  %v17261_v63 = vld [vmem:[#allocation307_spill] sm:$0xff] }
 0x5f4   :  { %17252 = vst [vmem:[#allocation288_spill] sm:$0xff] %v11959_v57 }
 0x5f5   :  { %v3241_v33 = vpop.f32.mrf.mxu2 }
 0x5f6   :  { %v11963_v50 = vadd.f32 %v3241_v33, %v3153_v36  ;;  %v3066_v40 = vpop.f32.mrf.mxu0  ;;  %v17262_v36 = vld [vmem:[#allocation127_spill] sm:$0xff] }
 0x5f7   :  { %v3067_v37 = vadd.f32 %v3066_v40, %v11639_v28  ;;  %v3165_v60 = vpop.f32.mrf.mxu1  ;;  %v17263_v33 = vld [vmem:[#allocation123_spill] sm:$0xff]  ;;  %v17265_v28 = vld [vmem:[#allocation192_spill] sm:$0xff] }
 0x5f8   :  { %17255 = vst [vmem:[#allocation35_spill] sm:$0xff] %v11963_v50  ;;  %v7736_v50 = vor.u32 %v17263_v33, %v17262_v36  ;;  %v7860_v40 = vor.u32 %v17265_v28, %v17264_v9  ;;  %v17270_v33 = vld [vmem:[#allocation356_spill] sm:$0xff]  ;;  %v17272_v28 = vld [vmem:[#allocation91_spill] sm:$0xff] }
 0x5f9   :  { %v4034_v25 = vpop.f32.mrf.mxu3  ;;  %3105 = vmatmul.bf16.gmra.mxu0 %v17256_v17  ;;  %v3156_v47 = vadd.f32 %v3155_v56, %v3067_v37 }
 0x5fa   :  { %v11970_v61 = vadd.f32 %v4034_v25, %v17258_v10  ;;  %3204 = vmatmul.bf16.gmra.mxu1 %v17260_v54  ;;  %7707 = vmatmul.msk.bf16.gmra.mxu2 %vm1841_vm0, %v17261_v63  ;;  %v17267_v25 = vld [vmem:[#allocation252_spill] sm:$0xff]  ;;  %v17269_v10 = vld [vmem:[#allocation345_spill] sm:$0xff] }
 0x5fb   :  { %4291 = vmatpush.bf16.msrb.mxu2 %v7736_v50  ;;  %4113 = vmatpush.bf16.msrb.mxu0 %v7860_v40  ;;  %v7988_v37 = vor.u32 %v17268_v58, %v17267_v25  ;;  %v3412_v40 = vunpack.c.l.b16 %v17272_v28  ;;  %v17286_v28 = vld [vmem:[#allocation244_spill] sm:$0xff] }
 0x5fc   :  { %17259 = vst [vmem:[#allocation43_spill] sm:$0xff] %v11970_v61 }
 0x5fd   :  { %v3244_v17 = vpop.f32.mrf.mxu2  ;;  %4202 = vmatpush.bf16.msrb.mxu1 %v7988_v37 }
 0x5fe   :  { %v11979_v56 = vadd.f32 %v3244_v17, %v3156_v47  ;;  %4076 = vmatmul.bf16.gmra.mxu3 %v11967_v3  ;;  %v3068_v6 = vpop.f32.mrf.mxu0  ;;  %v17273_v17 = vld [vmem:[#allocation93_spill] sm:$0xff]  ;;  %v17274_v3 = vld [vmem:[#allocation312_spill] sm:$0xff] }
 0x5ff   :  { %v3069_v54 = vadd.f32 %v3068_v6, %v17269_v10  ;;  %v3167_v63 = vpop.f32.mrf.mxu1  ;;  %v17275_v6 = vld [vmem:[#allocation20_spill] sm:$0xff]  ;;  %v17276_v10 = vld [vmem:[#allocation357_spill] sm:$0xff] }
 0x600   :  { %17266 = vst [vmem:[#allocation47_spill] sm:$0xff] %v11979_v56  ;;  %v3415_v56 = vunpack.c.l.b16 %v17273_v17  ;;  %v17284_v17 = vld [vmem:[#allocation95_spill] sm:$0xff] }
 0x601   :  { %v4037_v20 = vpop.f32.mrf.mxu3  ;;  %v3158_v36 = vadd.f32 %v3157_v1, %v3069_v54  ;;  %v17278_v54 = vld [vmem:[#allocation308_spill] sm:$0xff] }
 0x602   :  { %v11986_v61 = vadd.f32 %v4037_v20, %v17270_v33  ;;  %v17277_v20 = vld [vmem:[#allocation349_spill] sm:$0xff] }
 0x605   :  { %v3246_v9 = vpop.f32.mrf.mxu2 }
 0x606   :  { %v11988_v50 = vadd.f32 %v3246_v9, %v3158_v36  ;;  %v3071_v47 = vpop.f32.mrf.mxu0  ;;  %v12000_v36 = vpack.c.b16 %v3415_v56, %v3412_v40  ;;  %v17285_v56 = vld [vmem:[#allocation97_spill] sm:$0xff] }
 0x607   :  { %v3072_v57 = vadd.f32 %v3071_v47, %v17274_v3  ;;  %v3170_v25 = vpop.f32.mrf.mxu1  ;;  %v17281_v47 = vld [vmem:[#allocation350_spill] sm:$0xff]  ;;  %v3421_v40 = vunpack.c.l.b16 %v17285_v56 }
 0x608   :  { %17271 = vst [vmem:[#allocation45_spill] sm:$0xff] %v11988_v50  ;;  %v17292_v56 = vld [vmem:[#allocation58_spill] sm:$0xff] }
 0x609   :  { %v4039_v58 = vpop.f32.mrf.mxu3  ;;  %3110 = vmatmul.bf16.gmra.mxu0 %v17275_v6  ;;  %v3161_v37 = vadd.f32 %v3160_v24, %v3072_v57  ;;  %17279 = vst [vmem:[#allocation78_spill] sm:$0xff] %v12000_v36 }
 0x60a   :  { %v11995_v1 = vadd.f32 %v4039_v58, %v17276_v10  ;;  %3209 = vmatmul.bf16.gmra.mxu1 %v17277_v20  ;;  %7708 = vmatmul.msk.bf16.gmra.mxu2 %vm1841_vm0, %v17278_v54  ;;  %v17282_v58 = vld [vmem:[#allocation358_spill] sm:$0xff]  ;;  %v3418_v54 = vunpack.c.l.b16 %v17284_v17  ;;  %v17291_v17 = vld [vmem:[#allocation359_spill] sm:$0xff] }
 0x60d   :  { %v3249_v33 = vpop.f32.mrf.mxu2 }
 0x60e   :  { %v12002_v9 = vadd.f32 %v3249_v33, %v3161_v37  ;;  %4081 = vmatmul.bf16.gmra.mxu3 %v12000_v36  ;;  %v3073_v3 = vpop.f32.mrf.mxu0  ;;  %v17287_v37 = vld [vmem:[#allocation248_spill] sm:$0xff] }
 0x60f   :  { %v3074_v50 = vadd.f32 %v3073_v3, %v17281_v47  ;;  %v12006_v6 = vpop.f32.mrf.mxu1  ;;  %v7972_v33 = vor.u32 %v17287_v37, %v17286_v28  ;;  %v17293_v28 = vld [vmem:[#allocation311_spill] sm:$0xff]  ;;  %v17297_v37 = vld [vmem:[#allocation184_spill] sm:$0xff] }
 0x610   :  { %17280 = vst [vmem:[#allocation23_spill] sm:$0xff] %v12002_v9 }
 0x611   :  { %v4042_v24 = vpop.f32.mrf.mxu3  ;;  %v3163_v57 = vadd.f32 %v3162_v11, %v3074_v50  ;;  %4203 = vmatpush.bf16.msrb.mxu1 %v7972_v33  ;;  %v17289_v50 = vld [vmem:[#allocation26_spill] sm:$0xff] }
 0x612   :  { %v12009_v10 = vadd.f32 %v4042_v24, %v17282_v58  ;;  %v12021_v58 = vpack.c.b16 %v3421_v40, %v3418_v54  ;;  %v17299_v54 = vld [vmem:[#allocation235_spill] sm:$0xff] }
 0x614   :  { %17283 = vst [vmem:[#allocation151_spill] sm:$0xff] %v12009_v10 }
 0x615   :  { %v3251_v20 = vpop.f32.mrf.mxu2  ;;  %17290 = vst [vmem:[#allocation212_spill] sm:$0xff] %v12021_v58 }
 0x616   :  { %v12015_v9 = vadd.f32 %v3251_v20, %v3163_v57  ;;  %v3076_v36 = vpop.f32.mrf.mxu0  ;;  %v17294_v57 = vld [vmem:[#allocation119_spill] sm:$0xff] }
 0x617   :  { %v3077_v3 = vadd.f32 %v3076_v36, %v11671_v49  ;;  %v12018_v47 = vpop.f32.mrf.mxu1  ;;  %v17295_v20 = vld [vmem:[#allocation115_spill] sm:$0xff]  ;;  %v17296_v36 = vld [vmem:[#allocation180_spill] sm:$0xff] }
 0x618   :  { %17288 = vst [vmem:[#allocation147_spill] sm:$0xff] %v12015_v9  ;;  %v7720_v49 = vor.u32 %v17295_v20, %v17294_v57  ;;  %v7844_v33 = vor.u32 %v17297_v37, %v17296_v36  ;;  %v17301_v20 = vld [vmem:[#allocation231_spill] sm:$0xff]  ;;  %v17303_v37 = vld [vmem:[#allocation360_spill] sm:$0xff] }
 0x619   :  { %v4044_v11 = vpop.f32.mrf.mxu3  ;;  %3115 = vmatmul.bf16.gmra.mxu0 %v17289_v50  ;;  %v3166_v24 = vadd.f32 %v3165_v60, %v3077_v3  ;;  %v17298_v60 = vld [vmem:[#allocation239_spill] sm:$0xff] }
 0x61a   :  { %v12024_v10 = vadd.f32 %v4044_v11, %v17291_v17  ;;  %3214 = vmatmul.bf16.gmra.mxu1 %v17292_v56  ;;  %7709 = vmatmul.msk.bf16.gmra.mxu2 %vm1841_vm0, %v17293_v28  ;;  %v7960_v40 = vor.u32 %v17299_v54, %v17298_v60  ;;  %v17302_v36 = vld [vmem:[#allocation227_spill] sm:$0xff] }
 0x61b   :  { %4292 = vmatpush.bf16.msrb.mxu2 %v7720_v49  ;;  %4114 = vmatpush.bf16.msrb.mxu0 %v7844_v33  ;;  %v7944_v49 = vor.u32 %v17302_v36, %v17301_v20  ;;  %v17309_v36 = vld [vmem:[#allocation215_spill] sm:$0xff] }
 0x61c   :  { %4374 = vmatpush.bf16.msrb.mxu3 %v7960_v40 }
 0x61d   :  { %v3254_v50 = vpop.f32.mrf.mxu2 }
 0x61e   :  { %v12035_v3 = vadd.f32 %v3254_v50, %v3166_v24  ;;  %4086 = vmatmul.bf16.gmra.mxu3 %v12021_v58  ;;  %v3078_v17 = vpop.f32.mrf.mxu0  ;;  %v17304_v24 = vld [vmem:[#allocation223_spill] sm:$0xff]  ;;  %v17308_v58 = vld [vmem:[#allocation101_spill] sm:$0xff] }
 0x61f   :  { %v3079_v56 = vadd.f32 %v3078_v17, %v11680_v2  ;;  %v12039_v11 = vpop.f32.mrf.mxu1  ;;  %v17305_v50 = vld [vmem:[#allocation219_spill] sm:$0xff]  ;;  %v3427_v40 = vunpack.c.l.b16 %v17308_v58 }
 0x620   :  { %17300 = vst [vmem:[#allocation216_spill] sm:$0xff] %v12035_v3  ;;  %4375 = vmatpush.bf16.msrb.mxu3 %v7944_v49  ;;  %v7928_v54 = vor.u32 %v17305_v50, %v17304_v24  ;;  %v17307_v2 = vld [vmem:[#allocation99_spill] sm:$0xff]  ;;  %v17311_v24 = vld [vmem:[#allocation362_spill] sm:$0xff] }
 0x621   :  { %v4047_v28 = vpop.f32.mrf.mxu3  ;;  %v3168_v57 = vadd.f32 %v3167_v63, %v3079_v56  ;;  %v3424_v17 = vunpack.c.l.b16 %v17307_v2  ;;  %v17310_v49 = vld [vmem:[#allocation211_spill] sm:$0xff]  ;;  %v17314_v50 = vld [vmem:[#allocation314_spill] sm:$0xff] }
 0x622   :  { %v12044_v33 = vadd.f32 %v4047_v28, %v17303_v37  ;;  %v7912_v37 = vor.u32 %v17310_v49, %v17309_v36  ;;  %v17327_v2 = vld [vmem:[#allocation187_spill] sm:$0xff] }
 0x624   :  { %4376 = vmatpush.bf16.msrb.mxu3 %v7928_v54  ;;  %v17317_v54 = vld [vmem:[#allocation203_spill] sm:$0xff] }
 0x625   :  { %v3256_v60 = vpop.f32.mrf.mxu2 }
 0x626   :  { %v12048_v3 = vadd.f32 %v3256_v60, %v3168_v57  ;;  %v3081_v9 = vpop.f32.mrf.mxu0  ;;  %v17313_v60 = vld [vmem:[#allocation66_spill] sm:$0xff] }
 0x627   :  { %v3082_v63 = vadd.f32 %v3081_v9, %v11694_v27  ;;  %v12053_v56 = vpop.f32.mrf.mxu1  ;;  %v17316_v9 = vld [vmem:[#allocation207_spill] sm:$0xff] }
 0x628   :  { %17306 = vst [vmem:[#allocation276_spill] sm:$0xff] %v12048_v3  ;;  %v12064_v3 = vpack.c.b16 %v3427_v40, %v3424_v17  ;;  %4377 = vmatpush.bf16.msrb.mxu3 %v7912_v37  ;;  %v7896_v58 = vor.u32 %v17317_v54, %v17316_v9  ;;  %v17319_v17 = vld [vmem:[#allocation199_spill] sm:$0xff] }
 0x629   :  { %v4049_v20 = vpop.f32.mrf.mxu3  ;;  %3120 = vmatmul.bf16.gmra.mxu0 %v17014_v32  ;;  %v3171_v28 = vadd.f32 %v3170_v25, %v3082_v63  ;;  %v17320_v40 = vld [vmem:[#allocation195_spill] sm:$0xff] }
 0x62a   :  { %v12059_v57 = vadd.f32 %v4049_v20, %v17311_v24  ;;  %3219 = vmatmul.bf16.gmra.mxu1 %v17313_v60  ;;  %7710 = vmatmul.msk.bf16.gmra.mxu2 %vm1841_vm0, %v17314_v50  ;;  %17315 = vst [vmem:[#allocation51_spill] sm:$0xff] %v12064_v3  ;;  %v7880_v37 = vor.u32 %v17320_v40, %v17319_v17  ;;  %v17321_v24 = vld [vmem:[#allocation364_spill] sm:$0xff] }
 0x62b   :  { %v17322_v50 = vld [vmem:[#allocation16_spill] sm:$0xff] }
 0x62c   :  { %17312 = vst [vmem:[#allocation280_spill] sm:$0xff] %v12059_v57  ;;  %4378 = vmatpush.bf16.msrb.mxu3 %v7896_v58  ;;  %v17326_v58 = vld [vmem:[#allocation191_spill] sm:$0xff] }
 0x62d   :  { %v3259_v27 = vpop.f32.mrf.mxu2  ;;  %v7864_v57 = vor.u32 %v17327_v2, %v17326_v58 }
 0x62e   :  { %v12068_v32 = vadd.f32 %v3259_v27, %v3171_v28  ;;  %4091 = vmatmul.bf16.gmra.mxu3 %v12064_v3  ;;  %v3083_v25 = vpop.f32.mrf.mxu0  ;;  %v3348_v28 = vunpack.c.l.b16 %v17322_v50  ;;  %v17323_v27 = vld [vmem:[#allocation19_spill] sm:$0xff] }
 0x62f   :  { %v3084_v63 = vadd.f32 %v3083_v25, %v11703_v19  ;;  %v12072_v20 = vpop.f32.mrf.mxu1  ;;  %v3351_v9 = vunpack.c.l.b16 %v17323_v27  ;;  %v17325_v25 = vld [vmem:[#allocation105_spill] sm:$0xff]  ;;  %v17331_v27 = vld [vmem:[#allocation183_spill] sm:$0xff] }
 0x630   :  { %17318 = vst [vmem:[#allocation12_spill] sm:$0xff] %v12068_v32  ;;  %4379 = vmatpush.bf16.msrb.mxu3 %v7880_v37  ;;  %v17324_v32 = vld [vmem:[#allocation103_spill] sm:$0xff]  ;;  %v3433_v3 = vunpack.c.l.b16 %v17325_v25 }
 0x631   :  { %v4052_v36 = vpop.f32.mrf.mxu3  ;;  %v3173_v49 = vadd.f32 %v12006_v6, %v3084_v63  ;;  %v3430_v19 = vunpack.c.l.b16 %v17324_v32  ;;  %v12088_v17 = vpack.c.b16 %v3351_v9, %v3348_v28  ;;  %v17332_v25 = vld [vmem:[#allocation179_spill] sm:$0xff] }
 0x632   :  { %v12078_v60 = vadd.f32 %v4052_v36, %v17321_v24  ;;  %v7848_v2 = vor.u32 %v17332_v25, %v17331_v27  ;;  %v17336_v9 = vld [vmem:[#allocation303_spill] sm:$0xff]  ;;  %v17339_v25 = vld [vmem:[#allocation174_spill] sm:$0xff] }
 0x633   :  { %17329 = vst [vmem:[#allocation387_spill] sm:$0xff] %v12088_v17  ;;  %v12095_v50 = vpack.c.b16 %v3433_v3, %v3430_v19 }
 0x634   :  { %4380 = vmatpush.bf16.msrb.mxu3 %v7864_v57  ;;  %v17335_v57 = vld [vmem:[#allocation242_spill] sm:$0xff] }
 0x635   :  { %v3261_v54 = vpop.f32.mrf.mxu2  ;;  %17330 = vst [vmem:[#allocation65_spill] sm:$0xff] %v12095_v50 }
 0x636   :  { %v12086_v6 = vadd.f32 %v3261_v54, %v3173_v49  ;;  %v3086_v63 = vpop.f32.mrf.mxu0  ;;  %v17333_v49 = vld [vmem:[#allocation325_spill] sm:$0xff] }
 0x637   :  { %v3087_v36 = vadd.f32 %v3086_v63, %v11721_v31  ;;  %v12091_v40 = vpop.f32.mrf.mxu1  ;;  %v17334_v31 = vld [vmem:[#allocation238_spill] sm:$0xff] }
 0x638   :  { %17328 = vst [vmem:[#allocation30_spill] sm:$0xff] %v12086_v6  ;;  %v7964_v28 = vor.u32 %v17335_v57, %v17334_v31  ;;  %4381 = vmatpush.bf16.msrb.mxu3 %v7848_v2  ;;  %v17340_v63 = vld [vmem:[#allocation178_spill] sm:$0xff]  ;;  %v17341_v31 = vld [vmem:[#allocation328_spill] sm:$0xff] }
 0x639   :  { %v4054_v24 = vpop.f32.mrf.mxu3  ;;  %3125 = vmatmul.bf16.gmra.mxu0 %v17019_v0  ;;  %v3176_v37 = vadd.f32 %v12018_v47, %v3087_v36  ;;  %v17337_v0 = vld [vmem:[#allocation299_spill] sm:$0xff]  ;;  %v17342_v57 = vld [vmem:[#allocation22_spill] sm:$0xff] }
 0x63a   :  { %v12100_v54 = vadd.f32 %v4054_v24, %v17333_v49  ;;  %7711 = vmatmul.msk.bf16.gmra.mxu2 %vm1841_vm0, %v17020_v23  ;;  %4204 = vmatmul.bf16.vlgmr.msrb.gmra.mxu1 %v12088_v17  ;;  %v8088_v58 = vor.u32 %v17337_v0, %v17336_v9  ;;  %v7836_v23 = vor.u32 %v17340_v63, %v17339_v25  ;;  %v17346_v25 = vld [vmem:[#allocation107_spill] sm:$0xff] }
 0x63b   :  { %4641 = vmatpush.bf16.msra.mxu2 %v7964_v28  ;;  %v3354_v28 = vunpack.c.l.b16 %v17342_v57 }
 0x63c   :  { %4463 = vmatpush.bf16.msra.mxu0 %v8088_v58  ;;  %4552 = vmatpush.bf16.msra.mxu1 %v7836_v23 }
 0x63d   :  { %v3264_v47 = vpop.f32.mrf.mxu2 }
 0x63e   :  { %v12109_v3 = vadd.f32 %v3264_v47, %v3176_v37  ;;  %4096 = vmatmul.bf16.gmra.mxu3 %v12095_v50  ;;  %v3088_v19 = vpop.f32.mrf.mxu0  ;;  %v17343_v37 = vld [vmem:[#allocation25_spill] sm:$0xff] }
 0x63f   :  { %v3089_v36 = vadd.f32 %v3088_v19, %v11726_v39  ;;  %v3187_v24 = vpop.f32.mrf.mxu1  ;;  %v3357_v9 = vunpack.c.l.b16 %v17343_v37  ;;  %v3436_v39 = vunpack.c.l.b16 %v17346_v25  ;;  %v17347_v19 = vld [vmem:[#allocation109_spill] sm:$0xff] }
 0x640   :  { %17338 = vst [vmem:[#allocation90_spill] sm:$0xff] %v12109_v3  ;;  %v3439_v63 = vunpack.c.l.b16 %v17347_v19 }
 0x641   :  { %v4057_v27 = vpop.f32.mrf.mxu3  ;;  %v3178_v49 = vadd.f32 %v12039_v11, %v3089_v36  ;;  %v12123_v3 = vpack.c.b16 %v3357_v9, %v3354_v28 }
 0x642   :  { %v12117_v2 = vadd.f32 %v4057_v27, %v17341_v31  ;;  %v17348_v31 = vld [vmem:[#allocation366_spill] sm:$0xff] }
 0x643   :  { %17345 = vst [vmem:[#allocation143_spill] sm:$0xff] %v12123_v3 }
 0x645   :  { %v3266_v0 = vpop.f32.mrf.mxu2 }
 0x646   :  { %v12121_v58 = vadd.f32 %v3266_v0, %v3178_v49  ;;  %v3091_v47 = vpop.f32.mrf.mxu0  ;;  %v12136_v49 = vpack.c.b16 %v3439_v63, %v3436_v39  ;;  %v17352_v39 = vld [vmem:[#allocation28_spill] sm:$0xff] }
 0x647   :  { %v3092_v23 = vadd.f32 %v3091_v47, %v11736_v62  ;;  %v3190_v11 = vpop.f32.mrf.mxu1  ;;  %v3347_v47 = vunpack.c.h.b16 %v17140_v53  ;;  %v3360_v63 = vunpack.c.l.b16 %v17352_v39  ;;  %v17359_v39 = vld [vmem:[#allocation295_spill] sm:$0xff] }
 0x648   :  { %17344 = vst [vmem:[#allocation38_spill] sm:$0xff] %v12121_v58 }
 0x649   :  { %v4059_v36 = vpop.f32.mrf.mxu3  ;;  %3130 = vmatmul.bf16.gmra.mxu0 %v17023_v5  ;;  %v3181_v27 = vadd.f32 %v12053_v56, %v3092_v23  ;;  %17349 = vst [vmem:[#allocation139_spill] sm:$0xff] %v12136_v49  ;;  %v17351_v23 = vld [vmem:[#allocation367_spill] sm:$0xff] }
 0x64a   :  { %v12131_v57 = vadd.f32 %v4059_v36, %v17348_v31  ;;  %7712 = vmatmul.msk.bf16.gmra.mxu2 %vm1841_vm0, %v17024_v4  ;;  %4209 = vmatmul.bf16.gmra.mxu1 %v12123_v3  ;;  %v3350_v4 = vunpack.c.h.b16 %v17141_v45 }
 0x64d   :  { %v3269_v28 = vpop.f32.mrf.mxu2 }
 0x64e   :  { %v12138_v37 = vadd.f32 %v3269_v28, %v3181_v27  ;;  %4101 = vmatmul.bf16.gmra.mxu3 %v12136_v49  ;;  %v3093_v62 = vpop.f32.mrf.mxu0  ;;  %v17353_v27 = vld [vmem:[#allocation32_spill] sm:$0xff] }
 0x64f   :  { %v3094_v5 = vadd.f32 %v3093_v62, %v11743_v30  ;;  %v3192_v9 = vpop.f32.mrf.mxu1  ;;  %v3363_v31 = vunpack.c.l.b16 %v17353_v27 }
 0x650   :  { %17350 = vst [vmem:[#allocation204_spill] sm:$0xff] %v12138_v37  ;;  %v12150_v37 = vpack.c.b16 %v3350_v4, %v3347_v47  ;;  %v17358_v47 = vld [vmem:[#allocation234_spill] sm:$0xff] }
 0x651   :  { %v4062_v56 = vpop.f32.mrf.mxu3  ;;  %v3183_v0 = vadd.f32 %v12072_v20, %v3094_v5  ;;  %v12154_v62 = vpack.c.b16 %v3363_v31, %v3360_v63  ;;  %v17360_v63 = vld [vmem:[#allocation291_spill] sm:$0xff] }
 0x652   :  { %v12146_v36 = vadd.f32 %v4062_v56, %v17351_v23  ;;  %v17356_v56 = vld [vmem:[#allocation327_spill] sm:$0xff]  ;;  %v8072_v27 = vor.u32 %v17360_v63, %v17359_v39  ;;  %v17364_v39 = vld [vmem:[#allocation9_spill] sm:$0xff] }
 0x653   :  { %17355 = vst [vmem:[#allocation268_spill] sm:$0xff] %v12154_v62 }
 0x654   :  { %4464 = vmatpush.bf16.msra.mxu0 %v8072_v27 }
 0x655   :  { %v3271_v28 = vpop.f32.mrf.mxu2 }
 0x656   :  { %v12152_v58 = vadd.f32 %v3271_v28, %v3183_v0  ;;  %v3096_v30 = vpop.f32.mrf.mxu0  ;;  %v17357_v0 = vld [vmem:[#allocation230_spill] sm:$0xff] }
 0x657   :  { %v3097_v20 = vadd.f32 %v3096_v30, %v11761_v8  ;;  %v3195_v53 = vpop.f32.mrf.mxu1  ;;  %v7948_v4 = vor.u32 %v17358_v47, %v17357_v0  ;;  %v17362_v28 = vld [vmem:[#allocation166_spill] sm:$0xff]  ;;  %v3353_v47 = vunpack.c.h.b16 %v17152_v15 }
 0x658   :  { %17354 = vst [vmem:[#allocation208_spill] sm:$0xff] %v12152_v58  ;;  %v17363_v30 = vld [vmem:[#allocation170_spill] sm:$0xff] }
 0x659   :  { %v4064_v5 = vpop.f32.mrf.mxu3  ;;  %4115 = vmatmul.bf16.vlgmr.msrb.gmra.mxu0 %v12150_v37  ;;  %v3186_v45 = vadd.f32 %v12091_v40, %v3097_v20  ;;  %4642 = vmatpush.bf16.msra.mxu2 %v7948_v4  ;;  %v7820_v20 = vor.u32 %v17363_v30, %v17362_v28  ;;  %v3356_v4 = vunpack.c.h.b16 %v17153_v48  ;;  %v17370_v30 = vld [vmem:[#allocation369_spill] sm:$0xff] }
 0x65a   :  { %v12160_v23 = vadd.f32 %v4064_v5, %v17356_v56  ;;  %4214 = vmatmul.bf16.gmra.mxu1 %v12154_v62  ;;  %4293 = vmatmul.bf16.vlgmr.msrb.gmra.mxu2 %v11749_v16 }
 0x65b   :  { %4553 = vmatpush.bf16.msra.mxu1 %v7820_v20  ;;  %v12181_v62 = vpack.c.b16 %v3356_v4, %v3353_v47 }
 0x65d   :  { %v3274_v8 = vpop.f32.mrf.mxu2  ;;  %17367 = vst [vmem:[#allocation53_spill] sm:$0xff] %v12181_v62 }
 0x65e   :  { %v12168_v31 = vadd.f32 %v3274_v8, %v3186_v45  ;;  %4382 = vmatmul.bf16.vlgmr.msrb.gmra.mxu3 %v12150_v37  ;;  %v3098_v40 = vpop.f32.mrf.mxu0  ;;  %v17365_v45 = vld [vmem:[#allocation36_spill] sm:$0xff] }
 0x65f   :  { %v3099_v5 = vadd.f32 %v3098_v40, %v11768_v42  ;;  %v3197_v56 = vpop.f32.mrf.mxu1  ;;  %v3366_v27 = vunpack.c.l.b16 %v17365_v45  ;;  %v17366_v8 = vld [vmem:[#allocation40_spill] sm:$0xff]  ;;  %v17372_v45 = vld [vmem:[#allocation370_spill] sm:$0xff] }
 0x660   :  { %17361 = vst [vmem:[#allocation272_spill] sm:$0xff] %v12168_v31  ;;  %v3369_v31 = vunpack.c.l.b16 %v17366_v8  ;;  %v17373_v8 = vld [vmem:[#allocation44_spill] sm:$0xff] }
 0x661   :  { %v4067_v58 = vpop.f32.mrf.mxu3  ;;  %v3188_v0 = vadd.f32 %v3187_v24, %v3099_v5 }
 0x662   :  { %v12177_v63 = vadd.f32 %v4067_v58, %v17364_v39  ;;  %v12185_v40 = vpack.c.b16 %v3369_v31, %v3366_v27  ;;  %v3362_v39 = vunpack.c.h.b16 %v17158_v35 }
 0x664   :  { %17369 = vst [vmem:[#allocation337_spill] sm:$0xff] %v12185_v40 }
 0x665   :  { %v3276_v6 = vpop.f32.mrf.mxu2 }
 0x666   :  { %v12183_v28 = vadd.f32 %v3276_v6, %v3188_v0  ;;  %v3101_v42 = vpop.f32.mrf.mxu0 }
 0x667   :  { %v3102_v24 = vadd.f32 %v3101_v42, %v11780_v59  ;;  %v12188_v15 = vpop.f32.mrf.mxu1  ;;  %v3372_v42 = vunpack.c.l.b16 %v17373_v8  ;;  %v17381_v8 = vld [vmem:[#allocation287_spill] sm:$0xff] }
 0x668   :  { %17368 = vst [vmem:[#allocation323_spill] sm:$0xff] %v12183_v28 }
 0x669   :  { %v4069_v48 = vpop.f32.mrf.mxu3  ;;  %4120 = vmatmul.bf16.gmra.mxu0 %v12181_v62  ;;  %v3191_v58 = vadd.f32 %v3190_v11, %v3102_v24  ;;  %v3359_v11 = vunpack.c.h.b16 %v17157_v22  ;;  %v17374_v24 = vld [vmem:[#allocation48_spill] sm:$0xff] }
 0x66a   :  { %v12192_v20 = vadd.f32 %v4069_v48, %v17370_v30  ;;  %4219 = vmatmul.bf16.gmra.mxu1 %v12185_v40  ;;  %4298 = vmatmul.bf16.gmra.mxu2 %v11774_v52  ;;  %v3375_v48 = vunpack.c.l.b16 %v17374_v24 }
 0x66b   :  { %v12209_v30 = vpack.c.b16 %v3362_v39, %v3359_v11  ;;  %v17380_v11 = vld [vmem:[#allocation226_spill] sm:$0xff] }
 0x66d   :  { %v3279_v6 = vpop.f32.mrf.mxu2  ;;  %17375 = vst [vmem:[#allocation389_spill] sm:$0xff] %v12209_v30 }
 0x66e   :  { %v12196_v5 = vadd.f32 %v3279_v6, %v3191_v58  ;;  %4387 = vmatmul.bf16.gmra.mxu3 %v12181_v62  ;;  %v3103_v31 = vpop.f32.mrf.mxu0 }
 0x66f   :  { %v3104_v59 = vadd.f32 %v3103_v31, %v11787_v13  ;;  %v12200_v0 = vpop.f32.mrf.mxu1  ;;  %v12213_v31 = vpack.c.b16 %v3375_v48, %v3372_v42  ;;  %v17382_v42 = vld [vmem:[#allocation283_spill] sm:$0xff] }
 0x670   :  { %17371 = vst [vmem:[#allocation46_spill] sm:$0xff] %v12196_v5  ;;  %v8056_v24 = vor.u32 %v17382_v42, %v17381_v8  ;;  %v3365_v42 = vunpack.c.h.b16 %v17168_v7  ;;  %v17389_v5 = vld [vmem:[#allocation56_spill] sm:$0xff]  ;;  %v17393_v7 = vld [vmem:[#allocation363_spill] sm:$0xff] }
 0x671   :  { %v4072_v47 = vpop.f32.mrf.mxu3  ;;  %v3193_v4 = vadd.f32 %v3192_v9, %v3104_v59  ;;  %17377 = vst [vmem:[#allocation340_spill] sm:$0xff] %v12213_v31 }
 0x672   :  { %v12205_v27 = vadd.f32 %v4072_v47, %v17372_v45  ;;  %v17378_v47 = vld [vmem:[#allocation371_spill] sm:$0xff]  ;;  %4465 = vmatpush.bf16.msra.mxu0 %v8056_v24 }
 0x675   :  { %v3281_v58 = vpop.f32.mrf.mxu2 }
 0x676   :  { %v12211_v6 = vadd.f32 %v3281_v58, %v3193_v4  ;;  %v3106_v13 = vpop.f32.mrf.mxu0  ;;  %v17379_v4 = vld [vmem:[#allocation222_spill] sm:$0xff] }
 0x677   :  { %v3107_v9 = vadd.f32 %v3106_v13, %v11805_v26  ;;  %v12216_v22 = vpop.f32.mrf.mxu1  ;;  %v7932_v39 = vor.u32 %v17380_v11, %v17379_v4  ;;  %v17384_v58 = vld [vmem:[#allocation158_spill] sm:$0xff]  ;;  %v17387_v4 = vld [vmem:[#allocation49_spill] sm:$0xff] }
 0x678   :  { %17376 = vst [vmem:[#allocation75_spill] sm:$0xff] %v12211_v6  ;;  %v17385_v13 = vld [vmem:[#allocation162_spill] sm:$0xff]  ;;  %v17386_v6 = vld [vmem:[#allocation361_spill] sm:$0xff] }
 0x679   :  { %v4074_v35 = vpop.f32.mrf.mxu3  ;;  %4125 = vmatmul.bf16.gmra.mxu0 %v12209_v30  ;;  %v3196_v59 = vadd.f32 %v3195_v53, %v3107_v9  ;;  %4643 = vmatpush.bf16.msra.mxu2 %v7932_v39  ;;  %v7804_v9 = vor.u32 %v17385_v13, %v17384_v58  ;;  %v2217_v11 = vadd.f32 %v17387_v4, %v17386_v6  ;;  %v3381_v58 = vunpack.c.l.b16 %v17389_v5 }
 0x67a   :  { %v12220_v45 = vadd.f32 %v4074_v35, %v17378_v47  ;;  %4224 = vmatmul.bf16.gmra.mxu1 %v12213_v31  ;;  %4303 = vmatmul.bf16.gmra.mxu2 %v11793_v18 }
 0x67b   :  { %4554 = vmatpush.bf16.msra.mxu1 %v7804_v9 }
 0x67d   :  { %v3284_v26 = vpop.f32.mrf.mxu2 }
 0x67e   :  { %v12228_v48 = vadd.f32 %v3284_v26, %v3196_v59  ;;  %4392 = vmatmul.bf16.gmra.mxu3 %v12209_v30  ;;  %v3108_v53 = vpop.f32.mrf.mxu0  ;;  %v3368_v59 = vunpack.c.h.b16 %v17169_v55  ;;  %v17388_v26 = vld [vmem:[#allocation52_spill] sm:$0xff]  ;;  %v17394_v55 = vld [vmem:[#allocation318_spill] sm:$0xff] }
 0x67f   :  { %v3109_v35 = vadd.f32 %v3108_v53, %v11812_v46  ;;  %v12234_v47 = vpop.f32.mrf.mxu1 }
 0x680   :  { %17383 = vst [vmem:[#allocation54_spill] sm:$0xff] %v12228_v48  ;;  %v3378_v48 = vunpack.c.l.b16 %v17388_v26  ;;  %v12244_v46 = vpack.c.b16 %v3368_v59, %v3365_v42  ;;  %v17396_v42 = vld [vmem:[#allocation324_spill] sm:$0xff]  ;;  %v17397_v59 = vld [vmem:[#allocation319_spill] sm:$0xff] }
 0x681   :  { %v4077_v8 = vpop.f32.mrf.mxu3  ;;  %v3198_v39 = vadd.f32 %v3197_v56, %v3109_v35  ;;  %v2219_v35 = vadd.f32 %v17394_v55, %v17393_v7  ;;  %v2222_v26 = vadd.f32 %v17397_v59, %v17396_v42  ;;  %v17398_v55 = vld [vmem:[#allocation60_spill] sm:$0xff] }
 0x682   :  { %v12240_v24 = vadd.f32 %v4077_v8, %v2217_v11  ;;  %17390 = vst [vmem:[#allocation135_spill] sm:$0xff] %v12244_v46  ;;  %v12248_v6 = vpack.c.b16 %v3381_v58, %v3378_v48 }
 0x684   :  { %17392 = vst [vmem:[#allocation196_spill] sm:$0xff] %v12248_v6 }
 0x685   :  { %v3286_v13 = vpop.f32.mrf.mxu2 }
 0x686   :  { %v12246_v53 = vadd.f32 %v3286_v13, %v3198_v39  ;;  %v3111_v28 = vpop.f32.mrf.mxu0  ;;  %v3371_v13 = vunpack.c.h.b16 %v17173_v29  ;;  %v17403_v29 = vld [vmem:[#allocation316_spill] sm:$0xff] }
 0x687   :  { %v3112_v56 = vadd.f32 %v3111_v28, %v11824_v12  ;;  %v12251_v9 = vpop.f32.mrf.mxu1 }
 0x688   :  { %17391 = vst [vmem:[#allocation131_spill] sm:$0xff] %v12246_v53 }
 0x689   :  { %v4079_v4 = vpop.f32.mrf.mxu3  ;;  %4130 = vmatmul.bf16.gmra.mxu0 %v12244_v46  ;;  %v3201_v5 = vadd.f32 %v12188_v15, %v3112_v56  ;;  %v3374_v56 = vunpack.c.h.b16 %v17174_v41  ;;  %v17404_v41 = vld [vmem:[#allocation320_spill] sm:$0xff] }
 0x68a   :  { %v12257_v11 = vadd.f32 %v4079_v4, %v2219_v35  ;;  %4229 = vmatmul.bf16.gmra.mxu1 %v12248_v6  ;;  %4308 = vmatmul.bf16.gmra.mxu2 %v11818_v44  ;;  %v3384_v35 = vunpack.c.l.b16 %v17398_v55  ;;  %v17399_v4 = vld [vmem:[#allocation64_spill] sm:$0xff]  ;;  %v2224_v59 = vadd.f32 %v17404_v41, %v17403_v29  ;;  %v17412_v29 = vld [vmem:[#allocation154_spill] sm:$0xff] }
 0x68d   :  { %v3289_v48 = vpop.f32.mrf.mxu2 }
 0x68e   :  { %v12261_v8 = vadd.f32 %v3289_v48, %v3201_v5  ;;  %4397 = vmatmul.bf16.gmra.mxu3 %v12244_v46  ;;  %v3113_v12 = vpop.f32.mrf.mxu0  ;;  %v3387_v5 = vunpack.c.l.b16 %v17399_v4 }
 0x68f   :  { %v3114_v28 = vadd.f32 %v3113_v12, %v11831_v21  ;;  %v12265_v39 = vpop.f32.mrf.mxu1  ;;  %v12276_v21 = vpack.c.b16 %v3374_v56, %v3371_v13  ;;  %v17406_v13 = vld [vmem:[#allocation214_spill] sm:$0xff] }
 0x690   :  { %17395 = vst [vmem:[#allocation200_spill] sm:$0xff] %v12261_v8  ;;  %v12280_v42 = vpack.c.b16 %v3387_v5, %v3384_v35  ;;  %v17407_v56 = vld [vmem:[#allocation218_spill] sm:$0xff] }
 0x691   :  { %v4082_v15 = vpop.f32.mrf.mxu3  ;;  %v3203_v58 = vadd.f32 %v12200_v0, %v3114_v28  ;;  %17400 = vst [vmem:[#allocation260_spill] sm:$0xff] %v12276_v21  ;;  %v7916_v35 = vor.u32 %v17407_v56, %v17406_v13  ;;  %v17414_v13 = vld [vmem:[#allocation322_spill] sm:$0xff] }
 0x692   :  { %v12272_v7 = vadd.f32 %v4082_v15, %v2222_v26  ;;  %17402 = vst [vmem:[#allocation341_spill] sm:$0xff] %v12280_v42 }
 0x693   :  { %4644 = vmatpush.bf16.msra.mxu2 %v7916_v35 }
 0x695   :  { %v3291_v48 = vpop.f32.mrf.mxu2 }
 0x696   :  { %v12278_v12 = vadd.f32 %v3291_v48, %v3203_v58  ;;  %v3116_v8 = vpop.f32.mrf.mxu0  ;;  %v17405_v58 = vld [vmem:[#allocation171_spill] sm:$0xff] }
 0x697   :  { %v3117_v0 = vadd.f32 %v3116_v8, %v11849_v14  ;;  %v12283_v28 = vpop.f32.mrf.mxu1  ;;  %v17408_v14 = vld [vmem:[#allocation279_spill] sm:$0xff] }
 0x698   :  { %17401 = vst [vmem:[#allocation264_spill] sm:$0xff] %v12278_v12  ;;  %v17409_v8 = vld [vmem:[#allocation275_spill] sm:$0xff]  ;;  %v17413_v12 = vld [vmem:[#allocation321_spill] sm:$0xff] }
 0x699   :  { %v4084_v26 = vpop.f32.mrf.mxu3  ;;  %4135 = vmatmul.bf16.gmra.mxu0 %v12276_v21  ;;  %v3206_v15 = vadd.f32 %v12216_v22, %v3117_v0  ;;  %v8040_v4 = vor.u32 %v17409_v8, %v17408_v14  ;;  %v17411_v0 = vld [vmem:[#allocation150_spill] sm:$0xff]  ;;  %v2227_v56 = vadd.f32 %v17414_v13, %v17413_v12  ;;  %v17415_v8 = vld [vmem:[#allocation55_spill] sm:$0xff] }
 0x69a   :  { %v12289_v55 = vadd.f32 %v4084_v26, %v2224_v59  ;;  %4234 = vmatmul.bf16.gmra.mxu1 %v12280_v42  ;;  %4313 = vmatmul.bf16.gmra.mxu2 %v17405_v58  ;;  %v7788_v41 = vor.u32 %v17412_v29, %v17411_v0  ;;  %v17418_v0 = vld [vmem:[#allocation71_spill] sm:$0xff] }
 0x69b   :  { %4466 = vmatpush.bf16.msra.mxu0 %v8040_v4  ;;  %v3380_v4 = vunpack.c.h.b16 %v17415_v8  ;;  %v3393_v29 = vunpack.c.l.b16 %v17418_v0  ;;  %v17422_v13 = vld [vmem:[#allocation15_spill] sm:$0xff]  ;;  %v17424_v8 = vld [vmem:[#allocation326_spill] sm:$0xff] }
 0x69c   :  { %4555 = vmatpush.bf16.msra.mxu1 %v7788_v41 }
 0x69d   :  { %v3294_v5 = vpop.f32.mrf.mxu2 }
 0x69e   :  { %v12297_v48 = vadd.f32 %v3294_v5, %v3206_v15  ;;  %4402 = vmatmul.bf16.gmra.mxu3 %v12276_v21  ;;  %v3118_v22 = vpop.f32.mrf.mxu0  ;;  %v3377_v15 = vunpack.c.h.b16 %v17187_v38  ;;  %v17423_v38 = vld [vmem:[#allocation69_spill] sm:$0xff] }
 0x69f   :  { %v3119_v59 = vadd.f32 %v3118_v22, %v11856_v51  ;;  %v12303_v26 = vpop.f32.mrf.mxu1 }
 0x6a0   :  { %17410 = vst [vmem:[#allocation352_spill] sm:$0xff] %v12297_v48  ;;  %v17417_v48 = vld [vmem:[#allocation68_spill] sm:$0xff]  ;;  %v12314_v22 = vpack.c.b16 %v3380_v4, %v3377_v15 }
 0x6a1   :  { %v4087_v14 = vpop.f32.mrf.mxu3  ;;  %v3208_v35 = vadd.f32 %v12234_v47, %v3119_v59  ;;  %v3390_v53 = vunpack.c.l.b16 %v17417_v48 }
 0x6a2   :  { %v12310_v5 = vadd.f32 %v4087_v14, %v2227_v56  ;;  %17419 = vst [vmem:[#allocation11_spill] sm:$0xff] %v12314_v22  ;;  %v2229_v56 = vadd.f32 %v17424_v8, %v17423_v38  ;;  %v17430_v38 = vld [vmem:[#allocation329_spill] sm:$0xff] }
 0x6a3   :  { %v12318_v41 = vpack.c.b16 %v3393_v29, %v3390_v53  ;;  %v17428_v29 = vld [vmem:[#allocation10_spill] sm:$0xff] }
 0x6a4   :  { %17416 = vst [vmem:[#allocation72_spill] sm:$0xff] %v12310_v5 }
 0x6a5   :  { %v3296_v51 = vpop.f32.mrf.mxu2  ;;  %17421 = vst [vmem:[#allocation343_spill] sm:$0xff] %v12318_v41 }
 0x6a6   :  { %v12316_v42 = vadd.f32 %v3296_v51, %v3208_v35  ;;  %v3121_v12 = vpop.f32.mrf.mxu0  ;;  %v17426_v35 = vld [vmem:[#allocation300_spill] sm:$0xff] }
 0x6a7   :  { %v3122_v47 = vadd.f32 %v3121_v12, %v17422_v13  ;;  %v12321_v59 = vpop.f32.mrf.mxu1  ;;  %v17429_v13 = vld [vmem:[#allocation57_spill] sm:$0xff] }
 0x6a8   :  { %17420 = vst [vmem:[#allocation353_spill] sm:$0xff] %v12316_v42  ;;  %v2232_v8 = vadd.f32 %v17430_v38, %v17429_v13  ;;  %v17432_v42 = vld [vmem:[#allocation63_spill] sm:$0xff]  ;;  %v17439_v38 = vld [vmem:[#allocation37_spill] sm:$0xff] }
 0x6a9   :  { %v4089_v14 = vpop.f32.mrf.mxu3  ;;  %4140 = vmatmul.bf16.gmra.mxu0 %v12314_v22  ;;  %v3211_v48 = vadd.f32 %v12251_v9, %v3122_v47 }
 0x6aa   :  { %v12327_v0 = vadd.f32 %v4089_v14, %v2229_v56  ;;  %4239 = vmatmul.bf16.gmra.mxu1 %v12318_v41  ;;  %4318 = vmatmul.bf16.gmra.mxu2 %v17426_v35  ;;  %v17431_v56 = vld [vmem:[#allocation59_spill] sm:$0xff]  ;;  %v3386_v41 = vunpack.c.h.b16 %v17432_v42  ;;  %v17440_v42 = vld [vmem:[#allocation330_spill] sm:$0xff] }
 0x6ab   :  { %v3383_v14 = vunpack.c.h.b16 %v17431_v56 }
 0x6ac   :  { %17425 = vst [vmem:[#allocation62_spill] sm:$0xff] %v12327_v0 }
 0x6ad   :  { %v3299_v53 = vpop.f32.mrf.mxu2 }
 0x6ae   :  { %v12331_v15 = vadd.f32 %v3299_v53, %v3211_v48  ;;  %4407 = vmatmul.bf16.gmra.mxu3 %v12314_v22  ;;  %v3123_v4 = vpop.f32.mrf.mxu0  ;;  %v17434_v48 = vld [vmem:[#allocation74_spill] sm:$0xff] }
 0x6af   :  { %v3124_v51 = vadd.f32 %v3123_v4, %v17428_v29  ;;  %v12335_v12 = vpop.f32.mrf.mxu1  ;;  %v3396_v53 = vunpack.c.l.b16 %v17434_v48  ;;  %v12346_v4 = vpack.c.b16 %v3386_v41, %v3383_v14  ;;  %v17442_v41 = vld [vmem:[#allocation167_spill] sm:$0xff]  ;;  %v17445_v48 = vld [vmem:[#allocation206_spill] sm:$0xff] }
 0x6b0   :  { %17427 = vst [vmem:[#allocation392_spill] sm:$0xff] %v12331_v15  ;;  %v17435_v15 = vld [vmem:[#allocation77_spill] sm:$0xff] }
 0x6b1   :  { %v4092_v9 = vpop.f32.mrf.mxu3  ;;  %v3213_v47 = vadd.f32 %v12265_v39, %v3124_v51  ;;  %v3399_v22 = vunpack.c.l.b16 %v17435_v15  ;;  %17436 = vst [vmem:[#allocation87_spill] sm:$0xff] %v12346_v4 }
 0x6b2   :  { %v12342_v6 = vadd.f32 %v4092_v9, %v2232_v8  ;;  %v2234_v8 = vadd.f32 %v17440_v42, %v17439_v38 }
 0x6b3   :  { %v12350_v13 = vpack.c.b16 %v3399_v22, %v3396_v53  ;;  %v17446_v53 = vld [vmem:[#allocation210_spill] sm:$0xff] }
 0x6b4   :  { %17433 = vst [vmem:[#allocation354_spill] sm:$0xff] %v12342_v6  ;;  %v7900_v38 = vor.u32 %v17446_v53, %v17445_v48  ;;  %v17456_v48 = vld [vmem:[#allocation80_spill] sm:$0xff] }
 0x6b5   :  { %v3301_v0 = vpop.f32.mrf.mxu2  ;;  %17438 = vst [vmem:[#allocation346_spill] sm:$0xff] %v12350_v13  ;;  %v3402_v53 = vunpack.c.l.b16 %v17456_v48 }
 0x6b6   :  { %v12348_v29 = vadd.f32 %v3301_v0, %v3213_v47  ;;  %v3126_v21 = vpop.f32.mrf.mxu0  ;;  %4645 = vmatpush.bf16.msra.mxu2 %v7900_v38  ;;  %v17462_v38 = vld [vmem:[#allocation81_spill] sm:$0xff] }
 0x6b7   :  { %v3127_v39 = vadd.f32 %v3126_v21, %v11893_v43  ;;  %v12353_v51 = vpop.f32.mrf.mxu1  ;;  %v17444_v21 = vld [vmem:[#allocation232_spill] sm:$0xff] }
 0x6b8   :  { %17437 = vst [vmem:[#allocation355_spill] sm:$0xff] %v12348_v29 }
 0x6b9   :  { %v4094_v9 = vpop.f32.mrf.mxu3  ;;  %4145 = vmatmul.bf16.gmra.mxu0 %v12346_v4  ;;  %v3216_v15 = vadd.f32 %v12283_v28, %v3127_v39  ;;  %v17447_v28 = vld [vmem:[#allocation271_spill] sm:$0xff] }
 0x6ba   :  { %v12359_v56 = vadd.f32 %v4094_v9, %v2234_v8  ;;  %4244 = vmatmul.bf16.gmra.mxu1 %v12350_v13  ;;  %4323 = vmatmul.bf16.gmra.mxu2 %v17442_v41  ;;  %v17448_v39 = vld [vmem:[#allocation267_spill] sm:$0xff]  ;;  %v17449_v8 = vld [vmem:[#allocation142_spill] sm:$0xff] }
 0x6bb   :  { %v8024_v42 = vor.u32 %v17448_v39, %v17447_v28  ;;  %v17450_v9 = vld [vmem:[#allocation146_spill] sm:$0xff]  ;;  %v17451_v13 = vld [vmem:[#allocation331_spill] sm:$0xff] }
 0x6bc   :  { %17441 = vst [vmem:[#allocation307_spill] sm:$0xff] %v12359_v56  ;;  %v7772_v29 = vor.u32 %v17450_v9, %v17449_v8  ;;  %v17452_v56 = vld [vmem:[#allocation332_spill] sm:$0xff]  ;;  %v17457_v28 = vld [vmem:[#allocation83_spill] sm:$0xff] }
 0x6bd   :  { %v3304_v22 = vpop.f32.mrf.mxu2  ;;  %4467 = vmatpush.bf16.msra.mxu0 %v8024_v42  ;;  %v3405_v39 = vunpack.c.l.b16 %v17457_v28  ;;  %v17463_v42 = vld [vmem:[#allocation84_spill] sm:$0xff]  ;;  %v17467_v28 = vld [vmem:[#allocation27_spill] sm:$0xff] }
 0x6be   :  { %v12363_v0 = vadd.f32 %v3304_v22, %v3216_v15  ;;  %4412 = vmatmul.bf16.gmra.mxu3 %v12346_v4  ;;  %v3128_v43 = vpop.f32.mrf.mxu0  ;;  %v2237_v15 = vadd.f32 %v17452_v56, %v17451_v13  ;;  %v17453_v4 = vld [vmem:[#allocation67_spill] sm:$0xff]  ;;  %4556 = vmatpush.bf16.msra.mxu1 %v7772_v29 }
 0x6bf   :  { %v3129_v47 = vadd.f32 %v3128_v43, %v17444_v21  ;;  %v12367_v14 = vpop.f32.mrf.mxu1  ;;  %v3389_v6 = vunpack.c.h.b16 %v17453_v4  ;;  %v17454_v43 = vld [vmem:[#allocation70_spill] sm:$0xff]  ;;  %v17461_v4 = vld [vmem:[#allocation21_spill] sm:$0xff] }
 0x6c0   :  { %17443 = vst [vmem:[#allocation127_spill] sm:$0xff] %v12363_v0  ;;  %v3392_v21 = vunpack.c.h.b16 %v17454_v43 }
 0x6c1   :  { %v4097_v22 = vpop.f32.mrf.mxu3  ;;  %v3218_v0 = vadd.f32 %v12303_v26, %v3129_v47  ;;  %v12388_v26 = vpack.c.b16 %v3405_v39, %v3402_v53 }
 0x6c2   :  { %v12380_v41 = vadd.f32 %v4097_v22, %v2237_v15  ;;  %v12384_v9 = vpack.c.b16 %v3392_v21, %v3389_v6  ;;  %v2239_v15 = vadd.f32 %v17463_v42, %v17462_v38  ;;  %v17465_v6 = vld [vmem:[#allocation292_spill] sm:$0xff] }
 0x6c3   :  { %17460 = vst [vmem:[#allocation252_spill] sm:$0xff] %v12388_v26 }
 0x6c4   :  { %17455 = vst [vmem:[#allocation123_spill] sm:$0xff] %v12380_v41 }
 0x6c5   :  { %v3306_v8 = vpop.f32.mrf.mxu2  ;;  %17458 = vst [vmem:[#allocation188_spill] sm:$0xff] %v12384_v9 }
 0x6c6   :  { %v12386_v13 = vadd.f32 %v3306_v8, %v3218_v0  ;;  %v3131_v56 = vpop.f32.mrf.mxu0 }
 0x6c7   :  { %v3132_v47 = vadd.f32 %v3131_v56, %v17461_v4  ;;  %v4210_v43 = vpop.f32.mrf.mxu1  ;;  %v17468_v56 = vld [vmem:[#allocation333_spill] sm:$0xff]  ;;  %v17469_v4 = vld [vmem:[#allocation334_spill] sm:$0xff] }
 0x6c8   :  { %17459 = vst [vmem:[#allocation192_spill] sm:$0xff] %v12386_v13  ;;  %v2242_v38 = vadd.f32 %v17469_v4, %v17468_v56  ;;  %v17478_v4 = vld [vmem:[#allocation13_spill] sm:$0xff] }
 0x6c9   :  { %v4099_v22 = vpop.f32.mrf.mxu3  ;;  %4150 = vmatmul.bf16.gmra.mxu0 %v12384_v9  ;;  %v3221_v48 = vadd.f32 %v12321_v59, %v3132_v47  ;;  %v17470_v47 = vld [vmem:[#allocation73_spill] sm:$0xff] }
 0x6ca   :  { %v12395_v29 = vadd.f32 %v4099_v22, %v2239_v15  ;;  %4249 = vmatmul.bf16.gmra.mxu1 %v12388_v26  ;;  %4328 = vmatmul.bf16.gmra.mxu2 %v17465_v6  ;;  %v3395_v15 = vunpack.c.h.b16 %v17470_v47  ;;  %v17471_v22 = vld [vmem:[#allocation76_spill] sm:$0xff]  ;;  %v17479_v47 = vld [vmem:[#allocation335_spill] sm:$0xff] }
 0x6cb   :  { %v3398_v13 = vunpack.c.h.b16 %v17471_v22  ;;  %v2244_v22 = vadd.f32 %v17479_v47, %v17478_v4 }
 0x6cc   :  { %17464 = vst [vmem:[#allocation256_spill] sm:$0xff] %v12395_v29 }
 0x6cd   :  { %v3309_v0 = vpop.f32.mrf.mxu2  ;;  %v12412_v41 = vpack.c.b16 %v3398_v13, %v3395_v15  ;;  %v17481_v13 = vld [vmem:[#allocation31_spill] sm:$0xff]  ;;  %v17483_v15 = vld [vmem:[#allocation220_spill] sm:$0xff] }
 0x6ce   :  { %v12399_v21 = vadd.f32 %v3309_v0, %v3221_v48  ;;  %4417 = vmatmul.bf16.gmra.mxu3 %v12384_v9  ;;  %v3133_v53 = vpop.f32.mrf.mxu0  ;;  %v17473_v48 = vld [vmem:[#allocation86_spill] sm:$0xff] }
 0x6cf   :  { %v3134_v39 = vadd.f32 %v3133_v53, %v17467_v28  ;;  %v4212_v8 = vpop.f32.mrf.mxu1  ;;  %v3408_v0 = vunpack.c.l.b16 %v17473_v48  ;;  %17475 = vst [vmem:[#allocation312_spill] sm:$0xff] %v12412_v41 }
 0x6d0   :  { %17466 = vst [vmem:[#allocation345_spill] sm:$0xff] %v12399_v21  ;;  %v17474_v21 = vld [vmem:[#allocation89_spill] sm:$0xff] }
 0x6d1   :  { %v4102_v42 = vpop.f32.mrf.mxu3  ;;  %v3223_v59 = vadd.f32 %v12335_v12, %v3134_v39  ;;  %v3411_v9 = vunpack.c.l.b16 %v17474_v21 }
 0x6d2   :  { %v12408_v26 = vadd.f32 %v4102_v42, %v2242_v38 }
 0x6d3   :  { %v12416_v56 = vpack.c.b16 %v3411_v9, %v3408_v0 }
 0x6d4   :  { %17472 = vst [vmem:[#allocation356_spill] sm:$0xff] %v12408_v26  ;;  %v17489_v26 = vld [vmem:[#allocation259_spill] sm:$0xff] }
 0x6d5   :  { %v3311_v29 = vpop.f32.mrf.mxu2  ;;  %17477 = vst [vmem:[#allocation357_spill] sm:$0xff] %v12416_v56 }
 0x6d6   :  { %v12414_v53 = vadd.f32 %v3311_v29, %v3223_v59  ;;  %v4116_v28 = vpop.f32.mrf.mxu0  ;;  %v17482_v29 = vld [vmem:[#allocation373_spill] sm:$0xff] }
 0x6d7   :  { %v4117_v12 = vadd.f32 %v4116_v28, %v11938_v34  ;;  %v4215_v39 = vpop.f32.mrf.mxu1 }
 0x6d8   :  { %17476 = vst [vmem:[#allocation20_spill] sm:$0xff] %v12414_v53  ;;  %v17487_v53 = vld [vmem:[#allocation202_spill] sm:$0xff] }
 0x6d9   :  { %v12422_v38 = vadd.f32 %v12353_v51, %v4117_v12  ;;  %v4104_v42 = vpop.f32.mrf.mxu3  ;;  %4155 = vmatmul.bf16.gmra.mxu0 %v12412_v41  ;;  %v17484_v51 = vld [vmem:[#allocation79_spill] sm:$0xff]  ;;  %v17485_v12 = vld [vmem:[#allocation82_spill] sm:$0xff] }
 0x6da   :  { %v12425_v21 = vadd.f32 %v4104_v42, %v2244_v22  ;;  %4254 = vmatmul.bf16.gmra.mxu1 %v12416_v56  ;;  %4333 = vmatmul.bf16.gmra.mxu2 %v17481_v13  ;;  %v3401_v28 = vunpack.c.h.b16 %v17484_v51  ;;  %v3404_v4 = vunpack.c.h.b16 %v17485_v12  ;;  %v17486_v42 = vld [vmem:[#allocation198_spill] sm:$0xff] }
 0x6db   :  { %v7884_v56 = vor.u32 %v17487_v53, %v17486_v42  ;;  %v17494_v51 = vld [vmem:[#allocation94_spill] sm:$0xff] }
 0x6dc   :  { %17480 = vst [vmem:[#allocation349_spill] sm:$0xff] %v12425_v21  ;;  %v17488_v21 = vld [vmem:[#allocation263_spill] sm:$0xff]  ;;  %v3417_v31 = vunpack.c.l.b16 %v17494_v51  ;;  %v17496_v12 = vld [vmem:[#allocation338_spill] sm:$0xff] }
 0x6dd   :  { %v4294_v9 = vpop.f32.mrf.mxu2  ;;  %4646 = vmatpush.bf16.msra.mxu2 %v7884_v56  ;;  %v17500_v56 = vld [vmem:[#allocation224_spill] sm:$0xff] }
 0x6de   :  { %v4295_v59 = vadd.f32 %v4294_v9, %v17482_v29  ;;  %4422 = vmatmul.bf16.gmra.mxu3 %v12412_v41  ;;  %v4118_v34 = vpop.f32.mrf.mxu0  ;;  %v8008_v9 = vor.u32 %v17489_v26, %v17488_v21  ;;  %v17490_v29 = vld [vmem:[#allocation134_spill] sm:$0xff]  ;;  %v17498_v26 = vld [vmem:[#allocation288_spill] sm:$0xff] }
 0x6df   :  { %v4119_v48 = vadd.f32 %v4118_v34, %v17483_v15  ;;  %v4217_v0 = vpop.f32.mrf.mxu1  ;;  %v17491_v41 = vld [vmem:[#allocation138_spill] sm:$0xff]  ;;  %v17493_v34 = vld [vmem:[#allocation92_spill] sm:$0xff] }
 0x6e0   :  { %v7756_v13 = vor.u32 %v17491_v41, %v17490_v29  ;;  %v3414_v15 = vunpack.c.l.b16 %v17493_v34  ;;  %4468 = vmatpush.bf16.msra.mxu0 %v8008_v9  ;;  %v17502_v9 = vld [vmem:[#allocation43_spill] sm:$0xff] }
 0x6e1   :  { %v12435_v47 = vadd.f32 %v12367_v14, %v4119_v48  ;;  %v4383_v22 = vpop.f32.mrf.mxu3  ;;  %v12447_v48 = vpack.c.b16 %v3404_v4, %v3401_v28  ;;  %v17501_v28 = vld [vmem:[#allocation339_spill] sm:$0xff] }
 0x6e2   :  { %v12443_v6 = vadd.f32 %v4383_v22, %v4295_v59  ;;  %4557 = vmatpush.bf16.msra.mxu1 %v7756_v13  ;;  %v12450_v5 = vpack.c.b16 %v3417_v31, %v3414_v15 }
 0x6e3   :  { %17495 = vst [vmem:[#allocation350_spill] sm:$0xff] %v12447_v48 }
 0x6e4   :  { %17492 = vst [vmem:[#allocation308_spill] sm:$0xff] %v12443_v6 }
 0x6e5   :  { %v4296_v14 = vpop.f32.mrf.mxu2  ;;  %17497 = vst [vmem:[#allocation358_spill] sm:$0xff] %v12450_v5 }
 0x6e6   :  { %v4297_v53 = vadd.f32 %v4296_v14, %v17496_v12  ;;  %v4121_v42 = vpop.f32.mrf.mxu0  ;;  %v17503_v14 = vld [vmem:[#allocation85_spill] sm:$0xff] }
 0x6e7   :  { %v4122_v21 = vadd.f32 %v4121_v42, %v17498_v26  ;;  %v4220_v41 = vpop.f32.mrf.mxu1  ;;  %v3407_v12 = vunpack.c.h.b16 %v17503_v14 }
 0x6e9   :  { %v12453_v59 = vadd.f32 %v4210_v43, %v4122_v21  ;;  %v4385_v22 = vpop.f32.mrf.mxu3  ;;  %4160 = vmatmul.bf16.gmra.mxu0 %v12447_v48  ;;  %v17506_v21 = vld [vmem:[#allocation96_spill] sm:$0xff] }
 0x6ea   :  { %v12456_v29 = vadd.f32 %v4385_v22, %v4297_v53  ;;  %4259 = vmatmul.bf16.gmra.mxu1 %v12450_v5  ;;  %4338 = vmatmul.bf16.gmra.mxu2 %v17500_v56  ;;  %v17504_v53 = vld [vmem:[#allocation88_spill] sm:$0xff]  ;;  %v3420_v22 = vunpack.c.l.b16 %v17506_v21  ;;  %v17507_v5 = vld [vmem:[#allocation98_spill] sm:$0xff] }
 0x6eb   :  { %v3410_v42 = vunpack.c.h.b16 %v17504_v53  ;;  %v17525_v56 = vld [vmem:[#allocation126_spill] sm:$0xff] }
 0x6ec   :  { %17499 = vst [vmem:[#allocation244_spill] sm:$0xff] %v12456_v29  ;;  %v3423_v29 = vunpack.c.l.b16 %v17507_v5  ;;  %v17513_v5 = vld [vmem:[#allocation39_spill] sm:$0xff] }
 0x6ed   :  { %v4299_v13 = vpop.f32.mrf.mxu2 }
 0x6ee   :  { %v4300_v4 = vadd.f32 %v4299_v13, %v17501_v28  ;;  %4427 = vmatmul.bf16.gmra.mxu3 %v12447_v48  ;;  %v4123_v31 = vpop.f32.mrf.mxu0  ;;  %v12471_v28 = vpack.c.b16 %v3410_v42, %v3407_v12  ;;  %v17509_v48 = vld [vmem:[#allocation374_spill] sm:$0xff]  ;;  %v17514_v12 = vld [vmem:[#allocation375_spill] sm:$0xff] }
 0x6ef   :  { %v4124_v34 = vadd.f32 %v4123_v31, %v17502_v9  ;;  %v4222_v15 = vpop.f32.mrf.mxu1  ;;  %v12474_v9 = vpack.c.b16 %v3423_v29, %v3420_v22 }
 0x6f0   :  { %17508 = vst [vmem:[#allocation26_spill] sm:$0xff] %v12471_v28 }
 0x6f1   :  { %v12463_v43 = vadd.f32 %v4212_v8, %v4124_v34  ;;  %v4388_v51 = vpop.f32.mrf.mxu3  ;;  %17510 = vst [vmem:[#allocation359_spill] sm:$0xff] %v12474_v9 }
 0x6f2   :  { %v12467_v26 = vadd.f32 %v4388_v51, %v4300_v4 }
 0x6f4   :  { %17505 = vst [vmem:[#allocation248_spill] sm:$0xff] %v12467_v26  ;;  %v17521_v26 = vld [vmem:[#allocation251_spill] sm:$0xff] }
 0x6f5   :  { %v4301_v13 = vpop.f32.mrf.mxu2 }
 0x6f6   :  { %v4302_v6 = vadd.f32 %v4301_v13, %v17509_v48  ;;  %v4126_v31 = vpop.f32.mrf.mxu0  ;;  %v17517_v13 = vld [vmem:[#allocation93_spill] sm:$0xff] }
 0x6f7   :  { %v4127_v8 = vadd.f32 %v4126_v31, %v11986_v61  ;;  %v4225_v34 = vpop.f32.mrf.mxu1  ;;  %v3416_v31 = vunpack.c.h.b16 %v17517_v13  ;;  %v17528_v13 = vld [vmem:[#allocation344_spill] sm:$0xff] }
 0x6f9   :  { %v12477_v14 = vadd.f32 %v4215_v39, %v4127_v8  ;;  %v4390_v53 = vpop.f32.mrf.mxu3  ;;  %4165 = vmatmul.bf16.gmra.mxu0 %v12471_v28  ;;  %v17515_v39 = vld [vmem:[#allocation91_spill] sm:$0xff]  ;;  %v17518_v8 = vld [vmem:[#allocation190_spill] sm:$0xff] }
 0x6fa   :  { %v12480_v4 = vadd.f32 %v4390_v53, %v4302_v6  ;;  %4264 = vmatmul.bf16.gmra.mxu1 %v12474_v9  ;;  %4343 = vmatmul.bf16.gmra.mxu2 %v17513_v5  ;;  %v3413_v21 = vunpack.c.h.b16 %v17515_v39  ;;  %v17519_v53 = vld [vmem:[#allocation194_spill] sm:$0xff] }
 0x6fb   :  { %17511 = vst [vmem:[#allocation58_spill] sm:$0xff] %v12477_v14  ;;  %v7868_v9 = vor.u32 %v17519_v53, %v17518_v8  ;;  %v17526_v14 = vld [vmem:[#allocation130_spill] sm:$0xff] }
 0x6fc   :  { %17512 = vst [vmem:[#allocation311_spill] sm:$0xff] %v12480_v4  ;;  %v17520_v4 = vld [vmem:[#allocation255_spill] sm:$0xff]  ;;  %v7740_v39 = vor.u32 %v17526_v14, %v17525_v56 }
 0x6fd   :  { %v4304_v51 = vpop.f32.mrf.mxu2  ;;  %4647 = vmatpush.bf16.msra.mxu2 %v7868_v9  ;;  %v17532_v9 = vld [vmem:[#allocation78_spill] sm:$0xff] }
 0x6fe   :  { %v4305_v48 = vadd.f32 %v4304_v51, %v17514_v12  ;;  %4432 = vmatmul.bf16.gmra.mxu3 %v12471_v28  ;;  %v4128_v29 = vpop.f32.mrf.mxu0  ;;  %v7992_v51 = vor.u32 %v17521_v26, %v17520_v4  ;;  %v17523_v28 = vld [vmem:[#allocation100_spill] sm:$0xff]  ;;  %4558 = vmatpush.bf16.msra.mxu1 %v7740_v39  ;;  %v17530_v26 = vld [vmem:[#allocation151_spill] sm:$0xff] }
 0x6ff   :  { %v4129_v61 = vadd.f32 %v4128_v29, %v11995_v1  ;;  %v12487_v42 = vpop.f32.mrf.mxu1  ;;  %v3426_v5 = vunpack.c.l.b16 %v17523_v28  ;;  %v17524_v1 = vld [vmem:[#allocation102_spill] sm:$0xff]  ;;  %v17534_v39 = vld [vmem:[#allocation95_spill] sm:$0xff] }
 0x700   :  { %v3429_v29 = vunpack.c.l.b16 %v17524_v1  ;;  %4469 = vmatpush.bf16.msra.mxu0 %v7992_v51 }
 0x701   :  { %v12490_v22 = vadd.f32 %v4217_v0, %v4129_v61  ;;  %v4393_v6 = vpop.f32.mrf.mxu3  ;;  %v12503_v61 = vpack.c.b16 %v3416_v31, %v3413_v21  ;;  %v17533_v21 = vld [vmem:[#allocation376_spill] sm:$0xff] }
 0x702   :  { %v12497_v12 = vadd.f32 %v4393_v6, %v4305_v48 }
 0x703   :  { %17516 = vst [vmem:[#allocation119_spill] sm:$0xff] %v12490_v22  ;;  %v12506_v22 = vpack.c.b16 %v3429_v29, %v3426_v5 }
 0x704   :  { %17522 = vst [vmem:[#allocation115_spill] sm:$0xff] %v12497_v12 }
 0x705   :  { %v4306_v0 = vpop.f32.mrf.mxu2  ;;  %17527 = vst [vmem:[#allocation180_spill] sm:$0xff] %v12503_v61 }
 0x706   :  { %v4307_v8 = vadd.f32 %v4306_v0, %v17528_v13  ;;  %v4131_v53 = vpop.f32.mrf.mxu0  ;;  %17529 = vst [vmem:[#allocation184_spill] sm:$0xff] %v12506_v22  ;;  %v3419_v0 = vunpack.c.h.b16 %v17534_v39  ;;  %v17535_v13 = vld [vmem:[#allocation97_spill] sm:$0xff] }
 0x707   :  { %v4132_v4 = vadd.f32 %v4131_v53, %v17530_v26  ;;  %v12509_v48 = vpop.f32.mrf.mxu1  ;;  %v17537_v26 = vld [vmem:[#allocation104_spill] sm:$0xff] }
 0x709   :  { %v12511_v28 = vadd.f32 %v4220_v41, %v4132_v4  ;;  %v4395_v6 = vpop.f32.mrf.mxu3  ;;  %4170 = vmatmul.bf16.gmra.mxu0 %v12503_v61  ;;  %v3432_v4 = vunpack.c.l.b16 %v17537_v26  ;;  %v17548_v26 = vld [vmem:[#allocation306_spill] sm:$0xff] }
 0x70a   :  { %v12514_v56 = vadd.f32 %v4395_v6, %v4307_v8  ;;  %4269 = vmatmul.bf16.gmra.mxu1 %v12506_v22  ;;  %4348 = vmatmul.bf16.gmra.mxu2 %v17532_v9  ;;  %v3422_v8 = vunpack.c.h.b16 %v17535_v13  ;;  %v17538_v6 = vld [vmem:[#allocation106_spill] sm:$0xff] }
 0x70b   :  { %v17560_v9 = vld [vmem:[#allocation294_spill] sm:$0xff] }
 0x70c   :  { %17531 = vst [vmem:[#allocation239_spill] sm:$0xff] %v12514_v56  ;;  %v12531_v22 = vpack.c.b16 %v3422_v8, %v3419_v0  ;;  %v17542_v56 = vld [vmem:[#allocation377_spill] sm:$0xff]  ;;  %v17547_v8 = vld [vmem:[#allocation302_spill] sm:$0xff] }
 0x70d   :  { %v4309_v14 = vpop.f32.mrf.mxu2 }
 0x70e   :  { %v4310_v31 = vadd.f32 %v4309_v14, %v17533_v21  ;;  %4437 = vmatmul.bf16.gmra.mxu3 %v12503_v61  ;;  %v4133_v5 = vpop.f32.mrf.mxu0  ;;  %v3435_v14 = vunpack.c.l.b16 %v17538_v6  ;;  %17539 = vst [vmem:[#allocation231_spill] sm:$0xff] %v12531_v22  ;;  %v17540_v61 = vld [vmem:[#allocation118_spill] sm:$0xff] }
 0x70f   :  { %v4134_v51 = vadd.f32 %v4133_v5, %v12024_v10  ;;  %v12521_v1 = vpop.f32.mrf.mxu1  ;;  %v17541_v10 = vld [vmem:[#allocation122_spill] sm:$0xff] }
 0x710   :  { %v7724_v5 = vor.u32 %v17541_v10, %v17540_v61  ;;  %v12536_v12 = vpack.c.b16 %v3435_v14, %v3432_v4  ;;  %v17546_v61 = vld [vmem:[#allocation212_spill] sm:$0xff]  ;;  %v8092_v4 = vor.u32 %v17548_v26, %v17547_v8  ;;  %v17549_v6 = vld [vmem:[#allocation378_spill] sm:$0xff] }
 0x711   :  { %v12523_v41 = vadd.f32 %v4222_v15, %v4134_v51  ;;  %v4398_v29 = vpop.f32.mrf.mxu3  ;;  %v17555_v8 = vld [vmem:[#allocation186_spill] sm:$0xff] }
 0x712   :  { %v12527_v53 = vadd.f32 %v4398_v29, %v4310_v31  ;;  %17543 = vst [vmem:[#allocation227_spill] sm:$0xff] %v12536_v12  ;;  %4559 = vmatpush.bf16.msra.mxu1 %v7724_v5  ;;  %4730 = vmatpush.bf16.msra.mxu3 %v8092_v4  ;;  %v17551_v5 = vld [vmem:[#allocation99_spill] sm:$0xff] }
 0x714   :  { %17536 = vst [vmem:[#allocation235_spill] sm:$0xff] %v12527_v53 }
 0x715   :  { %v4311_v21 = vpop.f32.mrf.mxu2 }
 0x716   :  { %v4312_v15 = vadd.f32 %v4311_v21, %v17542_v56  ;;  %v4136_v51 = vpop.f32.mrf.mxu0 }
 0x717   :  { %v4137_v39 = vadd.f32 %v4136_v51, %v12044_v33  ;;  %v12539_v13 = vpop.f32.mrf.mxu1 }
 0x719   :  { %v12541_v31 = vadd.f32 %v4225_v34, %v4137_v39  ;;  %v4400_v29 = vpop.f32.mrf.mxu3  ;;  %4175 = vmatmul.bf16.gmra.mxu0 %v12531_v22  ;;  %v17550_v34 = vld [vmem:[#allocation280_spill] sm:$0xff] }
 0x71a   :  { %v12544_v0 = vadd.f32 %v4400_v29, %v4312_v15  ;;  %4274 = vmatmul.bf16.gmra.mxu1 %v12536_v12  ;;  %4353 = vmatmul.bf16.gmra.mxu2 %v17546_v61  ;;  %v3425_v15 = vunpack.c.h.b16 %v17551_v5  ;;  %v17553_v29 = vld [vmem:[#allocation101_spill] sm:$0xff]  ;;  %v17559_v61 = vld [vmem:[#allocation110_spill] sm:$0xff] }
 0x71b   :  { %17544 = vst [vmem:[#allocation360_spill] sm:$0xff] %v12541_v31  ;;  %v3428_v12 = vunpack.c.h.b16 %v17553_v29  ;;  %v3441_v4 = vunpack.c.l.b16 %v17559_v61  ;;  %v17561_v5 = vld [vmem:[#allocation298_spill] sm:$0xff] }
 0x71c   :  { %17545 = vst [vmem:[#allocation223_spill] sm:$0xff] %v12544_v0  ;;  %v17554_v0 = vld [vmem:[#allocation182_spill] sm:$0xff]  ;;  %v8076_v31 = vor.u32 %v17561_v5, %v17560_v9  ;;  %v17572_v5 = vld [vmem:[#allocation351_spill] sm:$0xff] }
 0x71d   :  { %v4314_v56 = vpop.f32.mrf.mxu2  ;;  %v7852_v26 = vor.u32 %v17555_v8, %v17554_v0  ;;  %v17563_v29 = vld [vmem:[#allocation286_spill] sm:$0xff] }
 0x71e   :  { %v4315_v33 = vadd.f32 %v4314_v56, %v17549_v6  ;;  %4442 = vmatmul.bf16.gmra.mxu3 %v12531_v22  ;;  %v4138_v14 = vpop.f32.mrf.mxu0  ;;  %v17556_v56 = vld [vmem:[#allocation247_spill] sm:$0xff]  ;;  %v17564_v0 = vld [vmem:[#allocation290_spill] sm:$0xff] }
 0x71f   :  { %v4139_v21 = vadd.f32 %v4138_v14, %v17550_v34  ;;  %v12553_v10 = vpop.f32.mrf.mxu1  ;;  %v17557_v6 = vld [vmem:[#allocation243_spill] sm:$0xff]  ;;  %v17558_v14 = vld [vmem:[#allocation108_spill] sm:$0xff]  ;;  %4648 = vmatpush.bf16.msra.mxu2 %v7852_v26  ;;  %4731 = vmatpush.bf16.msra.mxu3 %v8076_v31  ;;  %v8060_v8 = vor.u32 %v17564_v0, %v17563_v29  ;;  %v17568_v31 = vld [vmem:[#allocation282_spill] sm:$0xff] }
 0x720   :  { %v7976_v22 = vor.u32 %v17557_v6, %v17556_v56  ;;  %v3438_v34 = vunpack.c.l.b16 %v17558_v14  ;;  %v17570_v14 = vld [vmem:[#allocation270_spill] sm:$0xff] }
 0x721   :  { %v12557_v51 = vadd.f32 %v12487_v42, %v4139_v21  ;;  %v4403_v39 = vpop.f32.mrf.mxu3  ;;  %v12570_v21 = vpack.c.b16 %v3428_v12, %v3425_v15  ;;  %v17567_v12 = vld [vmem:[#allocation278_spill] sm:$0xff] }
 0x722   :  { %v12564_v53 = vadd.f32 %v4403_v39, %v4315_v33  ;;  %4470 = vmatpush.bf16.msra.mxu0 %v7976_v22  ;;  %v12575_v39 = vpack.c.b16 %v3441_v4, %v3438_v34  ;;  %v8044_v15 = vor.u32 %v17568_v31, %v17567_v12  ;;  %v17571_v34 = vld [vmem:[#allocation274_spill] sm:$0xff] }
 0x723   :  { %17552 = vst [vmem:[#allocation219_spill] sm:$0xff] %v12557_v51  ;;  %v17565_v51 = vld [vmem:[#allocation379_spill] sm:$0xff]  ;;  %4732 = vmatpush.bf16.msra.mxu3 %v8060_v8  ;;  %v8028_v4 = vor.u32 %v17571_v34, %v17570_v14  ;;  %v17574_v12 = vld [vmem:[#allocation262_spill] sm:$0xff] }
 0x724   :  { %17562 = vst [vmem:[#allocation215_spill] sm:$0xff] %v12570_v21  ;;  %v17575_v31 = vld [vmem:[#allocation266_spill] sm:$0xff] }
 0x725   :  { %v4316_v42 = vpop.f32.mrf.mxu2  ;;  %17566 = vst [vmem:[#allocation211_spill] sm:$0xff] %v12575_v39 }
 0x726   :  { %v4317_v56 = vadd.f32 %v4316_v42, %v17565_v51  ;;  %v4141_v33 = vpop.f32.mrf.mxu0  ;;  %v17569_v51 = vld [vmem:[#allocation51_spill] sm:$0xff] }
 0x727   :  { %v4142_v6 = vadd.f32 %v4141_v33, %v12078_v60  ;;  %v12578_v61 = vpop.f32.mrf.mxu1  ;;  %4733 = vmatpush.bf16.msra.mxu3 %v8044_v15  ;;  %v3431_v33 = vunpack.c.h.b16 %v17324_v32  ;;  %v8012_v15 = vor.u32 %v17575_v31, %v17574_v12 }
 0x729   :  { %v12581_v9 = vadd.f32 %v12509_v48, %v4142_v6  ;;  %v4405_v22 = vpop.f32.mrf.mxu3  ;;  %4180 = vmatmul.bf16.gmra.mxu0 %v12570_v21  ;;  %v17573_v6 = vld [vmem:[#allocation105_spill] sm:$0xff] }
 0x72a   :  { %v12586_v26 = vadd.f32 %v4405_v22, %v4317_v56  ;;  %4279 = vmatmul.bf16.gmra.mxu1 %v12575_v39  ;;  %4358 = vmatmul.bf16.gmra.mxu2 %v17569_v51  ;;  %v3434_v22 = vunpack.c.h.b16 %v17573_v6 }
 0x72b   :  { %4734 = vmatpush.bf16.msra.mxu3 %v8028_v4 }
 0x72c   :  { %v12604_v34 = vpack.c.b16 %v3434_v22, %v3431_v33 }
 0x72d   :  { %v4319_v60 = vpop.f32.mrf.mxu2 }
 0x72e   :  { %v4320_v48 = vadd.f32 %v4319_v60, %v17572_v5  ;;  %4447 = vmatmul.bf16.gmra.mxu3 %v12570_v21  ;;  %v4143_v42 = vpop.f32.mrf.mxu0  ;;  %17576 = vst [vmem:[#allocation362_spill] sm:$0xff] %v12604_v34  ;;  %v17578_v5 = vld [vmem:[#allocation258_spill] sm:$0xff] }
 0x72f   :  { %v4144_v29 = vadd.f32 %v4143_v42, %v12100_v54  ;;  %v4242_v0 = vpop.f32.mrf.mxu1  ;;  %4735 = vmatpush.bf16.msra.mxu3 %v8012_v15  ;;  %v17577_v54 = vld [vmem:[#allocation254_spill] sm:$0xff] }
 0x730   :  { %v7996_v4 = vor.u32 %v17578_v5, %v17577_v54  ;;  %v17579_v42 = vld [vmem:[#allocation34_spill] sm:$0xff]  ;;  %v3437_v54 = vunpack.c.h.b16 %v17346_v25 }
 0x731   :  { %v12596_v8 = vadd.f32 %v12521_v1, %v4144_v29  ;;  %v4408_v56 = vpop.f32.mrf.mxu3 }
 0x732   :  { %v12602_v14 = vadd.f32 %v4408_v56, %v4320_v48  ;;  %v17580_v48 = vld [vmem:[#allocation246_spill] sm:$0xff] }
 0x733   :  { %4736 = vmatpush.bf16.msra.mxu3 %v7996_v4  ;;  %v17581_v56 = vld [vmem:[#allocation250_spill] sm:$0xff] }
 0x734   :  { %v7980_v33 = vor.u32 %v17581_v56, %v17580_v48  ;;  %v17585_v48 = vld [vmem:[#allocation177_spill] sm:$0xff] }
 0x735   :  { %v4321_v60 = vpop.f32.mrf.mxu2  ;;  %v17586_v56 = vld [vmem:[#allocation173_spill] sm:$0xff] }
 0x736   :  { %v4322_v1 = vadd.f32 %v4321_v60, %v17579_v42  ;;  %v4146_v29 = vpop.f32.mrf.mxu0  ;;  %v3440_v42 = vunpack.c.h.b16 %v17347_v19 }
 0x737   :  { %v4147_v39 = vadd.f32 %v4146_v29, %v12117_v2  ;;  %v4245_v32 = vpop.f32.mrf.mxu1  ;;  %4737 = vmatpush.bf16.msra.mxu3 %v7980_v33  ;;  %v17582_v2 = vld [vmem:[#allocation42_spill] sm:$0xff]  ;;  %v17584_v29 = vld [vmem:[#allocation301_spill] sm:$0xff]  ;;  %v7840_v33 = vor.u32 %v17586_v56, %v17585_v48 }
 0x739   :  { %v12611_v6 = vadd.f32 %v12539_v13, %v4147_v39  ;;  %v4410_v12 = vpop.f32.mrf.mxu3  ;;  %4185 = vmatmul.bf16.gmra.mxu0 %v12604_v34 }
 0x73a   :  { %v12616_v22 = vadd.f32 %v4410_v12, %v4322_v1  ;;  %4363 = vmatmul.bf16.gmra.mxu2 %v12095_v50  ;;  %4560 = vmatmul.bf16.vlgmr.msra.gmra.mxu1 %v11749_v16  ;;  %v17583_v1 = vld [vmem:[#allocation305_spill] sm:$0xff] }
 0x73b   :  { %v8096_v12 = vor.u32 %v17584_v29, %v17583_v1  ;;  %v17588_v16 = vld [vmem:[#allocation237_spill] sm:$0xff]  ;;  %4819 = vmatpush.bf16.msrb.mxu0 %v7840_v33 }
 0x73d   :  { %v4324_v31 = vpop.f32.mrf.mxu2  ;;  %4997 = vmatpush.bf16.msrb.mxu2 %v8096_v12 }
 0x73e   :  { %v4325_v15 = vadd.f32 %v4324_v31, %v17582_v2  ;;  %4452 = vmatmul.bf16.gmra.mxu3 %v12604_v34  ;;  %v4148_v13 = vpop.f32.mrf.mxu0  ;;  %v17587_v2 = vld [vmem:[#allocation241_spill] sm:$0xff] }
 0x73f   :  { %v4149_v39 = vadd.f32 %v4148_v13, %v12131_v57  ;;  %v4247_v60 = vpop.f32.mrf.mxu1  ;;  %v7968_v57 = vor.u32 %v17588_v16, %v17587_v2  ;;  %v17590_v13 = vld [vmem:[#allocation315_spill] sm:$0xff]  ;;  %v17592_v2 = vld [vmem:[#allocation317_spill] sm:$0xff] }
 0x741   :  { %v12625_v5 = vadd.f32 %v12553_v10, %v4149_v39  ;;  %v4413_v4 = vpop.f32.mrf.mxu3  ;;  %4908 = vmatpush.bf16.msrb.mxu1 %v7968_v57  ;;  %v12636_v10 = vpack.c.b16 %v3440_v42, %v3437_v54  ;;  %v17591_v54 = vld [vmem:[#allocation50_spill] sm:$0xff] }
 0x742   :  { %v12632_v31 = vadd.f32 %v4413_v4, %v4325_v15 }
 0x743   :  { %17589 = vst [vmem:[#allocation66_spill] sm:$0xff] %v12636_v10 }
 0x745   :  { %v4326_v25 = vpop.f32.mrf.mxu2 }
 0x746   :  { %v4327_v39 = vadd.f32 %v4326_v25, %v17590_v13  ;;  %v4151_v19 = vpop.f32.mrf.mxu0 }
 0x747   :  { %v4152_v34 = vadd.f32 %v4151_v19, %v12146_v36  ;;  %v4250_v1 = vpop.f32.mrf.mxu1 }
 0x749   :  { %v12641_v29 = vadd.f32 %v12578_v61, %v4152_v34  ;;  %v4415_v15 = vpop.f32.mrf.mxu3  ;;  %4190 = vmatmul.bf16.gmra.mxu0 %v12636_v10 }
 0x74a   :  { %v12644_v4 = vadd.f32 %v4415_v15, %v4327_v39  ;;  %4368 = vmatmul.bf16.gmra.mxu2 %v12136_v49  ;;  %4565 = vmatmul.bf16.gmra.mxu1 %v11774_v52  ;;  %v17601_v52 = vld [vmem:[#allocation229_spill] sm:$0xff] }
 0x74d   :  { %v4329_v16 = vpop.f32.mrf.mxu2 }
 0x74e   :  { %v4330_v42 = vadd.f32 %v4329_v16, %v17591_v54  ;;  %4457 = vmatmul.bf16.gmra.mxu3 %v12636_v10  ;;  %v4153_v12 = vpop.f32.mrf.mxu0 }
 0x74f   :  { %v4154_v36 = vadd.f32 %v4153_v12, %v12160_v23  ;;  %v4252_v48 = vpop.f32.mrf.mxu1 }
 0x751   :  { %v12651_v61 = vadd.f32 %v4242_v0, %v4154_v36  ;;  %v4418_v34 = vpop.f32.mrf.mxu3  ;;  %v17594_v0 = vld [vmem:[#allocation380_spill] sm:$0xff] }
 0x752   :  { %v12653_v56 = vadd.f32 %v4418_v34, %v4330_v42  ;;  %v17595_v34 = vld [vmem:[#allocation297_spill] sm:$0xff] }
 0x755   :  { %v4331_v33 = vpop.f32.mrf.mxu2 }
 0x756   :  { %v4332_v57 = vadd.f32 %v4331_v33, %v17592_v2  ;;  %v4156_v25 = vpop.f32.mrf.mxu0  ;;  %v17596_v33 = vld [vmem:[#allocation293_spill] sm:$0xff] }
 0x757   :  { %v4157_v13 = vadd.f32 %v4156_v25, %v12177_v63  ;;  %v4255_v39 = vpop.f32.mrf.mxu1  ;;  %v8080_v2 = vor.u32 %v17596_v33, %v17595_v34  ;;  %v17598_v25 = vld [vmem:[#allocation165_spill] sm:$0xff] }
 0x759   :  { %v12657_v19 = vadd.f32 %v4245_v32, %v4157_v13  ;;  %v4420_v15 = vpop.f32.mrf.mxu3  ;;  %4471 = vmatmul.bf16.vlgmr.msra.gmra.mxu0 %v12088_v17  ;;  %4998 = vmatpush.bf16.msrb.mxu2 %v8080_v2 }
 0x75a   :  { %v12660_v16 = vadd.f32 %v4420_v15, %v4332_v57  ;;  %4570 = vmatmul.bf16.gmra.mxu1 %v11793_v18  ;;  %4649 = vmatmul.bf16.vlgmr.msra.gmra.mxu2 %v12150_v37  ;;  %v17597_v57 = vld [vmem:[#allocation169_spill] sm:$0xff] }
 0x75b   :  { %v7824_v13 = vor.u32 %v17598_v25, %v17597_v57  ;;  %v17600_v18 = vld [vmem:[#allocation233_spill] sm:$0xff] }
 0x75c   :  { %17593 = vst [vmem:[#allocation314_spill] sm:$0xff] %v12660_v16 }
 0x75d   :  { %v4334_v23 = vpop.f32.mrf.mxu2  ;;  %4820 = vmatpush.bf16.msrb.mxu0 %v7824_v13 }
 0x75e   :  { %v4335_v54 = vadd.f32 %v4334_v23, %v17594_v0  ;;  %4738 = vmatmul.bf16.vlgmr.msra.gmra.mxu3 %v12088_v17  ;;  %v4158_v42 = vpop.f32.mrf.mxu0  ;;  %v7952_v23 = vor.u32 %v17601_v52, %v17600_v18  ;;  %v17604_v18 = vld [vmem:[#allocation382_spill] sm:$0xff] }
 0x75f   :  { %v4159_v63 = vadd.f32 %v4158_v42, %v12192_v20  ;;  %v4257_v12 = vpop.f32.mrf.mxu1  ;;  %v17602_v20 = vld [vmem:[#allocation381_spill] sm:$0xff] }
 0x760   :  { %4909 = vmatpush.bf16.msrb.mxu1 %v7952_v23  ;;  %v17606_v23 = vld [vmem:[#allocation383_spill] sm:$0xff] }
 0x761   :  { %v12667_v32 = vadd.f32 %v4247_v60, %v4159_v63  ;;  %v4423_v36 = vpop.f32.mrf.mxu3 }
 0x762   :  { %v12673_v15 = vadd.f32 %v4423_v36, %v4335_v54 }
 0x764   :  { %17599 = vst [vmem:[#allocation207_spill] sm:$0xff] %v12673_v15 }
 0x765   :  { %v4336_v0 = vpop.f32.mrf.mxu2 }
 0x766   :  { %v4337_v42 = vadd.f32 %v4336_v0, %v17602_v20  ;;  %v4161_v60 = vpop.f32.mrf.mxu0 }
 0x767   :  { %v4162_v63 = vadd.f32 %v4161_v60, %v12205_v27  ;;  %v4260_v17 = vpop.f32.mrf.mxu1 }
 0x769   :  { %v12679_v16 = vadd.f32 %v4250_v1, %v4162_v63  ;;  %v4425_v34 = vpop.f32.mrf.mxu3  ;;  %4476 = vmatmul.bf16.gmra.mxu0 %v12123_v3 }
 0x76a   :  { %v12682_v54 = vadd.f32 %v4425_v34, %v4337_v42  ;;  %4575 = vmatmul.bf16.gmra.mxu1 %v11818_v44  ;;  %4654 = vmatmul.bf16.gmra.mxu2 %v12181_v62  ;;  %v17615_v44 = vld [vmem:[#allocation225_spill] sm:$0xff] }
 0x76b   :  { %v17708_v62 = vld [vmem:[#allocation133_spill] sm:$0xff] }
 0x76c   :  { %17603 = vst [vmem:[#allocation203_spill] sm:$0xff] %v12682_v54 }
 0x76d   :  { %v4339_v52 = vpop.f32.mrf.mxu2 }
 0x76e   :  { %v4340_v36 = vadd.f32 %v4339_v52, %v17604_v18  ;;  %4743 = vmatmul.bf16.gmra.mxu3 %v12123_v3  ;;  %v4163_v33 = vpop.f32.mrf.mxu0  ;;  %v17607_v52 = vld [vmem:[#allocation268_spill] sm:$0xff]  ;;  %v17609_v18 = vld [vmem:[#allocation14_spill] sm:$0xff]  ;;  %v17634_v3 = vld [vmem:[#allocation167_spill] sm:$0xff] }
 0x76f   :  { %v4164_v27 = vadd.f32 %v4163_v33, %v12220_v45  ;;  %v4262_v2 = vpop.f32.mrf.mxu1 }
 0x771   :  { %v12689_v1 = vadd.f32 %v4252_v48, %v4164_v27  ;;  %v4428_v57 = vpop.f32.mrf.mxu3 }
 0x772   :  { %v12691_v25 = vadd.f32 %v4428_v57, %v4340_v36 }
 0x774   :  { %17605 = vst [vmem:[#allocation199_spill] sm:$0xff] %v12691_v25 }
 0x775   :  { %v4341_v13 = vpop.f32.mrf.mxu2 }
 0x776   :  { %v4342_v0 = vadd.f32 %v4341_v13, %v17606_v23  ;;  %v4166_v20 = vpop.f32.mrf.mxu0  ;;  %v17610_v13 = vld [vmem:[#allocation289_spill] sm:$0xff] }
 0x777   :  { %v4167_v42 = vadd.f32 %v4166_v20, %v12240_v24  ;;  %v12695_v60 = vpop.f32.mrf.mxu1  ;;  %v17611_v23 = vld [vmem:[#allocation285_spill] sm:$0xff] }
 0x778   :  { %v17612_v20 = vld [vmem:[#allocation161_spill] sm:$0xff] }
 0x779   :  { %v12697_v63 = vadd.f32 %v4255_v39, %v4167_v42  ;;  %v4430_v34 = vpop.f32.mrf.mxu3  ;;  %4481 = vmatmul.bf16.gmra.mxu0 %v17607_v52  ;;  %v17613_v42 = vld [vmem:[#allocation157_spill] sm:$0xff] }
 0x77a   :  { %v12700_v45 = vadd.f32 %v4430_v34, %v4342_v0  ;;  %4580 = vmatmul.bf16.gmra.mxu1 %v17405_v58  ;;  %4659 = vmatmul.bf16.gmra.mxu2 %v12209_v30  ;;  %v8064_v0 = vor.u32 %v17611_v23, %v17610_v13  ;;  %v7808_v34 = vor.u32 %v17613_v42, %v17612_v20  ;;  %v17620_v42 = vld [vmem:[#allocation17_spill] sm:$0xff] }
 0x77c   :  { %17608 = vst [vmem:[#allocation195_spill] sm:$0xff] %v12700_v45  ;;  %4999 = vmatpush.bf16.msrb.mxu2 %v8064_v0  ;;  %4821 = vmatpush.bf16.msrb.mxu0 %v7808_v34 }
 0x77d   :  { %v4344_v48 = vpop.f32.mrf.mxu2 }
 0x77e   :  { %v4345_v36 = vadd.f32 %v4344_v48, %v17609_v18  ;;  %4748 = vmatmul.bf16.gmra.mxu3 %v17607_v52  ;;  %v4168_v33 = vpop.f32.mrf.mxu0  ;;  %v17616_v48 = vld [vmem:[#allocation221_spill] sm:$0xff] }
 0x77f   :  { %v4169_v24 = vadd.f32 %v4168_v33, %v12257_v11  ;;  %v12707_v27 = vpop.f32.mrf.mxu1  ;;  %v7936_v18 = vor.u32 %v17616_v48, %v17615_v44  ;;  %v17617_v33 = vld [vmem:[#allocation384_spill] sm:$0xff] }
 0x781   :  { %v12709_v39 = vadd.f32 %v4257_v12, %v4169_v24  ;;  %v4433_v57 = vpop.f32.mrf.mxu3  ;;  %4910 = vmatpush.bf16.msrb.mxu1 %v7936_v18 }
 0x782   :  { %v12715_v58 = vadd.f32 %v4433_v57, %v4345_v36  ;;  %v17618_v36 = vld [vmem:[#allocation111_spill] sm:$0xff] }
 0x783   :  { %v12727_v57 = vperm.slane %v17618_v36, 0 }
 0x784   :  { %17614 = vst [vmem:[#allocation364_spill] sm:$0xff] %v12715_v58 }
 0x785   :  { %v4346_v11 = vpop.f32.mrf.mxu2  ;;  %v5094_v0 = vadd.f32 %v12727_v57, %v12435_v47  ;;  %v5098_v20 = vadd.f32 %v12727_v57, %v12453_v59  ;;  %v5102_v47 = vadd.f32 %v12727_v57, %v12463_v43 }
 0x786   :  { %v4347_v52 = vadd.f32 %v4346_v11, %v17617_v33  ;;  %v4171_v12 = vpop.f32.mrf.mxu0 }
 0x787   :  { %v4172_v24 = vadd.f32 %v4171_v12, %v12272_v7  ;;  %v12721_v45 = vpop.f32.mrf.mxu1  ;;  %v12744_v11 = vmax.f32 %v5094_v0, 0.0  ;;  %v12752_v59 = vmax.f32 %v5098_v20, 0.0  ;;  %v12760_v0 = vmax.f32 %v5102_v47, 0.0  ;;  %v17630_v47 = vld [vmem:[#allocation72_spill] sm:$0xff] }
 0x789   :  { %v12723_v13 = vadd.f32 %v4260_v17, %v4172_v24  ;;  %v4435_v23 = vpop.f32.mrf.mxu3  ;;  %4486 = vmatmul.bf16.gmra.mxu0 %v12185_v40  ;;  %v5090_v17 = vadd.f32 %v12727_v57, %v12422_v38  ;;  %17621 = vst [vmem:[#allocation19_spill] sm:$0xff] %v12744_v11  ;;  %v17624_v24 = vld [vmem:[#allocation58_spill] sm:$0xff]  ;;  %v5506_v20 = vmul.f32 %v12752_v59, %v12752_v59 }
 0x78a   :  { %v12729_v44 = vadd.f32 %v4435_v23, %v4347_v52  ;;  %4585 = vmatmul.bf16.gmra.mxu1 %v17426_v35  ;;  %4664 = vmatmul.bf16.gmra.mxu2 %v12244_v46  ;;  %17623 = vst [vmem:[#allocation191_spill] sm:$0xff] %v12752_v59  ;;  %v5106_v23 = vadd.f32 %v12727_v57, %v17624_v24 }
 0x78b   :  { %v12750_v12 = vmax.f32 %v5090_v17, 0.0  ;;  %17626 = vst [vmem:[#allocation183_spill] sm:$0xff] %v12760_v0 }
 0x78c   :  { %17619 = vst [vmem:[#allocation16_spill] sm:$0xff] %v12729_v44 }
 0x78d   :  { %v4349_v7 = vpop.f32.mrf.mxu2  ;;  %17622 = vst [vmem:[#allocation103_spill] sm:$0xff] %v12750_v12  ;;  %v5498_v17 = vmul.f32 %v12750_v12, %v12750_v12  ;;  %v5346_v24 = vadd.f32 %v12744_v11, %v12750_v12 }
 0x78e   :  { %v4350_v34 = vadd.f32 %v4349_v7, %v17620_v42  ;;  %4753 = vmatmul.bf16.gmra.mxu3 %v12185_v40  ;;  %v4173_v52 = vpop.f32.mrf.mxu0  ;;  %v17627_v42 = vld [vmem:[#allocation119_spill] sm:$0xff] }
 0x78f   :  { %v4174_v48 = vadd.f32 %v4173_v52, %v12289_v55  ;;  %v12742_v18 = vpop.f32.mrf.mxu1  ;;  %v5502_v55 = vmul.f32 %v12744_v11, %v12744_v11  ;;  %v5110_v43 = vadd.f32 %v12727_v57, %v17627_v42  ;;  %v12768_v52 = vmax.f32 %v5106_v23, 0.0 }
 0x790   :  { %v5114_v23 = vadd.f32 %v12727_v57, %v12511_v28  ;;  %v5347_v58 = vadd.f32 %v5346_v24, %v12752_v59  ;;  %v17635_v28 = vld [vmem:[#allocation260_spill] sm:$0xff] }
 0x791   :  { %v12748_v33 = vadd.f32 %v4262_v2, %v4174_v48  ;;  %v4438_v38 = vpop.f32.mrf.mxu3  ;;  %17628 = vst [vmem:[#allocation179_spill] sm:$0xff] %v12768_v52  ;;  %v17629_v48 = vld [vmem:[#allocation365_spill] sm:$0xff]  ;;  %v5626_v42 = vadd.f32 %v5502_v55, %v5498_v17  ;;  %v12778_v44 = vmax.f32 %v5110_v43, 0.0  ;;  %v5514_v17 = vmul.f32 %v12768_v52, %v12768_v52 }
 0x792   :  { %v12756_v7 = vadd.f32 %v4438_v38, %v4350_v34  ;;  %v5348_v24 = vadd.f32 %v5347_v58, %v12760_v0 }
 0x793   :  { %17631 = vst [vmem:[#allocation325_spill] sm:$0xff] %v12778_v44  ;;  %v5627_v55 = vadd.f32 %v5626_v42, %v5506_v20 }
 0x794   :  { %17625 = vst [vmem:[#allocation187_spill] sm:$0xff] %v12756_v7  ;;  %v5510_v7 = vmul.f32 %v12760_v0, %v12760_v0  ;;  %v5349_v42 = vadd.f32 %v5348_v24, %v12768_v52  ;;  %v17648_v52 = vld [vmem:[#allocation213_spill] sm:$0xff] }
 0x795   :  { %v4351_v2 = vpop.f32.mrf.mxu2 }
 0x796   :  { %v4352_v34 = vadd.f32 %v4351_v2, %v17629_v48  ;;  %v4176_v38 = vpop.f32.mrf.mxu0  ;;  %v5118_v2 = vadd.f32 %v12727_v57, %v12523_v41  ;;  %v5628_v46 = vadd.f32 %v5627_v55, %v5510_v7  ;;  %v12798_v41 = vmax.f32 %v5114_v23, 0.0  ;;  %v17641_v55 = vld [vmem:[#allocation62_spill] sm:$0xff] }
 0x797   :  { %v4177_v35 = vadd.f32 %v4176_v38, %v17630_v47  ;;  %v12774_v40 = vpop.f32.mrf.mxu1  ;;  %v17632_v47 = vld [vmem:[#allocation340_spill] sm:$0xff]  ;;  %v5350_v23 = vadd.f32 %v5349_v42, %v12778_v44  ;;  %v17642_v42 = vld [vmem:[#allocation281_spill] sm:$0xff] }
 0x798   :  { %17636 = vst [vmem:[#allocation242_spill] sm:$0xff] %v12798_v41  ;;  %v12803_v25 = vmax.f32 %v5118_v2, 0.0  ;;  %v5522_v2 = vmul.f32 %v12798_v41, %v12798_v41 }
 0x799   :  { %v12786_v48 = vadd.f32 %v12695_v60, %v4177_v35  ;;  %v4440_v38 = vpop.f32.mrf.mxu3  ;;  %4491 = vmatmul.bf16.gmra.mxu0 %v17632_v47  ;;  %v5518_v35 = vmul.f32 %v12778_v44, %v12778_v44  ;;  %v17637_v60 = vld [vmem:[#allocation360_spill] sm:$0xff] }
 0x79a   :  { %v12791_v43 = vadd.f32 %v4440_v38, %v4352_v34  ;;  %4590 = vmatmul.bf16.gmra.mxu1 %v17634_v3  ;;  %4669 = vmatmul.bf16.gmra.mxu2 %v17635_v28  ;;  %v5122_v20 = vadd.f32 %v12727_v57, %v17637_v60  ;;  %17638 = vst [vmem:[#allocation303_spill] sm:$0xff] %v12803_v25  ;;  %v17639_v3 = vld [vmem:[#allocation219_spill] sm:$0xff]  ;;  %v17640_v28 = vld [vmem:[#allocation385_spill] sm:$0xff] }
 0x79b   :  { %v5629_v38 = vadd.f32 %v5628_v46, %v5514_v17  ;;  %v5526_v46 = vmul.f32 %v12803_v25, %v12803_v25 }
 0x79c   :  { %17633 = vst [vmem:[#allocation238_spill] sm:$0xff] %v12791_v43  ;;  %v5126_v43 = vadd.f32 %v12727_v57, %v17639_v3  ;;  %v12815_v24 = vmax.f32 %v5122_v20, 0.0  ;;  %v5130_v3 = vadd.f32 %v12727_v57, %v12581_v9  ;;  %v5134_v20 = vadd.f32 %v12727_v57, %v12596_v8  ;;  %v17647_v9 = vld [vmem:[#allocation217_spill] sm:$0xff] }
 0x79d   :  { %v4354_v34 = vpop.f32.mrf.mxu2  ;;  %v5630_v60 = vadd.f32 %v5629_v38, %v5518_v35  ;;  %v17645_v35 = vld [vmem:[#allocation149_spill] sm:$0xff]  ;;  %v7920_v54 = vor.u32 %v17648_v52, %v17647_v9 }
 0x79e   :  { %v4355_v58 = vadd.f32 %v4354_v34, %v17640_v28  ;;  %4758 = vmatmul.bf16.gmra.mxu3 %v17632_v47  ;;  %v4178_v7 = vpop.f32.mrf.mxu0  ;;  %v17643_v34 = vld [vmem:[#allocation277_spill] sm:$0xff]  ;;  %v12828_v47 = vmax.f32 %v5126_v43, 0.0  ;;  %v5138_v43 = vadd.f32 %v12727_v57, %v12611_v6 }
 0x79f   :  { %v4179_v0 = vadd.f32 %v4178_v7, %v17641_v55  ;;  %v12811_v59 = vpop.f32.mrf.mxu1  ;;  %v8048_v7 = vor.u32 %v17643_v34, %v17642_v42  ;;  %v17644_v55 = vld [vmem:[#allocation153_spill] sm:$0xff]  ;;  %v5530_v42 = vmul.f32 %v12815_v24, %v12815_v24  ;;  %v12839_v34 = vmax.f32 %v5130_v3, 0.0  ;;  %4911 = vmatpush.bf16.msrb.mxu1 %v7920_v54 }
 0x7a0   :  { %v7792_v38 = vor.u32 %v17645_v35, %v17644_v55  ;;  %v5534_v52 = vmul.f32 %v12828_v47, %v12828_v47  ;;  %v5142_v3 = vadd.f32 %v12727_v57, %v12625_v5  ;;  %v17650_v35 = vld [vmem:[#allocation354_spill] sm:$0xff]  ;;  %v12857_v9 = vmax.f32 %v5138_v43, 0.0  ;;  %v17651_v5 = vld [vmem:[#allocation196_spill] sm:$0xff]  ;;  %v17654_v43 = vld [vmem:[#allocation11_spill] sm:$0xff] }
 0x7a1   :  { %v12822_v17 = vadd.f32 %v12707_v27, %v4179_v0  ;;  %v4443_v28 = vpop.f32.mrf.mxu3  ;;  %v5351_v27 = vadd.f32 %v5350_v23, %v12798_v41  ;;  %5000 = vmatpush.bf16.msrb.mxu2 %v8048_v7  ;;  %v5631_v0 = vadd.f32 %v5630_v60, %v5522_v2  ;;  %v12846_v23 = vmax.f32 %v5134_v20, 0.0  ;;  %v17649_v7 = vld [vmem:[#allocation29_spill] sm:$0xff] }
 0x7a2   :  { %v12832_v44 = vadd.f32 %v4443_v28, %v4355_v58  ;;  %4822 = vmatpush.bf16.msrb.mxu0 %v7792_v38 }
 0x7a3   :  { %v5352_v8 = vadd.f32 %v5351_v27, %v12803_v25  ;;  %v5632_v28 = vadd.f32 %v5631_v0, %v5526_v46  ;;  %v5538_v46 = vmul.f32 %v12839_v34, %v12839_v34  ;;  %v5146_v27 = vadd.f32 %v12727_v57, %v12641_v29 }
 0x7a4   :  { %17646 = vst [vmem:[#allocation299_spill] sm:$0xff] %v12832_v44  ;;  %v5150_v29 = vadd.f32 %v12727_v57, %v12651_v61 }
 0x7a5   :  { %v4356_v58 = vpop.f32.mrf.mxu2  ;;  %v5353_v55 = vadd.f32 %v5352_v8, %v12815_v24  ;;  %v5633_v38 = vadd.f32 %v5632_v28, %v5530_v42  ;;  %v5542_v42 = vmul.f32 %v12846_v23, %v12846_v23 }
 0x7a6   :  { %v4357_v60 = vadd.f32 %v4356_v58, %v17649_v7  ;;  %v4181_v2 = vpop.f32.mrf.mxu0  ;;  %v17653_v7 = vld [vmem:[#allocation292_spill] sm:$0xff] }
 0x7a7   :  { %v4182_v6 = vadd.f32 %v4181_v2, %v17650_v35  ;;  %v12853_v54 = vpop.f32.mrf.mxu1  ;;  %v5354_v20 = vadd.f32 %v5353_v55, %v12828_v47  ;;  %v5634_v58 = vadd.f32 %v5633_v38, %v5534_v52  ;;  %v12872_v2 = vmax.f32 %v5142_v3, 0.0  ;;  %v17655_v3 = vld [vmem:[#allocation386_spill] sm:$0xff] }
 0x7a8   :  { %v5546_v52 = vmul.f32 %v12857_v9, %v12857_v9  ;;  %v12879_v35 = vmax.f32 %v5146_v27, 0.0  ;;  %v5158_v27 = vadd.f32 %v12727_v57, %v12667_v32 }
 0x7a9   :  { %v12863_v0 = vadd.f32 %v12721_v45, %v4182_v6  ;;  %v4445_v8 = vpop.f32.mrf.mxu3  ;;  %4496 = vmatmul.bf16.gmra.mxu0 %v17651_v5  ;;  %v5355_v45 = vadd.f32 %v5354_v20, %v12839_v34  ;;  %v5635_v55 = vadd.f32 %v5634_v58, %v5538_v46  ;;  %v5550_v46 = vmul.f32 %v12872_v2, %v12872_v2  ;;  %v17656_v58 = vld [vmem:[#allocation307_spill] sm:$0xff] }
 0x7aa   :  { %v12868_v28 = vadd.f32 %v4445_v8, %v4357_v60  ;;  %4595 = vmatmul.bf16.gmra.mxu1 %v17653_v7  ;;  %4674 = vmatmul.bf16.gmra.mxu2 %v17654_v43  ;;  %v5154_v60 = vadd.f32 %v12727_v57, %v12657_v19  ;;  %v12888_v20 = vmax.f32 %v5150_v29, 0.0  ;;  %v17660_v43 = vld [vmem:[#allocation390_spill] sm:$0xff] }
 0x7ab   :  { %v5356_v38 = vadd.f32 %v5355_v45, %v12846_v23  ;;  %v5636_v8 = vadd.f32 %v5635_v55, %v5542_v42  ;;  %v5554_v55 = vmul.f32 %v12879_v35, %v12879_v35 }
 0x7ac   :  { %17652 = vst [vmem:[#allocation174_spill] sm:$0xff] %v12868_v28 }
 0x7ad   :  { %v4359_v6 = vpop.f32.mrf.mxu2  ;;  %v5357_v45 = vadd.f32 %v5356_v38, %v12857_v9  ;;  %v5637_v42 = vadd.f32 %v5636_v8, %v5546_v52  ;;  %v5558_v52 = vmul.f32 %v12888_v20, %v12888_v20  ;;  %v12910_v38 = vmax.f32 %v5158_v27, 0.0 }
 0x7ae   :  { %v4360_v7 = vadd.f32 %v4359_v6, %v17655_v3  ;;  %4763 = vmatmul.bf16.gmra.mxu3 %v17651_v5  ;;  %v4183_v61 = vpop.f32.mrf.mxu0  ;;  %v12898_v6 = vmax.f32 %v5154_v60, 0.0  ;;  %v5162_v3 = vadd.f32 %v12727_v57, %v12679_v16  ;;  %v5166_v60 = vadd.f32 %v12727_v57, %v12689_v1 }
 0x7af   :  { %v4184_v28 = vadd.f32 %v4183_v61, %v17656_v58  ;;  %v12893_v19 = vpop.f32.mrf.mxu1  ;;  %v5358_v32 = vadd.f32 %v5357_v45, %v12872_v2  ;;  %v5638_v58 = vadd.f32 %v5637_v42, %v5550_v46  ;;  %v17658_v45 = vld [vmem:[#allocation368_spill] sm:$0xff]  ;;  %v5566_v1 = vmul.f32 %v12910_v38, %v12910_v38 }
 0x7b1   :  { %v12903_v29 = vadd.f32 %v12742_v18, %v4184_v28  ;;  %v4448_v5 = vpop.f32.mrf.mxu3  ;;  %v5359_v8 = vadd.f32 %v5358_v32, %v12879_v35  ;;  %v5639_v16 = vadd.f32 %v5638_v58, %v5554_v55  ;;  %v5562_v18 = vmul.f32 %v12898_v6, %v12898_v6  ;;  %v17659_v55 = vld [vmem:[#allocation123_spill] sm:$0xff] }
 0x7b2   :  { %v12906_v61 = vadd.f32 %v4448_v5, %v4360_v7  ;;  %v12917_v28 = vmax.f32 %v5162_v3, 0.0  ;;  %v5170_v5 = vadd.f32 %v12727_v57, %v12697_v63  ;;  %v12925_v32 = vmax.f32 %v5166_v60, 0.0 }
 0x7b3   :  { %v5360_v46 = vadd.f32 %v5359_v8, %v12888_v20  ;;  %v5174_v63 = vadd.f32 %v12727_v57, %v12709_v39  ;;  %v17663_v39 = vld [vmem:[#allocation31_spill] sm:$0xff] }
 0x7b4   :  { %17657 = vst [vmem:[#allocation178_spill] sm:$0xff] %v12906_v61  ;;  %v5640_v61 = vadd.f32 %v5639_v16, %v5558_v52  ;;  %v5570_v52 = vmul.f32 %v12917_v28, %v12917_v28  ;;  %v12936_v16 = vmax.f32 %v5170_v5, 0.0 }
 0x7b5   :  { %v4361_v7 = vpop.f32.mrf.mxu2  ;;  %v5361_v3 = vadd.f32 %v5360_v46, %v12898_v6  ;;  %v5178_v46 = vadd.f32 %v12727_v57, %v12723_v13  ;;  %v12949_v5 = vmax.f32 %v5174_v63, 0.0 }
 0x7b6   :  { %v4362_v27 = vadd.f32 %v4361_v7, %v17658_v45  ;;  %v4186_v42 = vpop.f32.mrf.mxu0  ;;  %v5641_v8 = vadd.f32 %v5640_v61, %v5562_v18  ;;  %v17661_v45 = vld [vmem:[#allocation341_spill] sm:$0xff]  ;;  %v5574_v18 = vmul.f32 %v12925_v32, %v12925_v32 }
 0x7b7   :  { %v4187_v58 = vadd.f32 %v4186_v42, %v17659_v55  ;;  %v4561_v44 = vpop.f32.mrf.mxu1 }
 0x7b8   :  { %v12932_v25 = vadd.f32 %v4561_v44, %v17660_v43  ;;  %v17664_v44 = vld [vmem:[#allocation87_spill] sm:$0xff]  ;;  %v5362_v43 = vadd.f32 %v5361_v3, %v12910_v38  ;;  %v5642_v61 = vadd.f32 %v5641_v8, %v5566_v1  ;;  %v5186_v1 = vadd.f32 %v12727_v57, %v12786_v48  ;;  %v17665_v3 = vld [vmem:[#allocation388_spill] sm:$0xff]  ;;  %v17667_v48 = vld [vmem:[#allocation61_spill] sm:$0xff] }
 0x7b9   :  { %v4276_v60 = vadd.f32 %v12774_v40, %v4187_v58  ;;  %v4450_v7 = vpop.f32.mrf.mxu3  ;;  %4501 = vmatmul.bf16.gmra.mxu0 %v17661_v45  ;;  %v5182_v40 = vadd.f32 %v12727_v57, %v12748_v33 }
 0x7ba   :  { %v12942_v42 = vadd.f32 %v4450_v7, %v4362_v27  ;;  %4600 = vmatmul.bf16.gmra.mxu1 %v17663_v39  ;;  %4679 = vmatmul.bf16.gmra.mxu2 %v17664_v44  ;;  %v5363_v55 = vadd.f32 %v5362_v43, %v12917_v28  ;;  %v5643_v13 = vadd.f32 %v5642_v61, %v5570_v52  ;;  %v12956_v7 = vmax.f32 %v5178_v46, 0.0 }
 0x7bb   :  { %v5578_v27 = vmul.f32 %v12936_v16, %v12936_v16  ;;  %v5582_v61 = vmul.f32 %v12949_v5, %v12949_v5  ;;  %v12966_v44 = vmax.f32 %v5182_v40, 0.0  ;;  %v5190_v46 = vadd.f32 %v12727_v57, %v12822_v17 }
 0x7bc   :  { %17662 = vst [vmem:[#allocation328_spill] sm:$0xff] %v12942_v42  ;;  %v5364_v39 = vadd.f32 %v5363_v55, %v12925_v32  ;;  %v5644_v33 = vadd.f32 %v5643_v13, %v5574_v18  ;;  %v17666_v42 = vld [vmem:[#allocation256_spill] sm:$0xff]  ;;  %v12977_v13 = vmax.f32 %v5186_v1, 0.0  ;;  %v5194_v40 = vadd.f32 %v12727_v57, %v12863_v0 }
 0x7bd   :  { %v4364_v58 = vpop.f32.mrf.mxu2 }
 0x7be   :  { %v4365_v8 = vadd.f32 %v4364_v58, %v17665_v3  ;;  %4768 = vmatmul.bf16.gmra.mxu3 %v17661_v45  ;;  %v4188_v63 = vpop.f32.mrf.mxu0  ;;  %v5365_v58 = vadd.f32 %v5364_v39, %v12936_v16  ;;  %v5645_v3 = vadd.f32 %v5644_v33, %v5578_v27  ;;  %v5590_v39 = vmul.f32 %v12966_v44, %v12966_v44 }
 0x7bf   :  { %v4189_v43 = vadd.f32 %v4188_v63, %v17666_v42  ;;  %v4563_v52 = vpop.f32.mrf.mxu1  ;;  %v5586_v42 = vmul.f32 %v12956_v7, %v12956_v7  ;;  %v12986_v27 = vmax.f32 %v5190_v46, 0.0  ;;  %v5198_v33 = vadd.f32 %v12727_v57, %v12903_v29 }
 0x7c0   :  { %v12971_v41 = vadd.f32 %v4563_v52, %v17667_v48  ;;  %v5366_v17 = vadd.f32 %v5365_v58, %v12949_v5  ;;  %v5646_v52 = vadd.f32 %v5645_v3, %v5582_v61  ;;  %v5594_v0 = vmul.f32 %v12977_v13, %v12977_v13  ;;  %v17669_v48 = vld [vmem:[#allocation41_spill] sm:$0xff] }
 0x7c1   :  { %v4278_v55 = vadd.f32 %v12811_v59, %v4189_v43  ;;  %v4453_v18 = vpop.f32.mrf.mxu3  ;;  %v5202_v46 = vadd.f32 %v12727_v57, %v4276_v60  ;;  %v5598_v29 = vmul.f32 %v12986_v27, %v12986_v27  ;;  %v13005_v30 = vmax.f32 %v5198_v33, 0.0  ;;  %v17672_v60 = vld [vmem:[#allocation343_spill] sm:$0xff] }
 0x7c2   :  { %v12981_v63 = vadd.f32 %v4453_v18, %v4365_v8  ;;  %v5367_v59 = vadd.f32 %v5366_v17, %v12956_v7  ;;  %v5647_v43 = vadd.f32 %v5646_v52, %v5586_v42  ;;  %v12993_v8 = vmax.f32 %v5194_v40, 0.0  ;;  %v17670_v18 = vld [vmem:[#allocation356_spill] sm:$0xff]  ;;  %v17671_v42 = vld [vmem:[#allocation391_spill] sm:$0xff] }
 0x7c4   :  { %17668 = vst [vmem:[#allocation22_spill] sm:$0xff] %v12981_v63  ;;  %v5368_v3 = vadd.f32 %v5367_v59, %v12966_v44  ;;  %v5648_v63 = vadd.f32 %v5647_v43, %v5590_v39  ;;  %v5602_v39 = vmul.f32 %v12993_v8, %v12993_v8 }
 0x7c5   :  { %v4366_v1 = vpop.f32.mrf.mxu2 }
 0x7c6   :  { %v4367_v58 = vadd.f32 %v4366_v1, %v17669_v48  ;;  %v4191_v61 = vpop.f32.mrf.mxu0  ;;  %v5369_v40 = vadd.f32 %v5368_v3, %v12977_v13  ;;  %v5206_v1 = vadd.f32 %v12727_v57, %v4278_v55  ;;  %v13017_v3 = vmax.f32 %v5202_v46, 0.0 }
 0x7c7   :  { %v4192_v45 = vadd.f32 %v4191_v61, %v17670_v18  ;;  %v4566_v17 = vpop.f32.mrf.mxu1  ;;  %v5649_v61 = vadd.f32 %v5648_v63, %v5594_v0  ;;  %v17674_v18 = vld [vmem:[#allocation224_spill] sm:$0xff]  ;;  %v5606_v63 = vmul.f32 %v13005_v30, %v13005_v30 }
 0x7c8   :  { %v13002_v52 = vadd.f32 %v4566_v17, %v17671_v42  ;;  %v17675_v17 = vld [vmem:[#allocation188_spill] sm:$0xff]  ;;  %v5370_v33 = vadd.f32 %v5369_v40, %v12986_v27  ;;  %v13023_v0 = vmax.f32 %v5206_v1, 0.0  ;;  %v5610_v40 = vmul.f32 %v13017_v3, %v13017_v3 }
 0x7c9   :  { %v4281_v59 = vadd.f32 %v12853_v54, %v4192_v45  ;;  %v4455_v48 = vpop.f32.mrf.mxu3  ;;  %4506 = vmatmul.bf16.gmra.mxu0 %v17672_v60  ;;  %v5650_v54 = vadd.f32 %v5649_v61, %v5598_v29 }
 0x7ca   :  { %v13012_v43 = vadd.f32 %v4455_v48, %v4367_v58  ;;  %4605 = vmatmul.bf16.gmra.mxu1 %v17674_v18  ;;  %4684 = vmatmul.bf16.gmra.mxu2 %v17675_v17  ;;  %v5371_v45 = vadd.f32 %v5370_v33, %v12993_v8  ;;  %v17676_v48 = vld [vmem:[#allocation372_spill] sm:$0xff]  ;;  %v17678_v17 = vld [vmem:[#allocation342_spill] sm:$0xff] }
 0x7cb   :  { %v5210_v55 = vadd.f32 %v12727_v57, %v4281_v59  ;;  %v5651_v42 = vadd.f32 %v5650_v54, %v5602_v39  ;;  %v17677_v59 = vld [vmem:[#allocation349_spill] sm:$0xff]  ;;  %v5614_v54 = vmul.f32 %v13023_v0, %v13023_v0 }
 0x7cc   :  { %17673 = vst [vmem:[#allocation25_spill] sm:$0xff] %v13012_v43  ;;  %v5372_v46 = vadd.f32 %v5371_v45, %v13005_v30 }
 0x7cd   :  { %v4369_v58 = vpop.f32.mrf.mxu2  ;;  %v13030_v29 = vmax.f32 %v5210_v55, 0.0  ;;  %v5652_v15 = vadd.f32 %v5651_v42, %v5606_v63 }
 0x7ce   :  { %v4370_v18 = vadd.f32 %v4369_v58, %v17676_v48  ;;  %4773 = vmatmul.bf16.gmra.mxu3 %v17672_v60  ;;  %v4193_v43 = vpop.f32.mrf.mxu0  ;;  %v5373_v39 = vadd.f32 %v5372_v46, %v13017_v3 }
 0x7cf   :  { %v4194_v61 = vadd.f32 %v4193_v43, %v17677_v59  ;;  %v4568_v33 = vpop.f32.mrf.mxu1  ;;  %v5653_v60 = vadd.f32 %v5652_v15, %v5610_v40  ;;  %v5618_v43 = vmul.f32 %v13030_v29, %v13030_v29  ;;  %v17681_v40 = vld [vmem:[#allocation308_spill] sm:$0xff] }
 0x7d0   :  { %v13034_v1 = vadd.f32 %v4568_v33, %v17678_v17  ;;  %v5374_v55 = vadd.f32 %v5373_v39, %v13023_v0  ;;  %v17680_v33 = vld [vmem:[#allocation336_spill] sm:$0xff] }
 0x7d1   :  { %v4283_v58 = vadd.f32 %v12893_v19, %v4194_v61  ;;  %v4458_v45 = vpop.f32.mrf.mxu3  ;;  %v5654_v59 = vadd.f32 %v5653_v60, %v5614_v54 }
 0x7d2   :  { %v13040_v48 = vadd.f32 %v4458_v45, %v4370_v18  ;;  %v5375_v63 = vadd.f32 %v5374_v55, %v13030_v29 }
 0x7d3   :  { %v5214_v17 = vadd.f32 %v12727_v57, %v4283_v58  ;;  %v5655_v61 = vadd.f32 %v5654_v59, %v5618_v43  ;;  %v17683_v57 = vld [vmem:[#allocation393_spill] sm:$0xff]  ;;  %v17686_v43 = vld [vmem:[#allocation39_spill] sm:$0xff]  ;;  %v17687_v59 = vld [vmem:[#allocation312_spill] sm:$0xff] }
 0x7d4   :  { %17679 = vst [vmem:[#allocation107_spill] sm:$0xff] %v13040_v48 }
 0x7d5   :  { %v13047_v42 = vmax.f32 %v5214_v17, 0.0  ;;  %v4371_v46 = vpop.f32.mrf.mxu2  ;;  %v17684_v17 = vld [vmem:[#allocation346_spill] sm:$0xff] }
 0x7d6   :  { %v4372_v11 = vadd.f32 %v4371_v46, %v17680_v33  ;;  %v4472_v19 = vpop.f32.mrf.mxu0 }
 0x7d7   :  { %v5376_v18 = vadd.f32 %v5375_v63, %v13047_v42  ;;  %v5622_v15 = vmul.f32 %v13047_v42, %v13047_v42  ;;  %v13054_v39 = vadd.f32 %v4472_v19, %v17681_v40  ;;  %v4571_v45 = vpop.f32.mrf.mxu1 }
 0x7d8   :  { %v13057_v60 = vadd.f32 %v4571_v45, %v17683_v57  ;;  %v17688_v57 = vld [vmem:[#allocation244_spill] sm:$0xff] }
 0x7d9   :  { %17682 = vst [vmem:[#allocation109_spill] sm:$0xff] %v13054_v39  ;;  %v5377_v54 = vrot.slane %v5376_v18, 4  ;;  %v5656_v58 = vadd.f32 %v5655_v61, %v5622_v15  ;;  %v4460_v55 = vpop.f32.mrf.mxu3  ;;  %4511 = vmatmul.bf16.gmra.mxu0 %v17684_v17 }
 0x7da   :  { %v13060_v46 = vadd.f32 %v4460_v55, %v4372_v11  ;;  %4610 = vmatmul.bf16.gmra.mxu1 %v17686_v43  ;;  %4689 = vmatmul.bf16.gmra.mxu2 %v17687_v59  ;;  %v17690_v55 = vld [vmem:[#allocation309_spill] sm:$0xff] }
 0x7db   :  { %v5378_v63 = vadd.f32 %v5377_v54, %v5376_v18  ;;  %v5657_v33 = vrot.slane %v5656_v58, 4 }
 0x7dc   :  { %17685 = vst [vmem:[#allocation366_spill] sm:$0xff] %v13060_v46 }
 0x7dd   :  { %v5379_v48 = vrot.slane %v5378_v63, 2  ;;  %v5658_v19 = vadd.f32 %v5657_v33, %v5656_v58  ;;  %v4650_v40 = vpop.f32.mrf.mxu2 }
 0x7de   :  { %v4651_v39 = vadd.f32 %v4650_v40, %v12932_v25  ;;  %4778 = vmatmul.bf16.gmra.mxu3 %v17684_v17  ;;  %v4474_v45 = vpop.f32.mrf.mxu0 }
 0x7df   :  { %v5380_v61 = vadd.f32 %v5379_v48, %v5378_v63  ;;  %v5659_v15 = vrot.slane %v5658_v19, 2  ;;  %v13067_v12 = vadd.f32 %v4474_v45, %v17688_v57  ;;  %v4573_v11 = vpop.f32.mrf.mxu1 }
 0x7e0   :  { %v13070_v43 = vadd.f32 %v4573_v11, %v17690_v55  ;;  %v17692_v11 = vld [vmem:[#allocation248_spill] sm:$0xff] }
 0x7e1   :  { %17689 = vst [vmem:[#allocation367_spill] sm:$0xff] %v13067_v12  ;;  %v5381_v46 = vrot.slane %v5380_v61, 1  ;;  %v5660_v18 = vadd.f32 %v5659_v15, %v5658_v19  ;;  %v4739_v54 = vpop.f32.mrf.mxu3  ;;  %v17694_v15 = vld [vmem:[#allocation347_spill] sm:$0xff]  ;;  %v17703_v12 = vld [vmem:[#allocation209_spill] sm:$0xff] }
 0x7e2   :  { %v13072_v59 = vadd.f32 %v4739_v54, %v4651_v39  ;;  %v17695_v54 = vld [vmem:[#allocation252_spill] sm:$0xff] }
 0x7e3   :  { %v5382_v58 = vadd.f32 %v5381_v46, %v5380_v61  ;;  %v5661_v33 = vrot.slane %v5660_v18, 1 }
 0x7e4   :  { %17691 = vst [vmem:[#allocation28_spill] sm:$0xff] %v13072_v59 }
 0x7e5   :  { %v13074_v25 = vmul.f32 0.00390625, %v5382_v58  ;;  %v5662_v40 = vadd.f32 %v5661_v33, %v5660_v18  ;;  %v4652_v17 = vpop.f32.mrf.mxu2  ;;  %v17697_v58 = vld [vmem:[#allocation78_spill] sm:$0xff]  ;;  %v17699_v33 = vld [vmem:[#allocation273_spill] sm:$0xff] }
 0x7e6   :  { %v4653_v48 = vadd.f32 %v4652_v17, %v12971_v41  ;;  %v4477_v63 = vpop.f32.mrf.mxu0  ;;  %v17698_v41 = vld [vmem:[#allocation350_spill] sm:$0xff] }
 0x7e7   :  { %v5774_v45 = vmul.f32 0.00390625, %v5662_v40  ;;  %v5778_v57 = vmul.f32 %v13074_v25, %v13074_v25  ;;  %v13080_v55 = vadd.f32 %v4477_v63, %v17692_v11  ;;  %v4576_v19 = vpop.f32.mrf.mxu1  ;;  %v17700_v40 = vld [vmem:[#allocation269_spill] sm:$0xff] }
 0x7e8   :  { %v13083_v39 = vadd.f32 %v4576_v19, %v17694_v15  ;;  %v8032_v59 = vor.u32 %v17700_v40, %v17699_v33  ;;  %v17701_v63 = vld [vmem:[#allocation145_spill] sm:$0xff] }
 0x7e9   :  { %17693 = vst [vmem:[#allocation32_spill] sm:$0xff] %v13080_v55  ;;  %v5782_v46 = vsub.f32 %v5774_v45, %v5778_v57  ;;  %v4741_v61 = vpop.f32.mrf.mxu3  ;;  %4516 = vmatmul.bf16.gmra.mxu0 %v17695_v54  ;;  %v17702_v11 = vld [vmem:[#allocation141_spill] sm:$0xff] }
 0x7ea   :  { %v13086_v18 = vadd.f32 %v4741_v61, %v4653_v48  ;;  %4615 = vmatmul.bf16.gmra.mxu1 %v17697_v58  ;;  %4694 = vmatmul.bf16.gmra.mxu2 %v17698_v41  ;;  %v7776_v55 = vor.u32 %v17702_v11, %v17701_v63  ;;  %v17704_v19 = vld [vmem:[#allocation205_spill] sm:$0xff] }
 0x7eb   :  { %v5786_v17 = vmax.f32 %v5782_v46, 0.0  ;;  %v7904_v15 = vor.u32 %v17704_v19, %v17703_v12  ;;  %5001 = vmatpush.bf16.msrb.mxu2 %v8032_v59  ;;  %v17705_v48 = vld [vmem:[#allocation265_spill] sm:$0xff]  ;;  %v17711_v12 = vld [vmem:[#allocation311_spill] sm:$0xff] }
 0x7ec   :  { %17696 = vst [vmem:[#allocation327_spill] sm:$0xff] %v13086_v18  ;;  %4823 = vmatpush.bf16.msrb.mxu0 %v7776_v55  ;;  %v17706_v61 = vld [vmem:[#allocation261_spill] sm:$0xff] }
 0x7ed   :  { %v5790_v45 = vadd.f32 1e-05, %v5786_v17  ;;  %v4655_v57 = vpop.f32.mrf.mxu2  ;;  %v8016_v18 = vor.u32 %v17706_v61, %v17705_v48  ;;  %v17707_v58 = vld [vmem:[#allocation137_spill] sm:$0xff]  ;;  %4912 = vmatpush.bf16.msrb.mxu1 %v7904_v15  ;;  %v17712_v17 = vld [vmem:[#allocation348_spill] sm:$0xff] }
 0x7ee   :  { %v7760_v41 = vor.u32 %v17708_v62, %v17707_v58  ;;  %v4656_v46 = vadd.f32 %v4655_v57, %v13002_v52  ;;  %4783 = vmatmul.bf16.gmra.mxu3 %v17695_v54  ;;  %v4479_v33 = vpop.f32.mrf.mxu0  ;;  %v17709_v40 = vld [vmem:[#allocation201_spill] sm:$0xff]  ;;  %v17716_v54 = vld [vmem:[#allocation172_spill] sm:$0xff] }
 0x7ef   :  { %v17710_v63 = vld [vmem:[#allocation197_spill] sm:$0xff]  ;;  %8512 = vrsqrt.f32 %v5790_v45  ;;  %v13105_v59 = vadd.f32 %v4479_v33, %v17711_v12  ;;  %v4578_v55 = vpop.f32.mrf.mxu1  ;;  %5002 = vmatpush.bf16.msrb.mxu2 %v8016_v18  ;;  %vm5800_vm2 = vweird.f32 %v5790_v45 }
 0x7f0   :  { %v7888_v11 = vor.u32 %v17710_v63, %v17709_v40  ;;  %v13108_v19 = vadd.f32 %v4578_v55, %v17712_v17  ;;  %4824 = vmatpush.bf16.msrb.mxu0 %v7760_v41  ;;  %v17714_v40 = vld [vmem:[#allocation115_spill] sm:$0xff]  ;;  %v17717_v18 = vld [vmem:[#allocation357_spill] sm:$0xff] }
 0x7f1   :  { %v4744_v48 = vpop.f32.mrf.mxu3 }
 0x7f2   :  { %v13110_v62 = vadd.f32 %v4744_v48, %v4656_v46  ;;  %4913 = vmatpush.bf16.msrb.mxu1 %v7888_v11  ;;  %v17719_v11 = vld [vmem:[#allocation212_spill] sm:$0xff]  ;;  %v17720_v48 = vld [vmem:[#allocation26_spill] sm:$0xff] }
 0x7f4   :  { %17713 = vst [vmem:[#allocation230_spill] sm:$0xff] %v13110_v62 }
 0x7f5   :  { %v8513_v52 = vpop.eup %8512  ;;  %v4657_v58 = vpop.f32.mrf.mxu2 }
 0x7f6   :  { %v5795_v15 = vmul.f32 %v8513_v52, %v5790_v45  ;;  %v4658_v57 = vadd.f32 %v4657_v58, %v13034_v1  ;;  %v4482_v61 = vpop.f32.mrf.mxu0  ;;  %vm5801_vm1 = vweird.f32 %v8513_v52  ;;  %v17724_v45 = vld [vmem:[#allocation257_spill] sm:$0xff] }
 0x7f7   :  { %v13114_v63 = vadd.f32 %v4482_v61, %v17714_v40  ;;  %v4581_v33 = vpop.f32.mrf.mxu1  ;;  %vm5802_vm3 = vmor %vm5800_vm2, %vm5801_vm1  ;;  %v17721_v40 = vld [vmem:[#allocation239_spill] sm:$0xff] }
 0x7f8   :  { %v5796_v12 = vmul.f32 %v8513_v52, %v5795_v15  ;;  %v13117_v55 = vadd.f32 %v4581_v33, %v17716_v54 }
 0x7f9   :  { %17715 = vst [vmem:[#allocation234_spill] sm:$0xff] %v13114_v63  ;;  %v4746_v17 = vpop.f32.mrf.mxu3  ;;  %4521 = vmatmul.bf16.gmra.mxu0 %v17717_v18 }
 0x7fa   :  { %v5797_v41 = vmul.f32 0.5, %v5796_v12  ;;  %v13120_v46 = vadd.f32 %v4746_v17, %v4658_v57  ;;  %4620 = vmatmul.bf16.gmra.mxu1 %v17719_v11  ;;  %4699 = vmatmul.bf16.gmra.mxu2 %v17720_v48  ;;  %v17723_v17 = vld [vmem:[#allocation176_spill] sm:$0xff] }
 0x7fc   :  { %17718 = vst [vmem:[#allocation295_spill] sm:$0xff] %v13120_v46  ;;  %v5798_v1 = vsub.f32 1.5, %v5797_v41 }
 0x7fd   :  { %v4660_v58 = vpop.f32.mrf.mxu2 }
 0x7fe   :  { %v5799_v61 = vmul.f32 %v8513_v52, %v5798_v1  ;;  %v4661_v15 = vadd.f32 %v4660_v58, %v13057_v60  ;;  %4788 = vmatmul.bf16.gmra.mxu3 %v17717_v18  ;;  %v4484_v54 = vpop.f32.mrf.mxu0  ;;  %v17725_v1 = vld [vmem:[#allocation253_spill] sm:$0xff] }
 0x7ff   :  { %v13127_v33 = vadd.f32 %v4484_v54, %v17721_v40  ;;  %v4583_v57 = vpop.f32.mrf.mxu1  ;;  %v8000_v60 = vor.u32 %v17725_v1, %v17724_v45  ;;  %v17726_v58 = vld [vmem:[#allocation129_spill] sm:$0xff]  ;;  %v17731_v45 = vld [vmem:[#allocation310_spill] sm:$0xff] }
 0x800   :  { %v5803_v12 = vsel %vm5802_vm3, %v8513_v52, %v5799_v61  ;;  %v13130_v11 = vadd.f32 %v4583_v57, %v17723_v17  ;;  %v17727_v18 = vld [vmem:[#allocation125_spill] sm:$0xff] }
 0x801   :  { %17722 = vst [vmem:[#allocation291_spill] sm:$0xff] %v13127_v33  ;;  %v5834_v41 = vmul.f32 %v5803_v12, %v17618_v36  ;;  %v4749_v48 = vpop.f32.mrf.mxu3  ;;  %v7744_v63 = vor.u32 %v17727_v18, %v17726_v58  ;;  %v17728_v54 = vld [vmem:[#allocation193_spill] sm:$0xff]  ;;  %5003 = vmatpush.bf16.msrb.mxu2 %v8000_v60  ;;  %v17732_v58 = vld [vmem:[#allocation358_spill] sm:$0xff] }
 0x802   :  { %v13133_v46 = vadd.f32 %v4749_v48, %v4661_v15  ;;  %v17729_v40 = vld [vmem:[#allocation189_spill] sm:$0xff]  ;;  %v17730_v15 = vld [vmem:[#allocation235_spill] sm:$0xff] }
 0x803   :  { %v5838_v62 = vmul.f32 %v5834_v41, %v13074_v25  ;;  %v7872_v33 = vor.u32 %v17729_v40, %v17728_v54  ;;  %4825 = vmatpush.bf16.msrb.mxu0 %v7744_v63 }
 0x805   :  { %v5846_v52 = vrot.slane %v5838_v62, 7  ;;  %v4662_v61 = vpop.f32.mrf.mxu2  ;;  %4914 = vmatpush.bf16.msrb.mxu1 %v7872_v33  ;;  %v17733_v62 = vld [vmem:[#allocation180_spill] sm:$0xff] }
 0x806   :  { %v4663_v57 = vadd.f32 %v4662_v61, %v13070_v43  ;;  %v4487_v48 = vpop.f32.mrf.mxu0  ;;  %v13155_v43 = vperm.slane %v5834_v41, 1 }
 0x807   :  { %v13144_v12 = vadd.f32 %v4487_v48, %v17730_v15  ;;  %v4586_v17 = vpop.f32.mrf.mxu1  ;;  %v5854_v25 = vsub.f32 %v17618_v36, %v5846_v52  ;;  %v17734_v52 = vld [vmem:[#allocation223_spill] sm:$0xff]  ;;  %v17735_v15 = vld [vmem:[#allocation164_spill] sm:$0xff] }
 0x808   :  { %v13147_v1 = vadd.f32 %v4586_v17, %v17731_v45  ;;  %v5898_v41 = vmul.f32 %v13155_v43, %v12828_v47  ;;  %v5910_v47 = vmul.f32 %v13155_v43, %v12857_v9 }
 0x809   :  { %v4751_v18 = vpop.f32.mrf.mxu3  ;;  %4526 = vmatmul.bf16.gmra.mxu0 %v17732_v58  ;;  %v13157_v63 = vperm.slane %v5854_v25, 2 }
 0x80a   :  { %v13151_v60 = vadd.f32 %v4751_v18, %v4663_v57  ;;  %4625 = vmatmul.bf16.gmra.mxu1 %v17569_v51  ;;  %4704 = vmatmul.bf16.gmra.mxu2 %v17733_v62  ;;  %v5894_v57 = vmul.f32 %v13155_v43, %v12815_v24  ;;  %v5906_v24 = vmul.f32 %v13155_v43, %v12846_v23  ;;  %v17805_v62 = vld [vmem:[#allocation124_spill] sm:$0xff] }
 0x80b   :  { %v13198_v23 = vadd.f32 %v13157_v63, %v5910_v47  ;;  %v5922_v47 = vmul.f32 %v13155_v43, %v12888_v20  ;;  %v5930_v20 = vmul.f32 %v13155_v43, %v12910_v38  ;;  %v5938_v38 = vmul.f32 %v13155_v43, %v12925_v32 }
 0x80c   :  { %v13172_v25 = vadd.f32 %v13157_v63, %v5894_v57  ;;  %v17737_v57 = vld [vmem:[#allocation185_spill] sm:$0xff] }
 0x80d   :  { %v4665_v33 = vpop.f32.mrf.mxu2  ;;  %17739 = vst [vmem:[#allocation170_spill] sm:$0xff] %v13198_v23 }
 0x80e   :  { %v4666_v54 = vadd.f32 %v4665_v33, %v13083_v39  ;;  %4793 = vmatmul.bf16.gmra.mxu3 %v17732_v58  ;;  %v4489_v40 = vpop.f32.mrf.mxu0  ;;  %v5902_v39 = vmul.f32 %v13155_v43, %v12839_v34  ;;  %v13179_v33 = vadd.f32 %v13157_v63, %v5898_v41  ;;  %v5914_v34 = vmul.f32 %v13155_v43, %v12872_v2 }
 0x80f   :  { %v13162_v61 = vadd.f32 %v4489_v40, %v17734_v52  ;;  %v4588_v48 = vpop.f32.mrf.mxu1 }
 0x810   :  { %v13167_v17 = vadd.f32 %v4588_v48, %v17735_v15  ;;  %v13184_v40 = vadd.f32 %v13157_v63, %v5902_v39  ;;  %v13191_v48 = vadd.f32 %v13157_v63, %v5906_v24  ;;  %v17738_v15 = vld [vmem:[#allocation181_spill] sm:$0xff]  ;;  %v13206_v52 = vadd.f32 %v13157_v63, %v5914_v34  ;;  %v17743_v34 = vld [vmem:[#allocation359_spill] sm:$0xff] }
 0x811   :  { %v4754_v45 = vpop.f32.mrf.mxu3  ;;  %v7856_v41 = vor.u32 %v17738_v15, %v17737_v57 }
 0x812   :  { %v13176_v18 = vadd.f32 %v4754_v45, %v4666_v54  ;;  %17736 = vst [vmem:[#allocation166_spill] sm:$0xff] %v13184_v40  ;;  %v5918_v45 = vmul.f32 %v13155_v43, %v12879_v35  ;;  %v17742_v35 = vld [vmem:[#allocation168_spill] sm:$0xff] }
 0x813   :  { %17740 = vst [vmem:[#allocation9_spill] sm:$0xff] %v13206_v52  ;;  %4915 = vmatpush.bf16.msrb.mxu1 %v7856_v41  ;;  %v5926_v41 = vmul.f32 %v13155_v43, %v12898_v6  ;;  %v13241_v6 = vadd.f32 %v13157_v63, %v5930_v20  ;;  %v5946_v20 = vmul.f32 %v13155_v43, %v12949_v5 }
 0x814   :  { %v13214_v57 = vadd.f32 %v13157_v63, %v5918_v45  ;;  %v5950_v5 = vmul.f32 %v13155_v43, %v12956_v7 }
 0x815   :  { %v4667_v54 = vpop.f32.mrf.mxu2  ;;  %17747 = vst [vmem:[#allocation370_spill] sm:$0xff] %v13241_v6  ;;  %v17812_v6 = vld [vmem:[#allocation32_spill] sm:$0xff] }
 0x816   :  { %v4668_v9 = vadd.f32 %v4667_v54, %v13108_v19  ;;  %v4492_v39 = vpop.f32.mrf.mxu0  ;;  %17741 = vst [vmem:[#allocation36_spill] sm:$0xff] %v13214_v57 }
 0x817   :  { %v13209_v2 = vadd.f32 %v4492_v39, %v12564_v53  ;;  %v4591_v36 = vpop.f32.mrf.mxu1  ;;  %v13223_v53 = vadd.f32 %v13157_v63, %v5922_v47  ;;  %v5934_v39 = vmul.f32 %v13155_v43, %v12917_v28  ;;  %v13238_v47 = vadd.f32 %v13157_v63, %v5926_v41  ;;  %v8462_v28 = vld [vmem:[%s16018_s3 + $0x38] sm:$0xff] }
 0x818   :  { %v13217_v19 = vadd.f32 %v4591_v36, %v17742_v35  ;;  %v17745_v36 = vld [vmem:[#allocation231_spill] sm:$0xff]  ;;  %6443 = vmatpush.bf16.msrb.mxu3 %v8462_v28  ;;  %v13269_v41 = vadd.f32 %v13157_v63, %v5946_v20  ;;  %v5954_v28 = vmul.f32 %v13155_v43, %v12966_v44  ;;  %v13286_v20 = vadd.f32 %v13157_v63, %v5950_v5 }
 0x819   :  { %v4756_v15 = vpop.f32.mrf.mxu3  ;;  %4531 = vmatmul.bf16.gmra.mxu0 %v17743_v34  ;;  %17744 = vst [vmem:[#allocation40_spill] sm:$0xff] %v13223_v53  ;;  %v5962_v44 = vmul.f32 %v13155_v43, %v12986_v27 }
 0x81a   :  { %v13229_v45 = vadd.f32 %v4756_v15, %v4668_v9  ;;  %4630 = vmatmul.bf16.gmra.mxu1 %v12095_v50  ;;  %4709 = vmatmul.bf16.gmra.mxu2 %v17745_v36  ;;  %17746 = vst [vmem:[#allocation369_spill] sm:$0xff] %v13238_v47  ;;  %v13246_v9 = vadd.f32 %v13157_v63, %v5934_v39 }
 0x81b   :  { %v5942_v15 = vmul.f32 %v13155_v43, %v12936_v16  ;;  %v13260_v39 = vadd.f32 %v13157_v63, %v5938_v38  ;;  %17751 = vst [vmem:[#allocation222_spill] sm:$0xff] %v13269_v41  ;;  %v17756_v38 = vld [vmem:[#allocation121_spill] sm:$0xff]  ;;  %v13295_v36 = vadd.f32 %v13157_v63, %v5954_v28  ;;  %v17796_v41 = vld [vmem:[#allocation175_spill] sm:$0xff] }
 0x81c   :  { %17748 = vst [vmem:[#allocation44_spill] sm:$0xff] %v13246_v9 }
 0x81d   :  { %v4670_v54 = vpop.f32.mrf.mxu2  ;;  %17749 = vst [vmem:[#allocation48_spill] sm:$0xff] %v13260_v39  ;;  %v13263_v16 = vadd.f32 %v13157_v63, %v5942_v15  ;;  %v5958_v15 = vmul.f32 %v13155_v43, %v12977_v13  ;;  %v5970_v13 = vmul.f32 %v13155_v43, %v13005_v30  ;;  %v5974_v30 = vmul.f32 %v13155_v43, %v13017_v3  ;;  %v17798_v39 = vld [vmem:[#allocation179_spill] sm:$0xff] }
 0x81e   :  { %v4671_v35 = vadd.f32 %v4670_v54, %v13117_v55  ;;  %4798 = vmatmul.bf16.gmra.mxu3 %v17743_v34  ;;  %v4494_v32 = vpop.f32.mrf.mxu0  ;;  %v17752_v55 = vld [vmem:[#allocation156_spill] sm:$0xff]  ;;  %17753 = vst [vmem:[#allocation226_spill] sm:$0xff] %v13286_v20  ;;  %v17757_v34 = vld [vmem:[#allocation117_spill] sm:$0xff] }
 0x81f   :  { %17750 = vst [vmem:[#allocation371_spill] sm:$0xff] %v13263_v16  ;;  %v13266_v24 = vadd.f32 %v4494_v32, %v12586_v26  ;;  %v4593_v50 = vpop.f32.mrf.mxu1  ;;  %v8461_v26 = vld [vmem:[%s16018_s3 + $0x30] sm:$0xff]  ;;  %v17755_v32 = vld [vmem:[#allocation245_spill] sm:$0xff]  ;;  %v7728_v58 = vor.u32 %v17757_v34, %v17756_v38  ;;  %v8460_v34 = vld [vmem:[%s16018_s3 + $0x28] sm:$0xff]  ;;  %v13309_v38 = vadd.f32 %v13157_v63, %v5958_v15  ;;  %v13324_v15 = vadd.f32 %v13157_v63, %v5970_v13 }
 0x820   :  { %v13274_v54 = vadd.f32 %v4593_v50, %v17752_v55  ;;  %v17754_v50 = vld [vmem:[#allocation249_spill] sm:$0xff]  ;;  %6444 = vmatpush.bf16.msrb.mxu3 %v8461_v26  ;;  %17758 = vst [vmem:[#allocation287_spill] sm:$0xff] %v13295_v36  ;;  %v13315_v26 = vadd.f32 %v13157_v63, %v5962_v44  ;;  %v13342_v3 = vadd.f32 %v13157_v63, %v5974_v30 }
 0x821   :  { %v4759_v51 = vpop.f32.mrf.mxu3  ;;  %v7984_v55 = vor.u32 %v17755_v32, %v17754_v50  ;;  %4826 = vmatpush.bf16.msrb.mxu0 %v7728_v58  ;;  %17759 = vst [vmem:[#allocation283_spill] sm:$0xff] %v13309_v38  ;;  %v17763_v32 = vld [vmem:[#allocation160_spill] sm:$0xff] }
 0x822   :  { %v13288_v7 = vadd.f32 %v4759_v51, %v4671_v35  ;;  %v5966_v51 = vmul.f32 %v13155_v43, %v12993_v8  ;;  %17760 = vst [vmem:[#allocation158_spill] sm:$0xff] %v13315_v26  ;;  %v17783_v26 = vld [vmem:[#allocation152_spill] sm:$0xff] }
 0x823   :  { %5004 = vmatpush.bf16.msrb.mxu2 %v7984_v55  ;;  %17762 = vst [vmem:[#allocation361_spill] sm:$0xff] %v13324_v15  ;;  %v17769_v55 = vld [vmem:[#allocation148_spill] sm:$0xff]  ;;  %v17775_v15 = vld [vmem:[#allocation211_spill] sm:$0xff] }
 0x824   :  { %v13318_v8 = vadd.f32 %v13157_v63, %v5966_v51  ;;  %6445 = vmatpush.bf16.msrb.mxu3 %v8460_v34  ;;  %v17764_v51 = vld [vmem:[#allocation184_spill] sm:$0xff]  ;;  %v5978_v34 = vmul.f32 %v13155_v43, %v13023_v0  ;;  %17765 = vst [vmem:[#allocation49_spill] sm:$0xff] %v13342_v3 }
 0x825   :  { %v4672_v35 = vpop.f32.mrf.mxu2 }
 0x826   :  { %v4673_v58 = vadd.f32 %v4672_v35, %v13130_v11  ;;  %v4497_v27 = vpop.f32.mrf.mxu0  ;;  %17761 = vst [vmem:[#allocation162_spill] sm:$0xff] %v13318_v8 }
 0x827   :  { %v13321_v28 = vadd.f32 %v4497_v27, %v12602_v14  ;;  %v4596_v50 = vpop.f32.mrf.mxu1  ;;  %v8459_v14 = vld [vmem:[%s16018_s3 + $0x20] sm:$0xff]  ;;  %v5982_v27 = vmul.f32 %v13155_v43, %v13030_v29 }
 0x828   :  { %v13329_v11 = vadd.f32 %v4596_v50, %v17763_v32  ;;  %6446 = vmatpush.bf16.msrb.mxu3 %v8459_v14  ;;  %v13351_v50 = vadd.f32 %v13157_v63, %v5978_v34  ;;  %v5986_v32 = vmul.f32 %v13155_v43, %v13047_v42 }
 0x829   :  { %v4761_v44 = vpop.f32.mrf.mxu3  ;;  %4536 = vmatmul.bf16.gmra.mxu0 %v17764_v51  ;;  %v13356_v0 = vadd.f32 %v13157_v63, %v5982_v27 }
 0x82a   :  { %v13344_v13 = vadd.f32 %v4761_v44, %v4673_v58  ;;  %4635 = vmatmul.bf16.gmra.mxu1 %v12136_v49  ;;  %4714 = vmatmul.bf16.gmra.mxu2 %v12570_v21  ;;  %17766 = vst [vmem:[#allocation52_spill] sm:$0xff] %v13351_v50  ;;  %v8458_v58 = vld [vmem:[%s16018_s3 + $0x18] sm:$0xff]  ;;  %v13364_v29 = vadd.f32 %v13157_v63, %v5986_v32  ;;  %v8457_v32 = vld [vmem:[%s16018_s3 + $0x10] sm:$0xff] }
 0x82b   :  { %17767 = vst [vmem:[#allocation56_spill] sm:$0xff] %v13356_v0  ;;  %v17788_v21 = vld [vmem:[#allocation191_spill] sm:$0xff] }
 0x82c   :  { %17768 = vst [vmem:[#allocation363_spill] sm:$0xff] %v13364_v29  ;;  %6447 = vmatpush.bf16.msrb.mxu3 %v8458_v58  ;;  %v17771_v29 = vld [vmem:[#allocation227_spill] sm:$0xff] }
 0x82d   :  { %v4675_v30 = vpop.f32.mrf.mxu2 }
 0x82e   :  { %v4676_v14 = vadd.f32 %v4675_v30, %v13147_v1  ;;  %4803 = vmatmul.bf16.gmra.mxu3 %v17764_v51  ;;  %v4499_v34 = vpop.f32.mrf.mxu0 }
 0x82f   :  { %v13369_v42 = vadd.f32 %v4499_v34, %v12616_v22  ;;  %v4598_v27 = vpop.f32.mrf.mxu1  ;;  %v8456_v22 = vld [vmem:[%s16018_s3 + $0x8] sm:$0xff] }
 0x830   :  { %v4599_v5 = vadd.f32 %v4598_v27, %v17769_v55  ;;  %6448 = vmatpush.bf16.msrb.mxu3 %v8457_v32  ;;  %v17770_v27 = vld [vmem:[#allocation140_spill] sm:$0xff]  ;;  %v17772_v32 = vld [vmem:[#allocation362_spill] sm:$0xff] }
 0x831   :  { %v4764_v49 = vpop.f32.mrf.mxu3 }
 0x832   :  { %v13377_v44 = vadd.f32 %v4764_v49, %v4676_v14  ;;  %v8455_v49 = vld [vmem:[%s16018_s3] sm:$0xff] }
 0x834   :  { %6449 = vmatpush.bf16.msrb.mxu3 %v8456_v22 }
 0x835   :  { %v4677_v1 = vpop.f32.mrf.mxu2 }
 0x836   :  { %v4678_v30 = vadd.f32 %v4677_v1, %v13167_v17  ;;  %v4502_v58 = vpop.f32.mrf.mxu0 }
 0x837   :  { %v13384_v34 = vadd.f32 %v4502_v58, %v12632_v31  ;;  %v4601_v55 = vpop.f32.mrf.mxu1 }
 0x838   :  { %v4602_v35 = vadd.f32 %v4601_v55, %v17770_v27  ;;  %6450 = vmatpush.bf16.msrb.mxu3 %v8455_v49  ;;  %v17773_v55 = vld [vmem:[#allocation144_spill] sm:$0xff] }
 0x839   :  { %v4766_v0 = vpop.f32.mrf.mxu3  ;;  %4541 = vmatmul.bf16.gmra.mxu0 %v17771_v29 }
 0x83a   :  { %v13391_v14 = vadd.f32 %v4766_v0, %v4678_v30  ;;  %4719 = vmatmul.bf16.gmra.mxu2 %v17772_v32  ;;  %4916 = vmatmul.bf16.vlgmr.msrb.gmra.mxu1 %v12150_v37  ;;  %v17784_v32 = vld [vmem:[#allocation389_spill] sm:$0xff] }
 0x83d   :  { %v4680_v31 = vpop.f32.mrf.mxu2 }
 0x83e   :  { %v4681_v17 = vadd.f32 %v4680_v31, %v13217_v19  ;;  %4808 = vmatmul.bf16.gmra.mxu3 %v17771_v29  ;;  %v4504_v1 = vpop.f32.mrf.mxu0  ;;  %v17774_v31 = vld [vmem:[#allocation132_spill] sm:$0xff] }
 0x83f   :  { %v13398_v22 = vadd.f32 %v4504_v1, %v12644_v4  ;;  %v4603_v58 = vpop.f32.mrf.mxu1  ;;  %v17776_v1 = vld [vmem:[#allocation53_spill] sm:$0xff] }
 0x840   :  { %v4604_v27 = vadd.f32 %v4603_v58, %v17773_v55 }
 0x841   :  { %v4769_v3 = vpop.f32.mrf.mxu3 }
 0x842   :  { %v13401_v0 = vadd.f32 %v4769_v3, %v4681_v17 }
 0x845   :  { %v4682_v30 = vpop.f32.mrf.mxu2 }
 0x846   :  { %v4683_v50 = vadd.f32 %v4682_v30, %v13274_v54  ;;  %v4507_v37 = vpop.f32.mrf.mxu0  ;;  %v17778_v30 = vld [vmem:[#allocation136_spill] sm:$0xff] }
 0x847   :  { %v13405_v49 = vadd.f32 %v4507_v37, %v12653_v56  ;;  %v4606_v19 = vpop.f32.mrf.mxu1  ;;  %v17777_v56 = vld [vmem:[#allocation314_spill] sm:$0xff] }
 0x848   :  { %v4607_v29 = vadd.f32 %v4606_v19, %v17774_v31 }
 0x849   :  { %v4771_v8 = vpop.f32.mrf.mxu3  ;;  %4546 = vmatmul.bf16.gmra.mxu0 %v17775_v15 }
 0x84a   :  { %v13409_v4 = vadd.f32 %v4771_v8, %v4683_v50  ;;  %4724 = vmatmul.bf16.gmra.mxu2 %v12636_v10  ;;  %4921 = vmatmul.bf16.gmra.mxu1 %v17776_v1  ;;  %v17779_v50 = vld [vmem:[#allocation103_spill] sm:$0xff] }
 0x84b   :  { %v5862_v51 = vmul.f32 %v13155_v43, %v17779_v50  ;;  %v17780_v1 = vld [vmem:[#allocation19_spill] sm:$0xff] }
 0x84c   :  { %v5866_v10 = vmul.f32 %v13155_v43, %v17780_v1 }
 0x84d   :  { %v4685_v3 = vpop.f32.mrf.mxu2 }
 0x84e   :  { %v4686_v17 = vadd.f32 %v4685_v3, %v13329_v11  ;;  %4813 = vmatmul.bf16.gmra.mxu3 %v17775_v15  ;;  %v4509_v54 = vpop.f32.mrf.mxu0  ;;  %v17781_v15 = vld [vmem:[#allocation207_spill] sm:$0xff] }
 0x84f   :  { %v13416_v58 = vadd.f32 %v4509_v54, %v17777_v56  ;;  %v4608_v55 = vpop.f32.mrf.mxu1  ;;  %v5994_v56 = vadd.f32 %v13157_v63, %v5862_v51  ;;  %v17786_v51 = vld [vmem:[#allocation203_spill] sm:$0xff] }
 0x850   :  { %v4609_v37 = vadd.f32 %v4608_v55, %v17778_v30  ;;  %v5998_v55 = vadd.f32 %v13157_v63, %v5866_v10  ;;  %v17782_v30 = vld [vmem:[#allocation128_spill] sm:$0xff] }
 0x851   :  { %v4774_v19 = vpop.f32.mrf.mxu3 }
 0x852   :  { %v13419_v31 = vadd.f32 %v4774_v19, %v4686_v17 }
 0x855   :  { %v4687_v8 = vpop.f32.mrf.mxu2 }
 0x856   :  { %v4688_v11 = vadd.f32 %v4687_v8, %v4599_v5  ;;  %v4512_v3 = vpop.f32.mrf.mxu0  ;;  %v17785_v5 = vld [vmem:[#allocation387_spill] sm:$0xff]  ;;  %v6122_v8 = vpack.c.bf16 %v5998_v55, %v5994_v56  ;;  %v5870_v56 = vmul.f32 %v13155_v43, %v17788_v21 }
 0x857   :  { %v13426_v38 = vadd.f32 %v4512_v3, %v17781_v15  ;;  %v4611_v54 = vpop.f32.mrf.mxu1  ;;  %v17789_v55 = vld [vmem:[#allocation183_spill] sm:$0xff] }
 0x858   :  { %v13431_v17 = vadd.f32 %v4611_v54, %v17782_v30  ;;  %v17787_v54 = vld [vmem:[#allocation116_spill] sm:$0xff]  ;;  %v17793_v21 = vld [vmem:[#allocation135_spill] sm:$0xff] }
 0x859   :  { %v4776_v19 = vpop.f32.mrf.mxu3  ;;  %4827 = vmatmul.bf16.vlgmr.msrb.gmra.mxu0 %v17783_v26 }
 0x85a   :  { %v13434_v50 = vadd.f32 %v4776_v19, %v4688_v11  ;;  %4926 = vmatmul.bf16.gmra.mxu1 %v17784_v32  ;;  %5005 = vmatmul.bf16.vlgmr.msrb.gmra.mxu2 %v17785_v5  ;;  %v17790_v5 = vld [vmem:[#allocation199_spill] sm:$0xff] }
 0x85d   :  { %v4690_v15 = vpop.f32.mrf.mxu2 }
 0x85e   :  { %v4691_v1 = vadd.f32 %v4690_v15, %v4602_v35  ;;  %6451 = vmatmul.bf16.vlgmr.msrb.gmra.mxu3 %v6122_v8  ;;  %v4514_v3 = vpop.f32.mrf.mxu0  ;;  %v5874_v35 = vmul.f32 %v13155_v43, %v17789_v55 }
 0x85f   :  { %v13439_v20 = vadd.f32 %v4514_v3, %v17786_v51  ;;  %v4613_v10 = vpop.f32.mrf.mxu1  ;;  %v17791_v3 = vld [vmem:[#allocation33_spill] sm:$0xff] }
 0x860   :  { %v13442_v30 = vadd.f32 %v4613_v10, %v17787_v54  ;;  %v6002_v10 = vadd.f32 %v13157_v63, %v5870_v56 }
 0x861   :  { %v4779_v36 = vpop.f32.mrf.mxu3 }
 0x862   :  { %v13444_v26 = vadd.f32 %v4779_v36, %v4691_v1  ;;  %v6006_v36 = vadd.f32 %v13157_v63, %v5874_v35 }
 0x864   :  { %v6126_v55 = vpack.c.bf16 %v6006_v36, %v6002_v10  ;;  %v5878_v10 = vmul.f32 %v13155_v43, %v17798_v39  ;;  %v17799_v36 = vld [vmem:[#allocation325_spill] sm:$0xff] }
 0x865   :  { %v4692_v11 = vpop.f32.mrf.mxu2 }
 0x866   :  { %v4693_v19 = vadd.f32 %v4692_v11, %v4604_v27  ;;  %v4517_v32 = vpop.f32.mrf.mxu0  ;;  %v17792_v27 = vld [vmem:[#allocation313_spill] sm:$0xff]  ;;  %v17794_v11 = vld [vmem:[#allocation143_spill] sm:$0xff] }
 0x867   :  { %v13451_v8 = vadd.f32 %v4517_v32, %v17790_v5  ;;  %v4616_v15 = vpop.f32.mrf.mxu1 }
 0x868   :  { %v13454_v51 = vadd.f32 %v4616_v15, %v17791_v3  ;;  %v17795_v15 = vld [vmem:[#allocation195_spill] sm:$0xff] }
 0x869   :  { %v4781_v1 = vpop.f32.mrf.mxu3  ;;  %4832 = vmatmul.bf16.gmra.mxu0 %v17792_v27 }
 0x86a   :  { %v13459_v54 = vadd.f32 %v4781_v1, %v4693_v19  ;;  %4931 = vmatmul.bf16.gmra.mxu1 %v17793_v21  ;;  %5010 = vmatmul.bf16.gmra.mxu2 %v17794_v11  ;;  %v17800_v11 = vld [vmem:[#allocation112_spill] sm:$0xff] }
 0x86d   :  { %v4695_v32 = vpop.f32.mrf.mxu2 }
 0x86e   :  { %v4696_v5 = vadd.f32 %v4695_v32, %v4607_v29  ;;  %6456 = vmatmul.bf16.gmra.mxu3 %v6126_v55  ;;  %v4519_v16 = vpop.f32.mrf.mxu0  ;;  %v5882_v29 = vmul.f32 %v13155_v43, %v17799_v36  ;;  %v13476_v55 = vperm.slane %v17800_v11, 0  ;;  %v17807_v11 = vld [vmem:[#allocation260_spill] sm:$0xff] }
 0x86f   :  { %v13464_v3 = vadd.f32 %v4519_v16, %v17795_v15  ;;  %v4618_v56 = vpop.f32.mrf.mxu1  ;;  %v17801_v16 = vld [vmem:[#allocation364_spill] sm:$0xff] }
 0x870   :  { %v13467_v35 = vadd.f32 %v4618_v56, %v17796_v41  ;;  %v17803_v15 = vld [vmem:[#allocation236_spill] sm:$0xff] }
 0x871   :  { %v4784_v9 = vpop.f32.mrf.mxu3 }
 0x872   :  { %v13469_v27 = vadd.f32 %v4784_v9, %v4696_v5  ;;  %v6010_v9 = vadd.f32 %v13157_v63, %v5878_v10  ;;  %v17804_v5 = vld [vmem:[#allocation367_spill] sm:$0xff] }
 0x873   :  { %v5095_v39 = vadd.f32 %v13476_v55, %v17804_v5  ;;  %v5099_v5 = vadd.f32 %v13476_v55, %v17812_v6 }
 0x874   :  { %17797 = vst [vmem:[#allocation318_spill] sm:$0xff] %v13469_v27  ;;  %v17833_v27 = vld [vmem:[#allocation187_spill] sm:$0xff] }
 0x875   :  { %v4697_v19 = vpop.f32.mrf.mxu2  ;;  %v13517_v6 = vmax.f32 %v5099_v5, 0.0 }
 0x876   :  { %v4698_v1 = vadd.f32 %v4697_v19, %v4609_v37  ;;  %v4522_v21 = vpop.f32.mrf.mxu0  ;;  %v6014_v37 = vadd.f32 %v13157_v63, %v5882_v29  ;;  %v13498_v29 = vmax.f32 %v5095_v39, 0.0  ;;  %v17818_v39 = vld [vmem:[#allocation240_spill] sm:$0xff] }
 0x877   :  { %v13479_v32 = vadd.f32 %v4522_v21, %v17801_v16  ;;  %v4621_v41 = vpop.f32.mrf.mxu1  ;;  %v17808_v21 = vld [vmem:[#allocation268_spill] sm:$0xff]  ;;  %v17809_v16 = vld [vmem:[#allocation109_spill] sm:$0xff]  ;;  %17819 = vst [vmem:[#allocation320_spill] sm:$0xff] %v13517_v6 }
 0x878   :  { %v13482_v56 = vadd.f32 %v4621_v41, %v17803_v15  ;;  %v5091_v41 = vadd.f32 %v13476_v55, %v17809_v16  ;;  %v17810_v15 = vld [vmem:[#allocation113_spill] sm:$0xff]  ;;  %v6130_v10 = vpack.c.bf16 %v6014_v37, %v6010_v9  ;;  %17811 = vst [vmem:[#allocation60_spill] sm:$0xff] %v13498_v29  ;;  %v17815_v16 = vld [vmem:[#allocation16_spill] sm:$0xff] }
 0x879   :  { %17802 = vst [vmem:[#allocation324_spill] sm:$0xff] %v13479_v32  ;;  %v4786_v19 = vpop.f32.mrf.mxu3  ;;  %4837 = vmatmul.bf16.gmra.mxu0 %v17805_v62  ;;  %v13496_v47 = vperm.slane %v17810_v15, 0  ;;  %v17817_v9 = vld [vmem:[#allocation28_spill] sm:$0xff]  ;;  %v17829_v32 = vld [vmem:[#allocation242_spill] sm:$0xff] }
 0x87a   :  { %v13489_v36 = vadd.f32 %v4786_v19, %v4698_v1  ;;  %4936 = vmatmul.bf16.gmra.mxu1 %v17807_v11  ;;  %5015 = vmatmul.bf16.gmra.mxu2 %v17808_v21  ;;  %v13503_v11 = vmax.f32 %v5091_v41, 0.0  ;;  %v17814_v19 = vld [vmem:[#allocation327_spill] sm:$0xff]  ;;  %v17820_v41 = vld [vmem:[#allocation230_spill] sm:$0xff] }
 0x87b   :  { %v5096_v21 = vadd.f32 %v13496_v47, %v17814_v19  ;;  %v5092_v37 = vadd.f32 %v13496_v47, %v17817_v9 }
 0x87c   :  { %17806 = vst [vmem:[#allocation319_spill] sm:$0xff] %v13489_v36  ;;  %v5383_v5 = vadd.f32 %v13498_v29, %v13503_v11 }
 0x87d   :  { %v4700_v57 = vpop.f32.mrf.mxu2  ;;  %17813 = vst [vmem:[#allocation64_spill] sm:$0xff] %v13503_v11  ;;  %v13527_v9 = vmax.f32 %v5096_v21, 0.0  ;;  %v13533_v52 = vmax.f32 %v5092_v37, 0.0  ;;  %v5886_v37 = vmul.f32 %v13155_v43, %v17829_v32 }
 0x87e   :  { %v4701_v62 = vadd.f32 %v4700_v57, %v13431_v17  ;;  %6461 = vmatmul.bf16.gmra.mxu3 %v6130_v10  ;;  %v4524_v1 = vpop.f32.mrf.mxu0  ;;  %v5503_v57 = vmul.f32 %v13498_v29, %v13498_v29  ;;  %v5103_v17 = vadd.f32 %v13476_v55, %v13105_v59  ;;  %v5100_v10 = vadd.f32 %v13496_v47, %v17820_v41  ;;  %v17830_v29 = vld [vmem:[#allocation303_spill] sm:$0xff] }
 0x87f   :  { %v13508_v53 = vadd.f32 %v4524_v1, %v17815_v16  ;;  %v4623_v15 = vpop.f32.mrf.mxu1  ;;  %v5499_v16 = vmul.f32 %v13503_v11, %v13503_v11  ;;  %17822 = vst [vmem:[#allocation218_spill] sm:$0xff] %v13527_v9  ;;  %v5507_v41 = vmul.f32 %v13517_v6, %v13517_v6  ;;  %v5384_v40 = vadd.f32 %v5383_v5, %v13517_v6 }
 0x880   :  { %v13513_v23 = vadd.f32 %v4623_v15, %v17818_v39  ;;  %v17823_v15 = vld [vmem:[#allocation234_spill] sm:$0xff]  ;;  %17824 = vst [vmem:[#allocation279_spill] sm:$0xff] %v13533_v52  ;;  %v5420_v5 = vadd.f32 %v13527_v9, %v13533_v52 }
 0x881   :  { %17816 = vst [vmem:[#allocation316_spill] sm:$0xff] %v13508_v53  ;;  %v4789_v1 = vpop.f32.mrf.mxu3  ;;  %v5107_v39 = vadd.f32 %v13476_v55, %v17823_v15  ;;  %v5663_v59 = vadd.f32 %v5503_v57, %v5499_v16  ;;  %v13537_v53 = vmax.f32 %v5103_v17, 0.0  ;;  %v5890_v57 = vmul.f32 %v13155_v43, %v17830_v29 }
 0x882   :  { %v13523_v19 = vadd.f32 %v4789_v1, %v4701_v62  ;;  %v13539_v62 = vmax.f32 %v5100_v10, 0.0  ;;  %v5504_v17 = vmul.f32 %v13527_v9, %v13527_v9  ;;  %v17832_v10 = vld [vmem:[#allocation291_spill] sm:$0xff]  ;;  %v6018_v43 = vadd.f32 %v13157_v63, %v5886_v37 }
 0x883   :  { %17825 = vst [vmem:[#allocation275_spill] sm:$0xff] %v13537_v53  ;;  %v13552_v16 = vmax.f32 %v5107_v39, 0.0  ;;  %v5111_v11 = vadd.f32 %v13476_v55, %v17832_v10  ;;  %v6022_v29 = vadd.f32 %v13157_v63, %v5890_v57  ;;  %v5500_v39 = vmul.f32 %v13533_v52, %v13533_v52  ;;  %v17839_v57 = vld [vmem:[#allocation11_spill] sm:$0xff] }
 0x884   :  { %17821 = vst [vmem:[#allocation214_spill] sm:$0xff] %v13523_v19  ;;  %v17827_v19 = vld [vmem:[#allocation295_spill] sm:$0xff]  ;;  %v5508_v37 = vmul.f32 %v13539_v62, %v13539_v62 }
 0x885   :  { %17826 = vst [vmem:[#allocation150_spill] sm:$0xff] %v13539_v62  ;;  %v4702_v1 = vpop.f32.mrf.mxu2  ;;  %v5104_v21 = vadd.f32 %v13496_v47, %v17827_v19  ;;  %v5700_v6 = vadd.f32 %v5504_v17, %v5500_v39  ;;  %v5119_v17 = vadd.f32 %v13476_v55, %v13162_v61  ;;  %v5123_v61 = vadd.f32 %v13476_v55, %v13209_v2 }
 0x886   :  { %v13544_v36 = vadd.f32 %v4702_v1, %v13442_v30  ;;  %v4527_v15 = vpop.f32.mrf.mxu0  ;;  %17831 = vst [vmem:[#allocation321_spill] sm:$0xff] %v13552_v16  ;;  %v5108_v1 = vadd.f32 %v13496_v47, %v13133_v46  ;;  %v17837_v46 = vld [vmem:[#allocation120_spill] sm:$0xff] }
 0x887   :  { %v13557_v19 = vadd.f32 %v4527_v15, %v17833_v27  ;;  %v4626_v30 = vpop.f32.mrf.mxu1  ;;  %v5511_v27 = vmul.f32 %v13537_v53, %v13537_v53  ;;  %v5115_v15 = vadd.f32 %v13476_v55, %v13144_v12  ;;  %v13578_v63 = vmax.f32 %v5104_v21, 0.0 }
 0x888   :  { %17828 = vst [vmem:[#allocation154_spill] sm:$0xff] %v13544_v36  ;;  %v17835_v36 = vld [vmem:[#allocation304_spill] sm:$0xff]  ;;  %v5385_v12 = vadd.f32 %v5384_v40, %v13537_v53  ;;  %v5112_v21 = vadd.f32 %v13496_v47, %v13151_v60  ;;  %v13624_v2 = vmax.f32 %v5119_v17, 0.0 }
 0x889   :  { %17834 = vst [vmem:[#allocation322_spill] sm:$0xff] %v13557_v19  ;;  %v13562_v32 = vadd.f32 %v4626_v30, %v17835_v36  ;;  %v13573_v10 = vpop.f32.mrf.mxu3  ;;  %4842 = vmatmul.bf16.gmra.mxu0 %v17837_v46  ;;  %v5664_v36 = vadd.f32 %v5663_v59, %v5507_v41  ;;  %v17840_v30 = vld [vmem:[#allocation337_spill] sm:$0xff]  ;;  %v13585_v19 = vmax.f32 %v5111_v11, 0.0  ;;  %v5515_v59 = vmul.f32 %v13552_v16, %v13552_v16 }
 0x88a   :  { %17836 = vst [vmem:[#allocation55_spill] sm:$0xff] %v13573_v10  ;;  %4941 = vmatmul.bf16.gmra.mxu1 %v17839_v57  ;;  %5020 = vmatmul.bf16.gmra.mxu2 %v17840_v30  ;;  %v13589_v41 = vmax.f32 %v5108_v1, 0.0  ;;  %v6134_v46 = vpack.c.bf16 %v6022_v29, %v6018_v43  ;;  %v5421_v30 = vadd.f32 %v5420_v5, %v13539_v62  ;;  %v13594_v10 = vmax.f32 %v5115_v15, 0.0 }
 0x88b   :  { %17838 = vst [vmem:[#allocation68_spill] sm:$0xff] %v13578_v63  ;;  %v5665_v57 = vadd.f32 %v5664_v36, %v5511_v27  ;;  %v5701_v11 = vadd.f32 %v5700_v6, %v5508_v37  ;;  %v5512_v39 = vmul.f32 %v13578_v63, %v13578_v63  ;;  %v5116_v1 = vadd.f32 %v13496_v47, %v13176_v18  ;;  %v17844_v6 = vld [vmem:[#allocation238_spill] sm:$0xff] }
 0x88c   :  { %17841 = vst [vmem:[#allocation71_spill] sm:$0xff] %v13585_v19  ;;  %v5386_v43 = vadd.f32 %v5385_v12, %v13552_v16  ;;  %v5519_v29 = vmul.f32 %v13585_v19, %v13585_v19  ;;  %v5516_v18 = vmul.f32 %v13589_v41, %v13589_v41  ;;  %v5120_v37 = vadd.f32 %v13496_v47, %v13229_v45 }
 0x88d   :  { %17842 = vst [vmem:[#allocation15_spill] sm:$0xff] %v13589_v41  ;;  %v4705_v40 = vpop.f32.mrf.mxu2  ;;  %v5666_v36 = vadd.f32 %v5665_v57, %v5515_v59  ;;  %v5422_v5 = vadd.f32 %v5421_v30, %v13578_v63  ;;  %v5523_v12 = vmul.f32 %v13594_v10, %v13594_v10  ;;  %v5702_v59 = vadd.f32 %v5701_v11, %v5512_v39 }
 0x88e   :  { %17843 = vst [vmem:[#allocation69_spill] sm:$0xff] %v13594_v10  ;;  %v13603_v53 = vadd.f32 %v4705_v40, %v13454_v51  ;;  %6466 = vmatmul.bf16.gmra.mxu3 %v6134_v46  ;;  %v4529_v60 = vpop.f32.mrf.mxu0  ;;  %v13617_v51 = vmax.f32 %v5112_v21, 0.0  ;;  %v5127_v46 = vadd.f32 %v13476_v55, %v13266_v24  ;;  %v5387_v57 = vadd.f32 %v5386_v43, %v13585_v19 }
 0x88f   :  { %v13611_v27 = vadd.f32 %v4529_v60, %v17844_v6  ;;  %v13613_v15 = vpop.f32.mrf.mxu1  ;;  %17846 = vst [vmem:[#allocation10_spill] sm:$0xff] %v13624_v2  ;;  %v13631_v21 = vmax.f32 %v5116_v1, 0.0  ;;  %v5667_v60 = vadd.f32 %v5666_v36, %v5519_v29  ;;  %v5423_v45 = vadd.f32 %v5422_v5, %v13589_v41 }
 0x890   :  { %17845 = vst [vmem:[#allocation326_spill] sm:$0xff] %v13617_v51  ;;  %v13634_v6 = vmax.f32 %v5123_v61, 0.0  ;;  %v5124_v30 = vadd.f32 %v13496_v47, %v13288_v7  ;;  %v5703_v17 = vadd.f32 %v5702_v59, %v5516_v18  ;;  %v5388_v16 = vadd.f32 %v5387_v57, %v13594_v10 }
 0x891   :  { %v13628_v40 = vpop.f32.mrf.mxu3  ;;  %17847 = vst [vmem:[#allocation57_spill] sm:$0xff] %v13631_v21  ;;  %v5520_v24 = vmul.f32 %v13617_v51, %v13617_v51  ;;  %v13641_v63 = vmax.f32 %v5120_v37, 0.0  ;;  %v5668_v11 = vadd.f32 %v5667_v60, %v5523_v12  ;;  %v5527_v39 = vmul.f32 %v13624_v2, %v13624_v2  ;;  %v17876_v9 = vld [vmem:[#allocation55_spill] sm:$0xff] }
 0x892   :  { %v13645_v1 = vmax.f32 %v5127_v46, 0.0  ;;  %v5131_v43 = vadd.f32 %v13476_v55, %v13321_v28  ;;  %v5424_v7 = vadd.f32 %v5423_v45, %v13617_v51  ;;  %v5524_v61 = vmul.f32 %v13631_v21, %v13631_v21  ;;  %v17849_v46 = vld [vmem:[#allocation299_spill] sm:$0xff] }
 0x893   :  { %17848 = vst [vmem:[#allocation329_spill] sm:$0xff] %v13641_v63  ;;  %v5128_v36 = vadd.f32 %v13496_v47, %v13344_v13  ;;  %v5531_v5 = vmul.f32 %v13634_v6, %v13634_v6  ;;  %v13659_v12 = vmax.f32 %v5124_v30, 0.0  ;;  %v5135_v28 = vadd.f32 %v13476_v55, %v13369_v42 }
 0x894   :  { %v5704_v60 = vadd.f32 %v5703_v17, %v5520_v24  ;;  %v5389_v13 = vadd.f32 %v5388_v16, %v13624_v2  ;;  %v5132_v45 = vadd.f32 %v13496_v47, %v13377_v44  ;;  %v5425_v30 = vadd.f32 %v5424_v7, %v13631_v21 }
 0x895   :  { %v4707_v29 = vpop.f32.mrf.mxu2  ;;  %v5535_v42 = vmul.f32 %v13645_v1, %v13645_v1  ;;  %v13676_v10 = vmax.f32 %v5131_v43, 0.0  ;;  %v13682_v24 = vmax.f32 %v5128_v36, 0.0  ;;  %v5139_v44 = vadd.f32 %v13476_v55, %v13384_v34 }
 0x896   :  { %v13655_v18 = vadd.f32 %v4707_v29, %v13467_v35  ;;  %v4532_v37 = vpop.f32.mrf.mxu0  ;;  %v5528_v35 = vmul.f32 %v13641_v63, %v13641_v63  ;;  %v5669_v29 = vadd.f32 %v5668_v11, %v5527_v39  ;;  %v5705_v17 = vadd.f32 %v5704_v60, %v5524_v61  ;;  %v17851_v11 = vld [vmem:[#allocation87_spill] sm:$0xff]  ;;  %v17852_v39 = vld [vmem:[#allocation340_spill] sm:$0xff] }
 0x897   :  { %v13664_v59 = vadd.f32 %v4532_v37, %v17849_v46  ;;  %v13666_v57 = vpop.f32.mrf.mxu1  ;;  %v17850_v46 = vld [vmem:[#allocation171_spill] sm:$0xff]  ;;  %v5390_v16 = vadd.f32 %v5389_v13, %v13634_v6  ;;  %v5426_v43 = vadd.f32 %v5425_v30, %v13641_v63  ;;  %v5532_v2 = vmul.f32 %v13659_v12, %v13659_v12 }
 0x898   :  { %v5670_v7 = vadd.f32 %v5669_v29, %v5531_v5  ;;  %v13691_v19 = vmax.f32 %v5135_v28, 0.0  ;;  %v5706_v61 = vadd.f32 %v5705_v17, %v5528_v35  ;;  %v13694_v36 = vmax.f32 %v5132_v45, 0.0 }
 0x899   :  { %v13678_v37 = vpop.f32.mrf.mxu3  ;;  %4847 = vmatmul.bf16.gmra.mxu0 %v17850_v46  ;;  %v5391_v60 = vadd.f32 %v5390_v16, %v13645_v1  ;;  %v5136_v34 = vadd.f32 %v13496_v47, %v13391_v14  ;;  %v5427_v46 = vadd.f32 %v5426_v43, %v13659_v12  ;;  %v5539_v5 = vmul.f32 %v13676_v10, %v13676_v10 }
 0x89a   :  { %4946 = vmatmul.bf16.gmra.mxu1 %v17851_v11  ;;  %5025 = vmatmul.bf16.gmra.mxu2 %v17852_v39  ;;  %v5671_v13 = vadd.f32 %v5670_v7, %v5535_v42  ;;  %v5143_v29 = vadd.f32 %v13476_v55, %v13398_v22  ;;  %v5536_v28 = vmul.f32 %v13682_v24, %v13682_v24  ;;  %v13705_v35 = vmax.f32 %v5139_v44, 0.0  ;;  %v17854_v44 = vld [vmem:[#allocation174_spill] sm:$0xff] }
 0x89b   :  { %v5140_v45 = vadd.f32 %v13496_v47, %v13401_v0  ;;  %v17853_v42 = vpack.c.bf16 %v13179_v33, %v13172_v25  ;;  %v5707_v16 = vadd.f32 %v5706_v61, %v5532_v2  ;;  %v5543_v22 = vmul.f32 %v13691_v19, %v13691_v19 }
 0x89c   :  { %v5147_v11 = vadd.f32 %v13476_v55, %v13405_v49  ;;  %v5392_v0 = vadd.f32 %v5391_v60, %v13676_v10  ;;  %v13727_v25 = vmax.f32 %v5136_v34, 0.0  ;;  %v5144_v33 = vadd.f32 %v13496_v47, %v13409_v4 }
 0x89d   :  { %v4710_v30 = vpop.f32.mrf.mxu2  ;;  %v5672_v2 = vadd.f32 %v5671_v13, %v5539_v5  ;;  %v5428_v43 = vadd.f32 %v5427_v46, %v13682_v24  ;;  %v13732_v61 = vmax.f32 %v5143_v29, 0.0  ;;  %v5151_v49 = vadd.f32 %v13476_v55, %v13416_v58 }
 0x89e   :  { %v13710_v14 = vadd.f32 %v4710_v30, %v13482_v56  ;;  %6471 = vmatmul.bf16.gmra.mxu3 %v17853_v42  ;;  %v4534_v17 = vpop.f32.mrf.mxu0  ;;  %v5540_v56 = vmul.f32 %v13694_v36, %v13694_v36  ;;  %v5708_v42 = vadd.f32 %v5707_v16, %v5536_v28  ;;  %v5393_v60 = vadd.f32 %v5392_v0, %v13691_v19 }
 0x89f   :  { %v13720_v39 = vadd.f32 %v4534_v17, %v17854_v44  ;;  %v13722_v7 = vpop.f32.mrf.mxu1  ;;  %17855 = vst [vmem:[#allocation59_spill] sm:$0xff] %v13732_v61  ;;  %v5547_v34 = vmul.f32 %v13705_v35, %v13705_v35  ;;  %v13741_v17 = vmax.f32 %v5140_v45, 0.0  ;;  %v5673_v44 = vadd.f32 %v5672_v2, %v5543_v22 }
 0x8a0   :  { %v5429_v4 = vadd.f32 %v5428_v43, %v13694_v36  ;;  %v13744_v13 = vmax.f32 %v5147_v11, 0.0  ;;  %v5148_v46 = vadd.f32 %v13496_v47, %v13419_v31  ;;  %v5709_v5 = vadd.f32 %v5708_v42, %v5540_v56 }
 0x8a1   :  { %v13736_v30 = vpop.f32.mrf.mxu3  ;;  %v5544_v58 = vmul.f32 %v13727_v25, %v13727_v25  ;;  %v13750_v29 = vmax.f32 %v5144_v33, 0.0  ;;  %v5155_v28 = vadd.f32 %v13476_v55, %v13426_v38  ;;  %v5394_v45 = vadd.f32 %v5393_v60, %v13705_v35 }
 0x8a2   :  { %v5551_v16 = vmul.f32 %v13732_v61, %v13732_v61  ;;  %v13757_v22 = vmax.f32 %v5151_v49, 0.0  ;;  %v5152_v11 = vadd.f32 %v13496_v47, %v13434_v50  ;;  %v5674_v0 = vadd.f32 %v5673_v44, %v5547_v34  ;;  %v17859_v50 = vld [vmem:[#allocation178_spill] sm:$0xff] }
 0x8a3   :  { %17856 = vst [vmem:[#allocation63_spill] sm:$0xff] %v13750_v29  ;;  %v5430_v56 = vadd.f32 %v5429_v4, %v13727_v25  ;;  %v5548_v33 = vmul.f32 %v13741_v17, %v13741_v17  ;;  %v5555_v43 = vmul.f32 %v13744_v13, %v13744_v13  ;;  %v13769_v42 = vmax.f32 %v5148_v46, 0.0 }
 0x8a4   :  { %17857 = vst [vmem:[#allocation74_spill] sm:$0xff] %v13757_v22  ;;  %v5159_v49 = vadd.f32 %v13476_v55, %v13439_v20  ;;  %v5710_v44 = vadd.f32 %v5709_v5, %v5544_v58  ;;  %v5395_v4 = vadd.f32 %v5394_v45, %v13732_v61  ;;  %v5675_v63 = vadd.f32 %v5674_v0, %v5551_v16  ;;  %v17862_v45 = vld [vmem:[#allocation188_spill] sm:$0xff] }
 0x8a5   :  { %v4712_v31 = vpop.f32.mrf.mxu2  ;;  %17858 = vst [vmem:[#allocation77_spill] sm:$0xff] %v13769_v42  ;;  %v5559_v46 = vmul.f32 %v13757_v22, %v13757_v22  ;;  %v13785_v21 = vmax.f32 %v5152_v11, 0.0  ;;  %v5156_v20 = vadd.f32 %v13496_v47, %v13444_v26  ;;  %v5431_v5 = vadd.f32 %v5430_v56, %v13741_v17  ;;  %v17863_v16 = vld [vmem:[#allocation196_spill] sm:$0xff] }
 0x8a6   :  { %v13765_v2 = vadd.f32 %v4712_v31, %v13513_v23  ;;  %v4537_v38 = vpop.f32.mrf.mxu0  ;;  %v5552_v23 = vmul.f32 %v13750_v29, %v13750_v29  ;;  %v13781_v31 = vmax.f32 %v5155_v28, 0.0  ;;  %v5711_v58 = vadd.f32 %v5710_v44, %v5548_v33 }
 0x8a7   :  { %v13774_v60 = vadd.f32 %v4537_v38, %v17859_v50  ;;  %v13776_v34 = vpop.f32.mrf.mxu1  ;;  %17860 = vst [vmem:[#allocation37_spill] sm:$0xff] %v13785_v21  ;;  %v17861_v50 = vld [vmem:[#allocation300_spill] sm:$0xff]  ;;  %v5163_v28 = vadd.f32 %v13476_v55, %v13451_v8  ;;  %v5396_v11 = vadd.f32 %v5395_v4, %v13744_v13  ;;  %v5676_v0 = vadd.f32 %v5675_v63, %v5555_v43 }
 0x8a8   :  { %v5556_v26 = vmul.f32 %v13769_v42, %v13769_v42  ;;  %v13800_v51 = vmax.f32 %v5159_v49, 0.0  ;;  %v5712_v41 = vadd.f32 %v5711_v58, %v5552_v23  ;;  %v5563_v56 = vmul.f32 %v13781_v31, %v13781_v31 }
 0x8a9   :  { %v13789_v38 = vpop.f32.mrf.mxu3  ;;  %4852 = vmatmul.bf16.gmra.mxu0 %v17861_v50  ;;  %v5432_v50 = vadd.f32 %v5431_v5, %v13750_v29  ;;  %v5160_v8 = vadd.f32 %v13496_v47, %v13459_v54  ;;  %v5397_v33 = vadd.f32 %v5396_v11, %v13757_v22  ;;  %v5677_v44 = vadd.f32 %v5676_v0, %v5559_v46  ;;  %v17866_v54 = vld [vmem:[#allocation166_spill] sm:$0xff] }
 0x8aa   :  { %4951 = vmatmul.bf16.gmra.mxu1 %v17862_v45  ;;  %5030 = vmatmul.bf16.gmra.mxu2 %v17863_v16  ;;  %17864 = vst [vmem:[#allocation330_spill] sm:$0xff] %v13800_v51  ;;  %v5560_v63 = vmul.f32 %v13785_v21, %v13785_v21  ;;  %v13810_v43 = vmax.f32 %v5156_v20, 0.0  ;;  %v13813_v45 = vmax.f32 %v5163_v28, 0.0  ;;  %v5167_v23 = vadd.f32 %v13476_v55, %v13464_v3  ;;  %v17868_v11 = vld [vmem:[#allocation318_spill] sm:$0xff]  ;;  %v17869_v28 = vld [vmem:[#allocation328_spill] sm:$0xff] }
 0x8ab   :  { %v5433_v49 = vadd.f32 %v5432_v50, %v13769_v42  ;;  %v17867_v58 = vpack.c.bf16 %v13191_v48, %v17866_v54  ;;  %v5713_v16 = vadd.f32 %v5712_v41, %v5556_v26  ;;  %v5567_v20 = vmul.f32 %v13800_v51, %v13800_v51  ;;  %v17871_v48 = vld [vmem:[#allocation324_spill] sm:$0xff] }
 0x8ac   :  { %17865 = vst [vmem:[#allocation232_spill] sm:$0xff] %v13810_v43  ;;  %v5164_v0 = vadd.f32 %v13496_v47, %v17868_v11  ;;  %v5398_v3 = vadd.f32 %v5397_v33, %v13781_v31  ;;  %v5171_v54 = vadd.f32 %v13476_v55, %v17871_v48  ;;  %v17872_v11 = vld [vmem:[#allocation319_spill] sm:$0xff]  ;;  %v5571_v33 = vmul.f32 %v13813_v45, %v13813_v45  ;;  %v17875_v48 = vld [vmem:[#allocation154_spill] sm:$0xff] }
 0x8ad   :  { %v4715_v4 = vpop.f32.mrf.mxu2  ;;  %v5434_v41 = vadd.f32 %v5433_v49, %v13785_v21  ;;  %v5714_v26 = vadd.f32 %v5713_v16, %v5560_v63  ;;  %v4792_v49 = vadd.f32 %v17876_v9, %v17875_v48 }
 0x8ae   :  { %v13818_v5 = vadd.f32 %v4715_v4, %v13562_v32  ;;  %6476 = vmatmul.bf16.gmra.mxu3 %v17867_v58  ;;  %v4539_v46 = vpop.f32.mrf.mxu0  ;;  %v5678_v32 = vadd.f32 %v5677_v44, %v5563_v56  ;;  %v13833_v4 = vmax.f32 %v5160_v8, 0.0  ;;  %v5564_v58 = vmul.f32 %v13810_v43, %v13810_v43  ;;  %v17874_v8 = vld [vmem:[#allocation316_spill] sm:$0xff] }
 0x8af   :  { %v13828_v50 = vadd.f32 %v4539_v46, %v17869_v28  ;;  %v13830_v62 = vpop.f32.mrf.mxu1  ;;  %v5168_v46 = vadd.f32 %v13496_v47, %v17872_v11  ;;  %v13846_v56 = vmax.f32 %v5167_v23, 0.0  ;;  %v5175_v44 = vadd.f32 %v13476_v55, %v17874_v8  ;;  %v17877_v23 = vld [vmem:[#allocation214_spill] sm:$0xff] }
 0x8b0   :  { %17870 = vst [vmem:[#allocation206_spill] sm:$0xff] %v13833_v4  ;;  %v5399_v63 = vadd.f32 %v5398_v3, %v13800_v51  ;;  %v5679_v16 = vadd.f32 %v5678_v32, %v5567_v20  ;;  %v5435_v52 = vadd.f32 %v5434_v41, %v13810_v43  ;;  %v13854_v21 = vmax.f32 %v5164_v0, 0.0  ;;  %v17879_v20 = vld [vmem:[#allocation322_spill] sm:$0xff] }
 0x8b1   :  { %v13842_v28 = vpop.f32.mrf.mxu3  ;;  %17873 = vst [vmem:[#allocation210_spill] sm:$0xff] %v13846_v56  ;;  %v5568_v11 = vmul.f32 %v13833_v4, %v13833_v4  ;;  %v13858_v42 = vmax.f32 %v5171_v54, 0.0  ;;  %v5172_v22 = vadd.f32 %v13496_v47, %v17877_v23  ;;  %v4795_v8 = vadd.f32 %v13628_v40, %v13603_v53 }
 0x8b2   :  { %v5715_v29 = vadd.f32 %v5714_v26, %v5564_v58  ;;  %v5400_v9 = vadd.f32 %v5399_v63, %v13813_v45  ;;  %v13865_v3 = vmax.f32 %v5168_v46, 0.0  ;;  %v5179_v0 = vadd.f32 %v13476_v55, %v17879_v20  ;;  %v17880_v58 = vld [vmem:[#allocation22_spill] sm:$0xff] }
 0x8b3   :  { %v5680_v41 = vadd.f32 %v5679_v16, %v5571_v33  ;;  %v5575_v54 = vmul.f32 %v13846_v56, %v13846_v56  ;;  %v13873_v48 = vmax.f32 %v5175_v44, 0.0  ;;  %v5176_v23 = vadd.f32 %v13496_v47, %v4792_v49 }
 0x8b4   :  { %17878 = vst [vmem:[#allocation271_spill] sm:$0xff] %v13865_v3  ;;  %v5436_v53 = vadd.f32 %v5435_v52, %v13833_v4  ;;  %v5572_v40 = vmul.f32 %v13854_v21, %v13854_v21  ;;  %v5183_v26 = vadd.f32 %v13476_v55, %v13611_v27  ;;  %v5716_v63 = vadd.f32 %v5715_v29, %v5568_v11  ;;  %v17882_v29 = vld [vmem:[#allocation167_spill] sm:$0xff] }
 0x8b5   :  { %v13869_v32 = vpop.f32.mrf.mxu2  ;;  %v5579_v44 = vmul.f32 %v13858_v42, %v13858_v42  ;;  %v13888_v16 = vmax.f32 %v5172_v22, 0.0  ;;  %v5180_v49 = vadd.f32 %v13496_v47, %v4795_v8  ;;  %v5401_v52 = vadd.f32 %v5400_v9, %v13846_v56  ;;  %v17884_v9 = vld [vmem:[#allocation312_spill] sm:$0xff] }
 0x8b6   :  { %v4542_v43 = vpop.f32.mrf.mxu0  ;;  %v5576_v20 = vmul.f32 %v13865_v3, %v13865_v3  ;;  %v13894_v4 = vmax.f32 %v5179_v0, 0.0  ;;  %v5187_v27 = vadd.f32 %v13476_v55, %v13664_v59  ;;  %v5681_v11 = vadd.f32 %v5680_v41, %v5575_v54  ;;  %v17885_v0 = vld [vmem:[#allocation341_spill] sm:$0xff] }
 0x8b7   :  { %v13882_v46 = vadd.f32 %v4542_v43, %v17880_v58  ;;  %v13884_v33 = vpop.f32.mrf.mxu1  ;;  %17881 = vst [vmem:[#allocation267_spill] sm:$0xff] %v13888_v16  ;;  %v5583_v22 = vmul.f32 %v13873_v48, %v13873_v48  ;;  %v13903_v58 = vmax.f32 %v5176_v23, 0.0  ;;  %v4797_v8 = vadd.f32 %v13678_v37, %v13655_v18 }
 0x8b8   :  { %v5437_v56 = vadd.f32 %v5436_v53, %v13854_v21  ;;  %v5717_v59 = vadd.f32 %v5716_v63, %v5572_v40  ;;  %v13910_v51 = vmax.f32 %v5183_v26, 0.0  ;;  %v5682_v41 = vadd.f32 %v5681_v11, %v5579_v44 }
 0x8b9   :  { %v13898_v43 = vpop.f32.mrf.mxu3  ;;  %4857 = vmatmul.bf16.gmra.mxu0 %v17882_v29  ;;  %17883 = vst [vmem:[#allocation142_spill] sm:$0xff] %v13903_v58  ;;  %v5402_v29 = vadd.f32 %v5401_v52, %v13858_v42  ;;  %v5580_v54 = vmul.f32 %v13888_v16, %v13888_v16  ;;  %v13915_v23 = vmax.f32 %v5180_v49, 0.0  ;;  %v5587_v37 = vmul.f32 %v13894_v4, %v13894_v4  ;;  %v17886_v52 = vld [vmem:[#allocation9_spill] sm:$0xff]  ;;  %v17887_v49 = vld [vmem:[#allocation170_spill] sm:$0xff] }
 0x8ba   :  { %4956 = vmatmul.bf16.gmra.mxu1 %v17884_v9  ;;  %5035 = vmatmul.bf16.gmra.mxu2 %v17885_v0  ;;  %v5438_v61 = vadd.f32 %v5437_v56, %v13865_v3  ;;  %v5718_v18 = vadd.f32 %v5717_v59, %v5576_v20  ;;  %v13920_v9 = vmax.f32 %v5187_v27, 0.0  ;;  %v5683_v26 = vadd.f32 %v5682_v41, %v5583_v22  ;;  %v17889_v59 = vld [vmem:[#allocation25_spill] sm:$0xff] }
 0x8bb   :  { %v5403_v40 = vadd.f32 %v5402_v29, %v13873_v48  ;;  %v5584_v63 = vmul.f32 %v13903_v58, %v13903_v58  ;;  %v5184_v44 = vadd.f32 %v13496_v47, %v4797_v8  ;;  %v17888_v11 = vpack.c.bf16 %v17886_v52, %v17887_v49 }
 0x8bc   :  { %v5439_v20 = vadd.f32 %v5438_v61, %v13888_v16  ;;  %v5591_v27 = vmul.f32 %v13910_v51, %v13910_v51  ;;  %v5191_v0 = vadd.f32 %v13476_v55, %v13720_v39  ;;  %v5719_v41 = vadd.f32 %v5718_v18, %v5580_v54 }
 0x8bd   :  { %v4720_v53 = vpop.f32.mrf.mxu2  ;;  %v5404_v8 = vadd.f32 %v5403_v40, %v13894_v4  ;;  %v5588_v52 = vmul.f32 %v13915_v23, %v13915_v23  ;;  %v5684_v49 = vadd.f32 %v5683_v26, %v5587_v37  ;;  %v5595_v61 = vmul.f32 %v13920_v9, %v13920_v9 }
 0x8be   :  { %6481 = vmatmul.bf16.gmra.mxu3 %v17888_v11  ;;  %v4544_v56 = vpop.f32.mrf.mxu0  ;;  %v5440_v11 = vadd.f32 %v5439_v20, %v13903_v58  ;;  %v5195_v16 = vadd.f32 %v13476_v55, %v13774_v60  ;;  %v5720_v3 = vadd.f32 %v5719_v41, %v5584_v63  ;;  %v13947_v54 = vmax.f32 %v5184_v44, 0.0  ;;  %v17891_v63 = vld [vmem:[#allocation163_spill] sm:$0xff] }
 0x8bf   :  { %v4545_v22 = vadd.f32 %v4544_v56, %v17889_v59  ;;  %v13935_v29 = vpop.f32.mrf.mxu1  ;;  %v17890_v56 = vld [vmem:[#allocation18_spill] sm:$0xff]  ;;  %v4800_v18 = vadd.f32 %v13736_v30, %v13710_v14  ;;  %v5405_v37 = vadd.f32 %v5404_v8, %v13910_v51  ;;  %v5685_v40 = vadd.f32 %v5684_v49, %v5591_v27 }
 0x8c0   :  { %v4629_v59 = vadd.f32 %v13613_v15, %v17890_v56  ;;  %v13952_v26 = vmax.f32 %v5191_v0, 0.0  ;;  %v5199_v20 = vadd.f32 %v13476_v55, %v13828_v50  ;;  %v5441_v60 = vadd.f32 %v5440_v11, %v13915_v23  ;;  %v17893_v56 = vld [vmem:[#allocation228_spill] sm:$0xff] }
 0x8c1   :  { %v4809_v39 = vpop.f32.mrf.mxu3  ;;  %v5721_v58 = vadd.f32 %v5720_v3, %v5588_v52  ;;  %v4632_v41 = vadd.f32 %v13666_v57, %v17891_v63  ;;  %v4802_v15 = vadd.f32 %v13789_v38, %v13765_v2  ;;  %v5406_v44 = vadd.f32 %v5405_v37, %v13920_v9 }
 0x8c2   :  { %v5686_v14 = vadd.f32 %v5685_v40, %v5595_v61  ;;  %v13962_v30 = vmax.f32 %v5195_v16, 0.0  ;;  %v5203_v27 = vadd.f32 %v13476_v55, %v13882_v46  ;;  %v5592_v50 = vmul.f32 %v13947_v54, %v13947_v54  ;;  %v17892_v46 = vld [vmem:[#allocation107_spill] sm:$0xff] }
 0x8c3   :  { %v5188_v3 = vadd.f32 %v13496_v47, %v4800_v18  ;;  %v4805_v57 = vadd.f32 %v13842_v28, %v13818_v5  ;;  %v4718_v8 = vadd.f32 %v13869_v32, %v4629_v59  ;;  %v5599_v38 = vmul.f32 %v13952_v26, %v13952_v26 }
 0x8c4   :  { %v13974_v16 = vmax.f32 %v5199_v20, 0.0  ;;  %v5207_v52 = vadd.f32 %v13476_v55, %v4545_v22  ;;  %v5442_v61 = vadd.f32 %v5441_v60, %v13947_v54  ;;  %v4634_v18 = vadd.f32 %v13722_v7, %v17893_v56  ;;  %v17894_v20 = vld [vmem:[#allocation292_spill] sm:$0xff] }
 0x8c5   :  { %v4722_v0 = vpop.f32.mrf.mxu2  ;;  %v5192_v5 = vadd.f32 %v13496_v47, %v4802_v15  ;;  %v4807_v28 = vadd.f32 %v13898_v43, %v4718_v8  ;;  %v5407_v32 = vadd.f32 %v5406_v44, %v13952_v26  ;;  %v5603_v59 = vmul.f32 %v13962_v30, %v13962_v30  ;;  %v17896_v43 = vld [vmem:[#allocation343_spill] sm:$0xff] }
 0x8c6   :  { %v4547_v2 = vpop.f32.mrf.mxu0  ;;  %v13988_v37 = vmax.f32 %v5203_v27, 0.0  ;;  %v5722_v60 = vadd.f32 %v5721_v58, %v5592_v50  ;;  %v13992_v63 = vmax.f32 %v5188_v3, 0.0  ;;  %v5196_v7 = vadd.f32 %v13496_v47, %v4805_v57 }
 0x8c7   :  { %v4548_v49 = vadd.f32 %v4547_v2, %v17892_v46  ;;  %v13978_v11 = vpop.f32.mrf.mxu1  ;;  %v4721_v15 = vadd.f32 %v4720_v53, %v4632_v41  ;;  %v17895_v2 = vld [vmem:[#allocation350_spill] sm:$0xff]  ;;  %v5687_v44 = vadd.f32 %v5686_v14, %v5599_v38  ;;  %v5408_v8 = vadd.f32 %v5407_v32, %v13962_v30 }
 0x8c8   :  { %v5607_v27 = vmul.f32 %v13974_v16, %v13974_v16  ;;  %v14000_v46 = vmax.f32 %v5207_v52, 0.0  ;;  %v5200_v58 = vadd.f32 %v13496_v47, %v4807_v28  ;;  %v4723_v3 = vadd.f32 %v4722_v0, %v4634_v18  ;;  %v17897_v52 = vld [vmem:[#allocation296_spill] sm:$0xff] }
 0x8c9   :  { %v5211_v22 = vadd.f32 %v13476_v55, %v4548_v49  ;;  %v4811_v40 = vpop.f32.mrf.mxu3  ;;  %4862 = vmatmul.bf16.gmra.mxu0 %v17894_v20  ;;  %v14002_v49 = vmax.f32 %v5192_v5, 0.0  ;;  %v4810_v50 = vadd.f32 %v4809_v39, %v4721_v15  ;;  %v5688_v57 = vadd.f32 %v5687_v44, %v5603_v59  ;;  %v17898_v39 = vld [vmem:[#allocation40_spill] sm:$0xff] }
 0x8ca   :  { %4961 = vmatmul.bf16.gmra.mxu1 %v17895_v2  ;;  %5040 = vmatmul.bf16.gmra.mxu2 %v17896_v43  ;;  %v5409_v53 = vadd.f32 %v5408_v8, %v13974_v16  ;;  %v5611_v41 = vmul.f32 %v13988_v37, %v13988_v37  ;;  %v5596_v56 = vmul.f32 %v13992_v63, %v13992_v63  ;;  %v14014_v32 = vmax.f32 %v5196_v7, 0.0  ;;  %v17899_v0 = vld [vmem:[#allocation36_spill] sm:$0xff]  ;;  %v17901_v2 = vld [vmem:[#allocation366_spill] sm:$0xff] }
 0x8cb   :  { %v14008_v14 = vmax.f32 %v5211_v22, 0.0  ;;  %v4637_v5 = vadd.f32 %v13776_v34, %v17897_v52  ;;  %v4812_v28 = vadd.f32 %v4811_v40, %v4723_v3  ;;  %v17900_v18 = vpack.c.bf16 %v17898_v39, %v17899_v0 }
 0x8cc   :  { %v5689_v20 = vadd.f32 %v5688_v57, %v5607_v27  ;;  %v5410_v15 = vadd.f32 %v5409_v53, %v13988_v37  ;;  %v5615_v22 = vmul.f32 %v14000_v46, %v14000_v46  ;;  %v5600_v34 = vmul.f32 %v14002_v49, %v14002_v49 }
 0x8cd   :  { %v4725_v38 = vpop.f32.mrf.mxu2  ;;  %v14027_v7 = vmax.f32 %v5200_v58, 0.0  ;;  %v5204_v40 = vadd.f32 %v13496_v47, %v4810_v50  ;;  %v5619_v57 = vmul.f32 %v14008_v14, %v14008_v14  ;;  %v5443_v39 = vadd.f32 %v5442_v61, %v13992_v63 }
 0x8ce   :  { %6486 = vmatmul.bf16.gmra.mxu3 %v17900_v18  ;;  %v4549_v59 = vpop.f32.mrf.mxu0  ;;  %v4726_v8 = vadd.f32 %v4725_v38, %v4637_v5  ;;  %v5690_v3 = vadd.f32 %v5689_v20, %v5611_v41  ;;  %v5411_v27 = vadd.f32 %v5410_v15, %v14000_v46  ;;  %v5723_v0 = vadd.f32 %v5722_v60, %v5596_v56 }
 0x8cf   :  { %v4550_v43 = vadd.f32 %v4549_v59, %v17901_v2  ;;  %v14023_v44 = vpop.f32.mrf.mxu1  ;;  %v5208_v18 = vadd.f32 %v13496_v47, %v4812_v28  ;;  %v5604_v58 = vmul.f32 %v14014_v32, %v14014_v32  ;;  %v5444_v5 = vadd.f32 %v5443_v39, %v14002_v49  ;;  %v17903_v2 = vld [vmem:[#allocation24_spill] sm:$0xff] }
 0x8d0   :  { %v5691_v50 = vadd.f32 %v5690_v3, %v5615_v22  ;;  %v5412_v41 = vadd.f32 %v5411_v27, %v14008_v14  ;;  %v5724_v20 = vadd.f32 %v5723_v0, %v5600_v34  ;;  %v14042_v15 = vmax.f32 %v5204_v40, 0.0 }
 0x8d1   :  { %v5215_v53 = vadd.f32 %v13476_v55, %v4550_v43  ;;  %v4814_v52 = vpop.f32.mrf.mxu3  ;;  %v5608_v61 = vmul.f32 %v14027_v7, %v14027_v7  ;;  %v4639_v43 = vadd.f32 %v13830_v62, %v17903_v2  ;;  %v14053_v34 = vmax.f32 %v5208_v18, 0.0 }
 0x8d2   :  { %v4815_v59 = vadd.f32 %v4814_v52, %v4726_v8  ;;  %v5692_v60 = vadd.f32 %v5691_v50, %v5619_v57  ;;  %v5445_v8 = vadd.f32 %v5444_v5, %v14014_v32  ;;  %v5725_v3 = vadd.f32 %v5724_v20, %v5604_v58  ;;  %v17904_v52 = vld [vmem:[#allocation159_spill] sm:$0xff] }
 0x8d3   :  { %v14039_v38 = vmax.f32 %v5215_v53, 0.0 }
 0x8d4   :  { %v5212_v55 = vadd.f32 %v13496_v47, %v4815_v59  ;;  %v5446_v0 = vadd.f32 %v5445_v8, %v14027_v7  ;;  %v5612_v59 = vmul.f32 %v14042_v15, %v14042_v15  ;;  %v17906_v8 = vld [vmem:[#allocation26_spill] sm:$0xff] }
 0x8d5   :  { %17902 = vst [vmem:[#allocation146_spill] sm:$0xff] %v14039_v38  ;;  %v5413_v56 = vadd.f32 %v5412_v41, %v14039_v38  ;;  %v5623_v28 = vmul.f32 %v14039_v38, %v14039_v38  ;;  %v4727_v22 = vpop.f32.mrf.mxu2  ;;  %v5726_v41 = vadd.f32 %v5725_v3, %v5608_v61  ;;  %v17905_v38 = vld [vmem:[#allocation31_spill] sm:$0xff] }
 0x8d6   :  { %v4828_v40 = vpop.f32.mrf.mxu0  ;;  %v14061_v50 = vmax.f32 %v5212_v55, 0.0  ;;  %v4728_v62 = vadd.f32 %v4727_v22, %v4639_v43  ;;  %v5447_v20 = vadd.f32 %v5446_v0, %v14042_v15 }
 0x8d7   :  { %v5414_v27 = vrot.slane %v5413_v56, 4  ;;  %v5693_v53 = vadd.f32 %v5692_v60, %v5623_v28  ;;  %v4829_v39 = vadd.f32 %v4828_v40, %v17904_v52  ;;  %v14056_v57 = vpop.f32.mrf.mxu1  ;;  %v5616_v60 = vmul.f32 %v14053_v34, %v14053_v34  ;;  %v17907_v40 = vld [vmem:[#allocation346_spill] sm:$0xff] }
 0x8d8   :  { %v5727_v61 = vadd.f32 %v5726_v41, %v5612_v59 }
 0x8d9   :  { %v5415_v5 = vadd.f32 %v5414_v27, %v5413_v56  ;;  %v5694_v18 = vrot.slane %v5693_v53, 4  ;;  %v4816_v2 = vpop.f32.mrf.mxu3  ;;  %4867 = vmatmul.bf16.gmra.mxu0 %v17905_v38  ;;  %v4918_v58 = vadd.f32 %v13884_v33, %v4829_v39  ;;  %v5448_v56 = vadd.f32 %v5447_v20, %v14053_v34 }
 0x8da   :  { %v4817_v28 = vadd.f32 %v4816_v2, %v4728_v62  ;;  %4966 = vmatmul.bf16.gmra.mxu1 %v17906_v8  ;;  %5045 = vmatmul.bf16.gmra.mxu2 %v17907_v40  ;;  %v5620_v38 = vmul.f32 %v14061_v50, %v14061_v50  ;;  %v5728_v52 = vadd.f32 %v5727_v61, %v5616_v60  ;;  %v17908_v2 = vld [vmem:[#allocation370_spill] sm:$0xff]  ;;  %v17911_v8 = vld [vmem:[#allocation155_spill] sm:$0xff] }
 0x8db   :  { %v5416_v55 = vrot.slane %v5415_v5, 2  ;;  %v5695_v22 = vadd.f32 %v5694_v18, %v5693_v53  ;;  %v5449_v39 = vadd.f32 %v5448_v56, %v14061_v50  ;;  %v17909_v53 = vld [vmem:[#allocation369_spill] sm:$0xff] }
 0x8dc   :  { %v5216_v33 = vadd.f32 %v13496_v47, %v4817_v28  ;;  %v17910_v59 = vpack.c.bf16 %v17908_v2, %v17909_v53 }
 0x8dd   :  { %v5417_v43 = vadd.f32 %v5416_v55, %v5415_v5  ;;  %v5696_v3 = vrot.slane %v5695_v22, 2  ;;  %v5006_v27 = vpop.f32.mrf.mxu2  ;;  %v5729_v5 = vadd.f32 %v5728_v52, %v5620_v38 }
 0x8de   :  { %v14075_v0 = vmax.f32 %v5216_v33, 0.0  ;;  %v14077_v62 = vadd.f32 %v5006_v27, %v4918_v58  ;;  %6491 = vmatmul.bf16.gmra.mxu3 %v17910_v59  ;;  %v4830_v41 = vpop.f32.mrf.mxu0 }
 0x8df   :  { %v5418_v18 = vrot.slane %v5417_v43, 1  ;;  %v5697_v20 = vadd.f32 %v5696_v3, %v5695_v22  ;;  %v4831_v40 = vadd.f32 %v4830_v41, %v17911_v8  ;;  %v14083_v47 = vpop.f32.mrf.mxu1  ;;  %v17912_v8 = vld [vmem:[#allocation284_spill] sm:$0xff] }
 0x8e0   :  { %v5450_v60 = vadd.f32 %v5449_v39, %v14075_v0  ;;  %v5624_v28 = vmul.f32 %v14075_v0, %v14075_v0 }
 0x8e1   :  { %v5419_v55 = vadd.f32 %v5418_v18, %v5417_v43  ;;  %v5698_v58 = vrot.slane %v5697_v20, 1  ;;  %v4920_v61 = vadd.f32 %v13935_v29, %v4831_v40 }
 0x8e2   :  { %v5451_v56 = vrot.slane %v5450_v60, 4  ;;  %v5730_v33 = vadd.f32 %v5729_v5, %v5624_v28 }
 0x8e3   :  { %v14089_v27 = vmul.f32 0.00390625, %v5419_v55  ;;  %v5699_v2 = vadd.f32 %v5698_v58, %v5697_v20 }
 0x8e4   :  { %v5452_v22 = vadd.f32 %v5451_v56, %v5450_v60  ;;  %v5731_v3 = vrot.slane %v5730_v33, 4  ;;  %v17913_v60 = vld [vmem:[#allocation224_spill] sm:$0xff] }
 0x8e5   :  { %v5775_v53 = vmul.f32 0.00390625, %v5699_v2  ;;  %v5779_v38 = vmul.f32 %v14089_v27, %v14089_v27  ;;  %v5008_v52 = vpop.f32.mrf.mxu2  ;;  %v17914_v2 = vld [vmem:[#allocation180_spill] sm:$0xff] }
 0x8e6   :  { %v5453_v39 = vrot.slane %v5452_v22, 2  ;;  %v5732_v59 = vadd.f32 %v5731_v3, %v5730_v33  ;;  %v14093_v41 = vadd.f32 %v5008_v52, %v4920_v61  ;;  %v4833_v43 = vpop.f32.mrf.mxu0  ;;  %v17915_v33 = vld [vmem:[#allocation252_spill] sm:$0xff] }
 0x8e7   :  { %v5783_v18 = vsub.f32 %v5775_v53, %v5779_v38  ;;  %v4834_v29 = vadd.f32 %v4833_v43, %v17912_v8  ;;  %v14096_v40 = vpop.f32.mrf.mxu1  ;;  %v17917_v43 = vld [vmem:[#allocation48_spill] sm:$0xff] }
 0x8e8   :  { %v5454_v5 = vadd.f32 %v5453_v39, %v5452_v22  ;;  %v5733_v28 = vrot.slane %v5732_v59, 2 }
 0x8e9   :  { %v5787_v20 = vmax.f32 %v5783_v18, 0.0  ;;  %4872 = vmatmul.bf16.gmra.mxu0 %v17913_v60  ;;  %v4923_v55 = vadd.f32 %v13978_v11, %v4834_v29  ;;  %v17918_v18 = vld [vmem:[#allocation44_spill] sm:$0xff] }
 0x8ea   :  { %v5455_v58 = vrot.slane %v5454_v5, 1  ;;  %v5734_v56 = vadd.f32 %v5733_v28, %v5732_v59  ;;  %4971 = vmatmul.bf16.gmra.mxu1 %v17914_v2  ;;  %5050 = vmatmul.bf16.gmra.mxu2 %v17915_v33  ;;  %v17919_v8 = vpack.c.bf16 %v17917_v43, %v17918_v18  ;;  %v17920_v59 = vld [vmem:[#allocation35_spill] sm:$0xff] }
 0x8eb   :  { %v5791_v61 = vadd.f32 1e-05, %v5787_v20  ;;  %v17922_v18 = vld [vmem:[#allocation47_spill] sm:$0xff] }
 0x8ec   :  { %v5456_v3 = vadd.f32 %v5455_v58, %v5454_v5  ;;  %v5735_v53 = vrot.slane %v5734_v56, 1 }
 0x8ed   :  { %8514 = vrsqrt.f32 %v5791_v61  ;;  %v5011_v38 = vpop.f32.mrf.mxu2  ;;  %vm5810_vm5 = vweird.f32 %v5791_v61 }
 0x8ee   :  { %v14102_v52 = vmul.f32 0.00390625, %v5456_v3  ;;  %v5736_v22 = vadd.f32 %v5735_v53, %v5734_v56  ;;  %v14104_v39 = vadd.f32 %v5011_v38, %v4923_v55  ;;  %6496 = vmatmul.bf16.gmra.mxu3 %v17919_v8  ;;  %v4835_v11 = vpop.f32.mrf.mxu0 }
 0x8ef   :  { %v4836_v29 = vadd.f32 %v4835_v11, %v17920_v59  ;;  %v14110_v28 = vpop.f32.mrf.mxu1  ;;  %v17923_v59 = vld [vmem:[#allocation39_spill] sm:$0xff] }
 0x8f0   :  { %17916 = vst [vmem:[#allocation331_spill] sm:$0xff] %v14104_v39  ;;  %v5776_v60 = vmul.f32 0.00390625, %v5736_v22  ;;  %v5780_v5 = vmul.f32 %v14102_v52, %v14102_v52  ;;  %v17937_v39 = vld [vmem:[#allocation358_spill] sm:$0xff] }
 0x8f1   :  { %v4925_v20 = vadd.f32 %v14023_v44, %v4836_v29 }
 0x8f2   :  { %v5784_v58 = vsub.f32 %v5776_v60, %v5780_v5  ;;  %v17924_v60 = vld [vmem:[#allocation231_spill] sm:$0xff]  ;;  %v17925_v5 = vld [vmem:[#allocation357_spill] sm:$0xff] }
 0x8f3   :  { %v8515_v2 = vpop.eup %8514 }
 0x8f4   :  { %v5805_v56 = vmul.f32 %v8515_v2, %v5791_v61  ;;  %v5788_v55 = vmax.f32 %v5784_v58, 0.0  ;;  %vm5811_vm4 = vweird.f32 %v8515_v2  ;;  %v8470_v61 = vld [vmem:[%s16018_s3 + $0x78] sm:$0xff] }
 0x8f5   :  { %v5013_v33 = vpop.f32.mrf.mxu2  ;;  %vm5812_vm6 = vmor %vm5810_vm5, %vm5811_vm4  ;;  %6532 = vmatpush.bf16.msra.mxu0 %v8470_v61 }
 0x8f6   :  { %v5806_v3 = vmul.f32 %v8515_v2, %v5805_v56  ;;  %v5792_v53 = vadd.f32 1e-05, %v5788_v55  ;;  %v14115_v38 = vadd.f32 %v5013_v33, %v4925_v20  ;;  %v4838_v43 = vpop.f32.mrf.mxu0  ;;  %v8486_v20 = vld [vmem:[%s16018_s3 + $0xf8] sm:$0xff] }
 0x8f7   :  { %v4839_v8 = vadd.f32 %v4838_v43, %v17922_v18  ;;  %v14118_v11 = vpop.f32.mrf.mxu1  ;;  %6710 = vmatpush.bf16.msra.mxu2 %v8486_v20  ;;  %v17928_v43 = vld [vmem:[#allocation371_spill] sm:$0xff] }
 0x8f8   :  { %17921 = vst [vmem:[#allocation332_spill] sm:$0xff] %v14115_v38  ;;  %v5807_v22 = vmul.f32 0.5, %v5806_v3  ;;  %8516 = vrsqrt.f32 %v5792_v53  ;;  %vm5820_vm8 = vweird.f32 %v5792_v53 }
 0x8f9   :  { %4877 = vmatmul.bf16.gmra.mxu0 %v17923_v59  ;;  %v4928_v44 = vadd.f32 %v14056_v57, %v4839_v8  ;;  %v17927_v57 = vld [vmem:[#allocation222_spill] sm:$0xff] }
 0x8fa   :  { %v5808_v29 = vsub.f32 1.5, %v5807_v22  ;;  %4976 = vmatmul.bf16.gmra.mxu1 %v17924_v60  ;;  %5055 = vmatmul.bf16.gmra.mxu2 %v17925_v5  ;;  %v17929_v18 = vpack.c.bf16 %v17927_v57, %v17928_v43  ;;  %v17930_v22 = vld [vmem:[#allocation112_spill] sm:$0xff]  ;;  %v17931_v60 = vld [vmem:[#allocation45_spill] sm:$0xff]  ;;  %v8477_v57 = vld [vmem:[%s16018_s3 + $0xb0] sm:$0xff] }
 0x8fc   :  { %v5809_v58 = vmul.f32 %v8515_v2, %v5808_v29 }
 0x8fd   :  { %v5016_v56 = vpop.f32.mrf.mxu2 }
 0x8fe   :  { %v8517_v55 = vpop.eup %8516  ;;  %v5813_v33 = vsel %vm5812_vm6, %v8515_v2, %v5809_v58  ;;  %v14127_v3 = vadd.f32 %v5016_v56, %v4928_v44  ;;  %6501 = vmatmul.bf16.gmra.mxu3 %v17929_v18  ;;  %v4840_v8 = vpop.f32.mrf.mxu0  ;;  %v8478_v2 = vld [vmem:[%s16018_s3 + $0xb8] sm:$0xff] }
 0x8ff   :  { %v5835_v59 = vmul.f32 %v5813_v33, %v17930_v22  ;;  %v4841_v5 = vadd.f32 %v4840_v8, %v17931_v60  ;;  %v14134_v38 = vpop.f32.mrf.mxu1  ;;  %v5815_v29 = vmul.f32 %v8517_v55, %v5792_v53  ;;  %6621 = vmatpush.bf16.msra.mxu1 %v8478_v2  ;;  %v14154_v60 = vpop.f32.mrf.mxu3  ;;  %v17935_v2 = vld [vmem:[#allocation78_spill] sm:$0xff]  ;;  %vm5821_vm7 = vweird.f32 %v8517_v55 }
 0x900   :  { %17926 = vst [vmem:[#allocation67_spill] sm:$0xff] %v14127_v3  ;;  %vm5822_vm9 = vmor %vm5820_vm8, %vm5821_vm7 }
 0x901   :  { %v4930_v44 = vadd.f32 %v14083_v47, %v4841_v5  ;;  %v14143_v20 = vperm.slane %v5835_v59, 1  ;;  %v5816_v58 = vmul.f32 %v8517_v55, %v5815_v29  ;;  %17932 = vst [vmem:[#allocation70_spill] sm:$0xff] %v14154_v60  ;;  %v8476_v5 = vld [vmem:[%s16018_s3 + $0xa8] sm:$0xff]  ;;  %v17934_v29 = vld [vmem:[#allocation23_spill] sm:$0xff] }
 0x903   :  { %v14150_v43 = vmul.f32 %v14143_v20, %v14008_v14  ;;  %v5817_v8 = vmul.f32 0.5, %v5816_v58  ;;  %6622 = vmatpush.bf16.msra.mxu1 %v8477_v57  ;;  %v17936_v14 = vld [vmem:[#allocation215_spill] sm:$0xff] }
 0x905   :  { %v5018_v56 = vpop.f32.mrf.mxu2  ;;  %v5818_v3 = vsub.f32 1.5, %v5817_v8 }
 0x906   :  { %v4843_v33 = vpop.f32.mrf.mxu0  ;;  %v14156_v47 = vadd.f32 %v5018_v56, %v4930_v44 }
 0x907   :  { %v14152_v18 = vpop.f32.mrf.mxu1  ;;  %v4844_v61 = vadd.f32 %v4843_v33, %v17934_v29  ;;  %v5819_v60 = vmul.f32 %v8517_v55, %v5818_v3  ;;  %6623 = vmatpush.bf16.msra.mxu1 %v8476_v5  ;;  %v17940_v33 = vld [vmem:[#allocation226_spill] sm:$0xff]  ;;  %v14183_v5 = vpop.f32.mrf.mxu3 }
 0x908   :  { %17933 = vst [vmem:[#allocation80_spill] sm:$0xff] %v14156_v47  ;;  %v17939_v47 = vld [vmem:[#allocation287_spill] sm:$0xff] }
 0x909   :  { %4882 = vmatmul.bf16.gmra.mxu0 %v17935_v2  ;;  %v4933_v58 = vadd.f32 %v14096_v40, %v4844_v61  ;;  %v5823_v56 = vsel %vm5822_vm9, %v8517_v55, %v5819_v60  ;;  %v17941_v29 = vpack.c.bf16 %v17939_v47, %v17940_v33  ;;  %v8475_v2 = vld [vmem:[%s16018_s3 + $0xa0] sm:$0xff]  ;;  %v17943_v40 = vld [vmem:[#allocation147_spill] sm:$0xff]  ;;  %v8474_v55 = vld [vmem:[%s16018_s3 + $0x98] sm:$0xff]  ;;  %17944 = vst [vmem:[#allocation21_spill] sm:$0xff] %v14183_v5 }
 0x90a   :  { %4981 = vmatmul.bf16.gmra.mxu1 %v17936_v14  ;;  %5060 = vmatmul.bf16.gmra.mxu2 %v17937_v39  ;;  %v17942_v39 = vld [vmem:[#allocation113_spill] sm:$0xff]  ;;  %v5839_v61 = vmul.f32 %v5835_v59, %v14089_v27  ;;  %v8468_v5 = vld [vmem:[%s16018_s3 + $0x68] sm:$0xff] }
 0x90b   :  { %v5836_v14 = vmul.f32 %v5823_v56, %v17942_v39  ;;  %6624 = vmatpush.bf16.msra.mxu1 %v8475_v2 }
 0x90d   :  { %v5021_v44 = vpop.f32.mrf.mxu2  ;;  %v5840_v60 = vmul.f32 %v5836_v14, %v14102_v52  ;;  %v8485_v52 = vld [vmem:[%s16018_s3 + $0xf0] sm:$0xff] }
 0x90e   :  { %v14166_v57 = vadd.f32 %v5021_v44, %v4933_v58  ;;  %6506 = vmatmul.bf16.gmra.mxu3 %v17941_v29  ;;  %v4845_v8 = vpop.f32.mrf.mxu0  ;;  %v14186_v44 = vperm.slane %v5836_v14, 1  ;;  %v17946_v14 = vld [vmem:[#allocation216_spill] sm:$0xff]  ;;  %6711 = vmatpush.bf16.msra.mxu2 %v8485_v52  ;;  %v5911_v52 = vmul.f32 %v14143_v20, %v13705_v35  ;;  %v17952_v35 = vld [vmem:[#allocation158_spill] sm:$0xff] }
 0x90f   :  { %v4846_v3 = vadd.f32 %v4845_v8, %v17943_v40  ;;  %v14176_v53 = vpop.f32.mrf.mxu1  ;;  %v5848_v58 = vrot.slane %v5840_v60, 7  ;;  %6625 = vmatpush.bf16.msra.mxu1 %v8474_v55  ;;  %v8473_v8 = vld [vmem:[%s16018_s3 + $0x90] sm:$0xff]  ;;  %v17947_v60 = vld [vmem:[#allocation212_spill] sm:$0xff] }
 0x910   :  { %17938 = vst [vmem:[#allocation83_spill] sm:$0xff] %v14166_v57  ;;  %v14197_v27 = vmul.f32 %v14186_v44, %v14061_v50  ;;  %v17949_v50 = vld [vmem:[#allocation359_spill] sm:$0xff] }
 0x911   :  { %v4935_v47 = vadd.f32 %v14110_v28, %v4846_v3  ;;  %v5856_v56 = vsub.f32 %v17942_v39, %v5848_v58  ;;  %v5847_v28 = vrot.slane %v5839_v61, 7  ;;  %v8472_v3 = vld [vmem:[%s16018_s3 + $0x88] sm:$0xff] }
 0x912   :  { %v17948_v61 = vld [vmem:[#allocation362_spill] sm:$0xff] }
 0x913   :  { %6626 = vmatpush.bf16.msra.mxu1 %v8473_v8  ;;  %v14207_v55 = vperm.slane %v5856_v56, 2  ;;  %v5855_v58 = vsub.f32 %v17930_v22, %v5847_v28  ;;  %v14218_v8 = vpop.f32.mrf.mxu3  ;;  %v5903_v56 = vmul.f32 %v14143_v20, %v13676_v10  ;;  %v5900_v28 = vmul.f32 %v14186_v44, %v13682_v24 }
 0x914   :  { %17950 = vst [vmem:[#allocation84_spill] sm:$0xff] %v14218_v8  ;;  %v14237_v10 = vmul.f32 %v14143_v20, %v13813_v45  ;;  %v14254_v45 = vmul.f32 %v14143_v20, %v13858_v42 }
 0x915   :  { %v5023_v33 = vpop.f32.mrf.mxu2 }
 0x916   :  { %v4848_v29 = vpop.f32.mrf.mxu0  ;;  %v14201_v2 = vadd.f32 %v5023_v33, %v4935_v47  ;;  %v5896_v47 = vmul.f32 %v14186_v44, %v13659_v12 }
 0x917   :  { %v14199_v59 = vpop.f32.mrf.mxu1  ;;  %v4849_v40 = vadd.f32 %v4848_v29, %v17946_v14  ;;  %v5895_v29 = vmul.f32 %v14143_v20, %v13634_v6  ;;  %6627 = vmatpush.bf16.msra.mxu1 %v8472_v3  ;;  %v14233_v6 = vmul.f32 %v14143_v20, %v13781_v31  ;;  %v17953_v3 = vld [vmem:[#allocation283_spill] sm:$0xff]  ;;  %v14250_v31 = vperm.slane %v5855_v58, 2 }
 0x918   :  { %17945 = vst [vmem:[#allocation81_spill] sm:$0xff] %v14201_v2  ;;  %v14227_v12 = vadd.f32 %v14207_v55, %v5896_v47  ;;  %v5904_v58 = vmul.f32 %v14186_v44, %v13694_v36  ;;  %v5908_v36 = vmul.f32 %v14186_v44, %v13727_v25 }
 0x919   :  { %4887 = vmatmul.bf16.gmra.mxu0 %v17947_v60  ;;  %v4938_v33 = vadd.f32 %v14118_v11, %v4849_v40  ;;  %v5919_v11 = vmul.f32 %v14143_v20, %v13744_v13  ;;  %v17954_v60 = vpack.c.bf16 %v17952_v35, %v17953_v3  ;;  %v8471_v13 = vld [vmem:[%s16018_s3 + $0x80] sm:$0xff]  ;;  %v14264_v35 = vmul.f32 %v14143_v20, %v13894_v4 }
 0x91a   :  { %4986 = vmatmul.bf16.gmra.mxu1 %v17948_v61  ;;  %5065 = vmatmul.bf16.gmra.mxu2 %v17949_v50  ;;  %v8469_v61 = vld [vmem:[%s16018_s3 + $0x70] sm:$0xff]  ;;  %v17955_v50 = vld [vmem:[#allocation276_spill] sm:$0xff]  ;;  %v14268_v3 = vmul.f32 %v14143_v20, %v13920_v9  ;;  %v5907_v4 = vmul.f32 %v14143_v20, %v13691_v19  ;;  %v5912_v9 = vmul.f32 %v14186_v44, %v13741_v17 }
 0x91b   :  { %6533 = vmatpush.bf16.msra.mxu0 %v8469_v61  ;;  %6628 = vmatpush.bf16.msra.mxu1 %v8471_v13  ;;  %v14291_v13 = vadd.f32 %v14250_v31, %v5895_v29  ;;  %v17961_v29 = vld [vmem:[#allocation330_spill] sm:$0xff]  ;;  %v14325_v8 = vpop.f32.mrf.mxu3 }
 0x91c   :  { %v5931_v39 = vmul.f32 %v14143_v20, %v17961_v29  ;;  %17966 = vst [vmem:[#allocation86_spill] sm:$0xff] %v14325_v8 }
 0x91d   :  { %v5026_v14 = vpop.f32.mrf.mxu2 }
 0x91e   :  { %v14239_v40 = vadd.f32 %v5026_v14, %v4938_v33  ;;  %6511 = vmatmul.bf16.gmra.mxu3 %v17954_v60  ;;  %v4850_v24 = vpop.f32.mrf.mxu0  ;;  %v14260_v14 = vadd.f32 %v14207_v55, %v5900_v28  ;;  %v5899_v60 = vmul.f32 %v14143_v20, %v13645_v1  ;;  %v17960_v28 = vld [vmem:[#allocation77_spill] sm:$0xff] }
 0x91f   :  { %v4851_v47 = vadd.f32 %v4850_v24, %v17955_v50  ;;  %v14257_v33 = vpop.f32.mrf.mxu1  ;;  %v14286_v24 = vadd.f32 %v14207_v55, %v5904_v58  ;;  %v17958_v50 = vld [vmem:[#allocation63_spill] sm:$0xff]  ;;  %v5920_v25 = vmul.f32 %v14186_v44, %v17960_v28  ;;  %v14303_v58 = vadd.f32 %v14207_v55, %v5908_v36  ;;  %v17965_v36 = vld [vmem:[#allocation232_spill] sm:$0xff]  ;;  %6534 = vmatpush.bf16.msra.mxu0 %v8468_v5  ;;  %v17977_v5 = vld [vmem:[#allocation66_spill] sm:$0xff] }
 0x920   :  { %17951 = vst [vmem:[#allocation27_spill] sm:$0xff] %v14239_v40  ;;  %v14294_v1 = vadd.f32 %v14250_v31, %v5899_v60  ;;  %v5916_v19 = vmul.f32 %v14186_v44, %v17958_v50  ;;  %v14321_v28 = vadd.f32 %v14250_v31, %v5907_v4  ;;  %v17967_v50 = vld [vmem:[#allocation37_spill] sm:$0xff]  ;;  %v17968_v40 = vld [vmem:[#allocation210_spill] sm:$0xff] }
 0x921   :  { %v14273_v42 = vadd.f32 %v14134_v38, %v4851_v47  ;;  %v17957_v38 = vld [vmem:[#allocation59_spill] sm:$0xff]  ;;  %v17959_v47 = vld [vmem:[#allocation74_spill] sm:$0xff]  ;;  %v5939_v4 = vmul.f32 %v14143_v20, %v17968_v40  ;;  %v14344_v57 = vadd.f32 %v14207_v55, %v5920_v25  ;;  %v14352_v40 = vadd.f32 %v14250_v31, %v5911_v52  ;;  %v17978_v52 = vld [vmem:[#allocation184_spill] sm:$0xff] }
 0x922   :  { %v5915_v61 = vmul.f32 %v14143_v20, %v17957_v38  ;;  %v5923_v17 = vmul.f32 %v14143_v20, %v17959_v47  ;;  %v14306_v38 = vadd.f32 %v14207_v55, %v5912_v9  ;;  %v14315_v22 = vadd.f32 %v14207_v55, %v5916_v19  ;;  %17964 = vst [vmem:[#allocation76_spill] sm:$0xff] %v14321_v28 }
 0x923   :  { %17956 = vst [vmem:[#allocation333_spill] sm:$0xff] %v14273_v42  ;;  %v14318_v47 = vadd.f32 %v14250_v31, %v5903_v56  ;;  %v5928_v9 = vmul.f32 %v14186_v44, %v17965_v36  ;;  %v5924_v56 = vmul.f32 %v14186_v44, %v17967_v50  ;;  %v5936_v19 = vmul.f32 %v14186_v44, %v13854_v21  ;;  %v17975_v36 = vld [vmem:[#allocation206_spill] sm:$0xff] }
 0x924   :  { %17970 = vst [vmem:[#allocation89_spill] sm:$0xff] %v14344_v57  ;;  %v5932_v25 = vmul.f32 %v14186_v44, %v17975_v36  ;;  %v14365_v21 = vadd.f32 %v14250_v31, %v5919_v11  ;;  %v17979_v11 = vld [vmem:[#allocation271_spill] sm:$0xff]  ;;  %v17984_v57 = vld [vmem:[#allocation162_spill] sm:$0xff] }
 0x925   :  { %v14310_v60 = vpop.f32.mrf.mxu2  ;;  %17963 = vst [vmem:[#allocation73_spill] sm:$0xff] %v14318_v47  ;;  %v14349_v50 = vadd.f32 %v14207_v55, %v5924_v56  ;;  %v14362_v47 = vadd.f32 %v14207_v55, %v5928_v9  ;;  %v14379_v9 = vadd.f32 %v14250_v31, %v5923_v17  ;;  %v5940_v36 = vmul.f32 %v14186_v44, %v17979_v11 }
 0x926   :  { %17962 = vst [vmem:[#allocation334_spill] sm:$0xff] %v14310_v60  ;;  %v4853_v29 = vpop.f32.mrf.mxu0  ;;  %v17969_v60 = vld [vmem:[#allocation12_spill] sm:$0xff] }
 0x927   :  { %v4854_v42 = vadd.f32 %v4853_v29, %v17969_v60  ;;  %v14337_v2 = vpop.f32.mrf.mxu1  ;;  %17971 = vst [vmem:[#allocation13_spill] sm:$0xff] %v14349_v50  ;;  %v14355_v60 = vadd.f32 %v14250_v31, %v5915_v61  ;;  %v17974_v29 = vld [vmem:[#allocation51_spill] sm:$0xff] }
 0x928   :  { %17972 = vst [vmem:[#allocation335_spill] sm:$0xff] %v14352_v40  ;;  %v17981_v61 = vld [vmem:[#allocation267_spill] sm:$0xff]  ;;  %v14402_v40 = vadd.f32 %v14207_v55, %v5940_v36 }
 0x929   :  { %17973 = vst [vmem:[#allocation373_spill] sm:$0xff] %v14355_v60  ;;  %4892 = vmatmul.bf16.gmra.mxu0 %v17974_v29  ;;  %v4943_v8 = vadd.f32 %v14152_v18, %v4854_v42  ;;  %v5947_v18 = vmul.f32 %v14143_v20, %v13873_v48  ;;  %v14376_v42 = vadd.f32 %v14207_v55, %v5932_v25 }
 0x92a   :  { %17976 = vst [vmem:[#allocation220_spill] sm:$0xff] %v14365_v21  ;;  %4991 = vmatmul.bf16.gmra.mxu1 %v17977_v5  ;;  %5070 = vmatmul.bf16.gmra.mxu2 %v17978_v52  ;;  %v14384_v29 = vadd.f32 %v14207_v55, %v5936_v19  ;;  %v17980_v5 = vld [vmem:[#allocation279_spill] sm:$0xff]  ;;  %v5944_v56 = vmul.f32 %v14186_v44, %v17981_v61  ;;  %v8467_v19 = vld [vmem:[%s16018_s3 + $0x60] sm:$0xff] }
 0x92b   :  { %v5864_v52 = vmul.f32 %v14186_v44, %v17980_v5  ;;  %v14392_v48 = vadd.f32 %v14250_v31, %v14233_v6  ;;  %v14395_v25 = vadd.f32 %v14250_v31, %v5931_v39  ;;  %v17982_v5 = vld [vmem:[#allocation142_spill] sm:$0xff]  ;;  %v5952_v6 = vmul.f32 %v14186_v44, %v13915_v23  ;;  %v17983_v39 = vld [vmem:[#allocation361_spill] sm:$0xff]  ;;  %6535 = vmatpush.bf16.msra.mxu0 %v8467_v19 }
 0x92c   :  { %v5948_v61 = vmul.f32 %v14186_v44, %v17982_v5  ;;  %v17985_v50 = vpack.c.bf16 %v17983_v39, %v17984_v57  ;;  %v14419_v11 = vadd.f32 %v14207_v55, %v5944_v56  ;;  %v17987_v5 = vld [vmem:[#allocation30_spill] sm:$0xff]  ;;  %v14435_v39 = vpop.f32.mrf.mxu3  ;;  %v14441_v56 = vadd.f32 %v14250_v31, %v5939_v4 }
 0x92d   :  { %v5031_v17 = vpop.f32.mrf.mxu2  ;;  %17989 = vst [vmem:[#allocation198_spill] sm:$0xff] %v14435_v39  ;;  %v14455_v19 = vadd.f32 %v14250_v31, %v14254_v45  ;;  %v14458_v36 = vadd.f32 %v14250_v31, %v5947_v18  ;;  %v17994_v4 = vld [vmem:[#allocation218_spill] sm:$0xff]  ;;  %v5964_v45 = vmul.f32 %v14186_v44, %v14002_v49 }
 0x92e   :  { %v14408_v60 = vadd.f32 %v5031_v17, %v4943_v8  ;;  %6516 = vmatmul.bf16.gmra.mxu3 %v17985_v50  ;;  %v4855_v28 = vpop.f32.mrf.mxu0  ;;  %17986 = vst [vmem:[#allocation79_spill] sm:$0xff] %v14419_v11  ;;  %v14427_v57 = vadd.f32 %v14207_v55, %v5948_v61  ;;  %v14431_v50 = vadd.f32 %v14250_v31, %v14237_v10 }
 0x92f   :  { %v4856_v21 = vadd.f32 %v4855_v28, %v17987_v5  ;;  %v14422_v23 = vpop.f32.mrf.mxu1  ;;  %v5960_v17 = vmul.f32 %v14186_v44, %v13992_v63  ;;  %v8466_v28 = vld [vmem:[%s16018_s3 + $0x58] sm:$0xff]  ;;  %17990 = vst [vmem:[#allocation202_spill] sm:$0xff] %v14441_v56  ;;  %v5956_v61 = vmul.f32 %v14186_v44, %v13947_v54  ;;  %v14446_v5 = vadd.f32 %v14207_v55, %v5952_v6 }
 0x930   :  { %17988 = vst [vmem:[#allocation82_spill] sm:$0xff] %v14431_v50  ;;  %v5868_v8 = vmul.f32 %v14186_v44, %v17994_v4  ;;  %v5968_v54 = vmul.f32 %v14186_v44, %v14014_v32  ;;  %v5955_v4 = vmul.f32 %v14143_v20, %v13910_v51  ;;  %v5996_v32 = vadd.f32 %v14207_v55, %v5864_v52 }
 0x931   :  { %17991 = vst [vmem:[#allocation263_spill] sm:$0xff] %v14446_v5  ;;  %v14449_v10 = vadd.f32 %v14176_v53, %v4856_v21  ;;  %v14467_v21 = vadd.f32 %v14207_v55, %v5956_v61  ;;  %v14474_v18 = vadd.f32 %v14207_v55, %v5960_v17  ;;  %6536 = vmatpush.bf16.msra.mxu0 %v8466_v28 }
 0x932   :  { %17992 = vst [vmem:[#allocation259_spill] sm:$0xff] %v14455_v19  ;;  %v6000_v63 = vadd.f32 %v14207_v55, %v5868_v8  ;;  %v14484_v6 = vadd.f32 %v14250_v31, %v14264_v35  ;;  %v14489_v49 = vadd.f32 %v14207_v55, %v5964_v45  ;;  %v14492_v17 = vadd.f32 %v14250_v31, %v5955_v4  ;;  %v8465_v45 = vld [vmem:[%s16018_s3 + $0x50] sm:$0xff]  ;;  %v8484_v4 = vld [vmem:[%s16018_s3 + $0xe8] sm:$0xff] }
 0x933   :  { %17993 = vst [vmem:[#allocation134_spill] sm:$0xff] %v14458_v36  ;;  %v5972_v51 = vmul.f32 %v14186_v44, %v14027_v7  ;;  %v14497_v52 = vadd.f32 %v14207_v55, %v5968_v54  ;;  %v5967_v8 = vmul.f32 %v14143_v20, %v13962_v30  ;;  %v5976_v35 = vmul.f32 %v14186_v44, %v14042_v15  ;;  %v18002_v30 = vld [vmem:[#allocation90_spill] sm:$0xff] }
 0x934   :  { %17995 = vst [vmem:[#allocation138_spill] sm:$0xff] %v14467_v21  ;;  %v5963_v7 = vmul.f32 %v14143_v20, %v13952_v26  ;;  %v14513_v54 = vadd.f32 %v14250_v31, %v14268_v3  ;;  %v6124_v5 = vpack.c.bf16 %v6000_v63, %v5996_v32  ;;  %v8464_v26 = vld [vmem:[%s16018_s3 + $0x48] sm:$0xff]  ;;  %6712 = vmatpush.bf16.msra.mxu2 %v8484_v4  ;;  %v14544_v4 = vpop.f32.mrf.mxu3 }
 0x935   :  { %17996 = vst [vmem:[#allocation92_spill] sm:$0xff] %v14474_v18  ;;  %v14486_v53 = vpop.f32.mrf.mxu2  ;;  %v14523_v36 = vadd.f32 %v14207_v55, %v5972_v51  ;;  %6537 = vmatpush.bf16.msra.mxu0 %v8465_v45  ;;  %v14538_v63 = vadd.f32 %v14207_v55, %v5976_v35  ;;  %v5971_v32 = vmul.f32 %v14143_v20, %v13974_v16  ;;  %v18021_v15 = vld [vmem:[#allocation38_spill] sm:$0xff]  ;;  %v18067_v18 = vld [vmem:[#allocation333_spill] sm:$0xff] }
 0x936   :  { %17997 = vst [vmem:[#allocation94_spill] sm:$0xff] %v14484_v6  ;;  %v4858_v28 = vpop.f32.mrf.mxu0  ;;  %v14529_v3 = vadd.f32 %v14250_v31, %v5963_v7  ;;  %v5975_v45 = vmul.f32 %v14143_v20, %v13988_v37  ;;  %v18008_v7 = vld [vmem:[#allocation227_spill] sm:$0xff]  ;;  %v5988_v16 = vmul.f32 %v14186_v44, %v14075_v0  ;;  %v14562_v37 = vadd.f32 %v14207_v55, %v14197_v27 }
 0x937   :  { %17998 = vst [vmem:[#allocation338_spill] sm:$0xff] %v14489_v49  ;;  %v4859_v61 = vadd.f32 %v4858_v28, %v18002_v30  ;;  %v14516_v39 = vpop.f32.mrf.mxu1  ;;  %v5980_v28 = vmul.f32 %v14186_v44, %v14053_v34  ;;  %v18005_v30 = vld [vmem:[#allocation65_spill] sm:$0xff]  ;;  %v14556_v35 = vadd.f32 %v14250_v31, %v5971_v32  ;;  %v18016_v34 = vld [vmem:[#allocation52_spill] sm:$0xff]  ;;  %v18068_v49 = vld [vmem:[#allocation334_spill] sm:$0xff] }
 0x938   :  { %17999 = vst [vmem:[#allocation288_spill] sm:$0xff] %v14492_v17  ;;  %v14571_v32 = vadd.f32 %v14207_v55, %v5988_v16  ;;  %v14574_v0 = vadd.f32 %v14250_v31, %v5975_v45  ;;  %v14591_v45 = vadd.f32 %v14250_v31, %v14150_v43  ;;  %v18027_v43 = vld [vmem:[#allocation139_spill] sm:$0xff]  ;;  %v5029_v21 = vadd.f32 %v18068_v49, %v18067_v18 }
 0x939   :  { %18000 = vst [vmem:[#allocation339_spill] sm:$0xff] %v14497_v52  ;;  %4897 = vmatmul.bf16.gmra.mxu0 %v18005_v30  ;;  %v4948_v19 = vadd.f32 %v14199_v59, %v4859_v61  ;;  %v14550_v59 = vadd.f32 %v14207_v55, %v5980_v28  ;;  %v14553_v61 = vadd.f32 %v14250_v31, %v5967_v8  ;;  %v8463_v8 = vld [vmem:[%s16018_s3 + $0x40] sm:$0xff]  ;;  %v18040_v52 = vld [vmem:[#allocation320_spill] sm:$0xff] }
 0x93a   :  { %18001 = vst [vmem:[#allocation43_spill] sm:$0xff] %v14513_v54  ;;  %5075 = vmatmul.bf16.gmra.mxu2 %v18008_v7  ;;  %6629 = vmatmul.bf16.vlgmr.msra.gmra.mxu1 %v6124_v5  ;;  %v5979_v28 = vmul.f32 %v14143_v20, %v14000_v46  ;;  %v18015_v7 = vld [vmem:[#allocation146_spill] sm:$0xff]  ;;  %v18017_v5 = vld [vmem:[#allocation49_spill] sm:$0xff] }
 0x93b   :  { %18003 = vst [vmem:[#allocation85_spill] sm:$0xff] %v14523_v36  ;;  %6538 = vmatpush.bf16.msra.mxu0 %v8464_v26  ;;  %v5987_v27 = vmul.f32 %v14143_v20, %v18015_v7  ;;  %v18018_v51 = vpack.c.bf16 %v18016_v34, %v18017_v5  ;;  %v5871_v36 = vmul.f32 %v14143_v20, %v18040_v52 }
 0x93c   :  { %18004 = vst [vmem:[#allocation88_spill] sm:$0xff] %v14529_v3  ;;  %v14587_v16 = vadd.f32 %v14250_v31, %v5979_v28  ;;  %v18023_v28 = vld [vmem:[#allocation150_spill] sm:$0xff]  ;;  %v18039_v3 = vld [vmem:[#allocation323_spill] sm:$0xff] }
 0x93d   :  { %18006 = vst [vmem:[#allocation96_spill] sm:$0xff] %v14538_v63  ;;  %v5036_v30 = vpop.f32.mrf.mxu2 }
 0x93e   :  { %18007 = vst [vmem:[#allocation98_spill] sm:$0xff] %v14544_v4  ;;  %v14578_v26 = vadd.f32 %v5036_v30, %v4948_v19  ;;  %6521 = vmatmul.bf16.gmra.mxu3 %v18018_v51  ;;  %v4860_v46 = vpop.f32.mrf.mxu0  ;;  %v14597_v51 = vadd.f32 %v14250_v31, %v5987_v27  ;;  %v14610_v30 = vpop.f32.mrf.mxu3  ;;  %v18066_v4 = vld [vmem:[#allocation81_spill] sm:$0xff] }
 0x93f   :  { %18009 = vst [vmem:[#allocation374_spill] sm:$0xff] %v14550_v59  ;;  %v4861_v7 = vadd.f32 %v4860_v46, %v18021_v15  ;;  %v4959_v19 = vpop.f32.mrf.mxu1  ;;  %6539 = vmatpush.bf16.msra.mxu0 %v8463_v8  ;;  %v5872_v15 = vmul.f32 %v14186_v44, %v18023_v28  ;;  %v18024_v46 = vld [vmem:[#allocation68_spill] sm:$0xff] }
 0x940   :  { %18010 = vst [vmem:[#allocation375_spill] sm:$0xff] %v14553_v61  ;;  %v5876_v61 = vmul.f32 %v14186_v44, %v18024_v46 }
 0x941   :  { %18011 = vst [vmem:[#allocation91_spill] sm:$0xff] %v14556_v35  ;;  %v14602_v5 = vadd.f32 %v14257_v33, %v4861_v7  ;;  %v6004_v27 = vadd.f32 %v14207_v55, %v5872_v15  ;;  %v18026_v33 = vld [vmem:[#allocation204_spill] sm:$0xff] }
 0x942   :  { %18012 = vst [vmem:[#allocation93_spill] sm:$0xff] %v14562_v37  ;;  %v6008_v8 = vadd.f32 %v14207_v55, %v5876_v61  ;;  %v18030_v61 = vld [vmem:[#allocation363_spill] sm:$0xff] }
 0x943   :  { %18013 = vst [vmem:[#allocation190_spill] sm:$0xff] %v14571_v32  ;;  %v18031_v32 = vld [vmem:[#allocation56_spill] sm:$0xff] }
 0x944   :  { %18014 = vst [vmem:[#allocation194_spill] sm:$0xff] %v14574_v0  ;;  %v18032_v35 = vpack.c.bf16 %v18030_v61, %v18031_v32 }
 0x945   :  { %18019 = vst [vmem:[#allocation255_spill] sm:$0xff] %v14587_v16  ;;  %v14614_v37 = vpop.f32.mrf.mxu2  ;;  %v6128_v16 = vpack.c.bf16 %v6008_v8, %v6004_v27  ;;  %v18034_v8 = vld [vmem:[#allocation64_spill] sm:$0xff] }
 0x946   :  { %18020 = vst [vmem:[#allocation251_spill] sm:$0xff] %v14591_v45  ;;  %v4863_v34 = vpop.f32.mrf.mxu0  ;;  %v18028_v45 = vld [vmem:[#allocation211_spill] sm:$0xff] }
 0x947   :  { %18022 = vst [vmem:[#allocation100_spill] sm:$0xff] %v14597_v51  ;;  %v4864_v7 = vadd.f32 %v4863_v34, %v18026_v33  ;;  %v4962_v0 = vpop.f32.mrf.mxu1  ;;  %v14620_v51 = vpop.f32.mrf.mxu3  ;;  %v18033_v34 = vld [vmem:[#allocation208_spill] sm:$0xff] }
 0x948   :  { %18025 = vst [vmem:[#allocation102_spill] sm:$0xff] %v14610_v30 }
 0x949   :  { %4902 = vmatmul.bf16.gmra.mxu0 %v18027_v43  ;;  %v4953_v28 = vadd.f32 %v14337_v2, %v4864_v7  ;;  %18029 = vst [vmem:[#allocation126_spill] sm:$0xff] %v14620_v51  ;;  %v5863_v43 = vmul.f32 %v14143_v20, %v18034_v8  ;;  %v18035_v2 = vld [vmem:[#allocation60_spill] sm:$0xff]  ;;  %v18036_v7 = vld [vmem:[#allocation15_spill] sm:$0xff] }
 0x94a   :  { %5080 = vmatmul.bf16.gmra.mxu2 %v18028_v45  ;;  %6634 = vmatmul.bf16.gmra.mxu1 %v6128_v16  ;;  %v5867_v45 = vmul.f32 %v14143_v20, %v18035_v2 }
 0x94d   :  { %v5041_v46 = vpop.f32.mrf.mxu2 }
 0x94e   :  { %v14622_v15 = vadd.f32 %v5041_v46, %v4953_v28  ;;  %6526 = vmatmul.bf16.gmra.mxu3 %v18032_v35  ;;  %v4865_v63 = vpop.f32.mrf.mxu0  ;;  %v5880_v28 = vmul.f32 %v14186_v44, %v18036_v7  ;;  %v18037_v46 = vld [vmem:[#allocation326_spill] sm:$0xff]  ;;  %v5995_v35 = vadd.f32 %v14250_v31, %v5863_v43 }
 0x94f   :  { %v4866_v33 = vadd.f32 %v4865_v63, %v18033_v34  ;;  %v4964_v27 = vpop.f32.mrf.mxu1  ;;  %v5884_v32 = vmul.f32 %v14186_v44, %v18037_v46  ;;  %v5999_v63 = vadd.f32 %v14250_v31, %v5867_v45 }
 0x950   :  { %v6012_v61 = vadd.f32 %v14207_v55, %v5880_v28 }
 0x951   :  { %v14633_v16 = vadd.f32 %v14422_v23, %v4866_v33  ;;  %v6016_v34 = vadd.f32 %v14207_v55, %v5884_v32  ;;  %v8483_v23 = vld [vmem:[%s16018_s3 + $0xe0] sm:$0xff]  ;;  %v18038_v33 = vld [vmem:[#allocation272_spill] sm:$0xff]  ;;  %v6123_v54 = vpack.c.bf16 %v5999_v63, %v5995_v35  ;;  %v18041_v35 = vld [vmem:[#allocation275_spill] sm:$0xff] }
 0x952   :  { %6713 = vmatpush.bf16.msra.mxu2 %v8483_v23  ;;  %v5875_v63 = vmul.f32 %v14143_v20, %v18041_v35  ;;  %v6003_v23 = vadd.f32 %v14250_v31, %v5871_v36 }
 0x953   :  { %v6132_v46 = vpack.c.bf16 %v6016_v34, %v6012_v61  ;;  %v18043_v61 = vld [vmem:[#allocation329_spill] sm:$0xff] }
 0x954   :  { %v5892_v34 = vmul.f32 %v14186_v44, %v18043_v61 }
 0x955   :  { %v14643_v8 = vpop.f32.mrf.mxu2 }
 0x956   :  { %v4868_v2 = vpop.f32.mrf.mxu0 }
 0x957   :  { %v4869_v7 = vadd.f32 %v4868_v2, %v18038_v33  ;;  %v4967_v59 = vpop.f32.mrf.mxu1 }
 0x959   :  { %6540 = vmatmul.bf16.vlgmr.msra.gmra.mxu0 %v6123_v54  ;;  %v4958_v43 = vadd.f32 %v14516_v39, %v4869_v7  ;;  %v18042_v54 = vld [vmem:[#allocation57_spill] sm:$0xff]  ;;  %v6024_v7 = vadd.f32 %v14207_v55, %v5892_v34 }
 0x95a   :  { %6639 = vmatmul.bf16.gmra.mxu1 %v6132_v46  ;;  %v5888_v39 = vmul.f32 %v14186_v44, %v18042_v54  ;;  %v18045_v54 = vld [vmem:[#allocation75_spill] sm:$0xff] }
 0x95c   :  { %v6020_v33 = vadd.f32 %v14207_v55, %v5888_v39  ;;  %v18046_v55 = vld [vmem:[#allocation321_spill] sm:$0xff] }
 0x95d   :  { %v5046_v45 = vpop.f32.mrf.mxu2  ;;  %v5879_v34 = vmul.f32 %v14143_v20, %v18046_v55  ;;  %v18050_v55 = vld [vmem:[#allocation69_spill] sm:$0xff] }
 0x95e   :  { %v14650_v28 = vadd.f32 %v5046_v45, %v4958_v43  ;;  %v4870_v32 = vpop.f32.mrf.mxu0 }
 0x95f   :  { %v4871_v51 = vadd.f32 %v4870_v32, %v18039_v3  ;;  %v14653_v30 = vpop.f32.mrf.mxu1  ;;  %v6007_v3 = vadd.f32 %v14250_v31, %v5875_v63  ;;  %v6136_v32 = vpack.c.bf16 %v6024_v7, %v6020_v33 }
 0x961   :  { %v14657_v2 = vadd.f32 %v4959_v19, %v4871_v51  ;;  %v18044_v51 = vld [vmem:[#allocation46_spill] sm:$0xff]  ;;  %v6127_v45 = vpack.c.bf16 %v6007_v3, %v6003_v23  ;;  %v6011_v3 = vadd.f32 %v14250_v31, %v5879_v34  ;;  %v5887_v34 = vmul.f32 %v14143_v20, %v18050_v55 }
 0x965   :  { %v14669_v52 = vpop.f32.mrf.mxu2 }
 0x966   :  { %v4873_v19 = vpop.f32.mrf.mxu0 }
 0x967   :  { %v4874_v46 = vadd.f32 %v4873_v19, %v18044_v51  ;;  %v14672_v43 = vpop.f32.mrf.mxu1  ;;  %v18047_v19 = vld [vmem:[#allocation71_spill] sm:$0xff]  ;;  %v8482_v51 = vld [vmem:[%s16018_s3 + $0xd8] sm:$0xff] }
 0x968   :  { %v5883_v23 = vmul.f32 %v14143_v20, %v18047_v19  ;;  %6714 = vmatpush.bf16.msra.mxu2 %v8482_v51  ;;  %v18051_v19 = vld [vmem:[#allocation10_spill] sm:$0xff]  ;;  %v18052_v51 = vpack.c.bf16 %v14303_v58, %v14286_v24 }
 0x969   :  { %6545 = vmatmul.bf16.gmra.mxu0 %v6127_v45  ;;  %v4963_v35 = vadd.f32 %v4962_v0, %v4874_v46  ;;  %v18048_v46 = vld [vmem:[#allocation54_spill] sm:$0xff] }
 0x96a   :  { %6644 = vmatmul.bf16.gmra.mxu1 %v6136_v32  ;;  %v6015_v0 = vadd.f32 %v14250_v31, %v5883_v23  ;;  %v5891_v23 = vmul.f32 %v14143_v20, %v18051_v19 }
 0x96c   :  { %v6131_v32 = vpack.c.bf16 %v6015_v0, %v6011_v3  ;;  %v6019_v3 = vadd.f32 %v14250_v31, %v5887_v34  ;;  %v18056_v34 = vld [vmem:[#allocation332_spill] sm:$0xff] }
 0x96d   :  { %v5051_v44 = vpop.f32.mrf.mxu2 }
 0x96e   :  { %v14674_v36 = vadd.f32 %v5051_v44, %v4963_v35  ;;  %v4875_v63 = vpop.f32.mrf.mxu0  ;;  %v18049_v44 = vpack.c.bf16 %v14260_v14, %v14227_v12 }
 0x96f   :  { %v4876_v39 = vadd.f32 %v4875_v63, %v18045_v54  ;;  %v14677_v61 = vpop.f32.mrf.mxu1 }
 0x971   :  { %v14681_v6 = vadd.f32 %v4964_v27, %v4876_v39 }
 0x975   :  { %v14687_v33 = vpop.f32.mrf.mxu2 }
 0x976   :  { %v4878_v7 = vpop.f32.mrf.mxu0 }
 0x977   :  { %v4879_v45 = vadd.f32 %v4878_v7, %v18048_v46  ;;  %v14693_v35 = vpop.f32.mrf.mxu1 }
 0x979   :  { %6550 = vmatmul.bf16.gmra.mxu0 %v6131_v32  ;;  %v4968_v27 = vadd.f32 %v4967_v59, %v4879_v45  ;;  %v6023_v59 = vadd.f32 %v14250_v31, %v5891_v23  ;;  %v18053_v32 = vld [vmem:[#allocation114_spill] sm:$0xff] }
 0x97a   :  { %6649 = vmatmul.bf16.gmra.mxu1 %v18049_v44  ;;  %v14724_v31 = vperm.slane %v18053_v32, 0 }
 0x97b   :  { %v6135_v14 = vpack.c.bf16 %v6023_v59, %v6019_v3  ;;  %v8481_v3 = vld [vmem:[%s16018_s3 + $0xd0] sm:$0xff] }
 0x97c   :  { %v5093_v44 = vadd.f32 %v14724_v31, %v14077_v62  ;;  %v5105_v19 = vadd.f32 %v14724_v31, %v18056_v34  ;;  %6715 = vmatpush.bf16.msra.mxu2 %v8481_v3  ;;  %v5129_v49 = vadd.f32 %v14724_v31, %v5029_v21 }
 0x97d   :  { %v5056_v63 = vpop.f32.mrf.mxu2 }
 0x97e   :  { %v14698_v54 = vadd.f32 %v5056_v63, %v4968_v27  ;;  %v14700_v39 = vpop.f32.mrf.mxu0  ;;  %v5097_v27 = vadd.f32 %v14724_v31, %v14093_v41  ;;  %v18054_v63 = vld [vmem:[#allocation331_spill] sm:$0xff]  ;;  %v14743_v41 = vmax.f32 %v5093_v44, 0.0  ;;  %v14756_v34 = vmax.f32 %v5105_v19, 0.0 }
 0x97f   :  { %v14708_v0 = vpop.f32.mrf.mxu1  ;;  %v5101_v55 = vadd.f32 %v14724_v31, %v18054_v63  ;;  %v18061_v44 = vpack.c.bf16 %v14315_v22, %v14306_v38 }
 0x980   :  { %v14734_v58 = vmax.f32 %v5097_v27, 0.0  ;;  %18057 = vst [vmem:[#allocation344_spill] sm:$0xff] %v14743_v41  ;;  %v18059_v27 = vpack.c.bf16 %v14294_v1, %v14291_v13  ;;  %v5501_v3 = vmul.f32 %v14743_v41, %v14743_v41  ;;  %v18064_v1 = vld [vmem:[#allocation83_spill] sm:$0xff] }
 0x981   :  { %v14745_v59 = vmax.f32 %v5101_v55, 0.0  ;;  %18060 = vst [vmem:[#allocation151_spill] sm:$0xff] %v14756_v34  ;;  %v18062_v55 = vld [vmem:[#allocation80_spill] sm:$0xff] }
 0x982   :  { %18055 = vst [vmem:[#allocation130_spill] sm:$0xff] %v14734_v58  ;;  %v5505_v63 = vmul.f32 %v14734_v58, %v14734_v58  ;;  %v5113_v17 = vadd.f32 %v14724_v31, %v18062_v55  ;;  %v5457_v22 = vadd.f32 %v14734_v58, %v14743_v41 }
 0x984   :  { %v5737_v38 = vadd.f32 %v5505_v63, %v5501_v3  ;;  %v14779_v32 = vmax.f32 %v5113_v17, 0.0  ;;  %v18070_v3 = vld [vmem:[#allocation27_spill] sm:$0xff] }
 0x985   :  { %v14710_v7 = vpop.f32.mrf.mxu2  ;;  %v5125_v41 = vadd.f32 %v14724_v31, %v18070_v3 }
 0x986   :  { %v14712_v12 = vpop.f32.mrf.mxu0  ;;  %18065 = vst [vmem:[#allocation95_spill] sm:$0xff] %v14779_v32 }
 0x987   :  { %v14719_v45 = vpop.f32.mrf.mxu1 }
 0x989   :  { %6555 = vmatmul.bf16.gmra.mxu0 %v6135_v14  ;;  %v18058_v14 = vld [vmem:[#allocation67_spill] sm:$0xff] }
 0x98a   :  { %6654 = vmatmul.bf16.gmra.mxu1 %v18052_v51  ;;  %v5109_v51 = vadd.f32 %v14724_v31, %v18058_v14  ;;  %v5509_v14 = vmul.f32 %v14745_v59, %v14745_v59 }
 0x98c   :  { %v14767_v13 = vmax.f32 %v5109_v51, 0.0  ;;  %v5121_v51 = vadd.f32 %v14724_v31, %v18066_v4  ;;  %v5738_v50 = vadd.f32 %v5737_v38, %v5509_v14  ;;  %v5521_v4 = vmul.f32 %v14779_v32, %v14779_v32 }
 0x98d   :  { %v14717_v46 = vpop.f32.mrf.mxu2  ;;  %v5034_v14 = vadd.f32 %v14486_v53, %v14449_v10  ;;  %v14816_v53 = vmax.f32 %v5129_v49, 0.0  ;;  %v5141_v49 = vadd.f32 %v14724_v31, %v14578_v26 }
 0x98e   :  { %v14721_v20 = vpop.f32.mrf.mxu0  ;;  %18063 = vst [vmem:[#allocation376_spill] sm:$0xff] %v14767_v13  ;;  %v5517_v58 = vmul.f32 %v14767_v13, %v14767_v13  ;;  %v14797_v18 = vmax.f32 %v5121_v51, 0.0 }
 0x98f   :  { %v14747_v62 = vpop.f32.mrf.mxu1 }
 0x990   :  { %18071 = vst [vmem:[#allocation104_spill] sm:$0xff] %v14797_v18  ;;  %v5529_v10 = vmul.f32 %v14797_v18, %v14797_v18 }
 0x995   :  { %v14732_v24 = vpop.f32.mrf.mxu2 }
 0x996   :  { %v14738_v23 = vpop.f32.mrf.mxu0 }
 0x997   :  { %v14793_v11 = vpop.f32.mrf.mxu1 }
 0x999   :  { %6560 = vmatmul.bf16.gmra.mxu0 %v18059_v27  ;;  %v5117_v27 = vadd.f32 %v14724_v31, %v18064_v1  ;;  %v5458_v1 = vadd.f32 %v5457_v22, %v14745_v59 }
 0x99a   :  { %6659 = vmatmul.bf16.gmra.mxu1 %v18061_v44  ;;  %v5513_v44 = vmul.f32 %v14756_v34, %v14756_v34 }
 0x99b   :  { %v14788_v63 = vmax.f32 %v5117_v27, 0.0  ;;  %v5459_v17 = vadd.f32 %v5458_v1, %v14756_v34  ;;  %v14805_v1 = vmax.f32 %v5125_v41, 0.0 }
 0x99c   :  { %v5739_v56 = vadd.f32 %v5738_v50, %v5513_v44  ;;  %v5133_v50 = vadd.f32 %v14724_v31, %v14408_v60 }
 0x99d   :  { %v14771_v19 = vpop.f32.mrf.mxu2  ;;  %18069 = vst [vmem:[#allocation97_spill] sm:$0xff] %v14788_v63  ;;  %v5460_v27 = vadd.f32 %v5459_v17, %v14767_v13  ;;  %v5525_v38 = vmul.f32 %v14788_v63, %v14788_v63  ;;  %v5533_v17 = vmul.f32 %v14805_v1, %v14805_v1  ;;  %v18075_v13 = vld [vmem:[#allocation13_spill] sm:$0xff] }
 0x99e   :  { %v14777_v55 = vpop.f32.mrf.mxu0  ;;  %v5740_v22 = vadd.f32 %v5739_v56, %v5517_v58  ;;  %v5137_v56 = vadd.f32 %v14724_v31, %v5034_v14  ;;  %v5039_v58 = vadd.f32 %v14614_v37, %v14602_v5  ;;  %v18076_v14 = vld [vmem:[#allocation89_spill] sm:$0xff] }
 0x99f   :  { %v5461_v51 = vadd.f32 %v5460_v27, %v14779_v32  ;;  %v14824_v27 = vmax.f32 %v5133_v50, 0.0  ;;  %v18072_v32 = vld [vmem:[#allocation76_spill] sm:$0xff]  ;;  %v18077_v34 = vpack.c.bf16 %v18075_v13, %v18076_v14 }
 0x9a0   :  { %v5741_v21 = vadd.f32 %v5740_v22, %v5521_v4  ;;  %v18073_v4 = vld [vmem:[#allocation73_spill] sm:$0xff]  ;;  %v5145_v50 = vadd.f32 %v14724_v31, %v5039_v58 }
 0x9a1   :  { %v5462_v41 = vadd.f32 %v5461_v51, %v14788_v63  ;;  %v18074_v22 = vpack.c.bf16 %v18072_v32, %v18073_v4  ;;  %v14837_v51 = vmax.f32 %v5137_v56, 0.0  ;;  %v5044_v32 = vadd.f32 %v14643_v8, %v14633_v16  ;;  %v18082_v63 = vld [vmem:[#allocation352_spill] sm:$0xff] }
 0x9a2   :  { %v5742_v60 = vadd.f32 %v5741_v21, %v5525_v38  ;;  %v5537_v38 = vmul.f32 %v14816_v53, %v14816_v53  ;;  %v14842_v21 = vpop.f32.mrf.mxu1  ;;  %v5149_v56 = vadd.f32 %v14724_v31, %v14622_v15 }
 0x9a3   :  { %v5463_v37 = vadd.f32 %v5462_v41, %v14797_v18  ;;  %v5545_v8 = vmul.f32 %v14837_v51, %v14837_v51 }
 0x9a4   :  { %v5743_v5 = vadd.f32 %v5742_v60, %v5529_v10  ;;  %v14849_v10 = vmax.f32 %v5141_v49, 0.0  ;;  %v14858_v60 = vmax.f32 %v5145_v50, 0.0 }
 0x9a5   :  { %v14809_v44 = vpop.f32.mrf.mxu2  ;;  %v5464_v26 = vadd.f32 %v5463_v37, %v14805_v1  ;;  %v14866_v37 = vmax.f32 %v5149_v56, 0.0 }
 0x9a6   :  { %v14812_v3 = vpop.f32.mrf.mxu0  ;;  %v5744_v4 = vadd.f32 %v5743_v5, %v5533_v17  ;;  %18078 = vst [vmem:[#allocation106_spill] sm:$0xff] %v14858_v60  ;;  %v5153_v17 = vadd.f32 %v14724_v31, %v5044_v32  ;;  %v5549_v15 = vmul.f32 %v14849_v10, %v14849_v10  ;;  %v5157_v5 = vadd.f32 %v14724_v31, %v14650_v28 }
 0x9a7   :  { %v5465_v58 = vadd.f32 %v5464_v26, %v14816_v53  ;;  %v18079_v26 = vld [vmem:[#allocation131_spill] sm:$0xff] }
 0x9a8   :  { %v5745_v16 = vadd.f32 %v5744_v4, %v5537_v38  ;;  %v4881_v32 = vadd.f32 %v14700_v39, %v18079_v26  ;;  %v5557_v39 = vmul.f32 %v14866_v37, %v14866_v37 }
 0x9a9   :  { %6565 = vmatmul.bf16.gmra.mxu0 %v18074_v22  ;;  %v5049_v22 = vadd.f32 %v14669_v52, %v14657_v2  ;;  %v5466_v49 = vadd.f32 %v5465_v58, %v14824_v27  ;;  %v5553_v2 = vmul.f32 %v14858_v60, %v14858_v60  ;;  %v14875_v52 = vmax.f32 %v5153_v17, 0.0  ;;  %v18080_v58 = vld [vmem:[#allocation200_spill] sm:$0xff] }
 0x9aa   :  { %6664 = vmatmul.bf16.gmra.mxu1 %v18077_v34  ;;  %v5541_v34 = vmul.f32 %v14824_v27, %v14824_v27  ;;  %v4884_v28 = vadd.f32 %v14712_v12, %v18080_v58  ;;  %v5165_v17 = vadd.f32 %v14724_v31, %v14674_v36  ;;  %v4970_v12 = vadd.f32 %v14653_v30, %v4881_v32  ;;  %v18083_v30 = vld [vmem:[#allocation373_spill] sm:$0xff]  ;;  %v18084_v32 = vld [vmem:[#allocation335_spill] sm:$0xff] }
 0x9ab   :  { %v5467_v38 = vadd.f32 %v5466_v49, %v14837_v51  ;;  %v5161_v4 = vadd.f32 %v14724_v31, %v5049_v22  ;;  %v14887_v49 = vmax.f32 %v5157_v5, 0.0  ;;  %v14891_v22 = vpop.f32.mrf.mxu1  ;;  %v5561_v5 = vmul.f32 %v14875_v52, %v14875_v52 }
 0x9ac   :  { %v5746_v14 = vadd.f32 %v5745_v16, %v5541_v34  ;;  %v5054_v34 = vadd.f32 %v14687_v33, %v14681_v6  ;;  %v8480_v6 = vld [vmem:[%s16018_s3 + $0xc8] sm:$0xff]  ;;  %v5059_v58 = vadd.f32 %v14710_v7, %v4970_v12  ;;  %v4973_v18 = vadd.f32 %v14672_v43, %v4884_v28 }
 0x9ad   :  { %v14847_v13 = vpop.f32.mrf.mxu2  ;;  %v5468_v56 = vadd.f32 %v5467_v38, %v14849_v10  ;;  %v14902_v26 = vmax.f32 %v5161_v4, 0.0  ;;  %6716 = vmatpush.bf16.msra.mxu2 %v8480_v6  ;;  %v5565_v4 = vmul.f32 %v14887_v49, %v14887_v49  ;;  %v18086_v7 = vpack.c.bf16 %v14376_v42, %v14362_v47 }
 0x9ae   :  { %v14853_v41 = vpop.f32.mrf.mxu0  ;;  %v5747_v50 = vadd.f32 %v5746_v14, %v5545_v8  ;;  %v5169_v36 = vadd.f32 %v14724_v31, %v5054_v34  ;;  %v5173_v43 = vadd.f32 %v14724_v31, %v14698_v54  ;;  %v5177_v47 = vadd.f32 %v14724_v31, %v5059_v58  ;;  %v18089_v58 = vld [vmem:[#allocation355_spill] sm:$0xff] }
 0x9af   :  { %v5469_v33 = vadd.f32 %v5468_v56, %v14858_v60  ;;  %v4889_v56 = vadd.f32 %v14738_v23, %v18082_v63  ;;  %v18085_v60 = vpack.c.bf16 %v18083_v30, %v18084_v32  ;;  %v5062_v23 = vadd.f32 %v14717_v46, %v4973_v18  ;;  %v18088_v46 = vld [vmem:[#allocation392_spill] sm:$0xff] }
 0x9b0   :  { %v5748_v8 = vadd.f32 %v5747_v50, %v5549_v15  ;;  %v18081_v15 = vld [vmem:[#allocation264_spill] sm:$0xff]  ;;  %v14929_v6 = vmax.f32 %v5169_v36, 0.0  ;;  %v14951_v32 = vmax.f32 %v5177_v47, 0.0 }
 0x9b1   :  { %v4886_v38 = vadd.f32 %v14721_v20, %v18081_v15  ;;  %v5470_v20 = vadd.f32 %v5469_v33, %v14866_v37  ;;  %v4978_v54 = vadd.f32 %v14693_v35, %v4889_v56  ;;  %v4896_v56 = vadd.f32 %v14853_v41, %v18089_v58 }
 0x9b2   :  { %v5749_v50 = vadd.f32 %v5748_v8, %v5553_v2  ;;  %v14915_v8 = vmax.f32 %v5165_v17, 0.0  ;;  %v5569_v17 = vmul.f32 %v14902_v26, %v14902_v26 }
 0x9b3   :  { %v4975_v63 = vadd.f32 %v14677_v61, %v4886_v38  ;;  %v5471_v28 = vadd.f32 %v5470_v20, %v14875_v52  ;;  %v4894_v61 = vadd.f32 %v14812_v3, %v18088_v46  ;;  %v14939_v38 = vmax.f32 %v5173_v43, 0.0  ;;  %v14949_v30 = vpop.f32.mrf.mxu1 }
 0x9b4   :  { %v5750_v2 = vadd.f32 %v5749_v50, %v5557_v39  ;;  %v5573_v12 = vmul.f32 %v14915_v8, %v14915_v8  ;;  %v5181_v50 = vadd.f32 %v14724_v31, %v5062_v23  ;;  %v5577_v3 = vmul.f32 %v14929_v6, %v14929_v6 }
 0x9b5   :  { %v14883_v16 = vpop.f32.mrf.mxu2  ;;  %v5064_v42 = vadd.f32 %v14732_v24, %v4975_v63  ;;  %v5581_v23 = vmul.f32 %v14939_v38, %v14939_v38 }
 0x9b6   :  { %v4898_v14 = vpop.f32.mrf.mxu0  ;;  %v5751_v39 = vadd.f32 %v5750_v2, %v5561_v5  ;;  %v5067_v5 = vadd.f32 %v14771_v19, %v4978_v54  ;;  %v4983_v19 = vadd.f32 %v14719_v45, %v4894_v61  ;;  %v14960_v63 = vmax.f32 %v5181_v50, 0.0 }
 0x9b7   :  { %v5185_v20 = vadd.f32 %v14724_v31, %v5064_v42 }
 0x9b8   :  { %v5752_v33 = vadd.f32 %v5751_v39, %v5565_v4  ;;  %v5189_v41 = vadd.f32 %v14724_v31, %v5067_v5 }
 0x9b9   :  { %6570 = vmatmul.bf16.gmra.mxu0 %v18085_v60  ;;  %v18087_v60 = vld [vmem:[#allocation353_spill] sm:$0xff] }
 0x9ba   :  { %6669 = vmatmul.bf16.gmra.mxu1 %v18086_v7  ;;  %v4891_v34 = vadd.f32 %v14777_v55, %v18087_v60  ;;  %v5472_v55 = vadd.f32 %v5471_v28, %v14887_v49  ;;  %v5753_v36 = vadd.f32 %v5752_v33, %v5569_v17  ;;  %v18090_v7 = vld [vmem:[#allocation127_spill] sm:$0xff]  ;;  %v5072_v60 = vadd.f32 %v14847_v13, %v4983_v19  ;;  %v18091_v28 = vld [vmem:[#allocation192_spill] sm:$0xff] }
 0x9bb   :  { %v4899_v43 = vadd.f32 %v4898_v14, %v18090_v7  ;;  %v5585_v17 = vmul.f32 %v14951_v32, %v14951_v32  ;;  %v14969_v14 = vmax.f32 %v5185_v20, 0.0  ;;  %v14977_v33 = vmax.f32 %v5189_v41, 0.0 }
 0x9bc   :  { %v4980_v24 = vadd.f32 %v14708_v0, %v4891_v34  ;;  %v5473_v35 = vadd.f32 %v5472_v55, %v14902_v26  ;;  %v5754_v4 = vadd.f32 %v5753_v36, %v5573_v12  ;;  %v5197_v12 = vadd.f32 %v14724_v31, %v5072_v60 }
 0x9bd   :  { %v5076_v18 = vpop.f32.mrf.mxu2  ;;  %v4988_v13 = vadd.f32 %v14793_v11, %v4899_v43  ;;  %v5593_v11 = vmul.f32 %v14969_v14, %v14969_v14 }
 0x9be   :  { %v4900_v15 = vpop.f32.mrf.mxu0  ;;  %v5069_v2 = vadd.f32 %v14809_v44, %v4980_v24  ;;  %v5474_v0 = vadd.f32 %v5473_v35, %v14915_v8  ;;  %v4985_v44 = vadd.f32 %v14747_v62, %v4896_v56  ;;  %v5755_v39 = vadd.f32 %v5754_v4, %v5577_v3  ;;  %v18092_v24 = vld [vmem:[#allocation345_spill] sm:$0xff]  ;;  %v18093_v3 = vld [vmem:[#allocation220_spill] sm:$0xff] }
 0x9bf   :  { %v4901_v45 = vadd.f32 %v4900_v15, %v18091_v28  ;;  %v5589_v62 = vmul.f32 %v14960_v63, %v14960_v63  ;;  %v5077_v50 = vadd.f32 %v5076_v18, %v4988_v13  ;;  %v18094_v58 = vpack.c.bf16 %v14379_v9, %v18093_v3 }
 0x9c0   :  { %v5475_v34 = vadd.f32 %v5474_v0, %v14929_v6  ;;  %v5193_v47 = vadd.f32 %v14724_v31, %v5069_v2  ;;  %v5074_v46 = vadd.f32 %v14883_v16, %v4985_v44  ;;  %v5756_v55 = vadd.f32 %v5755_v39, %v5581_v23  ;;  %v14992_v2 = vpop.f32.mrf.mxu1 }
 0x9c1   :  { %v4990_v5 = vadd.f32 %v14842_v21, %v4901_v45  ;;  %v18095_v21 = vpack.c.bf16 %v14402_v40, %v14384_v29  ;;  %v5597_v0 = vmul.f32 %v14977_v33, %v14977_v33  ;;  %v14999_v4 = vmax.f32 %v5197_v12, 0.0 }
 0x9c2   :  { %v5476_v54 = vadd.f32 %v5475_v34, %v14939_v38  ;;  %v5757_v36 = vadd.f32 %v5756_v55, %v5585_v17  ;;  %v14985_v16 = vmax.f32 %v5193_v47, 0.0  ;;  %v5201_v20 = vadd.f32 %v14724_v31, %v5074_v46 }
 0x9c3   :  { %v5205_v7 = vadd.f32 %v14724_v31, %v5077_v50  ;;  %v5605_v39 = vmul.f32 %v14999_v4, %v14999_v4 }
 0x9c4   :  { %v5477_v15 = vadd.f32 %v5476_v54, %v14951_v32  ;;  %v5758_v19 = vadd.f32 %v5757_v36, %v5589_v62  ;;  %v5601_v41 = vmul.f32 %v14985_v16, %v14985_v16  ;;  %v15007_v29 = vmax.f32 %v5201_v20, 0.0 }
 0x9c5   :  { %v5078_v42 = vpop.f32.mrf.mxu2 }
 0x9c6   :  { %v4903_v61 = vpop.f32.mrf.mxu0  ;;  %v5478_v56 = vadd.f32 %v5477_v15, %v14960_v63  ;;  %v5079_v18 = vadd.f32 %v5078_v42, %v4990_v5  ;;  %v5759_v23 = vadd.f32 %v5758_v19, %v5593_v11  ;;  %v18096_v42 = vld [vmem:[#allocation20_spill] sm:$0xff] }
 0x9c7   :  { %v4904_v35 = vadd.f32 %v4903_v61, %v18092_v24  ;;  %v5609_v61 = vmul.f32 %v15007_v29, %v15007_v29 }
 0x9c8   :  { %v5479_v9 = vadd.f32 %v5478_v56, %v14969_v14  ;;  %v5209_v34 = vadd.f32 %v14724_v31, %v5079_v18  ;;  %v5760_v45 = vadd.f32 %v5759_v23, %v5597_v0  ;;  %v15025_v50 = vpop.f32.mrf.mxu1  ;;  %v18097_v56 = vld [vmem:[#allocation111_spill] sm:$0xff] }
 0x9c9   :  { %6575 = vmatmul.bf16.gmra.mxu0 %v18094_v58  ;;  %v4993_v43 = vadd.f32 %v14891_v22, %v4904_v35  ;;  %v15013_v22 = vmax.f32 %v5205_v7, 0.0  ;;  %v15034_v20 = vperm.slane %v18097_v56, 3  ;;  %v18099_v23 = vld [vmem:[#allocation79_spill] sm:$0xff] }
 0x9ca   :  { %6674 = vmatmul.bf16.gmra.mxu1 %v18095_v21  ;;  %v5480_v40 = vadd.f32 %v5479_v9, %v14977_v33  ;;  %v5761_v46 = vadd.f32 %v5760_v45, %v5601_v41  ;;  %v15020_v55 = vmax.f32 %v5209_v34, 0.0  ;;  %v18100_v41 = vpack.c.bf16 %v14427_v57, %v18099_v23  ;;  %v18102_v57 = vld [vmem:[#allocation21_spill] sm:$0xff] }
 0x9cb   :  { %v5613_v15 = vmul.f32 %v15013_v22, %v15013_v22 }
 0x9cc   :  { %v5481_v17 = vadd.f32 %v5480_v40, %v14985_v16  ;;  %v5762_v62 = vadd.f32 %v5761_v46, %v5605_v39  ;;  %v5617_v3 = vmul.f32 %v15020_v55, %v15020_v55  ;;  %v6455_v46 = vadd.f32 %v18102_v57, %v15034_v20  ;;  %v18111_v57 = vld [vmem:[#allocation134_spill] sm:$0xff] }
 0x9cd   :  { %v5081_v60 = vpop.f32.mrf.mxu2 }
 0x9ce   :  { %v5082_v44 = vadd.f32 %v5081_v60, %v4993_v43  ;;  %v4905_v28 = vpop.f32.mrf.mxu0  ;;  %v5482_v13 = vadd.f32 %v5481_v17, %v14999_v4  ;;  %v5763_v36 = vadd.f32 %v5762_v62, %v5609_v61  ;;  %v18101_v60 = vld [vmem:[#allocation70_spill] sm:$0xff] }
 0x9cf   :  { %v4906_v54 = vadd.f32 %v4905_v28, %v18096_v42  ;;  %v6453_v40 = vadd.f32 %v18101_v60, %v15034_v20 }
 0x9d0   :  { %v5213_v47 = vadd.f32 %v14724_v31, %v5082_v44  ;;  %v5483_v12 = vadd.f32 %v5482_v13, %v15007_v29  ;;  %v5764_v18 = vadd.f32 %v5763_v36, %v5613_v15  ;;  %v6635_v28 = vpop.f32.mrf.mxu1 }
 0x9d1   :  { %v4995_v24 = vadd.f32 %v14949_v30, %v4906_v54  ;;  %v18098_v30 = vpack.c.bf16 %v14395_v25, %v14392_v48 }
 0x9d2   :  { %v15027_v5 = vmax.f32 %v5213_v47, 0.0  ;;  %v5484_v11 = vadd.f32 %v5483_v12, %v15013_v22  ;;  %v5765_v9 = vadd.f32 %v5764_v18, %v5617_v3  ;;  %v18103_v3 = vld [vmem:[#allocation202_spill] sm:$0xff] }
 0x9d4   :  { %v5485_v21 = vadd.f32 %v5484_v11, %v15020_v55  ;;  %v5621_v19 = vmul.f32 %v15027_v5, %v15027_v5 }
 0x9d5   :  { %v5083_v35 = vpop.f32.mrf.mxu2 }
 0x9d6   :  { %v5084_v58 = vadd.f32 %v5083_v35, %v4995_v24  ;;  %v5486_v7 = vadd.f32 %v5485_v21, %v15027_v5  ;;  %v5766_v34 = vadd.f32 %v5765_v9, %v5621_v19  ;;  %v6541_v48 = vpop.f32.mrf.mxu0  ;;  %v18106_v19 = vld [vmem:[#allocation138_spill] sm:$0xff]  ;;  %v18109_v9 = vld [vmem:[#allocation84_spill] sm:$0xff] }
 0x9d7   :  { %v6542_v25 = vadd.f32 %v6541_v48, %v6453_v40 }
 0x9d8   :  { %v5217_v0 = vadd.f32 %v14724_v31, %v5084_v58  ;;  %v6637_v35 = vpop.f32.mrf.mxu1  ;;  %v18104_v58 = vld [vmem:[#allocation82_spill] sm:$0xff] }
 0x9d9   :  { %6580 = vmatmul.bf16.gmra.mxu0 %v18098_v30  ;;  %v18105_v56 = vpack.c.bf16 %v18103_v3, %v18104_v58 }
 0x9da   :  { %v15044_v43 = vmax.f32 %v5217_v0, 0.0  ;;  %6679 = vmatmul.bf16.gmra.mxu1 %v18100_v41  ;;  %v18107_v0 = vld [vmem:[#allocation263_spill] sm:$0xff] }
 0x9db   :  { %v18108_v30 = vpack.c.bf16 %v18106_v19, %v18107_v0  ;;  %v6472_v0 = vpop.f32.mrf.mxu3 }
 0x9dc   :  { %v5487_v44 = vadd.f32 %v5486_v7, %v15044_v43  ;;  %v5625_v31 = vmul.f32 %v15044_v43, %v15044_v43  ;;  %v6458_v7 = vadd.f32 %v18109_v9, %v15034_v20  ;;  %v18118_v9 = vld [vmem:[#allocation98_spill] sm:$0xff] }
 0x9de   :  { %v5488_v45 = vrot.slane %v5487_v44, 4  ;;  %v5767_v39 = vadd.f32 %v5766_v34, %v5625_v31  ;;  %v6543_v62 = vpop.f32.mrf.mxu0  ;;  %v8479_v31 = vld [vmem:[%s16018_s3 + $0xc0] sm:$0xff] }
 0x9df   :  { %v6544_v12 = vadd.f32 %v6543_v62, %v6455_v46  ;;  %6717 = vmatpush.bf16.msra.mxu2 %v8479_v31  ;;  %v18112_v46 = vld [vmem:[#allocation259_spill] sm:$0xff]  ;;  %v18114_v62 = vld [vmem:[#allocation338_spill] sm:$0xff] }
 0x9e0   :  { %v5489_v17 = vadd.f32 %v5488_v45, %v5487_v44  ;;  %v5768_v47 = vrot.slane %v5767_v39, 4  ;;  %v6640_v45 = vpop.f32.mrf.mxu1 }
 0x9e1   :  { %v15081_v58 = vadd.f32 %v15025_v50, %v6544_v12  ;;  %v18119_v12 = vld [vmem:[#allocation114_spill] sm:$0xff] }
 0x9e2   :  { %v5490_v42 = vrot.slane %v5489_v17, 2  ;;  %v5769_v54 = vadd.f32 %v5768_v47, %v5767_v39  ;;  %v18110_v39 = vld [vmem:[#allocation86_spill] sm:$0xff]  ;;  %v15070_v47 = vadd.f32 %v14992_v2, %v6542_v25 }
 0x9e4   :  { %v5491_v13 = vadd.f32 %v5490_v42, %v5489_v17  ;;  %v5770_v61 = vrot.slane %v5769_v54, 2  ;;  %v6460_v17 = vadd.f32 %v18110_v39, %v15034_v20 }
 0x9e6   :  { %v5492_v15 = vrot.slane %v5491_v13, 1  ;;  %v5771_v24 = vadd.f32 %v5770_v61, %v5769_v54  ;;  %v6546_v60 = vpop.f32.mrf.mxu0 }
 0x9e7   :  { %v6547_v40 = vadd.f32 %v6546_v60, %v6458_v7  ;;  %v6465_v7 = vadd.f32 %v18118_v9, %v15034_v20 }
 0x9e8   :  { %v5493_v36 = vadd.f32 %v5492_v15, %v5491_v13  ;;  %v5772_v11 = vrot.slane %v5771_v24, 1  ;;  %v18113_v13 = vpack.c.bf16 %v18111_v57, %v18112_v46  ;;  %v18115_v15 = vld [vmem:[#allocation92_spill] sm:$0xff]  ;;  %v6642_v2 = vpop.f32.mrf.mxu1  ;;  %v15091_v46 = vpop.f32.mrf.mxu3 }
 0x9e9   :  { %6585 = vmatmul.bf16.gmra.mxu0 %v18105_v56 }
 0x9ea   :  { %v5497_v18 = vmul.f32 0.00390625, %v5493_v36  ;;  %v5773_v21 = vadd.f32 %v5772_v11, %v5771_v24  ;;  %6684 = vmatmul.bf16.gmra.mxu1 %v18108_v30  ;;  %v18116_v24 = vpack.c.bf16 %v18114_v62, %v18115_v15  ;;  %v18117_v36 = vld [vmem:[#allocation198_spill] sm:$0xff] }
 0x9eb   :  { %v6463_v11 = vadd.f32 %v18117_v36, %v15034_v20 }
 0x9ec   :  { %v5777_v23 = vmul.f32 0.00390625, %v5773_v21  ;;  %v5781_v41 = vmul.f32 %v5497_v18, %v5497_v18 }
 0x9ee   :  { %v5785_v34 = vsub.f32 %v5777_v23, %v5781_v41  ;;  %v6548_v42 = vpop.f32.mrf.mxu0  ;;  %v15085_v41 = vadd.f32 %v6635_v28, %v6547_v40  ;;  %v18124_v28 = vld [vmem:[#allocation339_spill] sm:$0xff] }
 0x9ef   :  { %v6549_v54 = vadd.f32 %v6548_v42, %v6460_v17  ;;  %v18120_v17 = vld [vmem:[#allocation288_spill] sm:$0xff]  ;;  %v18121_v42 = vld [vmem:[#allocation94_spill] sm:$0xff] }
 0x9f0   :  { %v5789_v44 = vmax.f32 %v5785_v34, 0.0  ;;  %v6645_v31 = vpop.f32.mrf.mxu1  ;;  %v18122_v57 = vpack.c.bf16 %v18120_v17, %v18121_v42  ;;  %v6477_v42 = vpop.f32.mrf.mxu3 }
 0x9f1   :  { %v15111_v9 = vadd.f32 %v6637_v35, %v6549_v54  ;;  %v18131_v35 = vld [vmem:[#allocation43_spill] sm:$0xff] }
 0x9f2   :  { %v5793_v48 = vadd.f32 1e-05, %v5789_v44 }
 0x9f4   :  { %8518 = vrsqrt.f32 %v5793_v48  ;;  %vm5830_vm11 = vweird.f32 %v5793_v48 }
 0x9f6   :  { %v6551_v25 = vpop.f32.mrf.mxu0 }
 0x9f7   :  { %v6552_v21 = vadd.f32 %v6551_v25, %v6463_v11  ;;  %v18127_v11 = vld [vmem:[#allocation344_spill] sm:$0xff]  ;;  %v18128_v25 = vld [vmem:[#allocation130_spill] sm:$0xff] }
 0x9f9   :  { %6590 = vmatmul.bf16.gmra.mxu0 %v18113_v13  ;;  %v15119_v17 = vadd.f32 %v6640_v45, %v6552_v21 }
 0x9fa   :  { %v8519_v61 = vpop.eup %8518  ;;  %6689 = vmatmul.bf16.gmra.mxu1 %v18116_v24  ;;  %v18126_v24 = vld [vmem:[#allocation102_spill] sm:$0xff] }
 0x9fb   :  { %v5825_v3 = vmul.f32 %v8519_v61, %v5793_v48  ;;  %vm5831_vm10 = vweird.f32 %v8519_v61  ;;  %v18123_v48 = vld [vmem:[#allocation85_spill] sm:$0xff]  ;;  %v6468_v36 = vadd.f32 %v18126_v24, %v15034_v20 }
 0x9fc   :  { %vm5832_vm12 = vmor %vm5830_vm11, %vm5831_vm10  ;;  %v18125_v40 = vpack.c.bf16 %v18123_v48, %v18124_v28  ;;  %v18133_v28 = vld [vmem:[#allocation374_spill] sm:$0xff] }
 0x9fd   :  { %v5826_v56 = vmul.f32 %v8519_v61, %v5825_v3 }
 0x9fe   :  { %v6553_v60 = vpop.f32.mrf.mxu0 }
 0x9ff   :  { %v5827_v19 = vmul.f32 0.5, %v5826_v56  ;;  %v6554_v50 = vadd.f32 %v6553_v60, %v6465_v7  ;;  %v15115_v60 = vpop.f32.mrf.mxu1 }
 0xa01   :  { %v5828_v30 = vsub.f32 1.5, %v5827_v19  ;;  %v15132_v24 = vadd.f32 %v6642_v2, %v6554_v50 }
 0xa03   :  { %v5829_v23 = vmul.f32 %v8519_v61, %v5828_v30 }
 0xa05   :  { %v5833_v34 = vsel %vm5832_vm12, %v8519_v61, %v5829_v23 }
 0xa06   :  { %v5837_v44 = vmul.f32 %v5833_v34, %v18119_v12  ;;  %v6556_v15 = vpop.f32.mrf.mxu0 }
 0xa07   :  { %v6557_v30 = vadd.f32 %v6556_v15, %v6468_v36  ;;  %v15126_v48 = vpop.f32.mrf.mxu1  ;;  %v6473_v15 = vadd.f32 %v6472_v0, %v15034_v20  ;;  %v18136_v36 = vld [vmem:[#allocation151_spill] sm:$0xff]  ;;  %v18137_v0 = vld [vmem:[#allocation376_spill] sm:$0xff] }
 0xa08   :  { %v5841_v39 = vmul.f32 %v5837_v44, %v5497_v18  ;;  %v15093_v62 = vperm.slane %v5837_v44, 1  ;;  %v18129_v44 = vld [vmem:[#allocation126_spill] sm:$0xff] }
 0xa09   :  { %6595 = vmatmul.bf16.gmra.mxu0 %v18122_v57 }
 0xa0a   :  { %v5849_v13 = vrot.slane %v5841_v39, 7  ;;  %6694 = vmatmul.bf16.gmra.mxu1 %v18125_v40  ;;  %v5865_v3 = vmul.f32 %v15093_v62, %v18127_v11  ;;  %v5869_v56 = vmul.f32 %v15093_v62, %v18128_v25  ;;  %v15109_v19 = vmul.f32 %v15093_v62, %v15027_v5  ;;  %v18134_v40 = vld [vmem:[#allocation96_spill] sm:$0xff]  ;;  %v15140_v25 = vpop.f32.mrf.mxu3 }
 0xa0b   :  { %v6470_v39 = vadd.f32 %v18129_v44, %v15034_v20  ;;  %v5873_v45 = vmul.f32 %v15093_v62, %v14745_v59  ;;  %v5877_v11 = vmul.f32 %v15093_v62, %v18136_v36  ;;  %v5881_v2 = vmul.f32 %v15093_v62, %v18137_v0  ;;  %v18141_v36 = vld [vmem:[#allocation375_spill] sm:$0xff] }
 0xa0c   :  { %v5857_v61 = vsub.f32 %v18119_v12, %v5849_v13  ;;  %v18130_v13 = vld [vmem:[#allocation88_spill] sm:$0xff]  ;;  %v5897_v59 = vmul.f32 %v15093_v62, %v14805_v1  ;;  %v5905_v50 = vmul.f32 %v15093_v62, %v14824_v27  ;;  %v5945_v1 = vmul.f32 %v15093_v62, %v14939_v38 }
 0xa0d   :  { %v18132_v54 = vpack.c.bf16 %v18130_v13, %v18131_v35  ;;  %v18138_v13 = vld [vmem:[#allocation95_spill] sm:$0xff]  ;;  %v5953_v27 = vmul.f32 %v15093_v62, %v14960_v63  ;;  %v5901_v63 = vmul.f32 %v15093_v62, %v14816_v53  ;;  %v5957_v53 = vmul.f32 %v15093_v62, %v14969_v14 }
 0xa0e   :  { %v15101_v18 = vperm.slane %v5857_v61, 2  ;;  %v6558_v57 = vpop.f32.mrf.mxu0  ;;  %v18135_v61 = vpack.c.bf16 %v18133_v28, %v18134_v40  ;;  %v5885_v35 = vmul.f32 %v15093_v62, %v18138_v13  ;;  %v15177_v40 = vadd.f32 %v6645_v31, %v6557_v30 }
 0xa0f   :  { %v15121_v5 = vadd.f32 %v6558_v57, %v6470_v39  ;;  %v5921_v39 = vmul.f32 %v15093_v62, %v14866_v37  ;;  %v5929_v57 = vmul.f32 %v15093_v62, %v14887_v49  ;;  %v5969_v37 = vmul.f32 %v15093_v62, %v14999_v4  ;;  %v18139_v4 = vld [vmem:[#allocation106_spill] sm:$0xff] }
 0xa10   :  { %v5997_v7 = vadd.f32 %v15101_v18, %v5865_v3  ;;  %v6001_v23 = vadd.f32 %v15101_v18, %v5869_v56  ;;  %v6005_v56 = vadd.f32 %v15101_v18, %v5873_v45  ;;  %v6013_v28 = vadd.f32 %v15101_v18, %v5881_v2 }
 0xa11   :  { %v6017_v38 = vadd.f32 %v15101_v18, %v5885_v35  ;;  %v5941_v45 = vmul.f32 %v15093_v62, %v14929_v6  ;;  %v5949_v31 = vmul.f32 %v15093_v62, %v14951_v32  ;;  %v18140_v6 = vld [vmem:[#allocation91_spill] sm:$0xff]  ;;  %v15207_v32 = vadd.f32 %v15101_v18, %v5897_v59 }
 0xa12   :  { %v6125_v34 = vpack.c.bf16 %v6001_v23, %v5997_v7  ;;  %v6009_v7 = vadd.f32 %v15101_v18, %v5877_v11  ;;  %v6478_v23 = vadd.f32 %v6477_v42, %v15034_v20  ;;  %v5937_v42 = vmul.f32 %v15093_v62, %v14915_v8  ;;  %v6482_v30 = vpop.f32.mrf.mxu3 }
 0xa13   :  { %v5977_v8 = vmul.f32 %v15093_v62, %v15013_v22  ;;  %v5933_v22 = vmul.f32 %v15093_v62, %v14902_v26  ;;  %v5989_v26 = vmul.f32 %v15093_v62, %v15044_v43  ;;  %v18142_v11 = vpack.c.bf16 %v18140_v6, %v18141_v36  ;;  %v18150_v36 = vld [vmem:[#allocation104_spill] sm:$0xff] }
 0xa14   :  { %6718 = vmatmul.bf16.vlgmr.msra.gmra.mxu2 %v6125_v34  ;;  %v5913_v34 = vmul.f32 %v15093_v62, %v14849_v10  ;;  %v6129_v44 = vpack.c.bf16 %v6009_v7, %v6005_v56  ;;  %v5961_v10 = vmul.f32 %v15093_v62, %v14977_v33  ;;  %v5909_v33 = vmul.f32 %v15093_v62, %v14837_v51  ;;  %v18144_v56 = vld [vmem:[#allocation93_spill] sm:$0xff] }
 0xa15   :  { %v5965_v51 = vmul.f32 %v15093_v62, %v14985_v16  ;;  %v15210_v14 = vadd.f32 %v15101_v18, %v5901_v63  ;;  %v15213_v16 = vadd.f32 %v15101_v18, %v5905_v50  ;;  %v15228_v2 = vadd.f32 %v15101_v18, %v5921_v39  ;;  %v18151_v63 = vld [vmem:[#allocation100_spill] sm:$0xff]  ;;  %v18152_v39 = vld [vmem:[#allocation251_spill] sm:$0xff] }
 0xa16   :  { %v6561_v21 = vpop.f32.mrf.mxu0  ;;  %v15222_v43 = vadd.f32 %v15101_v18, %v5913_v34  ;;  %v15238_v13 = vadd.f32 %v15101_v18, %v5929_v57  ;;  %v15241_v34 = vadd.f32 %v15101_v18, %v5933_v22  ;;  %v15259_v22 = vadd.f32 %v15101_v18, %v5949_v31 }
 0xa17   :  { %v15138_v3 = vadd.f32 %v6561_v21, %v6473_v15  ;;  %v5925_v15 = vmul.f32 %v15093_v62, %v14875_v52  ;;  %v5973_v21 = vmul.f32 %v15093_v62, %v15007_v29  ;;  %v5981_v52 = vmul.f32 %v15093_v62, %v15020_v55  ;;  %v18143_v55 = vld [vmem:[#allocation190_spill] sm:$0xff] }
 0xa18   :  { %v15216_v29 = vadd.f32 %v15101_v18, %v5909_v33  ;;  %v18145_v7 = vpack.c.bf16 %v18143_v55, %v18144_v56  ;;  %v6141_v50 = vpack.c.bf16 %v15210_v14, %v15207_v32  ;;  %v15248_v33 = vadd.f32 %v15101_v18, %v5937_v42 }
 0xa19   :  { %6600 = vmatmul.bf16.gmra.mxu0 %v18132_v54  ;;  %v15169_v54 = vpop.f32.mrf.mxu1  ;;  %v15231_v59 = vadd.f32 %v15101_v18, %v5925_v15  ;;  %v15256_v15 = vadd.f32 %v15101_v18, %v5945_v1  ;;  %v15264_v42 = vadd.f32 %v15101_v18, %v5953_v27  ;;  %v15276_v31 = vadd.f32 %v15101_v18, %v5961_v10  ;;  %v18146_v10 = vld [vmem:[#allocation255_spill] sm:$0xff]  ;;  %v18149_v1 = vld [vmem:[#allocation97_spill] sm:$0xff] }
 0xa1a   :  { %6699 = vmatmul.bf16.gmra.mxu1 %v18135_v61  ;;  %v5917_v61 = vmul.f32 %v15093_v62, %v18139_v4  ;;  %v15251_v4 = vadd.f32 %v15101_v18, %v5941_v45  ;;  %v15267_v45 = vadd.f32 %v15101_v18, %v5957_v53  ;;  %v15282_v55 = vadd.f32 %v15101_v18, %v5969_v37  ;;  %v6484_v56 = vpop.f32.mrf.mxu3 }
 0xa1b   :  { %v15287_v53 = vadd.f32 %v15101_v18, %v5973_v21  ;;  %v15302_v37 = vadd.f32 %v15101_v18, %v5989_v26  ;;  %v6475_v26 = vadd.f32 %v15091_v46, %v15034_v20  ;;  %v18147_v21 = vld [vmem:[#allocation194_spill] sm:$0xff]  ;;  %v5893_v46 = vmul.f32 %v15093_v62, %v18150_v36 }
 0xa1c   :  { %v15225_v0 = vadd.f32 %v15101_v18, %v5917_v61  ;;  %v18148_v27 = vpack.c.bf16 %v18146_v10, %v18147_v21  ;;  %v18154_v32 = vpack.c.bf16 %v15216_v29, %v15213_v16 }
 0xa1e   :  { %v15171_v49 = vpop.f32.mrf.mxu0 }
 0xa21   :  { %v6655_v6 = vpop.f32.mrf.mxu1 }
 0xa24   :  { %6723 = vmatmul.bf16.gmra.mxu2 %v6129_v44  ;;  %v18153_v44 = vpack.c.bf16 %v18151_v63, %v18152_v39 }
 0xa26   :  { %v6566_v35 = vpop.f32.mrf.mxu0 }
 0xa27   :  { %v6567_v61 = vadd.f32 %v6566_v35, %v6478_v23  ;;  %v15271_v23 = vadd.f32 %v15115_v60, %v15121_v5  ;;  %v15290_v60 = vadd.f32 %v15101_v18, %v5977_v8  ;;  %v15293_v5 = vadd.f32 %v15101_v18, %v5981_v52 }
 0xa28   :  { %v15310_v52 = vadd.f32 %v15126_v48, %v15138_v3  ;;  %v6483_v8 = vadd.f32 %v6482_v30, %v15034_v20  ;;  %v6487_v3 = vpop.f32.mrf.mxu3  ;;  %v5889_v35 = vmul.f32 %v15093_v62, %v18149_v1 }
 0xa29   :  { %6605 = vmatmul.bf16.gmra.mxu0 %v18142_v11  ;;  %v15279_v11 = vadd.f32 %v15101_v18, %v5965_v51  ;;  %v15299_v51 = vadd.f32 %v15101_v18, %v15109_v19  ;;  %v15330_v21 = vadd.f32 %v6655_v6, %v6567_v61  ;;  %v6488_v62 = vadd.f32 %v6487_v3, %v15034_v20 }
 0xa2a   :  { %6704 = vmatmul.bf16.gmra.mxu1 %v18145_v7  ;;  %v6133_v7 = vpack.c.bf16 %v6017_v38, %v6013_v28  ;;  %v6564_v28 = vadd.f32 %v15171_v49, %v6475_v26  ;;  %v6657_v38 = vpop.f32.mrf.mxu1  ;;  %v6021_v49 = vadd.f32 %v15101_v18, %v5889_v35  ;;  %v6025_v26 = vadd.f32 %v15101_v18, %v5893_v46 }
 0xa2c   :  { %v15322_v48 = vadd.f32 %v15169_v54, %v6564_v28  ;;  %v6480_v54 = vadd.f32 %v15140_v25, %v15034_v20  ;;  %v6485_v25 = vadd.f32 %v6484_v56, %v15034_v20 }
 0xa2e   :  { %v6568_v19 = vpop.f32.mrf.mxu0 }
 0xa2f   :  { %v6569_v1 = vadd.f32 %v6568_v19, %v6480_v54 }
 0xa30   :  { %v6489_v28 = vpop.f32.mrf.mxu3 }
 0xa31   :  { %v15338_v36 = vadd.f32 %v6657_v38, %v6569_v1  ;;  %v6490_v14 = vadd.f32 %v6489_v28, %v15034_v20 }
 0xa32   :  { %v6660_v10 = vpop.f32.mrf.mxu1 }
 0xa34   :  { %6728 = vmatmul.bf16.gmra.mxu2 %v6133_v7 }
 0xa36   :  { %v6571_v7 = vpop.f32.mrf.mxu0 }
 0xa37   :  { %v6572_v57 = vadd.f32 %v6571_v7, %v6483_v8 }
 0xa38   :  { %v6492_v61 = vpop.f32.mrf.mxu3 }
 0xa39   :  { %6610 = vmatmul.bf16.gmra.mxu0 %v18148_v27  ;;  %v6137_v27 = vpack.c.bf16 %v6025_v26, %v6021_v49  ;;  %v15340_v6 = vadd.f32 %v6660_v10, %v6572_v57  ;;  %v6493_v63 = vadd.f32 %v6492_v61, %v15034_v20  ;;  %v18155_v61 = vpack.c.bf16 %v15225_v0, %v15222_v43 }
 0xa3a   :  { %v6662_v18 = vpop.f32.mrf.mxu1 }
 0xa3e   :  { %v6573_v30 = vpop.f32.mrf.mxu0 }
 0xa3f   :  { %v6574_v39 = vadd.f32 %v6573_v30, %v6485_v25 }
 0xa41   :  { %v15347_v38 = vadd.f32 %v6662_v18, %v6574_v39 }
 0xa42   :  { %v6665_v19 = vpop.f32.mrf.mxu1 }
 0xa44   :  { %6733 = vmatmul.bf16.gmra.mxu2 %v6137_v27 }
 0xa46   :  { %v6576_v8 = vpop.f32.mrf.mxu0 }
 0xa47   :  { %v6577_v35 = vadd.f32 %v6576_v8, %v6488_v62 }
 0xa49   :  { %6615 = vmatmul.bf16.gmra.mxu0 %v18153_v44  ;;  %v6494_v44 = vpop.f32.mrf.mxu3  ;;  %v15349_v26 = vadd.f32 %v6665_v19, %v6577_v35 }
 0xa4a   :  { %v6667_v49 = vpop.f32.mrf.mxu1  ;;  %v6495_v16 = vadd.f32 %v6494_v44, %v15034_v20 }
 0xa4e   :  { %v6578_v7 = vpop.f32.mrf.mxu0 }
 0xa51   :  { %v6497_v57 = vpop.f32.mrf.mxu3 }
 0xa52   :  { %v6670_v56 = vpop.f32.mrf.mxu1  ;;  %v6498_v27 = vadd.f32 %v6497_v57, %v15034_v20 }
 0xa54   :  { %6738 = vmatmul.bf16.gmra.mxu2 %v6141_v50  ;;  %v6579_v50 = vadd.f32 %v6578_v7, %v6490_v14 }
 0xa56   :  { %v6581_v3 = vpop.f32.mrf.mxu0  ;;  %v15356_v30 = vadd.f32 %v6667_v49, %v6579_v50 }
 0xa57   :  { %v6582_v46 = vadd.f32 %v6581_v3, %v6493_v63 }
 0xa59   :  { %v6499_v62 = vpop.f32.mrf.mxu3  ;;  %v15358_v18 = vadd.f32 %v6670_v56, %v6582_v46  ;;  %v18156_v46 = vpack.c.bf16 %v15231_v59, %v15228_v2  ;;  %v18158_v59 = vpack.c.bf16 %v15251_v4, %v15248_v33 }
 0xa5a   :  { %v6672_v8 = vpop.f32.mrf.mxu1  ;;  %v6500_v43 = vadd.f32 %v6499_v62, %v15034_v20  ;;  %v18160_v62 = vpack.c.bf16 %v15267_v45, %v15264_v42 }
 0xa5e   :  { %v6583_v10 = vpop.f32.mrf.mxu0 }
 0xa5f   :  { %v6584_v29 = vadd.f32 %v6583_v10, %v6495_v16 }
 0xa61   :  { %v6502_v28 = vpop.f32.mrf.mxu3  ;;  %v15365_v25 = vadd.f32 %v6672_v8, %v6584_v29 }
 0xa62   :  { %v6503_v7 = vadd.f32 %v6502_v28, %v15034_v20  ;;  %v6675_v63 = vpop.f32.mrf.mxu1  ;;  %v18164_v28 = vpack.c.bf16 %v15302_v37, %v15299_v51 }
 0xa64   :  { %6743 = vmatmul.bf16.gmra.mxu2 %v18154_v32  ;;  %v18157_v32 = vpack.c.bf16 %v15241_v34, %v15238_v13  ;;  %v8494_v13 = vld [vmem:[%s16019_s4 + $0x38] sm:$0xff] }
 0xa65   :  { %7103 = vmatpush.bf16.msra.mxu3 %v8494_v13 }
 0xa66   :  { %v6586_v54 = vpop.f32.mrf.mxu0 }
 0xa67   :  { %v6587_v1 = vadd.f32 %v6586_v54, %v6498_v27 }
 0xa69   :  { %v15367_v3 = vadd.f32 %v6675_v63, %v6587_v1  ;;  %v15464_v51 = vpop.f32.mrf.mxu3 }
 0xa6a   :  { %v6677_v49 = vpop.f32.mrf.mxu1 }
 0xa6e   :  { %v6588_v35 = vpop.f32.mrf.mxu0 }
 0xa6f   :  { %v6589_v0 = vadd.f32 %v6588_v35, %v6500_v43 }
 0xa71   :  { %v15373_v44 = vadd.f32 %v6677_v49, %v6589_v0 }
 0xa72   :  { %v6680_v57 = vpop.f32.mrf.mxu1 }
 0xa74   :  { %6748 = vmatmul.bf16.gmra.mxu2 %v18155_v61  ;;  %v18162_v61 = vpack.c.bf16 %v15287_v53, %v15282_v55 }
 0xa76   :  { %v6591_v19 = vpop.f32.mrf.mxu0 }
 0xa77   :  { %v6592_v39 = vadd.f32 %v6591_v19, %v6503_v7 }
 0xa79   :  { %v15375_v10 = vadd.f32 %v6680_v57, %v6592_v39 }
 0xa7a   :  { %v15474_v43 = vpop.f32.mrf.mxu1 }
 0xa82   :  { %v15486_v57 = vpop.f32.mrf.mxu1 }
 0xa84   :  { %6753 = vmatmul.bf16.gmra.mxu2 %v18156_v46 }
 0xa94   :  { %6758 = vmatmul.bf16.gmra.mxu2 %v18157_v32 }
 0xa97   :  { %v6719_v14 = vpop.f32.mrf.mxu2 }
 0xa98   :  { %v15381_v50 = vadd.f32 %v6719_v14, %v15070_v47 }
 0xa9f   :  { %v6721_v56 = vpop.f32.mrf.mxu2 }
 0xaa0   :  { %v15384_v2 = vadd.f32 %v6721_v56, %v15081_v58  ;;  %v18159_v58 = vpack.c.bf16 %v15259_v22, %v15256_v15  ;;  %v8493_v15 = vld [vmem:[%s16019_s4 + $0x30] sm:$0xff] }
 0xaa1   :  { %7104 = vmatpush.bf16.msra.mxu3 %v8493_v15 }
 0xaa2   :  { %v15519_v15 = vmax.f32 %v15384_v2, 0.0 }
 0xaa4   :  { %6763 = vmatmul.bf16.gmra.mxu2 %v18158_v59  ;;  %v15495_v59 = vpop.f32.mrf.mxu1 }
 0xaa7   :  { %v6724_v27 = vpop.f32.mrf.mxu2 }
 0xaa8   :  { %v15390_v54 = vadd.f32 %v6724_v27, %v15085_v41 }
 0xaaf   :  { %v6726_v34 = vpop.f32.mrf.mxu2 }
 0xab0   :  { %v15396_v47 = vadd.f32 %v6726_v34, %v15111_v9 }
 0xab4   :  { %6768 = vmatmul.bf16.gmra.mxu2 %v18159_v58 }
 0xab7   :  { %v6729_v1 = vpop.f32.mrf.mxu2 }
 0xab8   :  { %v15402_v33 = vadd.f32 %v6729_v1, %v15119_v17 }
 0xabf   :  { %v6731_v4 = vpop.f32.mrf.mxu2 }
 0xac0   :  { %v15405_v41 = vadd.f32 %v6731_v4, %v15132_v24  ;;  %v18161_v24 = vpack.c.bf16 %v15279_v11, %v15276_v31  ;;  %v8492_v31 = vld [vmem:[%s16019_s4 + $0x28] sm:$0xff] }
 0xac1   :  { %7105 = vmatpush.bf16.msra.mxu3 %v8492_v31 }
 0xac4   :  { %6773 = vmatmul.bf16.gmra.mxu2 %v18160_v62 }
 0xac7   :  { %v6734_v8 = vpop.f32.mrf.mxu2 }
 0xac8   :  { %v15411_v9 = vadd.f32 %v6734_v8, %v15177_v40 }
 0xacf   :  { %v6736_v22 = vpop.f32.mrf.mxu2 }
 0xad0   :  { %v15417_v17 = vadd.f32 %v6736_v22, %v15271_v23 }
 0xad4   :  { %6778 = vmatmul.bf16.gmra.mxu2 %v18161_v24  ;;  %v15524_v24 = vmax.f32 %v15381_v50, 0.0  ;;  %v15541_v50 = vmax.f32 %v15402_v33, 0.0 }
 0xad6   :  { %v6869_v2 = vmul.f32 %v15524_v24, %v15524_v24  ;;  %v6873_v33 = vmul.f32 %v15541_v50, %v15541_v50 }
 0xad7   :  { %v6739_v35 = vpop.f32.mrf.mxu2 }
 0xad8   :  { %v15423_v42 = vadd.f32 %v6739_v35, %v15310_v52  ;;  %v15527_v35 = vmax.f32 %v15390_v54, 0.0  ;;  %v6831_v54 = vadd.f32 %v15519_v15, %v15524_v24 }
 0xada   :  { %v6871_v31 = vmul.f32 %v15527_v35, %v15527_v35 }
 0xadf   :  { %v6741_v45 = vpop.f32.mrf.mxu2 }
 0xae0   :  { %v15426_v40 = vadd.f32 %v6741_v45, %v15322_v48  ;;  %v18163_v48 = vpack.c.bf16 %v15293_v5, %v15290_v60  ;;  %v8491_v60 = vld [vmem:[%s16019_s4 + $0x20] sm:$0xff] }
 0xae1   :  { %7106 = vmatpush.bf16.msra.mxu3 %v8491_v60  ;;  %v15558_v60 = vmax.f32 %v15411_v9, 0.0 }
 0xae3   :  { %18166 = vst [vmem:[#allocation122_spill] sm:$0xff] %v15558_v60  ;;  %v6875_v9 = vmul.f32 %v15558_v60, %v15558_v60 }
 0xae4   :  { %6783 = vmatmul.bf16.gmra.mxu2 %v18162_v61  ;;  %v6870_v61 = vmul.f32 %v15519_v15, %v15519_v15 }
 0xae7   :  { %v6744_v16 = vpop.f32.mrf.mxu2 }
 0xae8   :  { %v15432_v23 = vadd.f32 %v6744_v16, %v15330_v21  ;;  %v15534_v16 = vmax.f32 %v15396_v47, 0.0  ;;  %v15550_v47 = vmax.f32 %v15405_v41, 0.0 }
 0xaea   :  { %18165 = vst [vmem:[#allocation118_spill] sm:$0xff] %v15550_v47  ;;  %v6874_v41 = vmul.f32 %v15550_v47, %v15550_v47 }
 0xaef   :  { %v6746_v11 = vpop.f32.mrf.mxu2 }
 0xaf0   :  { %v15438_v52 = vadd.f32 %v6746_v11, %v15338_v36 }
 0xaf4   :  { %6788 = vmatmul.bf16.gmra.mxu2 %v18163_v48  ;;  %v6901_v48 = vadd.f32 %v6870_v61, %v6869_v2 }
 0xaf7   :  { %v6749_v29 = vpop.f32.mrf.mxu2 }
 0xaf8   :  { %v15444_v55 = vadd.f32 %v6749_v29, %v15340_v6  ;;  %v6872_v29 = vmul.f32 %v15534_v16, %v15534_v16 }
 0xaff   :  { %v6751_v53 = vpop.f32.mrf.mxu2 }
 0xb00   :  { %v15447_v21 = vadd.f32 %v6751_v53, %v15347_v38  ;;  %v6832_v53 = vadd.f32 %v6831_v54, %v15527_v35  ;;  %v15582_v54 = vmax.f32 %v15426_v40, 0.0  ;;  %v15596_v40 = vmax.f32 %v15438_v52, 0.0 }
 0xb02   :  { %v6880_v52 = vmul.f32 %v15596_v40, %v15596_v40 }
 0xb04   :  { %6793 = vmatmul.bf16.gmra.mxu2 %v18164_v28 }
 0xb07   :  { %v6754_v7 = vpop.f32.mrf.mxu2 }
 0xb08   :  { %v15453_v36 = vadd.f32 %v6754_v7, %v15349_v26  ;;  %v15469_v26 = vpop.f32.mrf.mxu0  ;;  %v6902_v7 = vadd.f32 %v6901_v48, %v6871_v31 }
 0xb0f   :  { %v6756_v5 = vpop.f32.mrf.mxu2 }
 0xb10   :  { %v15459_v6 = vadd.f32 %v6756_v5, %v15356_v30  ;;  %v15476_v30 = vpop.f32.mrf.mxu3  ;;  %v15478_v0 = vpop.f32.mrf.mxu0 }
 0xb17   :  { %v6759_v19 = vpop.f32.mrf.mxu2 }
 0xb18   :  { %v15462_v38 = vadd.f32 %v6759_v19, %v15358_v18  ;;  %v8490_v18 = vld [vmem:[%s16019_s4 + $0x18] sm:$0xff]  ;;  %v15488_v32 = vpop.f32.mrf.mxu3  ;;  %v6833_v19 = vadd.f32 %v6832_v53, %v15534_v16 }
 0xb19   :  { %7107 = vmatpush.bf16.msra.mxu3 %v8490_v18 }
 0xb1f   :  { %v6761_v39 = vpop.f32.mrf.mxu2 }
 0xb20   :  { %v15467_v37 = vadd.f32 %v6761_v39, %v15365_v25  ;;  %v15497_v27 = vpop.f32.mrf.mxu3  ;;  %v6903_v39 = vadd.f32 %v6902_v7, %v6872_v29 }
 0xb27   :  { %v6764_v63 = vpop.f32.mrf.mxu2 }
 0xb28   :  { %v15472_v46 = vadd.f32 %v6764_v63, %v15367_v3  ;;  %v15490_v3 = vpop.f32.mrf.mxu0  ;;  %v15507_v1 = vpop.f32.mrf.mxu3  ;;  %v15566_v63 = vmax.f32 %v15417_v17, 0.0 }
 0xb2a   :  { %18167 = vst [vmem:[#allocation377_spill] sm:$0xff] %v15566_v63  ;;  %v6876_v17 = vmul.f32 %v15566_v63, %v15566_v63 }
 0xb2f   :  { %v6766_v49 = vpop.f32.mrf.mxu2 }
 0xb30   :  { %v15484_v25 = vadd.f32 %v6766_v49, %v15373_v44  ;;  %v15501_v34 = vpop.f32.mrf.mxu0  ;;  %v15503_v44 = vpop.f32.mrf.mxu1  ;;  %v6834_v49 = vadd.f32 %v6833_v19, %v15541_v50 }
 0xb31   :  { %v15521_v22 = vpop.f32.mrf.mxu3 }
 0xb32   :  { %v6835_v2 = vadd.f32 %v6834_v49, %v15550_v47 }
 0xb34   :  { %v6836_v48 = vadd.f32 %v6835_v2, %v15558_v60 }
 0xb36   :  { %v6837_v7 = vadd.f32 %v6836_v48, %v15566_v63 }
 0xb37   :  { %v6769_v14 = vpop.f32.mrf.mxu2 }
 0xb38   :  { %v15493_v56 = vadd.f32 %v6769_v14, %v15375_v10  ;;  %v15509_v4 = vpop.f32.mrf.mxu0  ;;  %v8489_v10 = vld [vmem:[%s16019_s4 + $0x10] sm:$0xff]  ;;  %v15516_v8 = vpop.f32.mrf.mxu1  ;;  %v6904_v14 = vadd.f32 %v6903_v39, %v6873_v33  ;;  %v6878_v39 = vmul.f32 %v15582_v54, %v15582_v54 }
 0xb39   :  { %7108 = vmatpush.bf16.msra.mxu3 %v8489_v10  ;;  %v15560_v5 = vpop.f32.mrf.mxu3  ;;  %v15574_v10 = vmax.f32 %v15423_v42, 0.0  ;;  %v15588_v42 = vmax.f32 %v15432_v23, 0.0 }
 0xb3a   :  { %v6905_v31 = vadd.f32 %v6904_v14, %v6874_v41 }
 0xb3b   :  { %v6877_v53 = vmul.f32 %v15574_v10, %v15574_v10  ;;  %v6838_v49 = vadd.f32 %v6837_v7, %v15574_v10  ;;  %v6879_v23 = vmul.f32 %v15588_v42, %v15588_v42 }
 0xb3c   :  { %v6906_v29 = vadd.f32 %v6905_v31, %v6875_v9  ;;  %v15604_v9 = vmax.f32 %v15444_v55, 0.0 }
 0xb3e   :  { %v6907_v19 = vadd.f32 %v6906_v29, %v6876_v17  ;;  %18168 = vst [vmem:[#allocation302_spill] sm:$0xff] %v15604_v9  ;;  %v6839_v17 = vadd.f32 %v6838_v49, %v15582_v54  ;;  %v15614_v29 = vmax.f32 %v15447_v21, 0.0  ;;  %v6881_v55 = vmul.f32 %v15604_v9, %v15604_v9 }
 0xb3f   :  { %v15499_v13 = vpop.f32.mrf.mxu2  ;;  %v15628_v21 = vmax.f32 %v15459_v6, 0.0  ;;  %v15642_v6 = vmax.f32 %v15462_v38, 0.0  ;;  %v6513_v38 = vadd.f32 %v15497_v27, %v15034_v20 }
 0xb40   :  { %v15529_v45 = vpop.f32.mrf.mxu0  ;;  %v15553_v28 = vpop.f32.mrf.mxu1  ;;  %v6908_v14 = vadd.f32 %v6907_v19, %v6877_v53  ;;  %v6840_v53 = vadd.f32 %v6839_v17, %v15588_v42  ;;  %v15620_v19 = vmax.f32 %v15453_v36, 0.0  ;;  %v8488_v36 = vld [vmem:[%s16019_s4 + $0x8] sm:$0xff] }
 0xb41   :  { %v15598_v41 = vpop.f32.mrf.mxu3  ;;  %7109 = vmatpush.bf16.msra.mxu3 %v8488_v36 }
 0xb42   :  { %v6909_v48 = vadd.f32 %v6908_v14, %v6878_v39  ;;  %v6841_v12 = vadd.f32 %v6840_v53, %v15596_v40  ;;  %v6505_v39 = vadd.f32 %v15464_v51, %v15034_v20  ;;  %v6882_v14 = vmul.f32 %v15614_v29, %v15614_v29 }
 0xb44   :  { %v6910_v7 = vadd.f32 %v6909_v48, %v6879_v23  ;;  %v6508_v23 = vadd.f32 %v15476_v30, %v15034_v20  ;;  %v6842_v17 = vadd.f32 %v6841_v12, %v15604_v9  ;;  %v6594_v48 = vadd.f32 %v15469_v26, %v6505_v39 }
 0xb45   :  { %v6510_v12 = vadd.f32 %v15488_v32, %v15034_v20  ;;  %v15653_v39 = vmax.f32 %v15467_v37, 0.0  ;;  %v6602_v37 = vadd.f32 %v15501_v34, %v6513_v38 }
 0xb46   :  { %v6911_v49 = vadd.f32 %v6910_v7, %v6880_v52  ;;  %v6883_v52 = vmul.f32 %v15620_v19, %v15620_v19  ;;  %v6597_v63 = vadd.f32 %v15478_v0, %v6508_v23  ;;  %v6843_v60 = vadd.f32 %v6842_v17, %v15614_v29 }
 0xb47   :  { %v15505_v58 = vpop.f32.mrf.mxu2  ;;  %v6885_v0 = vmul.f32 %v15642_v6, %v15642_v6  ;;  %v6683_v23 = vadd.f32 %v15474_v43, %v6594_v48 }
 0xb48   :  { %v15568_v18 = vpop.f32.mrf.mxu0  ;;  %v15591_v33 = vpop.f32.mrf.mxu1  ;;  %v6912_v51 = vadd.f32 %v6911_v49, %v6881_v55  ;;  %v6884_v55 = vmul.f32 %v15628_v21, %v15628_v21  ;;  %v6599_v49 = vadd.f32 %v15490_v3, %v6510_v12  ;;  %v6844_v32 = vadd.f32 %v6843_v60, %v15620_v19 }
 0xb49   :  { %v6524_v30 = vpop.f32.mrf.mxu3  ;;  %v6686_v27 = vadd.f32 %v15486_v57, %v6597_v63  ;;  %v6886_v3 = vmul.f32 %v15653_v39, %v15653_v39  ;;  %v15671_v60 = vmax.f32 %v15484_v25, 0.0  ;;  %v15681_v63 = vmax.f32 %v15493_v56, 0.0 }
 0xb4a   :  { %v6913_v26 = vadd.f32 %v6912_v51, %v6882_v14  ;;  %v15662_v14 = vmax.f32 %v15472_v46, 0.0  ;;  %v6845_v17 = vadd.f32 %v6844_v32, %v15628_v21  ;;  %v6772_v51 = vadd.f32 %v15499_v13, %v6683_v23 }
 0xb4b   :  { %v6515_v46 = vadd.f32 %v15507_v1, %v15034_v20  ;;  %v6688_v34 = vadd.f32 %v15495_v59, %v6599_v49  ;;  %v6518_v13 = vadd.f32 %v15521_v22, %v15034_v20  ;;  %v6691_v12 = vadd.f32 %v15503_v44, %v6602_v37 }
 0xb4c   :  { %v6914_v9 = vadd.f32 %v6913_v26, %v6883_v52  ;;  %v6846_v43 = vadd.f32 %v6845_v17, %v15642_v6  ;;  %v6887_v57 = vmul.f32 %v15662_v14, %v15662_v14  ;;  %v15691_v38 = vmax.f32 %v6772_v51, 0.0 }
 0xb4d   :  { %v6604_v52 = vadd.f32 %v15509_v4, %v6515_v46  ;;  %v6607_v22 = vadd.f32 %v15529_v45, %v6518_v13  ;;  %v6889_v44 = vmul.f32 %v15681_v63, %v15681_v63  ;;  %v6523_v37 = vadd.f32 %v15598_v41, %v15034_v20 }
 0xb4e   :  { %v6915_v36 = vadd.f32 %v6914_v9, %v6884_v55  ;;  %v6775_v9 = vadd.f32 %v15505_v58, %v6686_v27  ;;  %v6847_v1 = vadd.f32 %v6846_v43, %v15653_v39  ;;  %v6888_v55 = vmul.f32 %v15671_v60, %v15671_v60 }
 0xb4f   :  { %v15514_v62 = vpop.f32.mrf.mxu2  ;;  %v6520_v58 = vadd.f32 %v15560_v5, %v15034_v20  ;;  %v6693_v45 = vadd.f32 %v15516_v8, %v6604_v52  ;;  %v6525_v27 = vadd.f32 %v6524_v30, %v15034_v20 }
 0xb50   :  { %v15608_v31 = vpop.f32.mrf.mxu0  ;;  %v15637_v53 = vpop.f32.mrf.mxu1  ;;  %v6916_v48 = vadd.f32 %v6915_v36, %v6885_v0  ;;  %v6777_v56 = vadd.f32 %v15514_v62, %v6688_v34  ;;  %v6848_v4 = vadd.f32 %v6847_v1, %v15662_v14  ;;  %v15700_v0 = vmax.f32 %v6775_v9, 0.0 }
 0xb51   :  { %v6527_v49 = vpop.f32.mrf.mxu3  ;;  %v6609_v62 = vadd.f32 %v15568_v18, %v6520_v58  ;;  %v6696_v18 = vadd.f32 %v15553_v28, %v6607_v22 }
 0xb52   :  { %v6917_v26 = vadd.f32 %v6916_v48, %v6886_v3  ;;  %v6849_v5 = vadd.f32 %v6848_v4, %v15671_v60  ;;  %v6890_v3 = vmul.f32 %v15691_v38, %v15691_v38  ;;  %v15711_v51 = vmax.f32 %v6777_v56, 0.0 }
 0xb53   :  { %v6528_v43 = vadd.f32 %v6527_v49, %v15034_v20  ;;  %v6891_v8 = vmul.f32 %v15700_v0, %v15700_v0  ;;  %v6698_v13 = vadd.f32 %v15591_v33, %v6609_v62 }
 0xb54   :  { %v6918_v32 = vadd.f32 %v6917_v26, %v6887_v57  ;;  %v6850_v46 = vadd.f32 %v6849_v5, %v15681_v63  ;;  %v6892_v28 = vmul.f32 %v15711_v51, %v15711_v51 }
 0xb56   :  { %v6919_v36 = vadd.f32 %v6918_v32, %v6888_v55  ;;  %v6851_v9 = vadd.f32 %v6850_v46, %v15691_v38 }
 0xb57   :  { %v15543_v11 = vpop.f32.mrf.mxu2 }
 0xb58   :  { %v6613_v47 = vpop.f32.mrf.mxu0  ;;  %v6702_v59 = vpop.f32.mrf.mxu1  ;;  %v6780_v23 = vadd.f32 %v15543_v11, %v6691_v12  ;;  %v6612_v11 = vadd.f32 %v15608_v31, %v6523_v37  ;;  %v6920_v34 = vadd.f32 %v6919_v36, %v6889_v44  ;;  %v6852_v1 = vadd.f32 %v6851_v9, %v15700_v0 }
 0xb59   :  { %v6614_v57 = vadd.f32 %v6613_v47, %v6525_v27  ;;  %v6529_v58 = vpop.f32.mrf.mxu3 }
 0xb5a   :  { %v15720_v30 = vmax.f32 %v6780_v23, 0.0  ;;  %v6701_v55 = vadd.f32 %v15637_v53, %v6612_v11  ;;  %v6853_v33 = vadd.f32 %v6852_v1, %v15711_v51 }
 0xb5b   :  { %v6703_v4 = vadd.f32 %v6702_v59, %v6614_v57 }
 0xb5c   :  { %v6854_v37 = vadd.f32 %v6853_v33, %v15720_v30 }
 0xb5f   :  { %v15576_v61 = vpop.f32.mrf.mxu2 }
 0xb60   :  { %v6616_v17 = vpop.f32.mrf.mxu0  ;;  %v6782_v41 = vadd.f32 %v15576_v61, %v6693_v45  ;;  %v6921_v61 = vadd.f32 %v6920_v34, %v6890_v3  ;;  %v6705_v47 = vpop.f32.mrf.mxu1 }
 0xb61   :  { %v6617_v52 = vadd.f32 %v6616_v17, %v6528_v43  ;;  %v6530_v17 = vadd.f32 %v6529_v58, %v15034_v20 }
 0xb62   :  { %v15728_v12 = vmax.f32 %v6782_v41, 0.0  ;;  %v6922_v56 = vadd.f32 %v6921_v61, %v6891_v8 }
 0xb63   :  { %v6706_v44 = vadd.f32 %v6705_v47, %v6617_v52 }
 0xb64   :  { %v6923_v32 = vadd.f32 %v6922_v56, %v6892_v28  ;;  %v6894_v53 = vmul.f32 %v15728_v12, %v15728_v12  ;;  %v6855_v27 = vadd.f32 %v6854_v37, %v15728_v12 }
 0xb67   :  { %v15606_v2 = vpop.f32.mrf.mxu2 }
 0xb68   :  { %v6785_v31 = vadd.f32 %v15606_v2, %v6696_v18  ;;  %v6893_v2 = vmul.f32 %v15720_v30, %v15720_v30  ;;  %v6618_v23 = vpop.f32.mrf.mxu0 }
 0xb69   :  { %v6619_v3 = vadd.f32 %v6618_v23, %v6530_v17 }
 0xb6a   :  { %v15735_v49 = vmax.f32 %v6785_v31, 0.0  ;;  %v6924_v5 = vadd.f32 %v6923_v32, %v6893_v2 }
 0xb6c   :  { %v6925_v11 = vadd.f32 %v6924_v5, %v6894_v53  ;;  %v6856_v46 = vadd.f32 %v6855_v27, %v15735_v49 }
 0xb6f   :  { %v15644_v7 = vpop.f32.mrf.mxu2 }
 0xb70   :  { %v6787_v26 = vadd.f32 %v15644_v7, %v6698_v13 }
 0xb72   :  { %v15740_v7 = vmax.f32 %v6787_v26, 0.0 }
 0xb74   :  { %v6896_v41 = vmul.f32 %v15740_v7, %v15740_v7  ;;  %v6857_v43 = vadd.f32 %v6856_v46, %v15740_v7 }
 0xb77   :  { %v6789_v25 = vpop.f32.mrf.mxu2 }
 0xb78   :  { %v6790_v22 = vadd.f32 %v6789_v25, %v6701_v55  ;;  %v6895_v25 = vmul.f32 %v15735_v49, %v15735_v49 }
 0xb7a   :  { %v15746_v59 = vmax.f32 %v6790_v22, 0.0  ;;  %v6926_v20 = vadd.f32 %v6925_v11, %v6895_v25 }
 0xb7c   :  { %v6897_v34 = vmul.f32 %v15746_v59, %v15746_v59  ;;  %v6927_v57 = vadd.f32 %v6926_v20, %v6896_v41  ;;  %v6858_v9 = vadd.f32 %v6857_v43, %v15746_v59  ;;  %v8487_v43 = vld [vmem:[%s16019_s4] sm:$0xff] }
 0xb7d   :  { %7110 = vmatpush.bf16.msra.mxu3 %v8487_v43 }
 0xb7e   :  { %v6928_v61 = vadd.f32 %v6927_v57, %v6897_v34 }
 0xb7f   :  { %v6791_v48 = vpop.f32.mrf.mxu2 }
 0xb80   :  { %v6792_v62 = vadd.f32 %v6791_v48, %v6703_v4  ;;  %v6707_v48 = vpop.f32.mrf.mxu1 }
 0xb81   :  { %v6708_v13 = vadd.f32 %v6707_v48, %v6619_v3 }
 0xb82   :  { %v15751_v18 = vmax.f32 %v6792_v62, 0.0 }
 0xb84   :  { %v6898_v31 = vmul.f32 %v15751_v18, %v15751_v18  ;;  %v6859_v28 = vadd.f32 %v6858_v9, %v15751_v18 }
 0xb86   :  { %v6929_v55 = vadd.f32 %v6928_v61, %v6898_v31  ;;  %v18169_v61 = vld [vmem:[#allocation112_spill] sm:$0xff] }
 0xb87   :  { %v6794_v45 = vpop.f32.mrf.mxu2 }
 0xb88   :  { %v6795_v36 = vadd.f32 %v6794_v45, %v6706_v44 }
 0xb8a   :  { %v6829_v8 = vmax.f32 %v6795_v36, 0.0 }
 0xb8c   :  { %v6899_v1 = vmul.f32 %v6829_v8, %v6829_v8  ;;  %v6860_v47 = vadd.f32 %v6859_v28, %v6829_v8 }
 0xb8e   :  { %v6930_v2 = vadd.f32 %v6929_v55, %v6899_v1  ;;  %v18170_v55 = vld [vmem:[#allocation113_spill] sm:$0xff] }
 0xb8f   :  { %v6796_v52 = vpop.f32.mrf.mxu2 }
 0xb90   :  { %v6797_v26 = vadd.f32 %v6796_v52, %v6708_v13 }
 0xb92   :  { %v6830_v56 = vmax.f32 %v6797_v26, 0.0 }
 0xb94   :  { %v6861_v58 = vadd.f32 %v6860_v47, %v6830_v56  ;;  %v6900_v33 = vmul.f32 %v6830_v56, %v6830_v56 }
 0xb96   :  { %v6862_v22 = vrot.slane %v6861_v58, 4  ;;  %v6931_v4 = vadd.f32 %v6930_v2, %v6900_v33 }
 0xb98   :  { %v6863_v32 = vadd.f32 %v6862_v22, %v6861_v58  ;;  %v6932_v44 = vrot.slane %v6931_v4, 4 }
 0xb9a   :  { %v6864_v23 = vrot.slane %v6863_v32, 2  ;;  %v6933_v37 = vadd.f32 %v6932_v44, %v6931_v4 }
 0xb9c   :  { %v6865_v53 = vadd.f32 %v6864_v23, %v6863_v32  ;;  %v6934_v62 = vrot.slane %v6933_v37, 2 }
 0xb9e   :  { %v6866_v17 = vrot.slane %v6865_v53, 1  ;;  %v6935_v5 = vadd.f32 %v6934_v62, %v6933_v37 }
 0xba0   :  { %v6867_v45 = vadd.f32 %v6866_v17, %v6865_v53  ;;  %v6936_v27 = vrot.slane %v6935_v5, 1  ;;  %v18171_v17 = vld [vmem:[#allocation302_spill] sm:$0xff] }
 0xba2   :  { %v6868_v25 = vmul.f32 0.00390625, %v6867_v45  ;;  %v6937_v36 = vadd.f32 %v6936_v27, %v6935_v5 }
 0xba4   :  { %v6938_v3 = vmul.f32 0.00390625, %v6937_v36  ;;  %v6939_v11 = vmul.f32 %v6868_v25, %v6868_v25 }
 0xba6   :  { %v6940_v46 = vsub.f32 %v6938_v3, %v6939_v11 }
 0xba8   :  { %v6941_v41 = vmax.f32 %v6940_v46, 0.0 }
 0xbaa   :  { %v6942_v20 = vadd.f32 1e-05, %v6941_v41 }
 0xbac   :  { %8520 = vrsqrt.f32 %v6942_v20  ;;  %vm6949_vm14 = vweird.f32 %v6942_v20 }
 0xbb2   :  { %v8521_v34 = vpop.eup %8520 }
 0xbb3   :  { %v6944_v48 = vmul.f32 %v8521_v34, %v6942_v20  ;;  %vm6950_vm13 = vweird.f32 %v8521_v34 }
 0xbb4   :  { %vm6951_vm15 = vmor %vm6949_vm14, %vm6950_vm13 }
 0xbb5   :  { %v6945_v57 = vmul.f32 %v8521_v34, %v6944_v48 }
 0xbb7   :  { %v6946_v9 = vmul.f32 0.5, %v6945_v57 }
 0xbb9   :  { %v6947_v31 = vsub.f32 1.5, %v6946_v9 }
 0xbbb   :  { %v6948_v13 = vmul.f32 %v8521_v34, %v6947_v31 }
 0xbbd   :  { %v6952_v52 = vsel %vm6951_vm15, %v8521_v34, %v6948_v13 }
 0xbbe   :  { %v6953_v28 = vmul.f32 %v6952_v52, %v18169_v61 }
 0xbc0   :  { %v6954_v1 = vmul.f32 %v6953_v28, %v6868_v25  ;;  %v15764_v26 = vperm.slane %v6953_v28, 3 }
 0xbc2   :  { %v6955_v47 = vsub.f32 %v18170_v55, %v6954_v1  ;;  %v15768_v2 = vmul.f32 %v15764_v26, %v6830_v56  ;;  %v6957_v33 = vmul.f32 %v15764_v26, %v15524_v24  ;;  %v6958_v22 = vmul.f32 %v15764_v26, %v15519_v15 }
 0xbc3   :  { %v15777_v4 = vmul.f32 %v15764_v26, %v6829_v8  ;;  %v6959_v56 = vmul.f32 %v15764_v26, %v15527_v35  ;;  %v6960_v37 = vmul.f32 %v15764_v26, %v15534_v16  ;;  %v15787_v24 = vmul.f32 %v15764_v26, %v15541_v50 }
 0xbc4   :  { %v15770_v58 = vperm.slane %v6955_v47, 3  ;;  %v6965_v15 = vmul.f32 %v15764_v26, %v15574_v10  ;;  %v6966_v62 = vmul.f32 %v15764_v26, %v15582_v54  ;;  %v6967_v35 = vmul.f32 %v15764_v26, %v15588_v42 }
 0xbc5   :  { %v6968_v16 = vmul.f32 %v15764_v26, %v15596_v40  ;;  %v6969_v50 = vmul.f32 %v15764_v26, %v18171_v17  ;;  %v6970_v5 = vmul.f32 %v15764_v26, %v15614_v29  ;;  %v6971_v10 = vmul.f32 %v15764_v26, %v15620_v19 }
 0xbc6   :  { %v6990_v32 = vadd.f32 %v15770_v58, %v6957_v33  ;;  %v6991_v44 = vadd.f32 %v15770_v58, %v6958_v22  ;;  %v6992_v8 = vadd.f32 %v15770_v58, %v6959_v56  ;;  %v6993_v53 = vadd.f32 %v15770_v58, %v6960_v37 }
 0xbc7   :  { %v6972_v45 = vmul.f32 %v15764_v26, %v15628_v21  ;;  %v6973_v54 = vmul.f32 %v15764_v26, %v15642_v6  ;;  %v6974_v42 = vmul.f32 %v15764_v26, %v15653_v39  ;;  %v6975_v40 = vmul.f32 %v15764_v26, %v15662_v14 }
 0xbc8   :  { %v7022_v23 = vpack.c.bf16 %v6991_v44, %v6990_v32  ;;  %v6976_v27 = vmul.f32 %v15764_v26, %v15671_v60  ;;  %v6977_v29 = vmul.f32 %v15764_v26, %v15681_v63  ;;  %v6978_v19 = vmul.f32 %v15764_v26, %v15691_v38 }
 0xbc9   :  { %v6979_v21 = vmul.f32 %v15764_v26, %v15700_v0  ;;  %v6980_v6 = vmul.f32 %v15764_v26, %v15711_v51  ;;  %v7023_v25 = vpack.c.bf16 %v6993_v53, %v6992_v8  ;;  %v6981_v39 = vmul.f32 %v15764_v26, %v15720_v30 }
 0xbca   :  { %7111 = vmatmul.bf16.vlgmr.msra.gmra.mxu3 %v7022_v23  ;;  %v6982_v14 = vmul.f32 %v15764_v26, %v15728_v12  ;;  %v6983_v60 = vmul.f32 %v15764_v26, %v15735_v49  ;;  %v6984_v63 = vmul.f32 %v15764_v26, %v15740_v7  ;;  %v6985_v38 = vmul.f32 %v15764_v26, %v15746_v59  ;;  %v18172_v23 = vld [vmem:[#allocation118_spill] sm:$0xff] }
 0xbcb   :  { %v6986_v0 = vmul.f32 %v15764_v26, %v15751_v18  ;;  %v6998_v51 = vadd.f32 %v15770_v58, %v6965_v15  ;;  %v6999_v30 = vadd.f32 %v15770_v58, %v6966_v62  ;;  %v7000_v36 = vadd.f32 %v15770_v58, %v6967_v35 }
 0xbcc   :  { %v7001_v12 = vadd.f32 %v15770_v58, %v6968_v16  ;;  %v7002_v49 = vadd.f32 %v15770_v58, %v6969_v50  ;;  %v7003_v3 = vadd.f32 %v15770_v58, %v6970_v5  ;;  %v7004_v11 = vadd.f32 %v15770_v58, %v6971_v10  ;;  %v18174_v10 = vld [vmem:[#allocation377_spill] sm:$0xff] }
 0xbcd   :  { %v7026_v7 = vpack.c.bf16 %v6999_v30, %v6998_v51  ;;  %v7005_v59 = vadd.f32 %v15770_v58, %v6972_v45  ;;  %v7006_v18 = vadd.f32 %v15770_v58, %v6973_v54  ;;  %v7007_v20 = vadd.f32 %v15770_v58, %v6974_v42 }
 0xbce   :  { %v7027_v46 = vpack.c.bf16 %v7001_v12, %v7000_v36  ;;  %v7028_v41 = vpack.c.bf16 %v7003_v3, %v7002_v49  ;;  %v7008_v43 = vadd.f32 %v15770_v58, %v6975_v40  ;;  %v7009_v48 = vadd.f32 %v15770_v58, %v6976_v27 }
 0xbcf   :  { %v7029_v34 = vpack.c.bf16 %v7005_v59, %v7004_v11  ;;  %v7010_v57 = vadd.f32 %v15770_v58, %v6977_v29  ;;  %v7011_v9 = vadd.f32 %v15770_v58, %v6978_v19  ;;  %v7030_v31 = vpack.c.bf16 %v7007_v20, %v7006_v18 }
 0xbd0   :  { %v7012_v13 = vadd.f32 %v15770_v58, %v6979_v21  ;;  %v7013_v52 = vadd.f32 %v15770_v58, %v6980_v6  ;;  %v7014_v61 = vadd.f32 %v15770_v58, %v6981_v39  ;;  %v7031_v28 = vpack.c.bf16 %v7009_v48, %v7008_v43 }
 0xbd1   :  { %v7032_v1 = vpack.c.bf16 %v7011_v9, %v7010_v57  ;;  %v7015_v55 = vadd.f32 %v15770_v58, %v6982_v14  ;;  %v7016_v47 = vadd.f32 %v15770_v58, %v6983_v60  ;;  %v7017_v22 = vadd.f32 %v15770_v58, %v6984_v63 }
 0xbd2   :  { %v7033_v33 = vpack.c.bf16 %v7013_v52, %v7012_v13  ;;  %v15856_v32 = vadd.f32 %v15770_v58, %v6985_v38  ;;  %v15859_v44 = vadd.f32 %v15770_v58, %v6986_v0  ;;  %v6962_v56 = vmul.f32 %v15764_v26, %v18172_v23 }
 0xbd3   :  { %v7034_v37 = vpack.c.bf16 %v7015_v55, %v7014_v61  ;;  %v15865_v15 = vadd.f32 %v15770_v58, %v15777_v4  ;;  %v15869_v8 = vadd.f32 %v15770_v58, %v15768_v2  ;;  %v7035_v53 = vpack.c.bf16 %v7017_v22, %v7016_v47  ;;  %v18173_v4 = vld [vmem:[#allocation122_spill] sm:$0xff] }
 0xbd4   :  { %v7036_v62 = vpack.c.bf16 %v15859_v44, %v15856_v32  ;;  %v6994_v35 = vadd.f32 %v15770_v58, %v15787_v24  ;;  %v6995_v16 = vadd.f32 %v15770_v58, %v6962_v56  ;;  %v6963_v5 = vmul.f32 %v15764_v26, %v18173_v4  ;;  %v18175_v24 = vld [vmem:[#allocation114_spill] sm:$0xff] }
 0xbd5   :  { %v7037_v17 = vpack.c.bf16 %v15869_v8, %v15865_v15  ;;  %v6964_v2 = vmul.f32 %v15764_v26, %v18174_v10  ;;  %v15885_v40 = vperm.slane %v18175_v24, 3 }
 0xbd6   :  { %v7024_v50 = vpack.c.bf16 %v6995_v16, %v6994_v35  ;;  %v6996_v45 = vadd.f32 %v15770_v58, %v6963_v5 }
 0xbd7   :  { %v6997_v54 = vadd.f32 %v15770_v58, %v6964_v2 }
 0xbd9   :  { %v7025_v42 = vpack.c.bf16 %v6997_v54, %v6996_v45 }
 0xbda   :  { %7116 = vmatmul.bf16.gmra.mxu3 %v7023_v25 }
 0xbea   :  { %7121 = vmatmul.bf16.gmra.mxu3 %v7024_v50 }
 0xbfa   :  { %7126 = vmatmul.bf16.gmra.mxu3 %v7025_v42 }
 0xc0a   :  { %7131 = vmatmul.bf16.gmra.mxu3 %v7026_v7 }
 0xc1a   :  { %7136 = vmatmul.bf16.gmra.mxu3 %v7027_v46 }
 0xc2a   :  { %7141 = vmatmul.bf16.gmra.mxu3 %v7028_v41 }
 0xc3a   :  { %7146 = vmatmul.bf16.gmra.mxu3 %v7029_v34 }
 0xc4a   :  { %7151 = vmatmul.bf16.gmra.mxu3 %v7030_v31 }
 0xc4d   :  { %v7112_v27 = vpop.f32.mrf.mxu3 }
 0xc4e   :  { %v7113_v29 = vadd.f32 %v7112_v27, %v15885_v40 }
 0xc50   :  { %7192 = vst [vmem:[%s16021_s6] sm:$0xff] %v7113_v29 }
 0xc55   :  { %v7114_v26 = vpop.f32.mrf.mxu3 }
 0xc56   :  { %v7115_v58 = vadd.f32 %v7114_v26, %v15885_v40 }
 0xc58   :  { %7193 = vst [vmem:[%s16021_s6 + $0x8] sm:$0xff] %v7115_v58 }
 0xc5a   :  { %7156 = vmatmul.bf16.gmra.mxu3 %v7031_v28 }
 0xc5d   :  { %v7117_v19 = vpop.f32.mrf.mxu3 }
 0xc5e   :  { %v7118_v21 = vadd.f32 %v7117_v19, %v15885_v40 }
 0xc60   :  { %7194 = vst [vmem:[%s16021_s6 + $0x10] sm:$0xff] %v7118_v21 }
 0xc65   :  { %v7119_v6 = vpop.f32.mrf.mxu3 }
 0xc66   :  { %v7120_v25 = vadd.f32 %v7119_v6, %v15885_v40 }
 0xc68   :  { %7195 = vst [vmem:[%s16021_s6 + $0x18] sm:$0xff] %v7120_v25 }
 0xc6a   :  { %7161 = vmatmul.bf16.gmra.mxu3 %v7032_v1 }
 0xc6d   :  { %v7122_v39 = vpop.f32.mrf.mxu3 }
 0xc6e   :  { %v7123_v14 = vadd.f32 %v7122_v39, %v15885_v40 }
 0xc70   :  { %7196 = vst [vmem:[%s16021_s6 + $0x20] sm:$0xff] %v7123_v14 }
 0xc75   :  { %v7124_v60 = vpop.f32.mrf.mxu3 }
 0xc76   :  { %v7125_v63 = vadd.f32 %v7124_v60, %v15885_v40 }
 0xc78   :  { %7197 = vst [vmem:[%s16021_s6 + $0x28] sm:$0xff] %v7125_v63 }
 0xc7a   :  { %7166 = vmatmul.bf16.gmra.mxu3 %v7033_v33 }
 0xc7d   :  { %v7127_v38 = vpop.f32.mrf.mxu3 }
 0xc7e   :  { %v7128_v0 = vadd.f32 %v7127_v38, %v15885_v40 }
 0xc80   :  { %7198 = vst [vmem:[%s16021_s6 + $0x30] sm:$0xff] %v7128_v0 }
 0xc85   :  { %v7129_v51 = vpop.f32.mrf.mxu3 }
 0xc86   :  { %v7130_v30 = vadd.f32 %v7129_v51, %v15885_v40 }
 0xc88   :  { %7199 = vst [vmem:[%s16021_s6 + $0x38] sm:$0xff] %v7130_v30 }
 0xc8a   :  { %7171 = vmatmul.bf16.gmra.mxu3 %v7034_v37 }
 0xc8d   :  { %v7132_v36 = vpop.f32.mrf.mxu3 }
 0xc8e   :  { %v7133_v12 = vadd.f32 %v7132_v36, %v15885_v40 }
 0xc90   :  { %7200 = vst [vmem:[%s16021_s6 + $0x40] sm:$0xff] %v7133_v12 }
 0xc95   :  { %v7134_v49 = vpop.f32.mrf.mxu3 }
 0xc96   :  { %v7135_v3 = vadd.f32 %v7134_v49, %v15885_v40 }
 0xc98   :  { %7201 = vst [vmem:[%s16021_s6 + $0x48] sm:$0xff] %v7135_v3 }
 0xc9a   :  { %7176 = vmatmul.bf16.gmra.mxu3 %v7035_v53 }
 0xc9d   :  { %v7137_v7 = vpop.f32.mrf.mxu3 }
 0xc9e   :  { %v7138_v11 = vadd.f32 %v7137_v7, %v15885_v40 }
 0xca0   :  { %7202 = vst [vmem:[%s16021_s6 + $0x50] sm:$0xff] %v7138_v11 }
 0xca5   :  { %v7139_v59 = vpop.f32.mrf.mxu3 }
 0xca6   :  { %v7140_v18 = vadd.f32 %v7139_v59, %v15885_v40 }
 0xca8   :  { %7203 = vst [vmem:[%s16021_s6 + $0x58] sm:$0xff] %v7140_v18 }
 0xcaa   :  { %7181 = vmatmul.bf16.gmra.mxu3 %v7036_v62 }
 0xcad   :  { %v7142_v46 = vpop.f32.mrf.mxu3 }
 0xcae   :  { %v7143_v41 = vadd.f32 %v7142_v46, %v15885_v40 }
 0xcb0   :  { %7204 = vst [vmem:[%s16021_s6 + $0x60] sm:$0xff] %v7143_v41 }
 0xcb5   :  { %v7144_v20 = vpop.f32.mrf.mxu3 }
 0xcb6   :  { %v7145_v43 = vadd.f32 %v7144_v20, %v15885_v40 }
 0xcb8   :  { %7205 = vst [vmem:[%s16021_s6 + $0x68] sm:$0xff] %v7145_v43 }
 0xcba   :  { %7186 = vmatmul.bf16.gmra.mxu3 %v7037_v17 }
 0xcbd   :  { %v7147_v34 = vpop.f32.mrf.mxu3 }
 0xcbe   :  { %v7148_v48 = vadd.f32 %v7147_v34, %v15885_v40 }
 0xcc0   :  { %7206 = vst [vmem:[%s16021_s6 + $0x70] sm:$0xff] %v7148_v48 }
 0xcc5   :  { %v7149_v57 = vpop.f32.mrf.mxu3 }
 0xcc6   :  { %v7150_v9 = vadd.f32 %v7149_v57, %v15885_v40 }
 0xcc8   :  { %7207 = vst [vmem:[%s16021_s6 + $0x78] sm:$0xff] %v7150_v9 }
 0xccd   :  { %v7152_v31 = vpop.f32.mrf.mxu3 }
 0xcce   :  { %v7153_v13 = vadd.f32 %v7152_v31, %v15885_v40 }
 0xcd0   :  { %7208 = vst [vmem:[%s16021_s6 + $0x80] sm:$0xff] %v7153_v13 }
 0xcd5   :  { %v7154_v52 = vpop.f32.mrf.mxu3 }
 0xcd6   :  { %v7155_v61 = vadd.f32 %v7154_v52, %v15885_v40 }
 0xcd8   :  { %7209 = vst [vmem:[%s16021_s6 + $0x88] sm:$0xff] %v7155_v61 }
 0xcdd   :  { %v7157_v28 = vpop.f32.mrf.mxu3 }
 0xcde   :  { %v7158_v1 = vadd.f32 %v7157_v28, %v15885_v40 }
 0xce0   :  { %7210 = vst [vmem:[%s16021_s6 + $0x90] sm:$0xff] %v7158_v1 }
 0xce5   :  { %v7159_v55 = vpop.f32.mrf.mxu3 }
 0xce6   :  { %v7160_v47 = vadd.f32 %v7159_v55, %v15885_v40 }
 0xce8   :  { %7211 = vst [vmem:[%s16021_s6 + $0x98] sm:$0xff] %v7160_v47 }
 0xced   :  { %v7162_v33 = vpop.f32.mrf.mxu3 }
 0xcee   :  { %v7163_v22 = vadd.f32 %v7162_v33, %v15885_v40 }
 0xcf0   :  { %7212 = vst [vmem:[%s16021_s6 + $0xa0] sm:$0xff] %v7163_v22 }
 0xcf5   :  { %v7164_v32 = vpop.f32.mrf.mxu3 }
 0xcf6   :  { %v7165_v44 = vadd.f32 %v7164_v32, %v15885_v40 }
 0xcf8   :  { %7213 = vst [vmem:[%s16021_s6 + $0xa8] sm:$0xff] %v7165_v44 }
 0xcfd   :  { %v7167_v23 = vpop.f32.mrf.mxu3 }
 0xcfe   :  { %v7168_v56 = vadd.f32 %v7167_v23, %v15885_v40 }
 0xd00   :  { %7214 = vst [vmem:[%s16021_s6 + $0xb0] sm:$0xff] %v7168_v56 }
 0xd05   :  { %v7169_v37 = vpop.f32.mrf.mxu3 }
 0xd06   :  { %v7170_v15 = vadd.f32 %v7169_v37, %v15885_v40 }
 0xd08   :  { %7215 = vst [vmem:[%s16021_s6 + $0xb8] sm:$0xff] %v7170_v15 }
 0xd0d   :  { %v7172_v8 = vpop.f32.mrf.mxu3 }
 0xd0e   :  { %v7173_v53 = vadd.f32 %v7172_v8, %v15885_v40 }
 0xd10   :  { %7216 = vst [vmem:[%s16021_s6 + $0xc0] sm:$0xff] %v7173_v53 }
 0xd15   :  { %v7174_v62 = vpop.f32.mrf.mxu3 }
 0xd16   :  { %v7175_v35 = vadd.f32 %v7174_v62, %v15885_v40 }
 0xd18   :  { %7217 = vst [vmem:[%s16021_s6 + $0xc8] sm:$0xff] %v7175_v35 }
 0xd1d   :  { %v7177_v16 = vpop.f32.mrf.mxu3 }
 0xd1e   :  { %v7178_v17 = vadd.f32 %v7177_v16, %v15885_v40 }
 0xd20   :  { %7218 = vst [vmem:[%s16021_s6 + $0xd0] sm:$0xff] %v7178_v17 }
 0xd25   :  { %v7179_v50 = vpop.f32.mrf.mxu3 }
 0xd26   :  { %v7180_v4 = vadd.f32 %v7179_v50, %v15885_v40 }
 0xd28   :  { %7219 = vst [vmem:[%s16021_s6 + $0xd8] sm:$0xff] %v7180_v4 }
 0xd2d   :  { %v7182_v5 = vpop.f32.mrf.mxu3 }
 0xd2e   :  { %v7183_v10 = vadd.f32 %v7182_v5, %v15885_v40 }
 0xd30   :  { %7220 = vst [vmem:[%s16021_s6 + $0xe0] sm:$0xff] %v7183_v10 }
 0xd35   :  { %v7184_v2 = vpop.f32.mrf.mxu3 }
 0xd36   :  { %v7185_v45 = vadd.f32 %v7184_v2, %v15885_v40 }
 0xd38   :  { %7221 = vst [vmem:[%s16021_s6 + $0xe8] sm:$0xff] %v7185_v45 }
 0xd3d   :  { %v7187_v54 = vpop.f32.mrf.mxu3 }
 0xd3e   :  { %v7188_v42 = vadd.f32 %v7187_v54, %v15885_v40 }
 0xd40   :  { %7222 = vst [vmem:[%s16021_s6 + $0xf0] sm:$0xff] %v7188_v42 }
 0xd45   :  { %v7189_v24 = vpop.f32.mrf.mxu3 }
 0xd46   :  { %v7190_v27 = vadd.f32 %v7189_v24, %v15885_v40 }
 0xd48   :  { %7223 = vst [vmem:[%s16021_s6 + $0xf8] sm:$0xff] %v7190_v27 }
 0xd49   :  { %7228 = vsyncmov [#allocation4] }
 0xd4c   :  { %s7229_s30 = vpop.sfrf %7228 }
 0xd4d   :  { %p8257_p0 = scmp.ne.s32.totalorder %s7229_s30, 0 }
 0xd4f   :  { %7233 = shalt.err (%p8257_p0)  }
 0xd50   :  { %7235 = vsyncmov [#allocation4 + $0x1] }
 0xd53   :  { %s7236_s7 = vpop.sfrf %7235 }
 0xd54   :  { %p8258_p1 = scmp.ne.s32.totalorder %s7236_s7, 0 }
 0xd56   :  { %7240 = shalt.err (%p8258_p1)  }

</bundles_post_ra>
